<compile_context>
chip_gen: v7x
topology: tpu7x:2x2x1
jax: 0.10.0
libtpu: 0.0.40
codegen_flags: <defaults>
</compile_context>

<pallas_src>
import functools

import jax
import jax.numpy as jnp
from jax import lax
from jax.experimental import pallas as pl
from jax.experimental.pallas import tpu as pltpu

MXU_DTYPE = jnp.bfloat16   # MXU-native operand dtype (f32 accumulation); f32 for exact
XOFF = 8                   # 8-aligned sublane (W) offset of the image inside halo scratch
SPAD = 3                   # spatial-attention halo (covers the 7x7 conv)


# ----------------------------------------------------------------------------
# Fused FCAMBasicBlock kernel (one grid step per image)
# ----------------------------------------------------------------------------
def fcam_block_kernel(x_ref, w1_ref, w2_ref, bn_ref, wd_ref, wu_ref,
                      w3_ref, w5_ref, w7_ref, wrw_ref, b_ref,
                      o_ref, xpad_ref, mpad_ref, *, H, W, C):
    f32 = jnp.float32
    HW = H * W
    mxu_dt = w1_ref.dtype

    # Zero the halo scratches once per grid step; interiors are fully overwritten
    # below, halos stay zero == conv zero padding.  Deliberately NOT gated on
    # program_id so a megacore split of the "parallel" axis stays correct.
    xpad_ref[...] = jnp.zeros_like(xpad_ref)
    mpad_ref[...] = jnp.zeros_like(mpad_ref)

    x_flat = x_ref[0].astype(f32)                       # [HW, C] residual / conv1 input

    def sigmoid(z):                                     # exact: exp on EUP + f32 divide
        return 1.0 / (1.0 + jnp.exp(-z))

    # ---- 3x3 conv + folded BN (+ optional ReLU) as ONE im2col MXU matmul ----
    def conv3x3_bn(src_flat, w_ref, scale, bias, relu):
        xpad_ref[1:1 + H, XOFF:XOFF + W, :] = src_flat.reshape(H, W, C)
        cols = [xpad_ref[ky:ky + H, XOFF - 1 + kx:XOFF - 1 + kx + W, :]
                .reshape(HW, C).astype(mxu_dt)
                for ky in range(3) for kx in range(3)]
        patch = jnp.concatenate(cols, axis=1)                        # [HW, 9C] bf16
        out = jnp.dot(patch, w_ref[...], preferred_element_type=f32)
        out = out * scale + bias                                     # folded BN affine
        if relu:
            out = jnp.maximum(out, 0.0)
        return out                                                   # [HW, C] f32

    out1 = conv3x3_bn(x_flat, w1_ref, bn_ref[0:1, :], bn_ref[1:2, :], relu=True)
    out2 = conv3x3_bn(out1, w2_ref, bn_ref[2:3, :], bn_ref[3:4, :], relu=False)

    # ---- FCAM channel attention (shared 1x1 down/up projections on the MXU) ----
    pooled = jnp.concatenate([jnp.mean(out2, axis=0, keepdims=True),
                              jnp.max(out2, axis=0, keepdims=True)], axis=0)   # [2, C]
    hid = jnp.maximum(
        jnp.dot(pooled.astype(mxu_dt), wd_ref[...], preferred_element_type=f32), 0.0)
    zc = jnp.dot((hid[0:1, :] + hid[1:2, :]).astype(mxu_dt), wu_ref[...],
                 preferred_element_type=f32)                                   # [1, C]
    xc = out2 * sigmoid(zc)                                                    # [HW, C]

    # ---- FCAM spatial attention ----
    # Channel mean/max of the gated map as 2-D pad-3 slabs (halo zeros == conv pad).
    xc_hwc = xc.reshape(H, W, C)
    mpad_ref[0, SPAD:SPAD + H, SPAD:SPAD + W] = jnp.mean(xc_hwc, axis=2)
    mpad_ref[1, SPAD:SPAD + H, SPAD:SPAD + W] = jnp.max(xc_hwc, axis=2)
    sap = mpad_ref[0]                      # [H+6, W+6]
    smp = mpad_ref[1]

    def local_conv(w_ref, k, bias):        # kxk conv, 2 in-ch (mean,max) -> 1 out-ch
        off = SPAD - k // 2
        acc = jnp.zeros((H, W), f32)
        for ky in range(k):
            for kx in range(k):
                i = (ky * k + kx) * 2
                rs, cs = off + ky, off + kx
                acc = acc + sap[rs:rs + H, cs:cs + W] * w_ref[i]
                acc = acc + smp[rs:rs + H, cs:cs + W] * w_ref[i + 1]
        return jnp.maximum(acc + bias, 0.0)

    yb1 = local_conv(w3_ref, 3, b_ref[0])
    yb2 = local_conv(w5_ref, 5, b_ref[1])
    yb3 = local_conv(w7_ref, 7, b_ref[2])
    zs = yb1 * wrw_ref[0] + yb2 * wrw_ref[1] + yb3 * wrw_ref[2] + b_ref[3]
    ys = sigmoid(zs).reshape(H, W, 1)

    # gate + residual + final ReLU
    out = jnp.maximum(xc_hwc * ys + x_flat.reshape(H, W, C), 0.0)
    o_ref[0] = out.reshape(HW, C).astype(o_ref.dtype)


# ----------------------------------------------------------------------------
# Wrapper: weight packing + single pallas_call
# ----------------------------------------------------------------------------
def fcam_block_forward(x_nhwc, p):
    N, H, W, C = x_nhwc.shape
    HW = H * W
    x_flat = x_nhwc.reshape(N, HW, C)                 # contiguous (free) reshape

    Cr = p["wd"].shape[1]
    w1 = p["w1"].reshape(9 * C, C).astype(MXU_DTYPE)  # HWIO -> [(ky,kx,cin), cout]
    w2 = p["w2"].reshape(9 * C, C).astype(MXU_DTYPE)
    wd = p["wd"].astype(MXU_DTYPE)
    wu = p["wu"].astype(MXU_DTYPE)
    bn = jnp.stack([p["bn1_scale"], p["bn1_bias"],
                    p["bn2_scale"], p["bn2_bias"]]).astype(jnp.float32)

    smem = pl.BlockSpec(memory_space=pltpu.MemorySpace.SMEM)
    kern = functools.partial(fcam_block_kernel, H=H, W=W, C=C)
    # NOTE: grid=(N,) with small N leaves little DMA overlap; full fusion needs
    # whole-image blocks (global pooling + conv halos), so we accept it.
    out_flat = pl.pallas_call(
        kern,
        out_shape=jax.ShapeDtypeStruct((N, HW, C), jnp.float32),
        grid=(N,),
        in_specs=[
            pl.BlockSpec((1, HW, C), lambda n: (n, 0, 0)),    # x (also the residual)
            pl.BlockSpec((9 * C, C), lambda n: (0, 0)),       # conv1 im2col weight
            pl.BlockSpec((9 * C, C), lambda n: (0, 0)),       # conv2 im2col weight
            pl.BlockSpec((4, C), lambda n: (0, 0)),           # folded BN scale/bias
            pl.BlockSpec((C, Cr), lambda n: (0, 0)),          # conv_down (1x1)
            pl.BlockSpec((Cr, C), lambda n: (0, 0)),          # conv_up   (1x1)
            smem, smem, smem, smem, smem,                     # spatial conv scalars
        ],
        out_specs=pl.BlockSpec((1, HW, C), lambda n: (n, 0, 0)),
        scratch_shapes=[
            pltpu.VMEM((H + 2, W + 2 * XOFF, C), jnp.float32),           # conv halo
            pltpu.VMEM((2, H + 2 * SPAD, W + 2 * SPAD), jnp.float32),    # mean/max maps
        ],
        compiler_params=pltpu.CompilerParams(
            dimension_semantics=("parallel",),                # v7x: one image per TC
        ),
    )(x_flat, w1, w2, bn, wd, wu,
      p["w3f"], p["w5f"], p["w7f"], p["wrwf"], p["bvec"])
    return out_flat.reshape(N, H, W, C)


# ----------------------------------------------------------------------------
# Deterministic synthetic parameters (shapes match the PyTorch module __init__)
# ----------------------------------------------------------------------------
def init_params(key, C, Cr):
    ks = jax.random.split(key, 20)

    def nrm(k, shape, scale=0.1):
        return (scale * jax.random.normal(k, shape)).astype(jnp.float32)

    eps = 1e-5
    p = {}
    p["w1"] = nrm(ks[0], (3, 3, C, C))            # conv1 (HWIO)
    p["w2"] = nrm(ks[1], (3, 3, C, C))            # conv2 (HWIO)
    g1, b1 = 1.0 + nrm(ks[2], (C,)), nrm(ks[3], (C,))
    m1, v1 = nrm(ks[4], (C,)), 1.0 + jnp.abs(nrm(ks[5], (C,)))
    g2, b2 = 1.0 + nrm(ks[6], (C,)), nrm(ks[7], (C,))
    m2, v2 = nrm(ks[8], (C,)), 1.0 + jnp.abs(nrm(ks[9], (C,)))
    p["bn1_scale"] = g1 / jnp.sqrt(v1 + eps)
    p["bn1_bias"] = b1 - m1 * p["bn1_scale"]
    p["bn2_scale"] = g2 / jnp.sqrt(v2 + eps)
    p["bn2_bias"] = b2 - m2 * p["bn2_scale"]
    p["wd"] = nrm(ks[10], (C, Cr))                # conv_down (1x1), shared avg/max path
    p["wu"] = nrm(ks[11], (Cr, C))                # conv_up   (1x1)
    p["w3"] = nrm(ks[12], (3, 3, 2, 1))           # conv_local1 (HWIO)
    p["w5"] = nrm(ks[13], (5, 5, 2, 1))           # conv_local2
    p["w7"] = nrm(ks[14], (7, 7, 2, 1))           # conv_local3
    p["b3"] = nrm(ks[15], ())
    p["b5"] = nrm(ks[16], ())
    p["b7"] = nrm(ks[17], ())
    p["wrw"] = nrm(ks[18], (3,))                  # conv_rw weight (1x1, 3->1)
    p["brw"] = nrm(ks[19], ())
    # flattened forms consumed by the Pallas kernel (SMEM scalars)
    p["w3f"] = p["w3"].reshape(-1)
    p["w5f"] = p["w5"].reshape(-1)
    p["w7f"] = p["w7"].reshape(-1)
    p["wrwf"] = p["wrw"]
    p["bvec"] = jnp.stack([p["b3"], p["b5"], p["b7"], p["brw"]])
    return p


# ----------------------------------------------------------------------------
# Pure-JAX reference for verification
# ----------------------------------------------------------------------------
def reference_forward(x, p):
    dn = ("NHWC", "HWIO", "NHWC")
    hi = lax.Precision.HIGHEST

    def conv(inp, w):
        return lax.conv_general_dilated(inp, w, (1, 1), "SAME",
                                        dimension_numbers=dn, precision=hi)

    out = jnp.maximum(conv(x, p["w1"]) * p["bn1_scale"] + p["bn1_bias"], 0.0)
    out = conv(out, p["w2"]) * p["bn2_scale"] + p["bn2_bias"]
    # channel attention
    y_a = out.mean(axis=(1, 2))
    y_m = out.max(axis=(1, 2))
    za = jnp.maximum(y_a @ p["wd"], 0.0) @ p["wu"]
    zm = jnp.maximum(y_m @ p["wd"], 0.0) @ p["wu"]
    y = jax.nn.sigmoid(za + zm)
    xc = out * y[:, None, None, :]
    # spatial attention
    s2 = jnp.concatenate([xc.mean(axis=3, keepdims=True),
                          xc.max(axis=3, keepdims=True)], axis=3)
    b1 = jnp.maximum(conv(s2, p["w3"]) + p["b3"], 0.0)
    b2 = jnp.maximum(conv(s2, p["w5"]) + p["b5"], 0.0)
    b3 = jnp.maximum(conv(s2, p["w7"]) + p["b7"], 0.0)
    z = b1 * p["wrw"][0] + b2 * p["wrw"][1] + b3 * p["wrw"][2] + p["brw"]
    ys = jax.nn.sigmoid(z)
    return jnp.maximum(xc * ys + x, 0.0)


if __name__ == "__main__":
    key = jax.random.PRNGKey(0)
    N, C, H, W = 2, 16, 16, 16          # inplanes = planes = 16, stride = 1
    reduction = 4                       # channel // reduction = 4
    kx, kp = jax.random.split(key)
    x_nchw = jax.random.normal(kx, (N, C, H, W), jnp.float32)   # PyTorch NCHW input
    x_nhwc = jnp.transpose(x_nchw, (0, 2, 3, 1))                # kernel layout NHWC

    params = init_params(kp, C, C // reduction)

    out = jax.jit(fcam_block_forward)(x_nhwc, params)
    out = jax.block_until_ready(out)

    ref = reference_forward(x_nhwc, params)
    err = float(jnp.max(jnp.abs(out - ref)))
    assert out.shape == (N, H, W, C)
    # bf16 MXU operands (f32 accumulation) across two 3x3 convs vs a pure-f32
    # HIGHEST-precision reference: < 1% relative of the output magnitude.
    if err < 3e-2:
        print("KERNEL_OK")
    else:
        print(f"MISMATCH max_abs_err={err}")
</pallas_src>

<mosaic_0001>
module attributes {stable_mosaic.version = 11 : i64} {
  func.func @fcam_block_kernel(%arg0: i32, %arg1: memref<1x256x16xf32, #tpu.memory_space<vmem>>, %arg2: memref<144x16xbf16, #tpu.memory_space<vmem>>, %arg3: memref<144x16xbf16, #tpu.memory_space<vmem>>, %arg4: memref<4x16xf32, #tpu.memory_space<vmem>>, %arg5: memref<16x4xbf16, #tpu.memory_space<vmem>>, %arg6: memref<4x16xbf16, #tpu.memory_space<vmem>>, %arg7: memref<18xf32, #tpu.memory_space<smem>>, %arg8: memref<50xf32, #tpu.memory_space<smem>>, %arg9: memref<98xf32, #tpu.memory_space<smem>>, %arg10: memref<3xf32, #tpu.memory_space<smem>>, %arg11: memref<4xf32, #tpu.memory_space<smem>>, %arg12: memref<1x256x16xf32, #tpu.memory_space<vmem>>, %arg13: memref<18x32x16xf32, #tpu.memory_space<vmem>>, %arg14: memref<2x22x22xf32, #tpu.memory_space<vmem>>) attributes {dimension_semantics = [#tpu.dimension_semantics<parallel>], iteration_bounds = array<i64: 2>, scalar_prefetch = 0 : i64, scratch_operands = 2 : i64, tpu.core_type = #tpu.core_type<tc>, window_params = [{transform_indices = @transform_0, window_bounds = array<i64: 1, 256, 16>}, {pipeline_mode = #tpu.pipeline_mode<synchronous>, transform_indices = @transform_1, window_bounds = array<i64: 144, 16>}, {pipeline_mode = #tpu.pipeline_mode<synchronous>, transform_indices = @transform_2, window_bounds = array<i64: 144, 16>}, {pipeline_mode = #tpu.pipeline_mode<synchronous>, transform_indices = @transform_3, window_bounds = array<i64: 4, 16>}, {pipeline_mode = #tpu.pipeline_mode<synchronous>, transform_indices = @transform_4, window_bounds = array<i64: 16, 4>}, {pipeline_mode = #tpu.pipeline_mode<synchronous>, transform_indices = @transform_5, window_bounds = array<i64: 4, 16>}, {transform_indices = @transform_6, window_bounds = array<i64: 18>}, {transform_indices = @transform_7, window_bounds = array<i64: 50>}, {transform_indices = @transform_8, window_bounds = array<i64: 98>}, {transform_indices = @transform_9, window_bounds = array<i64: 3>}, {transform_indices = @transform_10, window_bounds = array<i64: 4>}, {transform_indices = @transform_11, window_bounds = array<i64: 1, 256, 16>}]} {
    %cst = arith.constant 0.000000e+00 : f32
    %0 = vector.broadcast %cst : f32 to vector<18x32x16xf32>
    %c0 = arith.constant 0 : index
    %c0_0 = arith.constant 0 : index
    %c0_1 = arith.constant 0 : index
    %1 = vector.load %arg13[%c0, %c0_0, %c0_1] : memref<18x32x16xf32, #tpu.memory_space<vmem>>, vector<18x32x16xf32>
    tpu.vector_store %arg13[%c0, %c0_0, %c0_1], %0 {strides = array<i32>} : memref<18x32x16xf32, #tpu.memory_space<vmem>>, vector<18x32x16xf32>,
    %cst_2 = arith.constant 0.000000e+00 : f32
    %2 = vector.broadcast %cst_2 : f32 to vector<2x22x22xf32>
    %c0_3 = arith.constant 0 : index
    %c0_4 = arith.constant 0 : index
    %c0_5 = arith.constant 0 : index
    %3 = vector.load %arg14[%c0_3, %c0_4, %c0_5] : memref<2x22x22xf32, #tpu.memory_space<vmem>>, vector<2x22x22xf32>
    tpu.vector_store %arg14[%c0_3, %c0_4, %c0_5], %2 {strides = array<i32>} : memref<2x22x22xf32, #tpu.memory_space<vmem>>, vector<2x22x22xf32>,
    %c0_6 = arith.constant 0 : index
    %c0_7 = arith.constant 0 : index
    %c0_8 = arith.constant 0 : index
    %4 = vector.load %arg1[%c0_6, %c0_7, %c0_8] : memref<1x256x16xf32, #tpu.memory_space<vmem>>, vector<1x256x16xf32>
    %5 = vector.shape_cast %4 : vector<1x256x16xf32> to vector<256x16xf32>
    %c0_9 = arith.constant 0 : index
    %c0_10 = arith.constant 0 : index
    %6 = vector.load %arg4[%c0_9, %c0_10] : memref<4x16xf32, #tpu.memory_space<vmem>>, vector<1x16xf32>
    %c1 = arith.constant 1 : index
    %c0_11 = arith.constant 0 : index
    %7 = vector.load %arg4[%c1, %c0_11] : memref<4x16xf32, #tpu.memory_space<vmem>>, vector<1x16xf32>
    %8 = vector.shape_cast %5 : vector<256x16xf32> to vector<16x16x16xf32>
    %c1_12 = arith.constant 1 : index
    %c8 = arith.constant 8 : index
    %c0_13 = arith.constant 0 : index
    %9 = vector.load %arg13[%c1_12, %c8, %c0_13] : memref<18x32x16xf32, #tpu.memory_space<vmem>>, vector<16x16x16xf32>
    tpu.vector_store %arg13[%c1_12, %c8, %c0_13], %8 {strides = array<i32>} : memref<18x32x16xf32, #tpu.memory_space<vmem>>, vector<16x16x16xf32>,
    %c0_14 = arith.constant 0 : index
    %c7 = arith.constant 7 : index
    %c0_15 = arith.constant 0 : index
    %10 = vector.load %arg13[%c0_14, %c7, %c0_15] : memref<18x32x16xf32, #tpu.memory_space<vmem>>, vector<16x16x16xf32>
    %11 = vector.shape_cast %10 : vector<16x16x16xf32> to vector<256x16xf32>
    %12 = arith.truncf %11 : vector<256x16xf32> to vector<256x16xbf16>
    %c0_16 = arith.constant 0 : index
    %c8_17 = arith.constant 8 : index
    %c0_18 = arith.constant 0 : index
    %13 = vector.load %arg13[%c0_16, %c8_17, %c0_18] : memref<18x32x16xf32, #tpu.memory_space<vmem>>, vector<16x16x16xf32>
    %14 = vector.shape_cast %13 : vector<16x16x16xf32> to vector<256x16xf32>
    %15 = arith.truncf %14 : vector<256x16xf32> to vector<256x16xbf16>
    %c0_19 = arith.constant 0 : index
    %c9 = arith.constant 9 : index
    %c0_20 = arith.constant 0 : index
    %16 = vector.load %arg13[%c0_19, %c9, %c0_20] : memref<18x32x16xf32, #tpu.memory_space<vmem>>, vector<16x16x16xf32>
    %17 = vector.shape_cast %16 : vector<16x16x16xf32> to vector<256x16xf32>
    %18 = arith.truncf %17 : vector<256x16xf32> to vector<256x16xbf16>
    %c1_21 = arith.constant 1 : index
    %c7_22 = arith.constant 7 : index
    %c0_23 = arith.constant 0 : index
    %19 = vector.load %arg13[%c1_21, %c7_22, %c0_23] : memref<18x32x16xf32, #tpu.memory_space<vmem>>, vector<16x16x16xf32>
    %20 = vector.shape_cast %19 : vector<16x16x16xf32> to vector<256x16xf32>
    %21 = arith.truncf %20 : vector<256x16xf32> to vector<256x16xbf16>
    %c1_24 = arith.constant 1 : index
    %c8_25 = arith.constant 8 : index
    %c0_26 = arith.constant 0 : index
    %22 = vector.load %arg13[%c1_24, %c8_25, %c0_26] : memref<18x32x16xf32, #tpu.memory_space<vmem>>, vector<16x16x16xf32>
    %23 = vector.shape_cast %22 : vector<16x16x16xf32> to vector<256x16xf32>
    %24 = arith.truncf %23 : vector<256x16xf32> to vector<256x16xbf16>
    %c1_27 = arith.constant 1 : index
    %c9_28 = arith.constant 9 : index
    %c0_29 = arith.constant 0 : index
    %25 = vector.load %arg13[%c1_27, %c9_28, %c0_29] : memref<18x32x16xf32, #tpu.memory_space<vmem>>, vector<16x16x16xf32>
    %26 = vector.shape_cast %25 : vector<16x16x16xf32> to vector<256x16xf32>
    %27 = arith.truncf %26 : vector<256x16xf32> to vector<256x16xbf16>
    %c2 = arith.constant 2 : index
    %c7_30 = arith.constant 7 : index
    %c0_31 = arith.constant 0 : index
    %28 = vector.load %arg13[%c2, %c7_30, %c0_31] : memref<18x32x16xf32, #tpu.memory_space<vmem>>, vector<16x16x16xf32>
    %29 = vector.shape_cast %28 : vector<16x16x16xf32> to vector<256x16xf32>
    %30 = arith.truncf %29 : vector<256x16xf32> to vector<256x16xbf16>
    %c2_32 = arith.constant 2 : index
    %c8_33 = arith.constant 8 : index
    %c0_34 = arith.constant 0 : index
    %31 = vector.load %arg13[%c2_32, %c8_33, %c0_34] : memref<18x32x16xf32, #tpu.memory_space<vmem>>, vector<16x16x16xf32>
    %32 = vector.shape_cast %31 : vector<16x16x16xf32> to vector<256x16xf32>
    %33 = arith.truncf %32 : vector<256x16xf32> to vector<256x16xbf16>
    %c2_35 = arith.constant 2 : index
    %c9_36 = arith.constant 9 : index
    %c0_37 = arith.constant 0 : index
    %34 = vector.load %arg13[%c2_35, %c9_36, %c0_37] : memref<18x32x16xf32, #tpu.memory_space<vmem>>, vector<16x16x16xf32>
    %35 = vector.shape_cast %34 : vector<16x16x16xf32> to vector<256x16xf32>
    %36 = arith.truncf %35 : vector<256x16xf32> to vector<256x16xbf16>
    %37 = tpu.concatenate %12, %15, %18, %21, %24, %27, %30, %33, %36 in 1 : vector<256x16xbf16>, vector<256x16xbf16>, vector<256x16xbf16>, vector<256x16xbf16>, vector<256x16xbf16>, vector<256x16xbf16>, vector<256x16xbf16>, vector<256x16xbf16>, vector<256x16xbf16> -> vector<256x144xbf16>
    %c0_38 = arith.constant 0 : index
    %c0_39 = arith.constant 0 : index
    %38 = vector.load %arg2[%c0_38, %c0_39] : memref<144x16xbf16, #tpu.memory_space<vmem>>, vector<144x16xbf16>
    %cst_40 = arith.constant dense<0.000000e+00> : vector<256x16xf32>
    %39 = tpu.matmul %37, %38, %cst_40 {dimension_numbers = #tpu.dot_dimension_numbers<[1], [0], [0], [1], [0, 0, 1, 1], [], []>} : vector<256x144xbf16>, vector<144x16xbf16>, vector<256x16xf32> -> vector<256x16xf32>
    %40 = vector.broadcast %6 : vector<1x16xf32> to vector<256x16xf32>
    %41 = arith.mulf %39, %40 : vector<256x16xf32>
    %42 = vector.broadcast %7 : vector<1x16xf32> to vector<256x16xf32>
    %43 = arith.addf %41, %42 : vector<256x16xf32>
    %cst_41 = arith.constant 0.000000e+00 : f32
    %44 = vector.broadcast %cst_41 : f32 to vector<256x16xf32>
    %45 = arith.maximumf %43, %44 : vector<256x16xf32>
    %c2_42 = arith.constant 2 : index
    %c0_43 = arith.constant 0 : index
    %46 = vector.load %arg4[%c2_42, %c0_43] : memref<4x16xf32, #tpu.memory_space<vmem>>, vector<1x16xf32>
    %c3 = arith.constant 3 : index
    %c0_44 = arith.constant 0 : index
    %47 = vector.load %arg4[%c3, %c0_44] : memref<4x16xf32, #tpu.memory_space<vmem>>, vector<1x16xf32>
    %48 = vector.shape_cast %45 : vector<256x16xf32> to vector<16x16x16xf32>
    %c1_45 = arith.constant 1 : index
    %c8_46 = arith.constant 8 : index
    %c0_47 = arith.constant 0 : index
    %49 = vector.load %arg13[%c1_45, %c8_46, %c0_47] : memref<18x32x16xf32, #tpu.memory_space<vmem>>, vector<16x16x16xf32>
    tpu.vector_store %arg13[%c1_45, %c8_46, %c0_47], %48 {strides = array<i32>} : memref<18x32x16xf32, #tpu.memory_space<vmem>>, vector<16x16x16xf32>,
    %c0_48 = arith.constant 0 : index
    %c7_49 = arith.constant 7 : index
    %c0_50 = arith.constant 0 : index
    %50 = vector.load %arg13[%c0_48, %c7_49, %c0_50] : memref<18x32x16xf32, #tpu.memory_space<vmem>>, vector<16x16x16xf32>
    %51 = vector.shape_cast %50 : vector<16x16x16xf32> to vector<256x16xf32>
    %52 = arith.truncf %51 : vector<256x16xf32> to vector<256x16xbf16>
    %c0_51 = arith.constant 0 : index
    %c8_52 = arith.constant 8 : index
    %c0_53 = arith.constant 0 : index
    %53 = vector.load %arg13[%c0_51, %c8_52, %c0_53] : memref<18x32x16xf32, #tpu.memory_space<vmem>>, vector<16x16x16xf32>
    %54 = vector.shape_cast %53 : vector<16x16x16xf32> to vector<256x16xf32>
    %55 = arith.truncf %54 : vector<256x16xf32> to vector<256x16xbf16>
    %c0_54 = arith.constant 0 : index
    %c9_55 = arith.constant 9 : index
    %c0_56 = arith.constant 0 : index
    %56 = vector.load %arg13[%c0_54, %c9_55, %c0_56] : memref<18x32x16xf32, #tpu.memory_space<vmem>>, vector<16x16x16xf32>
    %57 = vector.shape_cast %56 : vector<16x16x16xf32> to vector<256x16xf32>
    %58 = arith.truncf %57 : vector<256x16xf32> to vector<256x16xbf16>
    %c1_57 = arith.constant 1 : index
    %c7_58 = arith.constant 7 : index
    %c0_59 = arith.constant 0 : index
    %59 = vector.load %arg13[%c1_57, %c7_58, %c0_59] : memref<18x32x16xf32, #tpu.memory_space<vmem>>, vector<16x16x16xf32>
    %60 = vector.shape_cast %59 : vector<16x16x16xf32> to vector<256x16xf32>
    %61 = arith.truncf %60 : vector<256x16xf32> to vector<256x16xbf16>
    %c1_60 = arith.constant 1 : index
    %c8_61 = arith.constant 8 : index
    %c0_62 = arith.constant 0 : index
    %62 = vector.load %arg13[%c1_60, %c8_61, %c0_62] : memref<18x32x16xf32, #tpu.memory_space<vmem>>, vector<16x16x16xf32>
    %63 = vector.shape_cast %62 : vector<16x16x16xf32> to vector<256x16xf32>
    %64 = arith.truncf %63 : vector<256x16xf32> to vector<256x16xbf16>
    %c1_63 = arith.constant 1 : index
    %c9_64 = arith.constant 9 : index
    %c0_65 = arith.constant 0 : index
    %65 = vector.load %arg13[%c1_63, %c9_64, %c0_65] : memref<18x32x16xf32, #tpu.memory_space<vmem>>, vector<16x16x16xf32>
    %66 = vector.shape_cast %65 : vector<16x16x16xf32> to vector<256x16xf32>
    %67 = arith.truncf %66 : vector<256x16xf32> to vector<256x16xbf16>
    %c2_66 = arith.constant 2 : index
    %c7_67 = arith.constant 7 : index
    %c0_68 = arith.constant 0 : index
    %68 = vector.load %arg13[%c2_66, %c7_67, %c0_68] : memref<18x32x16xf32, #tpu.memory_space<vmem>>, vector<16x16x16xf32>
    %69 = vector.shape_cast %68 : vector<16x16x16xf32> to vector<256x16xf32>
    %70 = arith.truncf %69 : vector<256x16xf32> to vector<256x16xbf16>
    %c2_69 = arith.constant 2 : index
    %c8_70 = arith.constant 8 : index
    %c0_71 = arith.constant 0 : index
    %71 = vector.load %arg13[%c2_69, %c8_70, %c0_71] : memref<18x32x16xf32, #tpu.memory_space<vmem>>, vector<16x16x16xf32>
    %72 = vector.shape_cast %71 : vector<16x16x16xf32> to vector<256x16xf32>
    %73 = arith.truncf %72 : vector<256x16xf32> to vector<256x16xbf16>
    %c2_72 = arith.constant 2 : index
    %c9_73 = arith.constant 9 : index
    %c0_74 = arith.constant 0 : index
    %74 = vector.load %arg13[%c2_72, %c9_73, %c0_74] : memref<18x32x16xf32, #tpu.memory_space<vmem>>, vector<16x16x16xf32>
    %75 = vector.shape_cast %74 : vector<16x16x16xf32> to vector<256x16xf32>
    %76 = arith.truncf %75 : vector<256x16xf32> to vector<256x16xbf16>
    %77 = tpu.concatenate %52, %55, %58, %61, %64, %67, %70, %73, %76 in 1 : vector<256x16xbf16>, vector<256x16xbf16>, vector<256x16xbf16>, vector<256x16xbf16>, vector<256x16xbf16>, vector<256x16xbf16>, vector<256x16xbf16>, vector<256x16xbf16>, vector<256x16xbf16> -> vector<256x144xbf16>
    %c0_75 = arith.constant 0 : index
    %c0_76 = arith.constant 0 : index
    %78 = vector.load %arg3[%c0_75, %c0_76] : memref<144x16xbf16, #tpu.memory_space<vmem>>, vector<144x16xbf16>
    %cst_77 = arith.constant dense<0.000000e+00> : vector<256x16xf32>
    %79 = tpu.matmul %77, %78, %cst_77 {dimension_numbers = #tpu.dot_dimension_numbers<[1], [0], [0], [1], [0, 0, 1, 1], [], []>} : vector<256x144xbf16>, vector<144x16xbf16>, vector<256x16xf32> -> vector<256x16xf32>
    %80 = vector.broadcast %46 : vector<1x16xf32> to vector<256x16xf32>
    %81 = arith.mulf %79, %80 : vector<256x16xf32>
    %82 = vector.broadcast %47 : vector<1x16xf32> to vector<256x16xf32>
    %83 = arith.addf %81, %82 : vector<256x16xf32>
    %cst_78 = arith.constant dense<0.000000e+00> : vector<16xf32>
    %84 = vector.multi_reduction <add>, %83, %cst_78 [0] : vector<256x16xf32> to vector<16xf32>
    %85 = vector.shape_cast %84 : vector<16xf32> to vector<1x16xf32>
    %cst_79 = arith.constant 2.560000e+02 : f32
    %86 = vector.broadcast %cst_79 : f32 to vector<1x16xf32>
    %87 = arith.divf %85, %86 : vector<1x16xf32>
    %cst_80 = arith.constant dense<0xFF800000> : vector<16xf32>
    %88 = vector.multi_reduction <maximumf>, %83, %cst_80 [0] : vector<256x16xf32> to vector<16xf32>
    %89 = vector.shape_cast %88 : vector<16xf32> to vector<1x16xf32>
    %90 = tpu.concatenate %87, %89 in 0 : vector<1x16xf32>, vector<1x16xf32> -> vector<2x16xf32>
    %91 = arith.truncf %90 : vector<2x16xf32> to vector<2x16xbf16>
    %c0_81 = arith.constant 0 : index
    %c0_82 = arith.constant 0 : index
    %92 = vector.load %arg5[%c0_81, %c0_82] : memref<16x4xbf16, #tpu.memory_space<vmem>>, vector<16x4xbf16>
    %cst_83 = arith.constant dense<0.000000e+00> : vector<2x4xf32>
    %93 = tpu.matmul %91, %92, %cst_83 {dimension_numbers = #tpu.dot_dimension_numbers<[1], [0], [0], [1], [0, 0, 1, 1], [], []>} : vector<2x16xbf16>, vector<16x4xbf16>, vector<2x4xf32> -> vector<2x4xf32>
    %cst_84 = arith.constant 0.000000e+00 : f32
    %94 = vector.broadcast %cst_84 : f32 to vector<2x4xf32>
    %95 = arith.maximumf %93, %94 : vector<2x4xf32>
    %96 = vector.extract_strided_slice %95 {offsets = [0, 0], sizes = [1, 4], strides = [1, 1]} : vector<2x4xf32> to vector<1x4xf32>
    %97 = vector.extract_strided_slice %95 {offsets = [1, 0], sizes = [1, 4], strides = [1, 1]} : vector<2x4xf32> to vector<1x4xf32>
    %98 = arith.addf %96, %97 : vector<1x4xf32>
    %99 = arith.truncf %98 : vector<1x4xf32> to vector<1x4xbf16>
    %c0_85 = arith.constant 0 : index
    %c0_86 = arith.constant 0 : index
    %100 = vector.load %arg6[%c0_85, %c0_86] : memref<4x16xbf16, #tpu.memory_space<vmem>>, vector<4x16xbf16>
    %cst_87 = arith.constant dense<0.000000e+00> : vector<1x16xf32>
    %101 = tpu.matmul %99, %100, %cst_87 {dimension_numbers = #tpu.dot_dimension_numbers<[1], [0], [0], [1], [0, 0, 1, 1], [], []>} : vector<1x4xbf16>, vector<4x16xbf16>, vector<1x16xf32> -> vector<1x16xf32>
    %cst_88 = arith.constant 0.000000e+00 : f32
    %102 = vector.broadcast %cst_88 : f32 to vector<1x16xf32>
    %103 = arith.subf %102, %101 : vector<1x16xf32>
    %104 = math.exp %103 : vector<1x16xf32>
    %cst_89 = arith.constant 1.000000e+00 : f32
    %105 = vector.broadcast %cst_89 : f32 to vector<1x16xf32>
    %106 = arith.addf %105, %104 : vector<1x16xf32>
    %cst_90 = arith.constant 1.000000e+00 : f32
    %107 = vector.broadcast %cst_90 : f32 to vector<1x16xf32>
    %108 = arith.divf %107, %106 : vector<1x16xf32>
    %109 = vector.broadcast %108 : vector<1x16xf32> to vector<256x16xf32>
    %110 = arith.mulf %83, %109 : vector<256x16xf32>
    %111 = vector.shape_cast %110 : vector<256x16xf32> to vector<16x16x16xf32>
    %cst_91 = arith.constant dense<0.000000e+00> : vector<16x16xf32>
    %112 = vector.multi_reduction <add>, %111, %cst_91 [2] : vector<16x16x16xf32> to vector<16x16xf32>
    %cst_92 = arith.constant 1.600000e+01 : f32
    %113 = vector.broadcast %cst_92 : f32 to vector<16x16xf32>
    %114 = arith.divf %112, %113 : vector<16x16xf32>
    %c0_93 = arith.constant 0 : index
    %c3_94 = arith.constant 3 : index
    %c3_95 = arith.constant 3 : index
    %115 = vector.load %arg14[%c0_93, %c3_94, %c3_95] : memref<2x22x22xf32, #tpu.memory_space<vmem>>, vector<1x16x16xf32>
    %116 = vector.shape_cast %115 : vector<1x16x16xf32> to vector<16x16xf32>
    %117 = vector.shape_cast %114 : vector<16x16xf32> to vector<1x16x16xf32>
    tpu.vector_store %arg14[%c0_93, %c3_94, %c3_95], %117 {strides = array<i32>} : memref<2x22x22xf32, #tpu.memory_space<vmem>>, vector<1x16x16xf32>,
    %cst_96 = arith.constant dense<0xFF800000> : vector<16x16xf32>
    %118 = vector.multi_reduction <maximumf>, %111, %cst_96 [2] : vector<16x16x16xf32> to vector<16x16xf32>
    %c1_97 = arith.constant 1 : index
    %c3_98 = arith.constant 3 : index
    %c3_99 = arith.constant 3 : index
    %119 = vector.load %arg14[%c1_97, %c3_98, %c3_99] : memref<2x22x22xf32, #tpu.memory_space<vmem>>, vector<1x16x16xf32>
    %120 = vector.shape_cast %119 : vector<1x16x16xf32> to vector<16x16xf32>
    %121 = vector.shape_cast %118 : vector<16x16xf32> to vector<1x16x16xf32>
    tpu.vector_store %arg14[%c1_97, %c3_98, %c3_99], %121 {strides = array<i32>} : memref<2x22x22xf32, #tpu.memory_space<vmem>>, vector<1x16x16xf32>,
    %c0_100 = arith.constant 0 : index
    %c0_101 = arith.constant 0 : index
    %c0_102 = arith.constant 0 : index
    %122 = vector.load %arg14[%c0_100, %c0_101, %c0_102] : memref<2x22x22xf32, #tpu.memory_space<vmem>>, vector<1x22x22xf32>
    %123 = vector.shape_cast %122 : vector<1x22x22xf32> to vector<22x22xf32>
    %c1_103 = arith.constant 1 : index
    %c0_104 = arith.constant 0 : index
    %c0_105 = arith.constant 0 : index
    %124 = vector.load %arg14[%c1_103, %c0_104, %c0_105] : memref<2x22x22xf32, #tpu.memory_space<vmem>>, vector<1x22x22xf32>
    %125 = vector.shape_cast %124 : vector<1x22x22xf32> to vector<22x22xf32>
    %c0_106 = arith.constant 0 : index
    %126 = memref.load %arg11[%c0_106] : memref<4xf32, #tpu.memory_space<smem>>
    %cst_107 = arith.constant 0.000000e+00 : f32
    %127 = vector.broadcast %cst_107 : f32 to vector<16x16xf32>
    %128 = vector.extract_strided_slice %123 {offsets = [2, 2], sizes = [16, 16], strides = [1, 1]} : vector<22x22xf32> to vector<16x16xf32>
    %c0_108 = arith.constant 0 : index
    %129 = memref.load %arg7[%c0_108] : memref<18xf32, #tpu.memory_space<smem>>
    %130 = vector.broadcast %129 : f32 to vector<16x16xf32>
    %131 = arith.mulf %128, %130 : vector<16x16xf32>
    %132 = arith.addf %127, %131 : vector<16x16xf32>
    %133 = vector.extract_strided_slice %125 {offsets = [2, 2], sizes = [16, 16], strides = [1, 1]} : vector<22x22xf32> to vector<16x16xf32>
    %c1_109 = arith.constant 1 : index
    %134 = memref.load %arg7[%c1_109] : memref<18xf32, #tpu.memory_space<smem>>
    %135 = vector.broadcast %134 : f32 to vector<16x16xf32>
    %136 = arith.mulf %133, %135 : vector<16x16xf32>
    %137 = arith.addf %132, %136 : vector<16x16xf32>
    %138 = vector.extract_strided_slice %123 {offsets = [2, 3], sizes = [16, 16], strides = [1, 1]} : vector<22x22xf32> to vector<16x16xf32>
    %c2_110 = arith.constant 2 : index
    %139 = memref.load %arg7[%c2_110] : memref<18xf32, #tpu.memory_space<smem>>
    %140 = vector.broadcast %139 : f32 to vector<16x16xf32>
    %141 = arith.mulf %138, %140 : vector<16x16xf32>
    %142 = arith.addf %137, %141 : vector<16x16xf32>
    %143 = vector.extract_strided_slice %125 {offsets = [2, 3], sizes = [16, 16], strides = [1, 1]} : vector<22x22xf32> to vector<16x16xf32>
    %c3_111 = arith.constant 3 : index
    %144 = memref.load %arg7[%c3_111] : memref<18xf32, #tpu.memory_space<smem>>
    %145 = vector.broadcast %144 : f32 to vector<16x16xf32>
    %146 = arith.mulf %143, %145 : vector<16x16xf32>
    %147 = arith.addf %142, %146 : vector<16x16xf32>
    %148 = vector.extract_strided_slice %123 {offsets = [2, 4], sizes = [16, 16], strides = [1, 1]} : vector<22x22xf32> to vector<16x16xf32>
    %c4 = arith.constant 4 : index
    %149 = memref.load %arg7[%c4] : memref<18xf32, #tpu.memory_space<smem>>
    %150 = vector.broadcast %149 : f32 to vector<16x16xf32>
    %151 = arith.mulf %148, %150 : vector<16x16xf32>
    %152 = arith.addf %147, %151 : vector<16x16xf32>
    %153 = vector.extract_strided_slice %125 {offsets = [2, 4], sizes = [16, 16], strides = [1, 1]} : vector<22x22xf32> to vector<16x16xf32>
    %c5 = arith.constant 5 : index
    %154 = memref.load %arg7[%c5] : memref<18xf32, #tpu.memory_space<smem>>
    %155 = vector.broadcast %154 : f32 to vector<16x16xf32>
    %156 = arith.mulf %153, %155 : vector<16x16xf32>
    %157 = arith.addf %152, %156 : vector<16x16xf32>
    %158 = vector.extract_strided_slice %123 {offsets = [3, 2], sizes = [16, 16], strides = [1, 1]} : vector<22x22xf32> to vector<16x16xf32>
    %c6 = arith.constant 6 : index
    %159 = memref.load %arg7[%c6] : memref<18xf32, #tpu.memory_space<smem>>
    %160 = vector.broadcast %159 : f32 to vector<16x16xf32>
    %161 = arith.mulf %158, %160 : vector<16x16xf32>
    %162 = arith.addf %157, %161 : vector<16x16xf32>
    %163 = vector.extract_strided_slice %125 {offsets = [3, 2], sizes = [16, 16], strides = [1, 1]} : vector<22x22xf32> to vector<16x16xf32>
    %c7_112 = arith.constant 7 : index
    %164 = memref.load %arg7[%c7_112] : memref<18xf32, #tpu.memory_space<smem>>
    %165 = vector.broadcast %164 : f32 to vector<16x16xf32>
    %166 = arith.mulf %163, %165 : vector<16x16xf32>
    %167 = arith.addf %162, %166 : vector<16x16xf32>
    %168 = vector.extract_strided_slice %123 {offsets = [3, 3], sizes = [16, 16], strides = [1, 1]} : vector<22x22xf32> to vector<16x16xf32>
    %c8_113 = arith.constant 8 : index
    %169 = memref.load %arg7[%c8_113] : memref<18xf32, #tpu.memory_space<smem>>
    %170 = vector.broadcast %169 : f32 to vector<16x16xf32>
    %171 = arith.mulf %168, %170 : vector<16x16xf32>
    %172 = arith.addf %167, %171 : vector<16x16xf32>
    %173 = vector.extract_strided_slice %125 {offsets = [3, 3], sizes = [16, 16], strides = [1, 1]} : vector<22x22xf32> to vector<16x16xf32>
    %c9_114 = arith.constant 9 : index
    %174 = memref.load %arg7[%c9_114] : memref<18xf32, #tpu.memory_space<smem>>
    %175 = vector.broadcast %174 : f32 to vector<16x16xf32>
    %176 = arith.mulf %173, %175 : vector<16x16xf32>
    %177 = arith.addf %172, %176 : vector<16x16xf32>
    %178 = vector.extract_strided_slice %123 {offsets = [3, 4], sizes = [16, 16], strides = [1, 1]} : vector<22x22xf32> to vector<16x16xf32>
    %c10 = arith.constant 10 : index
    %179 = memref.load %arg7[%c10] : memref<18xf32, #tpu.memory_space<smem>>
    %180 = vector.broadcast %179 : f32 to vector<16x16xf32>
    %181 = arith.mulf %178, %180 : vector<16x16xf32>
    %182 = arith.addf %177, %181 : vector<16x16xf32>
    %183 = vector.extract_strided_slice %125 {offsets = [3, 4], sizes = [16, 16], strides = [1, 1]} : vector<22x22xf32> to vector<16x16xf32>
    %c11 = arith.constant 11 : index
    %184 = memref.load %arg7[%c11] : memref<18xf32, #tpu.memory_space<smem>>
    %185 = vector.broadcast %184 : f32 to vector<16x16xf32>
    %186 = arith.mulf %183, %185 : vector<16x16xf32>
    %187 = arith.addf %182, %186 : vector<16x16xf32>
    %188 = vector.extract_strided_slice %123 {offsets = [4, 2], sizes = [16, 16], strides = [1, 1]} : vector<22x22xf32> to vector<16x16xf32>
    %c12 = arith.constant 12 : index
    %189 = memref.load %arg7[%c12] : memref<18xf32, #tpu.memory_space<smem>>
    %190 = vector.broadcast %189 : f32 to vector<16x16xf32>
    %191 = arith.mulf %188, %190 : vector<16x16xf32>
    %192 = arith.addf %187, %191 : vector<16x16xf32>
    %193 = vector.extract_strided_slice %125 {offsets = [4, 2], sizes = [16, 16], strides = [1, 1]} : vector<22x22xf32> to vector<16x16xf32>
    %c13 = arith.constant 13 : index
    %194 = memref.load %arg7[%c13] : memref<18xf32, #tpu.memory_space<smem>>
    %195 = vector.broadcast %194 : f32 to vector<16x16xf32>
    %196 = arith.mulf %193, %195 : vector<16x16xf32>
    %197 = arith.addf %192, %196 : vector<16x16xf32>
    %198 = vector.extract_strided_slice %123 {offsets = [4, 3], sizes = [16, 16], strides = [1, 1]} : vector<22x22xf32> to vector<16x16xf32>
    %c14 = arith.constant 14 : index
    %199 = memref.load %arg7[%c14] : memref<18xf32, #tpu.memory_space<smem>>
    %200 = vector.broadcast %199 : f32 to vector<16x16xf32>
    %201 = arith.mulf %198, %200 : vector<16x16xf32>
    %202 = arith.addf %197, %201 : vector<16x16xf32>
    %203 = vector.extract_strided_slice %125 {offsets = [4, 3], sizes = [16, 16], strides = [1, 1]} : vector<22x22xf32> to vector<16x16xf32>
    %c15 = arith.constant 15 : index
    %204 = memref.load %arg7[%c15] : memref<18xf32, #tpu.memory_space<smem>>
    %205 = vector.broadcast %204 : f32 to vector<16x16xf32>
    %206 = arith.mulf %203, %205 : vector<16x16xf32>
    %207 = arith.addf %202, %206 : vector<16x16xf32>
    %208 = vector.extract_strided_slice %123 {offsets = [4, 4], sizes = [16, 16], strides = [1, 1]} : vector<22x22xf32> to vector<16x16xf32>
    %c16 = arith.constant 16 : index
    %209 = memref.load %arg7[%c16] : memref<18xf32, #tpu.memory_space<smem>>
    %210 = vector.broadcast %209 : f32 to vector<16x16xf32>
    %211 = arith.mulf %208, %210 : vector<16x16xf32>
    %212 = arith.addf %207, %211 : vector<16x16xf32>
    %213 = vector.extract_strided_slice %125 {offsets = [4, 4], sizes = [16, 16], strides = [1, 1]} : vector<22x22xf32> to vector<16x16xf32>
    %c17 = arith.constant 17 : index
    %214 = memref.load %arg7[%c17] : memref<18xf32, #tpu.memory_space<smem>>
    %215 = vector.broadcast %214 : f32 to vector<16x16xf32>
    %216 = arith.mulf %213, %215 : vector<16x16xf32>
    %217 = arith.addf %212, %216 : vector<16x16xf32>
    %218 = vector.broadcast %126 : f32 to vector<16x16xf32>
    %219 = arith.addf %217, %218 : vector<16x16xf32>
    %cst_115 = arith.constant 0.000000e+00 : f32
    %220 = vector.broadcast %cst_115 : f32 to vector<16x16xf32>
    %221 = arith.maximumf %219, %220 : vector<16x16xf32>
    %c1_116 = arith.constant 1 : index
    %222 = memref.load %arg11[%c1_116] : memref<4xf32, #tpu.memory_space<smem>>
    %cst_117 = arith.constant 0.000000e+00 : f32
    %223 = vector.broadcast %cst_117 : f32 to vector<16x16xf32>
    %224 = vector.extract_strided_slice %123 {offsets = [1, 1], sizes = [16, 16], strides = [1, 1]} : vector<22x22xf32> to vector<16x16xf32>
    %c0_118 = arith.constant 0 : index
    %225 = memref.load %arg8[%c0_118] : memref<50xf32, #tpu.memory_space<smem>>
    %226 = vector.broadcast %225 : f32 to vector<16x16xf32>
    %227 = arith.mulf %224, %226 : vector<16x16xf32>
    %228 = arith.addf %223, %227 : vector<16x16xf32>
    %229 = vector.extract_strided_slice %125 {offsets = [1, 1], sizes = [16, 16], strides = [1, 1]} : vector<22x22xf32> to vector<16x16xf32>
    %c1_119 = arith.constant 1 : index
    %230 = memref.load %arg8[%c1_119] : memref<50xf32, #tpu.memory_space<smem>>
    %231 = vector.broadcast %230 : f32 to vector<16x16xf32>
    %232 = arith.mulf %229, %231 : vector<16x16xf32>
    %233 = arith.addf %228, %232 : vector<16x16xf32>
    %234 = vector.extract_strided_slice %123 {offsets = [1, 2], sizes = [16, 16], strides = [1, 1]} : vector<22x22xf32> to vector<16x16xf32>
    %c2_120 = arith.constant 2 : index
    %235 = memref.load %arg8[%c2_120] : memref<50xf32, #tpu.memory_space<smem>>
    %236 = vector.broadcast %235 : f32 to vector<16x16xf32>
    %237 = arith.mulf %234, %236 : vector<16x16xf32>
    %238 = arith.addf %233, %237 : vector<16x16xf32>
    %239 = vector.extract_strided_slice %125 {offsets = [1, 2], sizes = [16, 16], strides = [1, 1]} : vector<22x22xf32> to vector<16x16xf32>
    %c3_121 = arith.constant 3 : index
    %240 = memref.load %arg8[%c3_121] : memref<50xf32, #tpu.memory_space<smem>>
    %241 = vector.broadcast %240 : f32 to vector<16x16xf32>
    %242 = arith.mulf %239, %241 : vector<16x16xf32>
    %243 = arith.addf %238, %242 : vector<16x16xf32>
    %244 = vector.extract_strided_slice %123 {offsets = [1, 3], sizes = [16, 16], strides = [1, 1]} : vector<22x22xf32> to vector<16x16xf32>
    %c4_122 = arith.constant 4 : index
    %245 = memref.load %arg8[%c4_122] : memref<50xf32, #tpu.memory_space<smem>>
    %246 = vector.broadcast %245 : f32 to vector<16x16xf32>
    %247 = arith.mulf %244, %246 : vector<16x16xf32>
    %248 = arith.addf %243, %247 : vector<16x16xf32>
    %249 = vector.extract_strided_slice %125 {offsets = [1, 3], sizes = [16, 16], strides = [1, 1]} : vector<22x22xf32> to vector<16x16xf32>
    %c5_123 = arith.constant 5 : index
    %250 = memref.load %arg8[%c5_123] : memref<50xf32, #tpu.memory_space<smem>>
    %251 = vector.broadcast %250 : f32 to vector<16x16xf32>
    %252 = arith.mulf %249, %251 : vector<16x16xf32>
    %253 = arith.addf %248, %252 : vector<16x16xf32>
    %254 = vector.extract_strided_slice %123 {offsets = [1, 4], sizes = [16, 16], strides = [1, 1]} : vector<22x22xf32> to vector<16x16xf32>
    %c6_124 = arith.constant 6 : index
    %255 = memref.load %arg8[%c6_124] : memref<50xf32, #tpu.memory_space<smem>>
    %256 = vector.broadcast %255 : f32 to vector<16x16xf32>
    %257 = arith.mulf %254, %256 : vector<16x16xf32>
    %258 = arith.addf %253, %257 : vector<16x16xf32>
    %259 = vector.extract_strided_slice %125 {offsets = [1, 4], sizes = [16, 16], strides = [1, 1]} : vector<22x22xf32> to vector<16x16xf32>
    %c7_125 = arith.constant 7 : index
    %260 = memref.load %arg8[%c7_125] : memref<50xf32, #tpu.memory_space<smem>>
    %261 = vector.broadcast %260 : f32 to vector<16x16xf32>
    %262 = arith.mulf %259, %261 : vector<16x16xf32>
    %263 = arith.addf %258, %262 : vector<16x16xf32>
    %264 = vector.extract_strided_slice %123 {offsets = [1, 5], sizes = [16, 16], strides = [1, 1]} : vector<22x22xf32> to vector<16x16xf32>
    %c8_126 = arith.constant 8 : index
    %265 = memref.load %arg8[%c8_126] : memref<50xf32, #tpu.memory_space<smem>>
    %266 = vector.broadcast %265 : f32 to vector<16x16xf32>
    %267 = arith.mulf %264, %266 : vector<16x16xf32>
    %268 = arith.addf %263, %267 : vector<16x16xf32>
    %269 = vector.extract_strided_slice %125 {offsets = [1, 5], sizes = [16, 16], strides = [1, 1]} : vector<22x22xf32> to vector<16x16xf32>
    %c9_127 = arith.constant 9 : index
    %270 = memref.load %arg8[%c9_127] : memref<50xf32, #tpu.memory_space<smem>>
    %271 = vector.broadcast %270 : f32 to vector<16x16xf32>
    %272 = arith.mulf %269, %271 : vector<16x16xf32>
    %273 = arith.addf %268, %272 : vector<16x16xf32>
    %274 = vector.extract_strided_slice %123 {offsets = [2, 1], sizes = [16, 16], strides = [1, 1]} : vector<22x22xf32> to vector<16x16xf32>
    %c10_128 = arith.constant 10 : index
    %275 = memref.load %arg8[%c10_128] : memref<50xf32, #tpu.memory_space<smem>>
    %276 = vector.broadcast %275 : f32 to vector<16x16xf32>
    %277 = arith.mulf %274, %276 : vector<16x16xf32>
    %278 = arith.addf %273, %277 : vector<16x16xf32>
    %279 = vector.extract_strided_slice %125 {offsets = [2, 1], sizes = [16, 16], strides = [1, 1]} : vector<22x22xf32> to vector<16x16xf32>
    %c11_129 = arith.constant 11 : index
    %280 = memref.load %arg8[%c11_129] : memref<50xf32, #tpu.memory_space<smem>>
    %281 = vector.broadcast %280 : f32 to vector<16x16xf32>
    %282 = arith.mulf %279, %281 : vector<16x16xf32>
    %283 = arith.addf %278, %282 : vector<16x16xf32>
    %284 = vector.extract_strided_slice %123 {offsets = [2, 2], sizes = [16, 16], strides = [1, 1]} : vector<22x22xf32> to vector<16x16xf32>
    %c12_130 = arith.constant 12 : index
    %285 = memref.load %arg8[%c12_130] : memref<50xf32, #tpu.memory_space<smem>>
    %286 = vector.broadcast %285 : f32 to vector<16x16xf32>
    %287 = arith.mulf %284, %286 : vector<16x16xf32>
    %288 = arith.addf %283, %287 : vector<16x16xf32>
    %289 = vector.extract_strided_slice %125 {offsets = [2, 2], sizes = [16, 16], strides = [1, 1]} : vector<22x22xf32> to vector<16x16xf32>
    %c13_131 = arith.constant 13 : index
    %290 = memref.load %arg8[%c13_131] : memref<50xf32, #tpu.memory_space<smem>>
    %291 = vector.broadcast %290 : f32 to vector<16x16xf32>
    %292 = arith.mulf %289, %291 : vector<16x16xf32>
    %293 = arith.addf %288, %292 : vector<16x16xf32>
    %294 = vector.extract_strided_slice %123 {offsets = [2, 3], sizes = [16, 16], strides = [1, 1]} : vector<22x22xf32> to vector<16x16xf32>
    %c14_132 = arith.constant 14 : index
    %295 = memref.load %arg8[%c14_132] : memref<50xf32, #tpu.memory_space<smem>>
    %296 = vector.broadcast %295 : f32 to vector<16x16xf32>
    %297 = arith.mulf %294, %296 : vector<16x16xf32>
    %298 = arith.addf %293, %297 : vector<16x16xf32>
    %299 = vector.extract_strided_slice %125 {offsets = [2, 3], sizes = [16, 16], strides = [1, 1]} : vector<22x22xf32> to vector<16x16xf32>
    %c15_133 = arith.constant 15 : index
    %300 = memref.load %arg8[%c15_133] : memref<50xf32, #tpu.memory_space<smem>>
    %301 = vector.broadcast %300 : f32 to vector<16x16xf32>
    %302 = arith.mulf %299, %301 : vector<16x16xf32>
    %303 = arith.addf %298, %302 : vector<16x16xf32>
    %304 = vector.extract_strided_slice %123 {offsets = [2, 4], sizes = [16, 16], strides = [1, 1]} : vector<22x22xf32> to vector<16x16xf32>
    %c16_134 = arith.constant 16 : index
    %305 = memref.load %arg8[%c16_134] : memref<50xf32, #tpu.memory_space<smem>>
    %306 = vector.broadcast %305 : f32 to vector<16x16xf32>
    %307 = arith.mulf %304, %306 : vector<16x16xf32>
    %308 = arith.addf %303, %307 : vector<16x16xf32>
    %309 = vector.extract_strided_slice %125 {offsets = [2, 4], sizes = [16, 16], strides = [1, 1]} : vector<22x22xf32> to vector<16x16xf32>
    %c17_135 = arith.constant 17 : index
    %310 = memref.load %arg8[%c17_135] : memref<50xf32, #tpu.memory_space<smem>>
    %311 = vector.broadcast %310 : f32 to vector<16x16xf32>
    %312 = arith.mulf %309, %311 : vector<16x16xf32>
    %313 = arith.addf %308, %312 : vector<16x16xf32>
    %314 = vector.extract_strided_slice %123 {offsets = [2, 5], sizes = [16, 16], strides = [1, 1]} : vector<22x22xf32> to vector<16x16xf32>
    %c18 = arith.constant 18 : index
    %315 = memref.load %arg8[%c18] : memref<50xf32, #tpu.memory_space<smem>>
    %316 = vector.broadcast %315 : f32 to vector<16x16xf32>
    %317 = arith.mulf %314, %316 : vector<16x16xf32>
    %318 = arith.addf %313, %317 : vector<16x16xf32>
    %319 = vector.extract_strided_slice %125 {offsets = [2, 5], sizes = [16, 16], strides = [1, 1]} : vector<22x22xf32> to vector<16x16xf32>
    %c19 = arith.constant 19 : index
    %320 = memref.load %arg8[%c19] : memref<50xf32, #tpu.memory_space<smem>>
    %321 = vector.broadcast %320 : f32 to vector<16x16xf32>
    %322 = arith.mulf %319, %321 : vector<16x16xf32>
    %323 = arith.addf %318, %322 : vector<16x16xf32>
    %324 = vector.extract_strided_slice %123 {offsets = [3, 1], sizes = [16, 16], strides = [1, 1]} : vector<22x22xf32> to vector<16x16xf32>
    %c20 = arith.constant 20 : index
    %325 = memref.load %arg8[%c20] : memref<50xf32, #tpu.memory_space<smem>>
    %326 = vector.broadcast %325 : f32 to vector<16x16xf32>
    %327 = arith.mulf %324, %326 : vector<16x16xf32>
    %328 = arith.addf %323, %327 : vector<16x16xf32>
    %329 = vector.extract_strided_slice %125 {offsets = [3, 1], sizes = [16, 16], strides = [1, 1]} : vector<22x22xf32> to vector<16x16xf32>
    %c21 = arith.constant 21 : index
    %330 = memref.load %arg8[%c21] : memref<50xf32, #tpu.memory_space<smem>>
    %331 = vector.broadcast %330 : f32 to vector<16x16xf32>
    %332 = arith.mulf %329, %331 : vector<16x16xf32>
    %333 = arith.addf %328, %332 : vector<16x16xf32>
    %334 = vector.extract_strided_slice %123 {offsets = [3, 2], sizes = [16, 16], strides = [1, 1]} : vector<22x22xf32> to vector<16x16xf32>
    %c22 = arith.constant 22 : index
    %335 = memref.load %arg8[%c22] : memref<50xf32, #tpu.memory_space<smem>>
    %336 = vector.broadcast %335 : f32 to vector<16x16xf32>
    %337 = arith.mulf %334, %336 : vector<16x16xf32>
    %338 = arith.addf %333, %337 : vector<16x16xf32>
    %339 = vector.extract_strided_slice %125 {offsets = [3, 2], sizes = [16, 16], strides = [1, 1]} : vector<22x22xf32> to vector<16x16xf32>
    %c23 = arith.constant 23 : index
    %340 = memref.load %arg8[%c23] : memref<50xf32, #tpu.memory_space<smem>>
    %341 = vector.broadcast %340 : f32 to vector<16x16xf32>
    %342 = arith.mulf %339, %341 : vector<16x16xf32>
    %343 = arith.addf %338, %342 : vector<16x16xf32>
    %344 = vector.extract_strided_slice %123 {offsets = [3, 3], sizes = [16, 16], strides = [1, 1]} : vector<22x22xf32> to vector<16x16xf32>
    %c24 = arith.constant 24 : index
    %345 = memref.load %arg8[%c24] : memref<50xf32, #tpu.memory_space<smem>>
    %346 = vector.broadcast %345 : f32 to vector<16x16xf32>
    %347 = arith.mulf %344, %346 : vector<16x16xf32>
    %348 = arith.addf %343, %347 : vector<16x16xf32>
    %349 = vector.extract_strided_slice %125 {offsets = [3, 3], sizes = [16, 16], strides = [1, 1]} : vector<22x22xf32> to vector<16x16xf32>
    %c25 = arith.constant 25 : index
    %350 = memref.load %arg8[%c25] : memref<50xf32, #tpu.memory_space<smem>>
    %351 = vector.broadcast %350 : f32 to vector<16x16xf32>
    %352 = arith.mulf %349, %351 : vector<16x16xf32>
    %353 = arith.addf %348, %352 : vector<16x16xf32>
    %354 = vector.extract_strided_slice %123 {offsets = [3, 4], sizes = [16, 16], strides = [1, 1]} : vector<22x22xf32> to vector<16x16xf32>
    %c26 = arith.constant 26 : index
    %355 = memref.load %arg8[%c26] : memref<50xf32, #tpu.memory_space<smem>>
    %356 = vector.broadcast %355 : f32 to vector<16x16xf32>
    %357 = arith.mulf %354, %356 : vector<16x16xf32>
    %358 = arith.addf %353, %357 : vector<16x16xf32>
    %359 = vector.extract_strided_slice %125 {offsets = [3, 4], sizes = [16, 16], strides = [1, 1]} : vector<22x22xf32> to vector<16x16xf32>
    %c27 = arith.constant 27 : index
    %360 = memref.load %arg8[%c27] : memref<50xf32, #tpu.memory_space<smem>>
    %361 = vector.broadcast %360 : f32 to vector<16x16xf32>
    %362 = arith.mulf %359, %361 : vector<16x16xf32>
    %363 = arith.addf %358, %362 : vector<16x16xf32>
    %364 = vector.extract_strided_slice %123 {offsets = [3, 5], sizes = [16, 16], strides = [1, 1]} : vector<22x22xf32> to vector<16x16xf32>
    %c28 = arith.constant 28 : index
    %365 = memref.load %arg8[%c28] : memref<50xf32, #tpu.memory_space<smem>>
    %366 = vector.broadcast %365 : f32 to vector<16x16xf32>
    %367 = arith.mulf %364, %366 : vector<16x16xf32>
    %368 = arith.addf %363, %367 : vector<16x16xf32>
    %369 = vector.extract_strided_slice %125 {offsets = [3, 5], sizes = [16, 16], strides = [1, 1]} : vector<22x22xf32> to vector<16x16xf32>
    %c29 = arith.constant 29 : index
    %370 = memref.load %arg8[%c29] : memref<50xf32, #tpu.memory_space<smem>>
    %371 = vector.broadcast %370 : f32 to vector<16x16xf32>
    %372 = arith.mulf %369, %371 : vector<16x16xf32>
    %373 = arith.addf %368, %372 : vector<16x16xf32>
    %374 = vector.extract_strided_slice %123 {offsets = [4, 1], sizes = [16, 16], strides = [1, 1]} : vector<22x22xf32> to vector<16x16xf32>
    %c30 = arith.constant 30 : index
    %375 = memref.load %arg8[%c30] : memref<50xf32, #tpu.memory_space<smem>>
    %376 = vector.broadcast %375 : f32 to vector<16x16xf32>
    %377 = arith.mulf %374, %376 : vector<16x16xf32>
    %378 = arith.addf %373, %377 : vector<16x16xf32>
    %379 = vector.extract_strided_slice %125 {offsets = [4, 1], sizes = [16, 16], strides = [1, 1]} : vector<22x22xf32> to vector<16x16xf32>
    %c31 = arith.constant 31 : index
    %380 = memref.load %arg8[%c31] : memref<50xf32, #tpu.memory_space<smem>>
    %381 = vector.broadcast %380 : f32 to vector<16x16xf32>
    %382 = arith.mulf %379, %381 : vector<16x16xf32>
    %383 = arith.addf %378, %382 : vector<16x16xf32>
    %384 = vector.extract_strided_slice %123 {offsets = [4, 2], sizes = [16, 16], strides = [1, 1]} : vector<22x22xf32> to vector<16x16xf32>
    %c32 = arith.constant 32 : index
    %385 = memref.load %arg8[%c32] : memref<50xf32, #tpu.memory_space<smem>>
    %386 = vector.broadcast %385 : f32 to vector<16x16xf32>
    %387 = arith.mulf %384, %386 : vector<16x16xf32>
    %388 = arith.addf %383, %387 : vector<16x16xf32>
    %389 = vector.extract_strided_slice %125 {offsets = [4, 2], sizes = [16, 16], strides = [1, 1]} : vector<22x22xf32> to vector<16x16xf32>
    %c33 = arith.constant 33 : index
    %390 = memref.load %arg8[%c33] : memref<50xf32, #tpu.memory_space<smem>>
    %391 = vector.broadcast %390 : f32 to vector<16x16xf32>
    %392 = arith.mulf %389, %391 : vector<16x16xf32>
    %393 = arith.addf %388, %392 : vector<16x16xf32>
    %394 = vector.extract_strided_slice %123 {offsets = [4, 3], sizes = [16, 16], strides = [1, 1]} : vector<22x22xf32> to vector<16x16xf32>
    %c34 = arith.constant 34 : index
    %395 = memref.load %arg8[%c34] : memref<50xf32, #tpu.memory_space<smem>>
    %396 = vector.broadcast %395 : f32 to vector<16x16xf32>
    %397 = arith.mulf %394, %396 : vector<16x16xf32>
    %398 = arith.addf %393, %397 : vector<16x16xf32>
    %399 = vector.extract_strided_slice %125 {offsets = [4, 3], sizes = [16, 16], strides = [1, 1]} : vector<22x22xf32> to vector<16x16xf32>
    %c35 = arith.constant 35 : index
    %400 = memref.load %arg8[%c35] : memref<50xf32, #tpu.memory_space<smem>>
    %401 = vector.broadcast %400 : f32 to vector<16x16xf32>
    %402 = arith.mulf %399, %401 : vector<16x16xf32>
    %403 = arith.addf %398, %402 : vector<16x16xf32>
    %404 = vector.extract_strided_slice %123 {offsets = [4, 4], sizes = [16, 16], strides = [1, 1]} : vector<22x22xf32> to vector<16x16xf32>
    %c36 = arith.constant 36 : index
    %405 = memref.load %arg8[%c36] : memref<50xf32, #tpu.memory_space<smem>>
    %406 = vector.broadcast %405 : f32 to vector<16x16xf32>
    %407 = arith.mulf %404, %406 : vector<16x16xf32>
    %408 = arith.addf %403, %407 : vector<16x16xf32>
    %409 = vector.extract_strided_slice %125 {offsets = [4, 4], sizes = [16, 16], strides = [1, 1]} : vector<22x22xf32> to vector<16x16xf32>
    %c37 = arith.constant 37 : index
    %410 = memref.load %arg8[%c37] : memref<50xf32, #tpu.memory_space<smem>>
    %411 = vector.broadcast %410 : f32 to vector<16x16xf32>
    %412 = arith.mulf %409, %411 : vector<16x16xf32>
    %413 = arith.addf %408, %412 : vector<16x16xf32>
    %414 = vector.extract_strided_slice %123 {offsets = [4, 5], sizes = [16, 16], strides = [1, 1]} : vector<22x22xf32> to vector<16x16xf32>
    %c38 = arith.constant 38 : index
    %415 = memref.load %arg8[%c38] : memref<50xf32, #tpu.memory_space<smem>>
    %416 = vector.broadcast %415 : f32 to vector<16x16xf32>
    %417 = arith.mulf %414, %416 : vector<16x16xf32>
    %418 = arith.addf %413, %417 : vector<16x16xf32>
    %419 = vector.extract_strided_slice %125 {offsets = [4, 5], sizes = [16, 16], strides = [1, 1]} : vector<22x22xf32> to vector<16x16xf32>
    %c39 = arith.constant 39 : index
    %420 = memref.load %arg8[%c39] : memref<50xf32, #tpu.memory_space<smem>>
    %421 = vector.broadcast %420 : f32 to vector<16x16xf32>
    %422 = arith.mulf %419, %421 : vector<16x16xf32>
    %423 = arith.addf %418, %422 : vector<16x16xf32>
    %424 = vector.extract_strided_slice %123 {offsets = [5, 1], sizes = [16, 16], strides = [1, 1]} : vector<22x22xf32> to vector<16x16xf32>
    %c40 = arith.constant 40 : index
    %425 = memref.load %arg8[%c40] : memref<50xf32, #tpu.memory_space<smem>>
    %426 = vector.broadcast %425 : f32 to vector<16x16xf32>
    %427 = arith.mulf %424, %426 : vector<16x16xf32>
    %428 = arith.addf %423, %427 : vector<16x16xf32>
    %429 = vector.extract_strided_slice %125 {offsets = [5, 1], sizes = [16, 16], strides = [1, 1]} : vector<22x22xf32> to vector<16x16xf32>
    %c41 = arith.constant 41 : index
    %430 = memref.load %arg8[%c41] : memref<50xf32, #tpu.memory_space<smem>>
    %431 = vector.broadcast %430 : f32 to vector<16x16xf32>
    %432 = arith.mulf %429, %431 : vector<16x16xf32>
    %433 = arith.addf %428, %432 : vector<16x16xf32>
    %434 = vector.extract_strided_slice %123 {offsets = [5, 2], sizes = [16, 16], strides = [1, 1]} : vector<22x22xf32> to vector<16x16xf32>
    %c42 = arith.constant 42 : index
    %435 = memref.load %arg8[%c42] : memref<50xf32, #tpu.memory_space<smem>>
    %436 = vector.broadcast %435 : f32 to vector<16x16xf32>
    %437 = arith.mulf %434, %436 : vector<16x16xf32>
    %438 = arith.addf %433, %437 : vector<16x16xf32>
    %439 = vector.extract_strided_slice %125 {offsets = [5, 2], sizes = [16, 16], strides = [1, 1]} : vector<22x22xf32> to vector<16x16xf32>
    %c43 = arith.constant 43 : index
    %440 = memref.load %arg8[%c43] : memref<50xf32, #tpu.memory_space<smem>>
    %441 = vector.broadcast %440 : f32 to vector<16x16xf32>
    %442 = arith.mulf %439, %441 : vector<16x16xf32>
    %443 = arith.addf %438, %442 : vector<16x16xf32>
    %444 = vector.extract_strided_slice %123 {offsets = [5, 3], sizes = [16, 16], strides = [1, 1]} : vector<22x22xf32> to vector<16x16xf32>
    %c44 = arith.constant 44 : index
    %445 = memref.load %arg8[%c44] : memref<50xf32, #tpu.memory_space<smem>>
    %446 = vector.broadcast %445 : f32 to vector<16x16xf32>
    %447 = arith.mulf %444, %446 : vector<16x16xf32>
    %448 = arith.addf %443, %447 : vector<16x16xf32>
    %449 = vector.extract_strided_slice %125 {offsets = [5, 3], sizes = [16, 16], strides = [1, 1]} : vector<22x22xf32> to vector<16x16xf32>
    %c45 = arith.constant 45 : index
    %450 = memref.load %arg8[%c45] : memref<50xf32, #tpu.memory_space<smem>>
    %451 = vector.broadcast %450 : f32 to vector<16x16xf32>
    %452 = arith.mulf %449, %451 : vector<16x16xf32>
    %453 = arith.addf %448, %452 : vector<16x16xf32>
    %454 = vector.extract_strided_slice %123 {offsets = [5, 4], sizes = [16, 16], strides = [1, 1]} : vector<22x22xf32> to vector<16x16xf32>
    %c46 = arith.constant 46 : index
    %455 = memref.load %arg8[%c46] : memref<50xf32, #tpu.memory_space<smem>>
    %456 = vector.broadcast %455 : f32 to vector<16x16xf32>
    %457 = arith.mulf %454, %456 : vector<16x16xf32>
    %458 = arith.addf %453, %457 : vector<16x16xf32>
    %459 = vector.extract_strided_slice %125 {offsets = [5, 4], sizes = [16, 16], strides = [1, 1]} : vector<22x22xf32> to vector<16x16xf32>
    %c47 = arith.constant 47 : index
    %460 = memref.load %arg8[%c47] : memref<50xf32, #tpu.memory_space<smem>>
    %461 = vector.broadcast %460 : f32 to vector<16x16xf32>
    %462 = arith.mulf %459, %461 : vector<16x16xf32>
    %463 = arith.addf %458, %462 : vector<16x16xf32>
    %464 = vector.extract_strided_slice %123 {offsets = [5, 5], sizes = [16, 16], strides = [1, 1]} : vector<22x22xf32> to vector<16x16xf32>
    %c48 = arith.constant 48 : index
    %465 = memref.load %arg8[%c48] : memref<50xf32, #tpu.memory_space<smem>>
    %466 = vector.broadcast %465 : f32 to vector<16x16xf32>
    %467 = arith.mulf %464, %466 : vector<16x16xf32>
    %468 = arith.addf %463, %467 : vector<16x16xf32>
    %469 = vector.extract_strided_slice %125 {offsets = [5, 5], sizes = [16, 16], strides = [1, 1]} : vector<22x22xf32> to vector<16x16xf32>
    %c49 = arith.constant 49 : index
    %470 = memref.load %arg8[%c49] : memref<50xf32, #tpu.memory_space<smem>>
    %471 = vector.broadcast %470 : f32 to vector<16x16xf32>
    %472 = arith.mulf %469, %471 : vector<16x16xf32>
    %473 = arith.addf %468, %472 : vector<16x16xf32>
    %474 = vector.broadcast %222 : f32 to vector<16x16xf32>
    %475 = arith.addf %473, %474 : vector<16x16xf32>
    %cst_136 = arith.constant 0.000000e+00 : f32
    %476 = vector.broadcast %cst_136 : f32 to vector<16x16xf32>
    %477 = arith.maximumf %475, %476 : vector<16x16xf32>
    %c2_137 = arith.constant 2 : index
    %478 = memref.load %arg11[%c2_137] : memref<4xf32, #tpu.memory_space<smem>>
    %cst_138 = arith.constant 0.000000e+00 : f32
    %479 = vector.broadcast %cst_138 : f32 to vector<16x16xf32>
    %480 = vector.extract_strided_slice %123 {offsets = [0, 0], sizes = [16, 16], strides = [1, 1]} : vector<22x22xf32> to vector<16x16xf32>
    %c0_139 = arith.constant 0 : index
    %481 = memref.load %arg9[%c0_139] : memref<98xf32, #tpu.memory_space<smem>>
    %482 = vector.broadcast %481 : f32 to vector<16x16xf32>
    %483 = arith.mulf %480, %482 : vector<16x16xf32>
    %484 = arith.addf %479, %483 : vector<16x16xf32>
    %485 = vector.extract_strided_slice %125 {offsets = [0, 0], sizes = [16, 16], strides = [1, 1]} : vector<22x22xf32> to vector<16x16xf32>
    %c1_140 = arith.constant 1 : index
    %486 = memref.load %arg9[%c1_140] : memref<98xf32, #tpu.memory_space<smem>>
    %487 = vector.broadcast %486 : f32 to vector<16x16xf32>
    %488 = arith.mulf %485, %487 : vector<16x16xf32>
    %489 = arith.addf %484, %488 : vector<16x16xf32>
    %490 = vector.extract_strided_slice %123 {offsets = [0, 1], sizes = [16, 16], strides = [1, 1]} : vector<22x22xf32> to vector<16x16xf32>
    %c2_141 = arith.constant 2 : index
    %491 = memref.load %arg9[%c2_141] : memref<98xf32, #tpu.memory_space<smem>>
    %492 = vector.broadcast %491 : f32 to vector<16x16xf32>
    %493 = arith.mulf %490, %492 : vector<16x16xf32>
    %494 = arith.addf %489, %493 : vector<16x16xf32>
    %495 = vector.extract_strided_slice %125 {offsets = [0, 1], sizes = [16, 16], strides = [1, 1]} : vector<22x22xf32> to vector<16x16xf32>
    %c3_142 = arith.constant 3 : index
    %496 = memref.load %arg9[%c3_142] : memref<98xf32, #tpu.memory_space<smem>>
    %497 = vector.broadcast %496 : f32 to vector<16x16xf32>
    %498 = arith.mulf %495, %497 : vector<16x16xf32>
    %499 = arith.addf %494, %498 : vector<16x16xf32>
    %500 = vector.extract_strided_slice %123 {offsets = [0, 2], sizes = [16, 16], strides = [1, 1]} : vector<22x22xf32> to vector<16x16xf32>
    %c4_143 = arith.constant 4 : index
    %501 = memref.load %arg9[%c4_143] : memref<98xf32, #tpu.memory_space<smem>>
    %502 = vector.broadcast %501 : f32 to vector<16x16xf32>
    %503 = arith.mulf %500, %502 : vector<16x16xf32>
    %504 = arith.addf %499, %503 : vector<16x16xf32>
    %505 = vector.extract_strided_slice %125 {offsets = [0, 2], sizes = [16, 16], strides = [1, 1]} : vector<22x22xf32> to vector<16x16xf32>
    %c5_144 = arith.constant 5 : index
    %506 = memref.load %arg9[%c5_144] : memref<98xf32, #tpu.memory_space<smem>>
    %507 = vector.broadcast %506 : f32 to vector<16x16xf32>
    %508 = arith.mulf %505, %507 : vector<16x16xf32>
    %509 = arith.addf %504, %508 : vector<16x16xf32>
    %510 = vector.extract_strided_slice %123 {offsets = [0, 3], sizes = [16, 16], strides = [1, 1]} : vector<22x22xf32> to vector<16x16xf32>
    %c6_145 = arith.constant 6 : index
    %511 = memref.load %arg9[%c6_145] : memref<98xf32, #tpu.memory_space<smem>>
    %512 = vector.broadcast %511 : f32 to vector<16x16xf32>
    %513 = arith.mulf %510, %512 : vector<16x16xf32>
    %514 = arith.addf %509, %513 : vector<16x16xf32>
    %515 = vector.extract_strided_slice %125 {offsets = [0, 3], sizes = [16, 16], strides = [1, 1]} : vector<22x22xf32> to vector<16x16xf32>
    %c7_146 = arith.constant 7 : index
    %516 = memref.load %arg9[%c7_146] : memref<98xf32, #tpu.memory_space<smem>>
    %517 = vector.broadcast %516 : f32 to vector<16x16xf32>
    %518 = arith.mulf %515, %517 : vector<16x16xf32>
    %519 = arith.addf %514, %518 : vector<16x16xf32>
    %520 = vector.extract_strided_slice %123 {offsets = [0, 4], sizes = [16, 16], strides = [1, 1]} : vector<22x22xf32> to vector<16x16xf32>
    %c8_147 = arith.constant 8 : index
    %521 = memref.load %arg9[%c8_147] : memref<98xf32, #tpu.memory_space<smem>>
    %522 = vector.broadcast %521 : f32 to vector<16x16xf32>
    %523 = arith.mulf %520, %522 : vector<16x16xf32>
    %524 = arith.addf %519, %523 : vector<16x16xf32>
    %525 = vector.extract_strided_slice %125 {offsets = [0, 4], sizes = [16, 16], strides = [1, 1]} : vector<22x22xf32> to vector<16x16xf32>
    %c9_148 = arith.constant 9 : index
    %526 = memref.load %arg9[%c9_148] : memref<98xf32, #tpu.memory_space<smem>>
    %527 = vector.broadcast %526 : f32 to vector<16x16xf32>
    %528 = arith.mulf %525, %527 : vector<16x16xf32>
    %529 = arith.addf %524, %528 : vector<16x16xf32>
    %530 = vector.extract_strided_slice %123 {offsets = [0, 5], sizes = [16, 16], strides = [1, 1]} : vector<22x22xf32> to vector<16x16xf32>
    %c10_149 = arith.constant 10 : index
    %531 = memref.load %arg9[%c10_149] : memref<98xf32, #tpu.memory_space<smem>>
    %532 = vector.broadcast %531 : f32 to vector<16x16xf32>
    %533 = arith.mulf %530, %532 : vector<16x16xf32>
    %534 = arith.addf %529, %533 : vector<16x16xf32>
    %535 = vector.extract_strided_slice %125 {offsets = [0, 5], sizes = [16, 16], strides = [1, 1]} : vector<22x22xf32> to vector<16x16xf32>
    %c11_150 = arith.constant 11 : index
    %536 = memref.load %arg9[%c11_150] : memref<98xf32, #tpu.memory_space<smem>>
    %537 = vector.broadcast %536 : f32 to vector<16x16xf32>
    %538 = arith.mulf %535, %537 : vector<16x16xf32>
    %539 = arith.addf %534, %538 : vector<16x16xf32>
    %540 = vector.extract_strided_slice %123 {offsets = [0, 6], sizes = [16, 16], strides = [1, 1]} : vector<22x22xf32> to vector<16x16xf32>
    %c12_151 = arith.constant 12 : index
    %541 = memref.load %arg9[%c12_151] : memref<98xf32, #tpu.memory_space<smem>>
    %542 = vector.broadcast %541 : f32 to vector<16x16xf32>
    %543 = arith.mulf %540, %542 : vector<16x16xf32>
    %544 = arith.addf %539, %543 : vector<16x16xf32>
    %545 = vector.extract_strided_slice %125 {offsets = [0, 6], sizes = [16, 16], strides = [1, 1]} : vector<22x22xf32> to vector<16x16xf32>
    %c13_152 = arith.constant 13 : index
    %546 = memref.load %arg9[%c13_152] : memref<98xf32, #tpu.memory_space<smem>>
    %547 = vector.broadcast %546 : f32 to vector<16x16xf32>
    %548 = arith.mulf %545, %547 : vector<16x16xf32>
    %549 = arith.addf %544, %548 : vector<16x16xf32>
    %550 = vector.extract_strided_slice %123 {offsets = [1, 0], sizes = [16, 16], strides = [1, 1]} : vector<22x22xf32> to vector<16x16xf32>
    %c14_153 = arith.constant 14 : index
    %551 = memref.load %arg9[%c14_153] : memref<98xf32, #tpu.memory_space<smem>>
    %552 = vector.broadcast %551 : f32 to vector<16x16xf32>
    %553 = arith.mulf %550, %552 : vector<16x16xf32>
    %554 = arith.addf %549, %553 : vector<16x16xf32>
    %555 = vector.extract_strided_slice %125 {offsets = [1, 0], sizes = [16, 16], strides = [1, 1]} : vector<22x22xf32> to vector<16x16xf32>
    %c15_154 = arith.constant 15 : index
    %556 = memref.load %arg9[%c15_154] : memref<98xf32, #tpu.memory_space<smem>>
    %557 = vector.broadcast %556 : f32 to vector<16x16xf32>
    %558 = arith.mulf %555, %557 : vector<16x16xf32>
    %559 = arith.addf %554, %558 : vector<16x16xf32>
    %560 = vector.extract_strided_slice %123 {offsets = [1, 1], sizes = [16, 16], strides = [1, 1]} : vector<22x22xf32> to vector<16x16xf32>
    %c16_155 = arith.constant 16 : index
    %561 = memref.load %arg9[%c16_155] : memref<98xf32, #tpu.memory_space<smem>>
    %562 = vector.broadcast %561 : f32 to vector<16x16xf32>
    %563 = arith.mulf %560, %562 : vector<16x16xf32>
    %564 = arith.addf %559, %563 : vector<16x16xf32>
    %565 = vector.extract_strided_slice %125 {offsets = [1, 1], sizes = [16, 16], strides = [1, 1]} : vector<22x22xf32> to vector<16x16xf32>
    %c17_156 = arith.constant 17 : index
    %566 = memref.load %arg9[%c17_156] : memref<98xf32, #tpu.memory_space<smem>>
    %567 = vector.broadcast %566 : f32 to vector<16x16xf32>
    %568 = arith.mulf %565, %567 : vector<16x16xf32>
    %569 = arith.addf %564, %568 : vector<16x16xf32>
    %570 = vector.extract_strided_slice %123 {offsets = [1, 2], sizes = [16, 16], strides = [1, 1]} : vector<22x22xf32> to vector<16x16xf32>
    %c18_157 = arith.constant 18 : index
    %571 = memref.load %arg9[%c18_157] : memref<98xf32, #tpu.memory_space<smem>>
    %572 = vector.broadcast %571 : f32 to vector<16x16xf32>
    %573 = arith.mulf %570, %572 : vector<16x16xf32>
    %574 = arith.addf %569, %573 : vector<16x16xf32>
    %575 = vector.extract_strided_slice %125 {offsets = [1, 2], sizes = [16, 16], strides = [1, 1]} : vector<22x22xf32> to vector<16x16xf32>
    %c19_158 = arith.constant 19 : index
    %576 = memref.load %arg9[%c19_158] : memref<98xf32, #tpu.memory_space<smem>>
    %577 = vector.broadcast %576 : f32 to vector<16x16xf32>
    %578 = arith.mulf %575, %577 : vector<16x16xf32>
    %579 = arith.addf %574, %578 : vector<16x16xf32>
    %580 = vector.extract_strided_slice %123 {offsets = [1, 3], sizes = [16, 16], strides = [1, 1]} : vector<22x22xf32> to vector<16x16xf32>
    %c20_159 = arith.constant 20 : index
    %581 = memref.load %arg9[%c20_159] : memref<98xf32, #tpu.memory_space<smem>>
    %582 = vector.broadcast %581 : f32 to vector<16x16xf32>
    %583 = arith.mulf %580, %582 : vector<16x16xf32>
    %584 = arith.addf %579, %583 : vector<16x16xf32>
    %585 = vector.extract_strided_slice %125 {offsets = [1, 3], sizes = [16, 16], strides = [1, 1]} : vector<22x22xf32> to vector<16x16xf32>
    %c21_160 = arith.constant 21 : index
    %586 = memref.load %arg9[%c21_160] : memref<98xf32, #tpu.memory_space<smem>>
    %587 = vector.broadcast %586 : f32 to vector<16x16xf32>
    %588 = arith.mulf %585, %587 : vector<16x16xf32>
    %589 = arith.addf %584, %588 : vector<16x16xf32>
    %590 = vector.extract_strided_slice %123 {offsets = [1, 4], sizes = [16, 16], strides = [1, 1]} : vector<22x22xf32> to vector<16x16xf32>
    %c22_161 = arith.constant 22 : index
    %591 = memref.load %arg9[%c22_161] : memref<98xf32, #tpu.memory_space<smem>>
    %592 = vector.broadcast %591 : f32 to vector<16x16xf32>
    %593 = arith.mulf %590, %592 : vector<16x16xf32>
    %594 = arith.addf %589, %593 : vector<16x16xf32>
    %595 = vector.extract_strided_slice %125 {offsets = [1, 4], sizes = [16, 16], strides = [1, 1]} : vector<22x22xf32> to vector<16x16xf32>
    %c23_162 = arith.constant 23 : index
    %596 = memref.load %arg9[%c23_162] : memref<98xf32, #tpu.memory_space<smem>>
    %597 = vector.broadcast %596 : f32 to vector<16x16xf32>
    %598 = arith.mulf %595, %597 : vector<16x16xf32>
    %599 = arith.addf %594, %598 : vector<16x16xf32>
    %600 = vector.extract_strided_slice %123 {offsets = [1, 5], sizes = [16, 16], strides = [1, 1]} : vector<22x22xf32> to vector<16x16xf32>
    %c24_163 = arith.constant 24 : index
    %601 = memref.load %arg9[%c24_163] : memref<98xf32, #tpu.memory_space<smem>>
    %602 = vector.broadcast %601 : f32 to vector<16x16xf32>
    %603 = arith.mulf %600, %602 : vector<16x16xf32>
    %604 = arith.addf %599, %603 : vector<16x16xf32>
    %605 = vector.extract_strided_slice %125 {offsets = [1, 5], sizes = [16, 16], strides = [1, 1]} : vector<22x22xf32> to vector<16x16xf32>
    %c25_164 = arith.constant 25 : index
    %606 = memref.load %arg9[%c25_164] : memref<98xf32, #tpu.memory_space<smem>>
    %607 = vector.broadcast %606 : f32 to vector<16x16xf32>
    %608 = arith.mulf %605, %607 : vector<16x16xf32>
    %609 = arith.addf %604, %608 : vector<16x16xf32>
    %610 = vector.extract_strided_slice %123 {offsets = [1, 6], sizes = [16, 16], strides = [1, 1]} : vector<22x22xf32> to vector<16x16xf32>
    %c26_165 = arith.constant 26 : index
    %611 = memref.load %arg9[%c26_165] : memref<98xf32, #tpu.memory_space<smem>>
    %612 = vector.broadcast %611 : f32 to vector<16x16xf32>
    %613 = arith.mulf %610, %612 : vector<16x16xf32>
    %614 = arith.addf %609, %613 : vector<16x16xf32>
    %615 = vector.extract_strided_slice %125 {offsets = [1, 6], sizes = [16, 16], strides = [1, 1]} : vector<22x22xf32> to vector<16x16xf32>
    %c27_166 = arith.constant 27 : index
    %616 = memref.load %arg9[%c27_166] : memref<98xf32, #tpu.memory_space<smem>>
    %617 = vector.broadcast %616 : f32 to vector<16x16xf32>
    %618 = arith.mulf %615, %617 : vector<16x16xf32>
    %619 = arith.addf %614, %618 : vector<16x16xf32>
    %620 = vector.extract_strided_slice %123 {offsets = [2, 0], sizes = [16, 16], strides = [1, 1]} : vector<22x22xf32> to vector<16x16xf32>
    %c28_167 = arith.constant 28 : index
    %621 = memref.load %arg9[%c28_167] : memref<98xf32, #tpu.memory_space<smem>>
    %622 = vector.broadcast %621 : f32 to vector<16x16xf32>
    %623 = arith.mulf %620, %622 : vector<16x16xf32>
    %624 = arith.addf %619, %623 : vector<16x16xf32>
    %625 = vector.extract_strided_slice %125 {offsets = [2, 0], sizes = [16, 16], strides = [1, 1]} : vector<22x22xf32> to vector<16x16xf32>
    %c29_168 = arith.constant 29 : index
    %626 = memref.load %arg9[%c29_168] : memref<98xf32, #tpu.memory_space<smem>>
    %627 = vector.broadcast %626 : f32 to vector<16x16xf32>
    %628 = arith.mulf %625, %627 : vector<16x16xf32>
    %629 = arith.addf %624, %628 : vector<16x16xf32>
    %630 = vector.extract_strided_slice %123 {offsets = [2, 1], sizes = [16, 16], strides = [1, 1]} : vector<22x22xf32> to vector<16x16xf32>
    %c30_169 = arith.constant 30 : index
    %631 = memref.load %arg9[%c30_169] : memref<98xf32, #tpu.memory_space<smem>>
    %632 = vector.broadcast %631 : f32 to vector<16x16xf32>
    %633 = arith.mulf %630, %632 : vector<16x16xf32>
    %634 = arith.addf %629, %633 : vector<16x16xf32>
    %635 = vector.extract_strided_slice %125 {offsets = [2, 1], sizes = [16, 16], strides = [1, 1]} : vector<22x22xf32> to vector<16x16xf32>
    %c31_170 = arith.constant 31 : index
    %636 = memref.load %arg9[%c31_170] : memref<98xf32, #tpu.memory_space<smem>>
    %637 = vector.broadcast %636 : f32 to vector<16x16xf32>
    %638 = arith.mulf %635, %637 : vector<16x16xf32>
    %639 = arith.addf %634, %638 : vector<16x16xf32>
    %640 = vector.extract_strided_slice %123 {offsets = [2, 2], sizes = [16, 16], strides = [1, 1]} : vector<22x22xf32> to vector<16x16xf32>
    %c32_171 = arith.constant 32 : index
    %641 = memref.load %arg9[%c32_171] : memref<98xf32, #tpu.memory_space<smem>>
    %642 = vector.broadcast %641 : f32 to vector<16x16xf32>
    %643 = arith.mulf %640, %642 : vector<16x16xf32>
    %644 = arith.addf %639, %643 : vector<16x16xf32>
    %645 = vector.extract_strided_slice %125 {offsets = [2, 2], sizes = [16, 16], strides = [1, 1]} : vector<22x22xf32> to vector<16x16xf32>
    %c33_172 = arith.constant 33 : index
    %646 = memref.load %arg9[%c33_172] : memref<98xf32, #tpu.memory_space<smem>>
    %647 = vector.broadcast %646 : f32 to vector<16x16xf32>
    %648 = arith.mulf %645, %647 : vector<16x16xf32>
    %649 = arith.addf %644, %648 : vector<16x16xf32>
    %650 = vector.extract_strided_slice %123 {offsets = [2, 3], sizes = [16, 16], strides = [1, 1]} : vector<22x22xf32> to vector<16x16xf32>
    %c34_173 = arith.constant 34 : index
    %651 = memref.load %arg9[%c34_173] : memref<98xf32, #tpu.memory_space<smem>>
    %652 = vector.broadcast %651 : f32 to vector<16x16xf32>
    %653 = arith.mulf %650, %652 : vector<16x16xf32>
    %654 = arith.addf %649, %653 : vector<16x16xf32>
    %655 = vector.extract_strided_slice %125 {offsets = [2, 3], sizes = [16, 16], strides = [1, 1]} : vector<22x22xf32> to vector<16x16xf32>
    %c35_174 = arith.constant 35 : index
    %656 = memref.load %arg9[%c35_174] : memref<98xf32, #tpu.memory_space<smem>>
    %657 = vector.broadcast %656 : f32 to vector<16x16xf32>
    %658 = arith.mulf %655, %657 : vector<16x16xf32>
    %659 = arith.addf %654, %658 : vector<16x16xf32>
    %660 = vector.extract_strided_slice %123 {offsets = [2, 4], sizes = [16, 16], strides = [1, 1]} : vector<22x22xf32> to vector<16x16xf32>
    %c36_175 = arith.constant 36 : index
    %661 = memref.load %arg9[%c36_175] : memref<98xf32, #tpu.memory_space<smem>>
    %662 = vector.broadcast %661 : f32 to vector<16x16xf32>
    %663 = arith.mulf %660, %662 : vector<16x16xf32>
    %664 = arith.addf %659, %663 : vector<16x16xf32>
    %665 = vector.extract_strided_slice %125 {offsets = [2, 4], sizes = [16, 16], strides = [1, 1]} : vector<22x22xf32> to vector<16x16xf32>
    %c37_176 = arith.constant 37 : index
    %666 = memref.load %arg9[%c37_176] : memref<98xf32, #tpu.memory_space<smem>>
    %667 = vector.broadcast %666 : f32 to vector<16x16xf32>
    %668 = arith.mulf %665, %667 : vector<16x16xf32>
    %669 = arith.addf %664, %668 : vector<16x16xf32>
    %670 = vector.extract_strided_slice %123 {offsets = [2, 5], sizes = [16, 16], strides = [1, 1]} : vector<22x22xf32> to vector<16x16xf32>
    %c38_177 = arith.constant 38 : index
    %671 = memref.load %arg9[%c38_177] : memref<98xf32, #tpu.memory_space<smem>>
    %672 = vector.broadcast %671 : f32 to vector<16x16xf32>
    %673 = arith.mulf %670, %672 : vector<16x16xf32>
    %674 = arith.addf %669, %673 : vector<16x16xf32>
    %675 = vector.extract_strided_slice %125 {offsets = [2, 5], sizes = [16, 16], strides = [1, 1]} : vector<22x22xf32> to vector<16x16xf32>
    %c39_178 = arith.constant 39 : index
    %676 = memref.load %arg9[%c39_178] : memref<98xf32, #tpu.memory_space<smem>>
    %677 = vector.broadcast %676 : f32 to vector<16x16xf32>
    %678 = arith.mulf %675, %677 : vector<16x16xf32>
    %679 = arith.addf %674, %678 : vector<16x16xf32>
    %680 = vector.extract_strided_slice %123 {offsets = [2, 6], sizes = [16, 16], strides = [1, 1]} : vector<22x22xf32> to vector<16x16xf32>
    %c40_179 = arith.constant 40 : index
    %681 = memref.load %arg9[%c40_179] : memref<98xf32, #tpu.memory_space<smem>>
    %682 = vector.broadcast %681 : f32 to vector<16x16xf32>
    %683 = arith.mulf %680, %682 : vector<16x16xf32>
    %684 = arith.addf %679, %683 : vector<16x16xf32>
    %685 = vector.extract_strided_slice %125 {offsets = [2, 6], sizes = [16, 16], strides = [1, 1]} : vector<22x22xf32> to vector<16x16xf32>
    %c41_180 = arith.constant 41 : index
    %686 = memref.load %arg9[%c41_180] : memref<98xf32, #tpu.memory_space<smem>>
    %687 = vector.broadcast %686 : f32 to vector<16x16xf32>
    %688 = arith.mulf %685, %687 : vector<16x16xf32>
    %689 = arith.addf %684, %688 : vector<16x16xf32>
    %690 = vector.extract_strided_slice %123 {offsets = [3, 0], sizes = [16, 16], strides = [1, 1]} : vector<22x22xf32> to vector<16x16xf32>
    %c42_181 = arith.constant 42 : index
    %691 = memref.load %arg9[%c42_181] : memref<98xf32, #tpu.memory_space<smem>>
    %692 = vector.broadcast %691 : f32 to vector<16x16xf32>
    %693 = arith.mulf %690, %692 : vector<16x16xf32>
    %694 = arith.addf %689, %693 : vector<16x16xf32>
    %695 = vector.extract_strided_slice %125 {offsets = [3, 0], sizes = [16, 16], strides = [1, 1]} : vector<22x22xf32> to vector<16x16xf32>
    %c43_182 = arith.constant 43 : index
    %696 = memref.load %arg9[%c43_182] : memref<98xf32, #tpu.memory_space<smem>>
    %697 = vector.broadcast %696 : f32 to vector<16x16xf32>
    %698 = arith.mulf %695, %697 : vector<16x16xf32>
    %699 = arith.addf %694, %698 : vector<16x16xf32>
    %700 = vector.extract_strided_slice %123 {offsets = [3, 1], sizes = [16, 16], strides = [1, 1]} : vector<22x22xf32> to vector<16x16xf32>
    %c44_183 = arith.constant 44 : index
    %701 = memref.load %arg9[%c44_183] : memref<98xf32, #tpu.memory_space<smem>>
    %702 = vector.broadcast %701 : f32 to vector<16x16xf32>
    %703 = arith.mulf %700, %702 : vector<16x16xf32>
    %704 = arith.addf %699, %703 : vector<16x16xf32>
    %705 = vector.extract_strided_slice %125 {offsets = [3, 1], sizes = [16, 16], strides = [1, 1]} : vector<22x22xf32> to vector<16x16xf32>
    %c45_184 = arith.constant 45 : index
    %706 = memref.load %arg9[%c45_184] : memref<98xf32, #tpu.memory_space<smem>>
    %707 = vector.broadcast %706 : f32 to vector<16x16xf32>
    %708 = arith.mulf %705, %707 : vector<16x16xf32>
    %709 = arith.addf %704, %708 : vector<16x16xf32>
    %710 = vector.extract_strided_slice %123 {offsets = [3, 2], sizes = [16, 16], strides = [1, 1]} : vector<22x22xf32> to vector<16x16xf32>
    %c46_185 = arith.constant 46 : index
    %711 = memref.load %arg9[%c46_185] : memref<98xf32, #tpu.memory_space<smem>>
    %712 = vector.broadcast %711 : f32 to vector<16x16xf32>
    %713 = arith.mulf %710, %712 : vector<16x16xf32>
    %714 = arith.addf %709, %713 : vector<16x16xf32>
    %715 = vector.extract_strided_slice %125 {offsets = [3, 2], sizes = [16, 16], strides = [1, 1]} : vector<22x22xf32> to vector<16x16xf32>
    %c47_186 = arith.constant 47 : index
    %716 = memref.load %arg9[%c47_186] : memref<98xf32, #tpu.memory_space<smem>>
    %717 = vector.broadcast %716 : f32 to vector<16x16xf32>
    %718 = arith.mulf %715, %717 : vector<16x16xf32>
    %719 = arith.addf %714, %718 : vector<16x16xf32>
    %720 = vector.extract_strided_slice %123 {offsets = [3, 3], sizes = [16, 16], strides = [1, 1]} : vector<22x22xf32> to vector<16x16xf32>
    %c48_187 = arith.constant 48 : index
    %721 = memref.load %arg9[%c48_187] : memref<98xf32, #tpu.memory_space<smem>>
    %722 = vector.broadcast %721 : f32 to vector<16x16xf32>
    %723 = arith.mulf %720, %722 : vector<16x16xf32>
    %724 = arith.addf %719, %723 : vector<16x16xf32>
    %725 = vector.extract_strided_slice %125 {offsets = [3, 3], sizes = [16, 16], strides = [1, 1]} : vector<22x22xf32> to vector<16x16xf32>
    %c49_188 = arith.constant 49 : index
    %726 = memref.load %arg9[%c49_188] : memref<98xf32, #tpu.memory_space<smem>>
    %727 = vector.broadcast %726 : f32 to vector<16x16xf32>
    %728 = arith.mulf %725, %727 : vector<16x16xf32>
    %729 = arith.addf %724, %728 : vector<16x16xf32>
    %730 = vector.extract_strided_slice %123 {offsets = [3, 4], sizes = [16, 16], strides = [1, 1]} : vector<22x22xf32> to vector<16x16xf32>
    %c50 = arith.constant 50 : index
    %731 = memref.load %arg9[%c50] : memref<98xf32, #tpu.memory_space<smem>>
    %732 = vector.broadcast %731 : f32 to vector<16x16xf32>
    %733 = arith.mulf %730, %732 : vector<16x16xf32>
    %734 = arith.addf %729, %733 : vector<16x16xf32>
    %735 = vector.extract_strided_slice %125 {offsets = [3, 4], sizes = [16, 16], strides = [1, 1]} : vector<22x22xf32> to vector<16x16xf32>
    %c51 = arith.constant 51 : index
    %736 = memref.load %arg9[%c51] : memref<98xf32, #tpu.memory_space<smem>>
    %737 = vector.broadcast %736 : f32 to vector<16x16xf32>
    %738 = arith.mulf %735, %737 : vector<16x16xf32>
    %739 = arith.addf %734, %738 : vector<16x16xf32>
    %740 = vector.extract_strided_slice %123 {offsets = [3, 5], sizes = [16, 16], strides = [1, 1]} : vector<22x22xf32> to vector<16x16xf32>
    %c52 = arith.constant 52 : index
    %741 = memref.load %arg9[%c52] : memref<98xf32, #tpu.memory_space<smem>>
    %742 = vector.broadcast %741 : f32 to vector<16x16xf32>
    %743 = arith.mulf %740, %742 : vector<16x16xf32>
    %744 = arith.addf %739, %743 : vector<16x16xf32>
    %745 = vector.extract_strided_slice %125 {offsets = [3, 5], sizes = [16, 16], strides = [1, 1]} : vector<22x22xf32> to vector<16x16xf32>
    %c53 = arith.constant 53 : index
    %746 = memref.load %arg9[%c53] : memref<98xf32, #tpu.memory_space<smem>>
    %747 = vector.broadcast %746 : f32 to vector<16x16xf32>
    %748 = arith.mulf %745, %747 : vector<16x16xf32>
    %749 = arith.addf %744, %748 : vector<16x16xf32>
    %750 = vector.extract_strided_slice %123 {offsets = [3, 6], sizes = [16, 16], strides = [1, 1]} : vector<22x22xf32> to vector<16x16xf32>
    %c54 = arith.constant 54 : index
    %751 = memref.load %arg9[%c54] : memref<98xf32, #tpu.memory_space<smem>>
    %752 = vector.broadcast %751 : f32 to vector<16x16xf32>
    %753 = arith.mulf %750, %752 : vector<16x16xf32>
    %754 = arith.addf %749, %753 : vector<16x16xf32>
    %755 = vector.extract_strided_slice %125 {offsets = [3, 6], sizes = [16, 16], strides = [1, 1]} : vector<22x22xf32> to vector<16x16xf32>
    %c55 = arith.constant 55 : index
    %756 = memref.load %arg9[%c55] : memref<98xf32, #tpu.memory_space<smem>>
    %757 = vector.broadcast %756 : f32 to vector<16x16xf32>
    %758 = arith.mulf %755, %757 : vector<16x16xf32>
    %759 = arith.addf %754, %758 : vector<16x16xf32>
    %760 = vector.extract_strided_slice %123 {offsets = [4, 0], sizes = [16, 16], strides = [1, 1]} : vector<22x22xf32> to vector<16x16xf32>
    %c56 = arith.constant 56 : index
    %761 = memref.load %arg9[%c56] : memref<98xf32, #tpu.memory_space<smem>>
    %762 = vector.broadcast %761 : f32 to vector<16x16xf32>
    %763 = arith.mulf %760, %762 : vector<16x16xf32>
    %764 = arith.addf %759, %763 : vector<16x16xf32>
    %765 = vector.extract_strided_slice %125 {offsets = [4, 0], sizes = [16, 16], strides = [1, 1]} : vector<22x22xf32> to vector<16x16xf32>
    %c57 = arith.constant 57 : index
    %766 = memref.load %arg9[%c57] : memref<98xf32, #tpu.memory_space<smem>>
    %767 = vector.broadcast %766 : f32 to vector<16x16xf32>
    %768 = arith.mulf %765, %767 : vector<16x16xf32>
    %769 = arith.addf %764, %768 : vector<16x16xf32>
    %770 = vector.extract_strided_slice %123 {offsets = [4, 1], sizes = [16, 16], strides = [1, 1]} : vector<22x22xf32> to vector<16x16xf32>
    %c58 = arith.constant 58 : index
    %771 = memref.load %arg9[%c58] : memref<98xf32, #tpu.memory_space<smem>>
    %772 = vector.broadcast %771 : f32 to vector<16x16xf32>
    %773 = arith.mulf %770, %772 : vector<16x16xf32>
    %774 = arith.addf %769, %773 : vector<16x16xf32>
    %775 = vector.extract_strided_slice %125 {offsets = [4, 1], sizes = [16, 16], strides = [1, 1]} : vector<22x22xf32> to vector<16x16xf32>
    %c59 = arith.constant 59 : index
    %776 = memref.load %arg9[%c59] : memref<98xf32, #tpu.memory_space<smem>>
    %777 = vector.broadcast %776 : f32 to vector<16x16xf32>
    %778 = arith.mulf %775, %777 : vector<16x16xf32>
    %779 = arith.addf %774, %778 : vector<16x16xf32>
    %780 = vector.extract_strided_slice %123 {offsets = [4, 2], sizes = [16, 16], strides = [1, 1]} : vector<22x22xf32> to vector<16x16xf32>
    %c60 = arith.constant 60 : index
    %781 = memref.load %arg9[%c60] : memref<98xf32, #tpu.memory_space<smem>>
    %782 = vector.broadcast %781 : f32 to vector<16x16xf32>
    %783 = arith.mulf %780, %782 : vector<16x16xf32>
    %784 = arith.addf %779, %783 : vector<16x16xf32>
    %785 = vector.extract_strided_slice %125 {offsets = [4, 2], sizes = [16, 16], strides = [1, 1]} : vector<22x22xf32> to vector<16x16xf32>
    %c61 = arith.constant 61 : index
    %786 = memref.load %arg9[%c61] : memref<98xf32, #tpu.memory_space<smem>>
    %787 = vector.broadcast %786 : f32 to vector<16x16xf32>
    %788 = arith.mulf %785, %787 : vector<16x16xf32>
    %789 = arith.addf %784, %788 : vector<16x16xf32>
    %790 = vector.extract_strided_slice %123 {offsets = [4, 3], sizes = [16, 16], strides = [1, 1]} : vector<22x22xf32> to vector<16x16xf32>
    %c62 = arith.constant 62 : index
    %791 = memref.load %arg9[%c62] : memref<98xf32, #tpu.memory_space<smem>>
    %792 = vector.broadcast %791 : f32 to vector<16x16xf32>
    %793 = arith.mulf %790, %792 : vector<16x16xf32>
    %794 = arith.addf %789, %793 : vector<16x16xf32>
    %795 = vector.extract_strided_slice %125 {offsets = [4, 3], sizes = [16, 16], strides = [1, 1]} : vector<22x22xf32> to vector<16x16xf32>
    %c63 = arith.constant 63 : index
    %796 = memref.load %arg9[%c63] : memref<98xf32, #tpu.memory_space<smem>>
    %797 = vector.broadcast %796 : f32 to vector<16x16xf32>
    %798 = arith.mulf %795, %797 : vector<16x16xf32>
    %799 = arith.addf %794, %798 : vector<16x16xf32>
    %800 = vector.extract_strided_slice %123 {offsets = [4, 4], sizes = [16, 16], strides = [1, 1]} : vector<22x22xf32> to vector<16x16xf32>
    %c64 = arith.constant 64 : index
    %801 = memref.load %arg9[%c64] : memref<98xf32, #tpu.memory_space<smem>>
    %802 = vector.broadcast %801 : f32 to vector<16x16xf32>
    %803 = arith.mulf %800, %802 : vector<16x16xf32>
    %804 = arith.addf %799, %803 : vector<16x16xf32>
    %805 = vector.extract_strided_slice %125 {offsets = [4, 4], sizes = [16, 16], strides = [1, 1]} : vector<22x22xf32> to vector<16x16xf32>
    %c65 = arith.constant 65 : index
    %806 = memref.load %arg9[%c65] : memref<98xf32, #tpu.memory_space<smem>>
    %807 = vector.broadcast %806 : f32 to vector<16x16xf32>
    %808 = arith.mulf %805, %807 : vector<16x16xf32>
    %809 = arith.addf %804, %808 : vector<16x16xf32>
    %810 = vector.extract_strided_slice %123 {offsets = [4, 5], sizes = [16, 16], strides = [1, 1]} : vector<22x22xf32> to vector<16x16xf32>
    %c66 = arith.constant 66 : index
    %811 = memref.load %arg9[%c66] : memref<98xf32, #tpu.memory_space<smem>>
    %812 = vector.broadcast %811 : f32 to vector<16x16xf32>
    %813 = arith.mulf %810, %812 : vector<16x16xf32>
    %814 = arith.addf %809, %813 : vector<16x16xf32>
    %815 = vector.extract_strided_slice %125 {offsets = [4, 5], sizes = [16, 16], strides = [1, 1]} : vector<22x22xf32> to vector<16x16xf32>
    %c67 = arith.constant 67 : index
    %816 = memref.load %arg9[%c67] : memref<98xf32, #tpu.memory_space<smem>>
    %817 = vector.broadcast %816 : f32 to vector<16x16xf32>
    %818 = arith.mulf %815, %817 : vector<16x16xf32>
    %819 = arith.addf %814, %818 : vector<16x16xf32>
    %820 = vector.extract_strided_slice %123 {offsets = [4, 6], sizes = [16, 16], strides = [1, 1]} : vector<22x22xf32> to vector<16x16xf32>
    %c68 = arith.constant 68 : index
    %821 = memref.load %arg9[%c68] : memref<98xf32, #tpu.memory_space<smem>>
    %822 = vector.broadcast %821 : f32 to vector<16x16xf32>
    %823 = arith.mulf %820, %822 : vector<16x16xf32>
    %824 = arith.addf %819, %823 : vector<16x16xf32>
    %825 = vector.extract_strided_slice %125 {offsets = [4, 6], sizes = [16, 16], strides = [1, 1]} : vector<22x22xf32> to vector<16x16xf32>
    %c69 = arith.constant 69 : index
    %826 = memref.load %arg9[%c69] : memref<98xf32, #tpu.memory_space<smem>>
    %827 = vector.broadcast %826 : f32 to vector<16x16xf32>
    %828 = arith.mulf %825, %827 : vector<16x16xf32>
    %829 = arith.addf %824, %828 : vector<16x16xf32>
    %830 = vector.extract_strided_slice %123 {offsets = [5, 0], sizes = [16, 16], strides = [1, 1]} : vector<22x22xf32> to vector<16x16xf32>
    %c70 = arith.constant 70 : index
    %831 = memref.load %arg9[%c70] : memref<98xf32, #tpu.memory_space<smem>>
    %832 = vector.broadcast %831 : f32 to vector<16x16xf32>
    %833 = arith.mulf %830, %832 : vector<16x16xf32>
    %834 = arith.addf %829, %833 : vector<16x16xf32>
    %835 = vector.extract_strided_slice %125 {offsets = [5, 0], sizes = [16, 16], strides = [1, 1]} : vector<22x22xf32> to vector<16x16xf32>
    %c71 = arith.constant 71 : index
    %836 = memref.load %arg9[%c71] : memref<98xf32, #tpu.memory_space<smem>>
    %837 = vector.broadcast %836 : f32 to vector<16x16xf32>
    %838 = arith.mulf %835, %837 : vector<16x16xf32>
    %839 = arith.addf %834, %838 : vector<16x16xf32>
    %840 = vector.extract_strided_slice %123 {offsets = [5, 1], sizes = [16, 16], strides = [1, 1]} : vector<22x22xf32> to vector<16x16xf32>
    %c72 = arith.constant 72 : index
    %841 = memref.load %arg9[%c72] : memref<98xf32, #tpu.memory_space<smem>>
    %842 = vector.broadcast %841 : f32 to vector<16x16xf32>
    %843 = arith.mulf %840, %842 : vector<16x16xf32>
    %844 = arith.addf %839, %843 : vector<16x16xf32>
    %845 = vector.extract_strided_slice %125 {offsets = [5, 1], sizes = [16, 16], strides = [1, 1]} : vector<22x22xf32> to vector<16x16xf32>
    %c73 = arith.constant 73 : index
    %846 = memref.load %arg9[%c73] : memref<98xf32, #tpu.memory_space<smem>>
    %847 = vector.broadcast %846 : f32 to vector<16x16xf32>
    %848 = arith.mulf %845, %847 : vector<16x16xf32>
    %849 = arith.addf %844, %848 : vector<16x16xf32>
    %850 = vector.extract_strided_slice %123 {offsets = [5, 2], sizes = [16, 16], strides = [1, 1]} : vector<22x22xf32> to vector<16x16xf32>
    %c74 = arith.constant 74 : index
    %851 = memref.load %arg9[%c74] : memref<98xf32, #tpu.memory_space<smem>>
    %852 = vector.broadcast %851 : f32 to vector<16x16xf32>
    %853 = arith.mulf %850, %852 : vector<16x16xf32>
    %854 = arith.addf %849, %853 : vector<16x16xf32>
    %855 = vector.extract_strided_slice %125 {offsets = [5, 2], sizes = [16, 16], strides = [1, 1]} : vector<22x22xf32> to vector<16x16xf32>
    %c75 = arith.constant 75 : index
    %856 = memref.load %arg9[%c75] : memref<98xf32, #tpu.memory_space<smem>>
    %857 = vector.broadcast %856 : f32 to vector<16x16xf32>
    %858 = arith.mulf %855, %857 : vector<16x16xf32>
    %859 = arith.addf %854, %858 : vector<16x16xf32>
    %860 = vector.extract_strided_slice %123 {offsets = [5, 3], sizes = [16, 16], strides = [1, 1]} : vector<22x22xf32> to vector<16x16xf32>
    %c76 = arith.constant 76 : index
    %861 = memref.load %arg9[%c76] : memref<98xf32, #tpu.memory_space<smem>>
    %862 = vector.broadcast %861 : f32 to vector<16x16xf32>
    %863 = arith.mulf %860, %862 : vector<16x16xf32>
    %864 = arith.addf %859, %863 : vector<16x16xf32>
    %865 = vector.extract_strided_slice %125 {offsets = [5, 3], sizes = [16, 16], strides = [1, 1]} : vector<22x22xf32> to vector<16x16xf32>
    %c77 = arith.constant 77 : index
    %866 = memref.load %arg9[%c77] : memref<98xf32, #tpu.memory_space<smem>>
    %867 = vector.broadcast %866 : f32 to vector<16x16xf32>
    %868 = arith.mulf %865, %867 : vector<16x16xf32>
    %869 = arith.addf %864, %868 : vector<16x16xf32>
    %870 = vector.extract_strided_slice %123 {offsets = [5, 4], sizes = [16, 16], strides = [1, 1]} : vector<22x22xf32> to vector<16x16xf32>
    %c78 = arith.constant 78 : index
    %871 = memref.load %arg9[%c78] : memref<98xf32, #tpu.memory_space<smem>>
    %872 = vector.broadcast %871 : f32 to vector<16x16xf32>
    %873 = arith.mulf %870, %872 : vector<16x16xf32>
    %874 = arith.addf %869, %873 : vector<16x16xf32>
    %875 = vector.extract_strided_slice %125 {offsets = [5, 4], sizes = [16, 16], strides = [1, 1]} : vector<22x22xf32> to vector<16x16xf32>
    %c79 = arith.constant 79 : index
    %876 = memref.load %arg9[%c79] : memref<98xf32, #tpu.memory_space<smem>>
    %877 = vector.broadcast %876 : f32 to vector<16x16xf32>
    %878 = arith.mulf %875, %877 : vector<16x16xf32>
    %879 = arith.addf %874, %878 : vector<16x16xf32>
    %880 = vector.extract_strided_slice %123 {offsets = [5, 5], sizes = [16, 16], strides = [1, 1]} : vector<22x22xf32> to vector<16x16xf32>
    %c80 = arith.constant 80 : index
    %881 = memref.load %arg9[%c80] : memref<98xf32, #tpu.memory_space<smem>>
    %882 = vector.broadcast %881 : f32 to vector<16x16xf32>
    %883 = arith.mulf %880, %882 : vector<16x16xf32>
    %884 = arith.addf %879, %883 : vector<16x16xf32>
    %885 = vector.extract_strided_slice %125 {offsets = [5, 5], sizes = [16, 16], strides = [1, 1]} : vector<22x22xf32> to vector<16x16xf32>
    %c81 = arith.constant 81 : index
    %886 = memref.load %arg9[%c81] : memref<98xf32, #tpu.memory_space<smem>>
    %887 = vector.broadcast %886 : f32 to vector<16x16xf32>
    %888 = arith.mulf %885, %887 : vector<16x16xf32>
    %889 = arith.addf %884, %888 : vector<16x16xf32>
    %890 = vector.extract_strided_slice %123 {offsets = [5, 6], sizes = [16, 16], strides = [1, 1]} : vector<22x22xf32> to vector<16x16xf32>
    %c82 = arith.constant 82 : index
    %891 = memref.load %arg9[%c82] : memref<98xf32, #tpu.memory_space<smem>>
    %892 = vector.broadcast %891 : f32 to vector<16x16xf32>
    %893 = arith.mulf %890, %892 : vector<16x16xf32>
    %894 = arith.addf %889, %893 : vector<16x16xf32>
    %895 = vector.extract_strided_slice %125 {offsets = [5, 6], sizes = [16, 16], strides = [1, 1]} : vector<22x22xf32> to vector<16x16xf32>
    %c83 = arith.constant 83 : index
    %896 = memref.load %arg9[%c83] : memref<98xf32, #tpu.memory_space<smem>>
    %897 = vector.broadcast %896 : f32 to vector<16x16xf32>
    %898 = arith.mulf %895, %897 : vector<16x16xf32>
    %899 = arith.addf %894, %898 : vector<16x16xf32>
    %900 = vector.extract_strided_slice %123 {offsets = [6, 0], sizes = [16, 16], strides = [1, 1]} : vector<22x22xf32> to vector<16x16xf32>
    %c84 = arith.constant 84 : index
    %901 = memref.load %arg9[%c84] : memref<98xf32, #tpu.memory_space<smem>>
    %902 = vector.broadcast %901 : f32 to vector<16x16xf32>
    %903 = arith.mulf %900, %902 : vector<16x16xf32>
    %904 = arith.addf %899, %903 : vector<16x16xf32>
    %905 = vector.extract_strided_slice %125 {offsets = [6, 0], sizes = [16, 16], strides = [1, 1]} : vector<22x22xf32> to vector<16x16xf32>
    %c85 = arith.constant 85 : index
    %906 = memref.load %arg9[%c85] : memref<98xf32, #tpu.memory_space<smem>>
    %907 = vector.broadcast %906 : f32 to vector<16x16xf32>
    %908 = arith.mulf %905, %907 : vector<16x16xf32>
    %909 = arith.addf %904, %908 : vector<16x16xf32>
    %910 = vector.extract_strided_slice %123 {offsets = [6, 1], sizes = [16, 16], strides = [1, 1]} : vector<22x22xf32> to vector<16x16xf32>
    %c86 = arith.constant 86 : index
    %911 = memref.load %arg9[%c86] : memref<98xf32, #tpu.memory_space<smem>>
    %912 = vector.broadcast %911 : f32 to vector<16x16xf32>
    %913 = arith.mulf %910, %912 : vector<16x16xf32>
    %914 = arith.addf %909, %913 : vector<16x16xf32>
    %915 = vector.extract_strided_slice %125 {offsets = [6, 1], sizes = [16, 16], strides = [1, 1]} : vector<22x22xf32> to vector<16x16xf32>
    %c87 = arith.constant 87 : index
    %916 = memref.load %arg9[%c87] : memref<98xf32, #tpu.memory_space<smem>>
    %917 = vector.broadcast %916 : f32 to vector<16x16xf32>
    %918 = arith.mulf %915, %917 : vector<16x16xf32>
    %919 = arith.addf %914, %918 : vector<16x16xf32>
    %920 = vector.extract_strided_slice %123 {offsets = [6, 2], sizes = [16, 16], strides = [1, 1]} : vector<22x22xf32> to vector<16x16xf32>
    %c88 = arith.constant 88 : index
    %921 = memref.load %arg9[%c88] : memref<98xf32, #tpu.memory_space<smem>>
    %922 = vector.broadcast %921 : f32 to vector<16x16xf32>
    %923 = arith.mulf %920, %922 : vector<16x16xf32>
    %924 = arith.addf %919, %923 : vector<16x16xf32>
    %925 = vector.extract_strided_slice %125 {offsets = [6, 2], sizes = [16, 16], strides = [1, 1]} : vector<22x22xf32> to vector<16x16xf32>
    %c89 = arith.constant 89 : index
    %926 = memref.load %arg9[%c89] : memref<98xf32, #tpu.memory_space<smem>>
    %927 = vector.broadcast %926 : f32 to vector<16x16xf32>
    %928 = arith.mulf %925, %927 : vector<16x16xf32>
    %929 = arith.addf %924, %928 : vector<16x16xf32>
    %930 = vector.extract_strided_slice %123 {offsets = [6, 3], sizes = [16, 16], strides = [1, 1]} : vector<22x22xf32> to vector<16x16xf32>
    %c90 = arith.constant 90 : index
    %931 = memref.load %arg9[%c90] : memref<98xf32, #tpu.memory_space<smem>>
    %932 = vector.broadcast %931 : f32 to vector<16x16xf32>
    %933 = arith.mulf %930, %932 : vector<16x16xf32>
    %934 = arith.addf %929, %933 : vector<16x16xf32>
    %935 = vector.extract_strided_slice %125 {offsets = [6, 3], sizes = [16, 16], strides = [1, 1]} : vector<22x22xf32> to vector<16x16xf32>
    %c91 = arith.constant 91 : index
    %936 = memref.load %arg9[%c91] : memref<98xf32, #tpu.memory_space<smem>>
    %937 = vector.broadcast %936 : f32 to vector<16x16xf32>
    %938 = arith.mulf %935, %937 : vector<16x16xf32>
    %939 = arith.addf %934, %938 : vector<16x16xf32>
    %940 = vector.extract_strided_slice %123 {offsets = [6, 4], sizes = [16, 16], strides = [1, 1]} : vector<22x22xf32> to vector<16x16xf32>
    %c92 = arith.constant 92 : index
    %941 = memref.load %arg9[%c92] : memref<98xf32, #tpu.memory_space<smem>>
    %942 = vector.broadcast %941 : f32 to vector<16x16xf32>
    %943 = arith.mulf %940, %942 : vector<16x16xf32>
    %944 = arith.addf %939, %943 : vector<16x16xf32>
    %945 = vector.extract_strided_slice %125 {offsets = [6, 4], sizes = [16, 16], strides = [1, 1]} : vector<22x22xf32> to vector<16x16xf32>
    %c93 = arith.constant 93 : index
    %946 = memref.load %arg9[%c93] : memref<98xf32, #tpu.memory_space<smem>>
    %947 = vector.broadcast %946 : f32 to vector<16x16xf32>
    %948 = arith.mulf %945, %947 : vector<16x16xf32>
    %949 = arith.addf %944, %948 : vector<16x16xf32>
    %950 = vector.extract_strided_slice %123 {offsets = [6, 5], sizes = [16, 16], strides = [1, 1]} : vector<22x22xf32> to vector<16x16xf32>
    %c94 = arith.constant 94 : index
    %951 = memref.load %arg9[%c94] : memref<98xf32, #tpu.memory_space<smem>>
    %952 = vector.broadcast %951 : f32 to vector<16x16xf32>
    %953 = arith.mulf %950, %952 : vector<16x16xf32>
    %954 = arith.addf %949, %953 : vector<16x16xf32>
    %955 = vector.extract_strided_slice %125 {offsets = [6, 5], sizes = [16, 16], strides = [1, 1]} : vector<22x22xf32> to vector<16x16xf32>
    %c95 = arith.constant 95 : index
    %956 = memref.load %arg9[%c95] : memref<98xf32, #tpu.memory_space<smem>>
    %957 = vector.broadcast %956 : f32 to vector<16x16xf32>
    %958 = arith.mulf %955, %957 : vector<16x16xf32>
    %959 = arith.addf %954, %958 : vector<16x16xf32>
    %960 = vector.extract_strided_slice %123 {offsets = [6, 6], sizes = [16, 16], strides = [1, 1]} : vector<22x22xf32> to vector<16x16xf32>
    %c96 = arith.constant 96 : index
    %961 = memref.load %arg9[%c96] : memref<98xf32, #tpu.memory_space<smem>>
    %962 = vector.broadcast %961 : f32 to vector<16x16xf32>
    %963 = arith.mulf %960, %962 : vector<16x16xf32>
    %964 = arith.addf %959, %963 : vector<16x16xf32>
    %965 = vector.extract_strided_slice %125 {offsets = [6, 6], sizes = [16, 16], strides = [1, 1]} : vector<22x22xf32> to vector<16x16xf32>
    %c97 = arith.constant 97 : index
    %966 = memref.load %arg9[%c97] : memref<98xf32, #tpu.memory_space<smem>>
    %967 = vector.broadcast %966 : f32 to vector<16x16xf32>
    %968 = arith.mulf %965, %967 : vector<16x16xf32>
    %969 = arith.addf %964, %968 : vector<16x16xf32>
    %970 = vector.broadcast %478 : f32 to vector<16x16xf32>
    %971 = arith.addf %969, %970 : vector<16x16xf32>
    %cst_189 = arith.constant 0.000000e+00 : f32
    %972 = vector.broadcast %cst_189 : f32 to vector<16x16xf32>
    %973 = arith.maximumf %971, %972 : vector<16x16xf32>
    %c0_190 = arith.constant 0 : index
    %974 = memref.load %arg10[%c0_190] : memref<3xf32, #tpu.memory_space<smem>>
    %975 = vector.broadcast %974 : f32 to vector<16x16xf32>
    %976 = arith.mulf %221, %975 : vector<16x16xf32>
    %c1_191 = arith.constant 1 : index
    %977 = memref.load %arg10[%c1_191] : memref<3xf32, #tpu.memory_space<smem>>
    %978 = vector.broadcast %977 : f32 to vector<16x16xf32>
    %979 = arith.mulf %477, %978 : vector<16x16xf32>
    %980 = arith.addf %976, %979 : vector<16x16xf32>
    %c2_192 = arith.constant 2 : index
    %981 = memref.load %arg10[%c2_192] : memref<3xf32, #tpu.memory_space<smem>>
    %982 = vector.broadcast %981 : f32 to vector<16x16xf32>
    %983 = arith.mulf %973, %982 : vector<16x16xf32>
    %984 = arith.addf %980, %983 : vector<16x16xf32>
    %c3_193 = arith.constant 3 : index
    %985 = memref.load %arg11[%c3_193] : memref<4xf32, #tpu.memory_space<smem>>
    %986 = vector.broadcast %985 : f32 to vector<16x16xf32>
    %987 = arith.addf %984, %986 : vector<16x16xf32>
    %cst_194 = arith.constant 0.000000e+00 : f32
    %988 = vector.broadcast %cst_194 : f32 to vector<16x16xf32>
    %989 = arith.subf %988, %987 : vector<16x16xf32>
    %990 = math.exp %989 : vector<16x16xf32>
    %cst_195 = arith.constant 1.000000e+00 : f32
    %991 = vector.broadcast %cst_195 : f32 to vector<16x16xf32>
    %992 = arith.addf %991, %990 : vector<16x16xf32>
    %cst_196 = arith.constant 1.000000e+00 : f32
    %993 = vector.broadcast %cst_196 : f32 to vector<16x16xf32>
    %994 = arith.divf %993, %992 : vector<16x16xf32>
    %995 = vector.shape_cast %994 : vector<16x16xf32> to vector<16x16x1xf32>
    %996 = vector.broadcast %995 : vector<16x16x1xf32> to vector<16x16x16xf32>
    %997 = arith.mulf %111, %996 : vector<16x16x16xf32>
    %998 = vector.shape_cast %5 : vector<256x16xf32> to vector<16x16x16xf32>
    %999 = arith.addf %997, %998 : vector<16x16x16xf32>
    %cst_197 = arith.constant 0.000000e+00 : f32
    %1000 = vector.broadcast %cst_197 : f32 to vector<16x16x16xf32>
    %1001 = arith.maximumf %999, %1000 : vector<16x16x16xf32>
    %1002 = vector.shape_cast %1001 : vector<16x16x16xf32> to vector<256x16xf32>
    %c0_198 = arith.constant 0 : index
    %c0_199 = arith.constant 0 : index
    %c0_200 = arith.constant 0 : index
    %1003 = vector.load %arg12[%c0_198, %c0_199, %c0_200] : memref<1x256x16xf32, #tpu.memory_space<vmem>>, vector<1x256x16xf32>
    %1004 = vector.shape_cast %1003 : vector<1x256x16xf32> to vector<256x16xf32>
    %1005 = vector.shape_cast %1002 : vector<256x16xf32> to vector<1x256x16xf32>
    tpu.vector_store %arg12[%c0_198, %c0_199, %c0_200], %1005 {strides = array<i32>} : memref<1x256x16xf32, #tpu.memory_space<vmem>>, vector<1x256x16xf32>,
    return
  }
  func.func @transform_0(%arg0: i32) -> (i32, i32, i32) {
    %c0_i32 = arith.constant 0 : i32
    %c0_i32_0 = arith.constant 0 : i32
    %c0_i32_1 = arith.constant 0 : i32
    return %arg0, %c0_i32, %c0_i32_0 : i32, i32, i32
  }
  func.func @transform_1(%arg0: i32) -> (i32, i32) {
    %c0_i32 = arith.constant 0 : i32
    %c0_i32_0 = arith.constant 0 : i32
    %c0_i32_1 = arith.constant 0 : i32
    return %c0_i32, %c0_i32_0 : i32, i32
  }
  func.func @transform_2(%arg0: i32) -> (i32, i32) {
    %c0_i32 = arith.constant 0 : i32
    %c0_i32_0 = arith.constant 0 : i32
    %c0_i32_1 = arith.constant 0 : i32
    return %c0_i32, %c0_i32_0 : i32, i32
  }
  func.func @transform_3(%arg0: i32) -> (i32, i32) {
    %c0_i32 = arith.constant 0 : i32
    %c0_i32_0 = arith.constant 0 : i32
    %c0_i32_1 = arith.constant 0 : i32
    return %c0_i32, %c0_i32_0 : i32, i32
  }
  func.func @transform_4(%arg0: i32) -> (i32, i32) {
    %c0_i32 = arith.constant 0 : i32
    %c0_i32_0 = arith.constant 0 : i32
    %c0_i32_1 = arith.constant 0 : i32
    return %c0_i32, %c0_i32_0 : i32, i32
  }
  func.func @transform_5(%arg0: i32) -> (i32, i32) {
    %c0_i32 = arith.constant 0 : i32
    %c0_i32_0 = arith.constant 0 : i32
    %c0_i32_1 = arith.constant 0 : i32
    return %c0_i32, %c0_i32_0 : i32, i32
  }
  func.func @transform_6(%arg0: i32) -> i32 {
    %c0_i32 = arith.constant 0 : i32
    %c0_i32_0 = arith.constant 0 : i32
    return %c0_i32 : i32
  }
  func.func @transform_7(%arg0: i32) -> i32 {
    %c0_i32 = arith.constant 0 : i32
    %c0_i32_0 = arith.constant 0 : i32
    return %c0_i32 : i32
  }
  func.func @transform_8(%arg0: i32) -> i32 {
    %c0_i32 = arith.constant 0 : i32
    %c0_i32_0 = arith.constant 0 : i32
    return %c0_i32 : i32
  }
  func.func @transform_9(%arg0: i32) -> i32 {
    %c0_i32 = arith.constant 0 : i32
    %c0_i32_0 = arith.constant 0 : i32
    return %c0_i32 : i32
  }
  func.func @transform_10(%arg0: i32) -> i32 {
    %c0_i32 = arith.constant 0 : i32
    %c0_i32_0 = arith.constant 0 : i32
    return %c0_i32 : i32
  }
  func.func @transform_11(%arg0: i32) -> (i32, i32, i32) {
    %c0_i32 = arith.constant 0 : i32
    %c0_i32_0 = arith.constant 0 : i32
    %c0_i32_1 = arith.constant 0 : i32
    return %arg0, %c0_i32, %c0_i32_0 : i32, i32, i32
  }
}

</mosaic_0001>

<bundles_post_ra>
// kernel: fcam_block_forward.1
= control target key start
LH: loop header
LB: loop body
LE: loop exit
PB: predicated region body
PF: predicated region fallthrough
CT: control target
= control target key end

     0   :  { %s14781_s0 = inlined_call_operand.hbm [shape: f32[2,256,16], index: 0, kind: input, shape index: {}]   ;;  %s14782_s1 = inlined_call_operand.vmem [shape: bf16[144,16], index: 1, kind: input, shape index: {}]   ;;  %s14783_s2 = inlined_call_operand.vmem [shape: bf16[144,16], index: 2, kind: input, shape index: {}]   ;;  %s14784_s3 = inlined_call_operand.vmem [shape: f32[4,16], index: 3, kind: input, shape index: {}]   ;;  %s14785_s4 = inlined_call_operand.vmem [shape: bf16[16,4], index: 4, kind: input, shape index: {}]   ;;  %s14786_s5 = inlined_call_operand.vmem [shape: bf16[4,16], index: 5, kind: input, shape index: {}]   ;;  %s14787_s6 = inlined_call_operand.vmem [shape: f32[18], index: 6, kind: input, shape index: {}]   ;;  %s14788_s7 = inlined_call_operand.vmem [shape: f32[50], index: 7, kind: input, shape index: {}]   ;;  %s14789_s8 = inlined_call_operand.vmem [shape: f32[98], index: 8, kind: input, shape index: {}]   ;;  %s14790_s9 = inlined_call_operand.vmem [shape: f32[3], index: 9, kind: input, shape index: {}]   ;;  %s14791_s10 = inlined_call_operand.vmem [shape: f32[4], index: 10, kind: input, shape index: {}]   ;;  %s14792_s11 = inlined_call_operand.hbm [shape: f32[2,256,16], index: 11, kind: output, shape index: {}]  }
   0x1   :  { %14978 = sst [smem:[#allocation254_spill]] %s14781_s0 }
   0x2   :  { %14979 = sst [smem:[#allocation255_spill]] %s14782_s1 }
   0x3   :  { %14980 = sst [smem:[#allocation256_spill]] %s14783_s2 }
   0x4   :  { %14981 = sst [smem:[#allocation257_spill]] %s14784_s3 }
   0x5   :  { %14982 = sst [smem:[#allocation258_spill]] %s14785_s4 }
   0x6   :  { %14983 = sst [smem:[#allocation259_spill]] %s14786_s5 }
   0x7   :  { %14984 = sst [smem:[#allocation260_spill]] %s14787_s6 }
   0x8   :  { %14985 = sst [smem:[#allocation261_spill]] %s14788_s7 }
   0x9   :  { %14986 = sst [smem:[#allocation262_spill]] %s14789_s8 }
   0xa   :  { %14987 = sst [smem:[#allocation263_spill]] %s14790_s9 }
   0xb   :  { %14988 = sst [smem:[#allocation264_spill]] %s14791_s10 }
   0xc   :  { %14989 = sst [smem:[#allocation265_spill]] %s14792_s11 }
   0xd   :  { %16 = vsyncpa [#allocation5], 0 }
   0xe   :  { %18 = vsyncpa [#allocation5 + $0x1], 0 }
   0xf   :  { %19 = vsyncpa [#allocation7], 0 }
  0x10   :  { %20 = vsyncpa [#allocation10], 0 }
  0x11   :  { %21 = vsyncpa [#allocation13], 0 }
  0x12   :  { %22 = vsyncpa [#allocation6], 0 }
  0x13   :  { %24 = vsyncpa [#allocation6 + $0x1], 0  ;;  %s9042_s17 = smov 0   ;;  %s9044_s18 = smov 0  }
  0x14   :  { %s9046_s19 = smov 0   ;;  %s9048_s20 = smov 0  }
  0x15 LB: > { %14990 = sst [smem:[#allocation21_spill]] %s8939_s17  ;;  %s14994_s7 = sld [smem:[#allocation261_spill]]  ;;  %s8951_s20 = sphi %s9048_s20, %s15782_s20   ;;  %s8947_s19 = sphi %s9046_s19, %s15785_s19   ;;  %s8943_s18 = sphi %s9044_s18, %s15784_s18   ;;  %s8939_s17 = sphi %s9042_s17, %s15783_s17  }
  0x16   : > { %14991 = sst [smem:[#allocation22_spill]] %s8943_s18  ;;  %s9066_s24 = sadd.s32 4294967295, %s8951_s20  }
  0x17   : > { %14992 = sst [smem:[#allocation23_spill]] %s8947_s19  ;;  %p8324_p0 = scmp.ge.s32.totalorder %s8951_s20, 1 }
  0x18   : > { %14993 = sst [smem:[#allocation24_spill]] %s8951_s20  ;;  %p14793_p1 = scmp.eq.s32.totalorder %s9066_s24, 0 }
  0x19   : > { %p297_p2 = scmp.lt.s32.totalorder %s8951_s20, 3  ;;  %s14996_s9 = sld [smem:[#allocation263_spill]] }
  0x1a   : > { %s14997_s6 = sld [smem:[#allocation260_spill]]  ;;  %s14999_s8 = sld [smem:[#allocation262_spill]] }
  0x1b   : > { %s336_s23 = sshll.u32 %s14994_s7, 4  ;;  %p9071_p3 = pnand %p8324_p0, %p297_p2  ;;  %s337_s23 = int_to_ptr.vmem [resolvable:$true] %s336_s23 }
  0x1c   : > { %s8768_s21 = scalar_lea.vmem %s337_s23, 16  ;;  %p8776_p11 = scmp.lt.s32.totalorder %s337_s23, %s337_s23 }
  0x1d   : > { %s14995_s25 = scalar_select %p9071_p3, 1, 0 }
  0x1e   : > { %p8614_p5 = pneg %p9071_p3  ;;  %p8769_p7 = scmp.ne.s32.totalorder %s337_s23, %s8768_s21 }
  0x1f   : > { %s358_s28 = sshll.u32 %s14996_s9, 4  ;;  %p8777_p12 = scmp.lt.s32.totalorder %s8768_s21, %s8768_s21  ;;  %s359_s28 = int_to_ptr.vmem [resolvable:$true] %s358_s28 }
  0x20   : > { %s325_s12 = sshll.u32 %s14997_s6, 4  ;;  %p9086_p6 = pnand %p8614_p5, %p14793_p1  ;;  %s9090_s12 = int_to_ptr.vmem [resolvable:$true] %s325_s12 }
  0x21   : > { %s347_s16 = sshll.u32 %s14999_s8, 4  ;;  %p8778_p13 = por %p8777_p12, %p8776_p11  ;;  %s9095_s16 = int_to_ptr.vmem [resolvable:$true] %s347_s16 }
  0x22   : > { %p9099_p8 = pneg %p9086_p6 }
  0x24   : > { %p8771_p9 = pnand %p9099_p8, %p8769_p7 }
  0x26   : > { %p8772_p10 = pneg %p8771_p9 }
  0x28   : > { %p8779_p0 = pnand %p8778_p13, %p8772_p10 }
  0x2a   : > { %8782 = shalt.err (!%p8779_p0)
}
  0x2b   : > { %s8953_s26 = smov [#allocation9]   ;;  %s8783_s27 = scalar_lea.vmem %s359_s28, 16 }
  0x2c   : > { %8620 = dma.vmem_to_smem (!%p9086_p6), %s337_s23, 16, %s8953_s26, [#allocation10]  }
  0x2d   : > { %p8784_p2 = scmp.ne.s32.totalorder %s359_s28, %s8783_s27  ;;  %p8791_p1 = scmp.lt.s32.totalorder %s359_s28, %s359_s28 }
  0x2e   : > { %p8792_p3 = scmp.lt.s32.totalorder %s8783_s27, %s8783_s27 }
  0x2f   : > { %p8786_p5 = pnand %p8784_p2, %p9099_p8 }
  0x30   : > { %p8793_p7 = por %p8792_p3, %p8791_p1 }
  0x31   : > { %p8787_p4 = pneg %p8786_p5 }
  0x33   : > { %p8794_p9 = pnand %p8793_p7, %p8787_p4 }
  0x35   : > { %8797 = shalt.err (!%p8794_p9)
}
  0x36   : > { %s8954_s29 = smov [#allocation12]   ;;  %s8798_s30 = scalar_lea.vmem %s9090_s12, 16 }
  0x37   : > { %8626 = dma.vmem_to_smem (!%p9086_p6), %s359_s28, 16, %s8954_s29, [#allocation13]  }
  0x38   : > { %p8799_p10 = scmp.ne.s32.totalorder %s9090_s12, %s8798_s30  ;;  %p8806_p13 = scmp.lt.s32.totalorder %s9090_s12, %s9090_s12 }
  0x39   : > { %p8807_p0 = scmp.lt.s32.totalorder %s8798_s30, %s8798_s30 }
  0x3a   : > { %p8801_p11 = pnand %p8799_p10, %p9099_p8 }
  0x3b   : > { %p8808_p2 = por %p8807_p0, %p8806_p13 }
  0x3c   : > { %p8802_p12 = pneg %p8801_p11 }
  0x3e   : > { %p8809_p1 = pnand %p8808_p2, %p8802_p12 }
  0x40   : > { %8812 = shalt.err (!%p8809_p1)
}
  0x41   : > { %s8955_s23 = smov [#allocation8]   ;;  %s8813_s28 = scalar_lea.vmem %s9095_s16, 16 }
  0x42   : > { %8617 = dma.vmem_to_smem (!%p9086_p6), %s9090_s12, 16, %s8955_s23, [#allocation7]  }
  0x43   : > { %p8814_p3 = scmp.ne.s32.totalorder %s9095_s16, %s8813_s28  ;;  %p8821_p7 = scmp.lt.s32.totalorder %s9095_s16, %s9095_s16 }
  0x44   : > { %p8822_p9 = scmp.lt.s32.totalorder %s8813_s28, %s8813_s28 }
  0x45   : > { %p8816_p4 = pnand %p8814_p3, %p9099_p8 }
  0x46   : > { %p8823_p10 = por %p8822_p9, %p8821_p7 }
  0x47   : > { %p8817_p5 = pneg %p8816_p4 }
  0x49   : > { %p8824_p11 = pnand %p8823_p10, %p8817_p5 }
  0x4b   : > { %8827 = shalt.err (!%p8824_p11)
}
  0x4c   : > { %s8956_s14 = smov [#allocation11]   ;;  %s15001_s10 = sld [smem:[#allocation264_spill]] }
  0x4d   : > { %8623 = dma.vmem_to_smem (!%p9086_p6), %s9095_s16, 16, %s8956_s14, [#allocation10]  }
  0x52   : > { %s369_s12 = sshll.u32 %s15001_s10, 4  ;;  %s370_s12 = int_to_ptr.vmem [resolvable:$true] %s369_s12 }
  0x53   : > { %s8828_s26 = scalar_lea.vmem %s370_s12, 16  ;;  %p8836_p2 = scmp.lt.s32.totalorder %s370_s12, %s370_s12 }
  0x54   : > { %p8829_p12 = scmp.ne.s32.totalorder %s370_s12, %s8828_s26  ;;  %p8837_p1 = scmp.lt.s32.totalorder %s8828_s26, %s8828_s26 }
  0x56   : > { %p8831_p13 = pnand %p8829_p12, %p9099_p8  ;;  %p8838_p3 = por %p8837_p1, %p8836_p2 }
  0x58   : > { %p8832_p0 = pneg %p8831_p13 }
  0x5a   : > { %p8839_p4 = pnand %p8838_p3, %p8832_p0 }
  0x5c   : > { %8842 = shalt.err (!%p8839_p4)
}
  0x5d   : > { %s8957_s27 = smov [#allocation14]   ;;  %s8323_s16 = sadd.s32 4294967294, %s8951_s20  }
  0x5e   : > { %8629 = dma.vmem_to_smem (!%p9086_p6), %s370_s12, 16, %s8957_s27, [#allocation13]  }
  0x5f   : > { %s9138_s22 = sadd.s32 1, %s8951_s20   ;;  %s37_s13 = sadd.s32 1, %s8947_s19 }
  0x60   : > { %15002 = sst [smem:[#allocation25_spill]] %s9138_s22  ;;  %s34_s29 = ssub.s32 %s8951_s20, %s9138_s22 }
  0x61   : > { %p44_p8 = scmp.ne.s32.totalorder %s8947_s19, %s8943_s18  ;;  %p35_p5 = scmp.eq.s32.totalorder %s34_s29, 0 }
  0x62   : > { %p45_p7 = scmp.eq.s32.totalorder %s8951_s20, 0  ;;  %p50_p9 = scmp.ne.s32.totalorder %s8943_s18, %s8939_s17 }
  0x63   : > { %p284_p10 = scmp.eq.s32.totalorder %s9066_s24, 1  ;;  %p15004_p12 = scmp.eq.s32.totalorder %s9066_s24, 0 }
  0x64   : > { %s9150_s30 = scalar_select %p35_p5, %s8947_s19, %s37_s13  }
  0x65   : > { %p46_p11 = por %p45_p7, %p44_p8  ;;  %p9154_p13 = por %p15004_p12, %p50_p9 }
  0x66   : > { %15003 = sst [smem:[#allocation26_spill]] %s9150_s30  ;;  %p9158_p6 = por %p284_p10, %p44_p8 }
  0x67   : > { %p290_p0 = scmp.eq.s32.totalorder %s8323_s16, 1  ;;  %p8643_p2 = scmp.lt.s32.totalorder %s8951_s20, 2 }
  0x68   : > { %s15006_s28 = scalar_select %p9158_p6, 1, 0 }
  0x69   : > { %s380_s14 = sand.u32 1, %s8947_s19   ;;  %p9164_p1 = por %p290_p0, %p50_p9 }
  0x6a   : > { %s8331_s21 = sshll.u32 %s380_s14, 8  ;;  %s8572_s12 = sshll.u32 %s8951_s20, 12 }
  0x6b   : > { %s15007_s15 = scalar_select %p9164_p1, 1, 0 }
  0x6c   : > { %s15009_s0 = sld [smem:[#allocation254_spill]]  ;;  %s384_s29 = scalar_lea.vmem [#allocation4], %s8331_s21 }
  0x6d   : > { %15008 = sst [smem:[#allocation27_spill]] %s15007_s15  ;;  %s391_s6 = sshll.u32 %s384_s29, 4  ;;  %s9178_s6 = int_to_ptr.vmem [resolvable:$true] %s391_s6 }
  0x6e   : > { %p9174_p3 = pnand %p8643_p2, %p46_p11  ;;  %s9180_s7 = scalar_lea.sflag [#allocation5], %s380_s14 }
  0x70   : > { %p8845_p8 = pneg %p9174_p3 }
  0x72   : > { %s9172_s13 = scalar_lea.hbm %s15009_s0, %s8572_s12  ;;  %s8848_s26 = scalar_lea.hbm %s15009_s0, 8192 }
  0x73   : > { %s8843_s8 = scalar_lea.hbm %s9172_s13, 4096  ;;  %p8849_p9 = scmp.lt.u32.totalorder %s9172_s13, %s15009_s0 }
  0x74   : > { %p8844_p4 = scmp.ne.s32.totalorder %s9172_s13, %s8843_s8  ;;  %p8850_p10 = scmp.lt.u32.totalorder %s8848_s26, %s8843_s8 }
  0x75   : > { %p8852_p12 = scmp.lt.u32.totalorder %s8843_s8, %s9172_s13 }
  0x76   : > { %p8846_p5 = pnand %p8845_p8, %p8844_p4  ;;  %p8851_p11 = por %p8850_p10, %p8849_p9 }
  0x78   : > { %p8847_p7 = pneg %p8846_p5  ;;  %p8853_p0 = por %p8852_p12, %p8851_p11 }
  0x7a   : > { %p8854_p2 = pnand %p8853_p0, %p8847_p7 }
  0x7c   : > { %8857 = shalt.err (!%p8854_p2)
}
  0x7d   : > { %s8858_s14 = scalar_lea.vmem %s9178_s6, 4096  ;;  %s8958_s21 = smov [#allocation4]  }
  0x7e   : > { %p8859_p4 = scmp.ne.s32.totalorder %s9178_s6, %s8858_s14  ;;  %s8863_s12 = sshll.u32 %s8958_s21, 4  ;;  %s8864_s12 = int_to_ptr.vmem [resolvable:$false] %s8863_s12 }
  0x7f   : > { %s8865_s27 = scalar_lea.vmem %s8864_s12, 8192  ;;  %p8866_p6 = scmp.lt.s32.totalorder %s9178_s6, %s8864_s12 }
  0x80   : > { %p8861_p5 = pnand %p8859_p4, %p8845_p8  ;;  %p8867_p9 = scmp.lt.s32.totalorder %s8865_s27, %s8858_s14 }
  0x82   : > { %p8862_p1 = pneg %p8861_p5  ;;  %p8868_p10 = por %p8867_p9, %p8866_p6 }
  0x84   : > { %p8869_p11 = pnand %p8868_p10, %p8862_p1 }
  0x86   : > { %8872 = shalt.err (!%p8869_p11)
}
  0x87   : > { %s8959_s8 = smov 128   ;;  %s8960_s26 = smov 8  }
  0x88   : > { %8633 = dma.hbm_to_vmem [thread:$0]  (!%p9174_p3), %s9172_s13, 4096, %s9178_s6, %s9180_s7, %s8959_s8, %s8959_s8, %s8960_s26  }
  0x89   : > { %p15011_p8 = scmp.ne.s32.totalorder %s14995_s25, 0 }
  0x8b   : > { %403 = sbr.rel (%p15011_p8) target bundleno = 3007 (0xbbf), region = 64 }
  0x92   : > { %s9211_s29 = sand.u32 1, %s8943_s18  }
  0x93   : > { %s14796_s14 = sshll.u32 %s9211_s29, 8  ;;  %s406_s21 = scalar_lea.sflag [#allocation5], %s9211_s29 }
  0x94   : > { %s9217_s12 = scalar_lea.vmem [#allocation4], %s14796_s14 }
  0x95   : > { %8918 = dma.done.wait (%p9154_p13), %s406_s21, 4096  }
  0x96   : > { %8920 = vsyncadd (%p9154_p13), %s406_s21, 4294963200  ;;  %p15012_p6 = scmp.eq.s32.totalorder %s9066_s24, 0 }
  0x98   : > { %8922 = dma.done.wait (%p15012_p6), [#allocation7], 16   ;;  %p15013_p1 = pmov %p15012_p6 }
  0x9a   : > { %8924 = vsyncadd (%p15013_p1), [#allocation7], 4294967280  ;;  %p15014_p3 = pmov %p15013_p1 }
  0x9b   : > { %p15015_p7 = pmov %p15013_p1 }
  0x9c   : > { %8926 = dma.done.wait (%p15014_p3), [#allocation10], 32  }
  0x9d   : > { %8928 = vsyncadd (%p15015_p7), [#allocation10], 4294967264  ;;  %p15016_p12 = pmov %p15013_p1 }
  0x9e   : > { %p15017_p0 = pmov %p15013_p1 }
  0x9f   : > { %8930 = dma.done.wait (%p15016_p12), [#allocation13], 32  }
  0xa0   : > { %8932 = vsyncadd (%p15017_p0), [#allocation13], 4294967264 }
  0xa1   : > { %434 = sfence }
  0xa2   : > { %vm470_vm0 = vcmask 130048   ;;  %v9236_v0 = vld [vmem:[%s9217_s12] sm:$0xff]  ;;  %v9239_v1 = vld [vmem:[%s9217_s12 + $0x8] sm:$0xff]  ;;  %v14797_v2 = vmov 0.0   ;;  %v9386_v3 = vld [vmem:[%s9217_s12 + $0x10] sm:$0xff]  ;;  %v14799_v9 = vmov 0  }
  0xa3   : > { %15018 = vst [vmem:[#allocation28_spill] sm:$0xff] %v9236_v0  ;;  %15019 = vst [vmem:[#allocation29_spill] sm:$0xff] %v9239_v1  ;;  %v9389_v4 = vld [vmem:[%s9217_s12 + $0x18] sm:$0xff]  ;;  %v9392_v5 = vld [vmem:[%s9217_s12 + $0x20] sm:$0xff]  ;;  %1769 = vmatprep.subr.bf16.mxu0 %v14799_v9  ;;  %3212 = vmatprep.subr.bf16.mxu1 %v14799_v9  ;;  %s15032_s1 = sld [smem:[#allocation255_spill]]  ;;  %s8963_s13 = smov 16  }
  0xa4   : > { %472 = vst.msk [vmem:[#allocation2 + $0x8] sm:$0xff] %vm470_vm0, %v14797_v2  ;;  %473 = vst.msk [vmem:[#allocation2 + $0x10] sm:$0xff] %vm470_vm0, %v14797_v2  ;;  %v9403_v6 = vld [vmem:[%s9217_s12 + $0x28] sm:$0xff]  ;;  %v9408_v7 = vld [vmem:[%s9217_s12 + $0x30] sm:$0xff]  ;;  %s8964_s16 = smov 48   ;;  %s8965_s27 = smov 32  }
  0xa5   : > { %471 = vst.msk [vmem:[#allocation2] sm:$0xff] %vm470_vm0, %v14797_v2  ;;  %474 = vst.msk [vmem:[#allocation2 + $0x18] sm:$0xff] %vm470_vm0, %v14797_v2  ;;  %v9411_v8 = vld [vmem:[%s9217_s12 + $0x38] sm:$0xff]  ;;  %v9422_v10 = vld [vmem:[%s9217_s12 + $0x40] sm:$0xff]  ;;  %s8966_s8 = smov 64   ;;  %s8967_s26 = smov 80  }
  0xa6   : > { %475 = vst.msk [vmem:[#allocation2 + $0x20] sm:$0xff] %vm470_vm0, %v14797_v2  ;;  %476 = vst.msk [vmem:[#allocation2 + $0x28] sm:$0xff] %vm470_vm0, %v14797_v2  ;;  %v9425_v11 = vld [vmem:[%s9217_s12 + $0x48] sm:$0xff]  ;;  %v9428_v12 = vld [vmem:[%s9217_s12 + $0x50] sm:$0xff]  ;;  %s14801_s21 = smov 96   ;;  %s8969_s6 = smov 112  }
  0xa7   : > { %477 = vst.msk [vmem:[#allocation2 + $0x30] sm:$0xff] %vm470_vm0, %v14797_v2  ;;  %478 = vst.msk [vmem:[#allocation2 + $0x38] sm:$0xff] %vm470_vm0, %v14797_v2  ;;  %v9435_v13 = vld [vmem:[%s9217_s12 + $0x58] sm:$0xff]  ;;  %v9440_v14 = vld [vmem:[%s9217_s12 + $0x60] sm:$0xff]  ;;  %vm1435_vm1 = vcmask 261120   ;;  %vm1468_vm2 = vcmask 392192  }
  0xa8   : > { %479 = vst.msk [vmem:[#allocation2 + $0x40] sm:$0xff] %vm470_vm0, %v14797_v2  ;;  %480 = vst.msk [vmem:[#allocation2 + $0x48] sm:$0xff] %vm470_vm0, %v14797_v2  ;;  %v9443_v15 = vld [vmem:[%s9217_s12 + $0x68] sm:$0xff]  ;;  %v9455_v17 = vld [vmem:[%s9217_s12 + $0x70] sm:$0xff]  ;;  %vm1501_vm3 = vcmask 523264   ;;  %vm1534_vm4 = vcmask 654336  }
  0xa9   : > { %481 = vst.msk [vmem:[#allocation2 + $0x50] sm:$0xff] %vm470_vm0, %v14797_v2  ;;  %482 = vst.msk [vmem:[#allocation2 + $0x58] sm:$0xff] %vm470_vm0, %v14797_v2  ;;  %v8709_v16 = vld [vmem:[%s15032_s1] sm:$0xff]   ;;  %v9458_v18 = vld [vmem:[%s9217_s12 + $0x78] sm:$0xff]  ;;  %vm1567_vm5 = vcmask 785408   ;;  %vm1600_vm6 = vcmask 916480  }
  0xaa   : > { %483 = vst.msk [vmem:[#allocation2 + $0x60] sm:$0xff] %vm470_vm0, %v14797_v2  ;;  %484 = vst.msk [vmem:[#allocation2 + $0x68] sm:$0xff] %vm470_vm0, %v14797_v2  ;;  %1770 = vmatpush1.bf16.msra.mxu0 %v8709_v16  ;;  %v8710_v19 = vld [vmem:[%s15032_s1 + $0x8] sm:$0xff]   ;;  %v8711_v44 = vld [vmem:[%s15032_s1 + $0x10] sm:$0xff]   ;;  %s15051_s2 = sld [smem:[#allocation256_spill]]  ;;  %s15053_s3 = sld [smem:[#allocation257_spill]] }
  0xab   : > { %485 = vst.msk [vmem:[#allocation2 + $0x70] sm:$0xff] %vm470_vm0, %v14797_v2  ;;  %486 = vst.msk [vmem:[#allocation2 + $0x78] sm:$0xff] %vm470_vm0, %v14797_v2  ;;  %v666_v20 = vld [vmem:[#allocation2 + $0x8] sm:$0xff]  ;;  %v667_v21 = vld [vmem:[#allocation2 + $0x10] sm:$0xff]  ;;  %1771 = vmatprep.subr.bf16.mxu0 %v14799_v9  ;;  %s15055_s7 = smov 96   ;;  %s15056_s4 = sld [smem:[#allocation258_spill]] }
  0xac   : > { %487 = vst.msk [vmem:[#allocation2 + $0x80] sm:$0xff] %vm470_vm0, %v14797_v2  ;;  %488 = vst.msk [vmem:[#allocation2 + $0x88] sm:$0xff] %vm470_vm0, %v14797_v2  ;;  %v714_v22 = vld [vmem:[#allocation2 + $0x9] sm:$0xff]  ;;  %v698_v23 = vpack.c.bf16 %v667_v21, %v666_v20  ;;  %v715_v26 = vld [vmem:[#allocation2 + $0x11] sm:$0xff]  ;;  %vm8970_vm7 = vmmov 0   ;;  %s15057_s5 = sld [smem:[#allocation259_spill]] }
  0xad   : > { %489 = vst.msk [vmem:[#allocation2 + $0x90] sm:$0xff] %vm470_vm0, %v14797_v2  ;;  %490 = vst.msk [vmem:[#allocation2 + $0x98] sm:$0xff] %vm470_vm0, %v14797_v2  ;;  %v746_v30 = vpack.c.bf16 %v715_v26, %v714_v22  ;;  %v8712_v46 = vld [vmem:[%s15032_s1 + $0x18] sm:$0xff]   ;;  %v9492_v47 = vld [vmem:[%s9217_s12 + $0x80] sm:$0xff]  ;;  %vm3650_vm8 = vcmask 1041408   ;;  %vm3585_vm9 = vcmask 1040384  }
  0xae   : > { %491 = vst.msk [vmem:[#allocation2 + $0xa0] sm:$0xff] %vm470_vm0, %v14797_v2  ;;  %492 = vst.msk [vmem:[#allocation2 + $0xa8] sm:$0xff] %vm470_vm0, %v14797_v2  ;;  %1067 = vrot.lane.b32.xlu0 %v698_v23, %s8963_s13  ;;  %1772 = vmatpush1.bf16.msra.mxu0 %v8710_v19  ;;  %v9495_v48 = vld [vmem:[%s9217_s12 + $0x88] sm:$0xff]  ;;  %v8713_v53 = vld [vmem:[%s15032_s1 + $0x20] sm:$0xff]   ;;  %vm3646_vm10 = vcmask 31744   ;;  %vm543_vm11 = vcmask 179200  }
  0xaf   : > { %493 = vst.msk [vmem:[#allocation2 + $0xb0] sm:$0xff] %vm470_vm0, %v14797_v2  ;;  %494 = vst.msk [vmem:[#allocation2 + $0xb8] sm:$0xff] %vm470_vm0, %v14797_v2  ;;  %1773 = vmatprep.subr.bf16.mxu0 %v14799_v9  ;;  %v9513_v55 = vld [vmem:[%s9217_s12 + $0x90] sm:$0xff]  ;;  %v9516_v56 = vld [vmem:[%s9217_s12 + $0x98] sm:$0xff]  ;;  %vm546_vm12 = vcmask 177152   ;;  %vm3909_vm13 = vcmask 154712  }
  0xb0   : > { %495 = vst.msk [vmem:[#allocation2 + $0xc0] sm:$0xff] %vm470_vm0, %v14797_v2  ;;  %496 = vst.msk [vmem:[#allocation2 + $0xc8] sm:$0xff] %vm470_vm0, %v14797_v2  ;;  %v9523_v57 = vld [vmem:[%s9217_s12 + $0xa0] sm:$0xff]  ;;  %v9526_v58 = vld [vmem:[%s9217_s12 + $0xa8] sm:$0xff]  ;;  %vm4046_vm14 = vcmask 1041409   ;;  %vm4048_vm15 = vcmask 1042434  }
  0xb1   : > { %497 = vst.msk [vmem:[#allocation2 + $0xd0] sm:$0xff] %vm470_vm0, %v14797_v2  ;;  %498 = vst.msk [vmem:[#allocation2 + $0xd8] sm:$0xff] %vm470_vm0, %v14797_v2  ;;  %v9529_v59 = vld [vmem:[%s9217_s12 + $0xb0] sm:$0xff]  ;;  %v8714_v60 = vld [vmem:[%s15032_s1 + $0x28] sm:$0xff]   ;;  %s14835_s25 = smov 127   ;;  %s8403_s23 = sld [smem:[#allocation8 + $0x5]] }
  0xb2   : > { %499 = vst.msk [vmem:[#allocation2 + $0xe0] sm:$0xff] %vm470_vm0, %v14797_v2  ;;  %500 = vst.msk [vmem:[#allocation2 + $0xe8] sm:$0xff] %vm470_vm0, %v14797_v2  ;;  %1115 = vrot.lane.b32.xlu0 %v746_v30, %s8965_s27  ;;  %1774 = vmatpush1.bf16.msra.mxu0 %v8711_v44  ;;  %v8715_v61 = vld [vmem:[%s15032_s1 + $0x30] sm:$0xff]   ;;  %v9548_v62 = vld [vmem:[%s9217_s12 + $0xb8] sm:$0xff]  ;;  %s11199_s14 = sld [smem:[#allocation11 + $0x7]]  ;;  %s11213_s0 = sld [smem:[#allocation8 + $0x9]] }
  0xb3   : > { %501 = vst.msk [vmem:[#allocation2 + $0xf0] sm:$0xff] %vm470_vm0, %v14797_v2  ;;  %502 = vst.msk [vmem:[#allocation2 + $0xf8] sm:$0xff] %vm470_vm0, %v14797_v2  ;;  %1775 = vmatprep.subr.bf16.mxu0 %v14799_v9  ;;  %v9551_v63 = vld [vmem:[%s9217_s12 + $0xc0] sm:$0xff]  ;;  %v9554_v16 = vld [vmem:[%s9217_s12 + $0xc8] sm:$0xff]  ;;  %s11225_s9 = sld [smem:[#allocation9 + $0xf]]  ;;  %s11227_s10 = sld [smem:[#allocation9 + $0x11]] }
  0xb4   : > { %503 = vst.msk [vmem:[#allocation2 + $0x100] sm:$0xff] %vm470_vm0, %v14797_v2  ;;  %504 = vst.msk [vmem:[#allocation2 + $0x108] sm:$0xff] %vm470_vm0, %v14797_v2  ;;  %v8717_v30 = vld [vmem:[%s15032_s1 + $0x40] sm:$0xff]   ;;  %v9615_v44 = vld [vmem:[%s9217_s12 + $0xe8] sm:$0xff]  ;;  %s11233_s30 = sld [smem:[#allocation9 + $0x17]]  ;;  %s11235_s19 = sld [smem:[#allocation9 + $0x19]] }
  0xb5   : > { %505 = vst.msk [vmem:[#allocation2 + $0x110] sm:$0xff] %vm470_vm0, %v14797_v2  ;;  %506 = vst.msk [vmem:[#allocation2 + $0x118] sm:$0xff] %vm470_vm0, %v14797_v2  ;;  %s11237_s18 = sld [smem:[#allocation9 + $0x1b]]  ;;  %s14845_s22 = smov 126  }
  0xb6   : > { %507 = vst.msk [vmem:[#allocation2 + $0x120] sm:$0xff] %vm470_vm0, %v14797_v2  ;;  %508 = vst.msk [vmem:[#allocation2 + $0x128] sm:$0xff] %vm470_vm0, %v14797_v2  ;;  %1776 = vmatpush1.bf16.msra.mxu0 %v8712_v46  ;;  %s11241_s20 = sld [smem:[#allocation9 + $0x1d]]  ;;  %s11243_s15 = sld [smem:[#allocation9 + $0x21]] }
  0xb7   : > { %509 = vst.msk [vmem:[#allocation2 + $0x130] sm:$0xff] %vm470_vm0, %v14797_v2  ;;  %510 = vst.msk [vmem:[#allocation2 + $0x138] sm:$0xff] %vm470_vm0, %v14797_v2  ;;  %1777 = vmatprep.subr.bf16.mxu0 %v14799_v9  ;;  %s11246_s17 = sld [smem:[#allocation9 + $0x23]]  ;;  %s11248_s11 = sld [smem:[#allocation9 + $0x25]] }
  0xb8   : > { %511 = vst.msk [vmem:[#allocation2 + $0x140] sm:$0xff] %vm470_vm0, %v14797_v2  ;;  %512 = vst.msk [vmem:[#allocation2 + $0x148] sm:$0xff] %vm470_vm0, %v14797_v2  ;;  %p15776_p2 = scmp.ne.s32.totalorder %s15006_s28, 0 }
  0xb9   : > { %513 = vst.msk [vmem:[#allocation2 + $0x150] sm:$0xff] %vm470_vm0, %v14797_v2  ;;  %514 = vst.msk [vmem:[#allocation2 + $0x158] sm:$0xff] %vm470_vm0, %v14797_v2 }
  0xba   : > { %515 = vst.msk [vmem:[#allocation2 + $0x160] sm:$0xff] %vm470_vm0, %v14797_v2  ;;  %516 = vst.msk [vmem:[#allocation2 + $0x168] sm:$0xff] %vm470_vm0, %v14797_v2  ;;  %1778 = vmatpush1.bf16.msra.mxu0 %v8713_v53 }
  0xbb   : > { %517 = vst.msk [vmem:[#allocation2 + $0x170] sm:$0xff] %vm470_vm0, %v14797_v2  ;;  %518 = vst.msk [vmem:[#allocation2 + $0x178] sm:$0xff] %vm470_vm0, %v14797_v2  ;;  %1779 = vmatprep.subr.bf16.mxu0 %v14799_v9 }
  0xbc   : > { %519 = vst.msk [vmem:[#allocation2 + $0x180] sm:$0xff] %vm470_vm0, %v14797_v2  ;;  %520 = vst.msk [vmem:[#allocation2 + $0x188] sm:$0xff] %vm470_vm0, %v14797_v2 }
  0xbd   : > { %521 = vst.msk [vmem:[#allocation2 + $0x190] sm:$0xff] %vm470_vm0, %v14797_v2  ;;  %522 = vst.msk [vmem:[#allocation2 + $0x198] sm:$0xff] %vm470_vm0, %v14797_v2 }
  0xbe   : > { %523 = vst.msk [vmem:[#allocation2 + $0x1a0] sm:$0xff] %vm470_vm0, %v14797_v2  ;;  %524 = vst.msk [vmem:[#allocation2 + $0x1a8] sm:$0xff] %vm470_vm0, %v14797_v2  ;;  %1780 = vmatpush1.bf16.msra.mxu0 %v8714_v60 }
  0xbf   : > { %525 = vst.msk [vmem:[#allocation2 + $0x1b0] sm:$0xff] %vm470_vm0, %v14797_v2  ;;  %526 = vst.msk [vmem:[#allocation2 + $0x1b8] sm:$0xff] %vm470_vm0, %v14797_v2  ;;  %1781 = vmatprep.subr.bf16.mxu0 %v14799_v9 }
  0xc0   : > { %527 = vst.msk [vmem:[#allocation2 + $0x1c0] sm:$0xff] %vm470_vm0, %v14797_v2  ;;  %528 = vst.msk [vmem:[#allocation2 + $0x1c8] sm:$0xff] %vm470_vm0, %v14797_v2 }
  0xc1   : > { %529 = vst.msk [vmem:[#allocation2 + $0x1d0] sm:$0xff] %vm470_vm0, %v14797_v2  ;;  %530 = vst.msk [vmem:[#allocation2 + $0x1d8] sm:$0xff] %vm470_vm0, %v14797_v2 }
  0xc2   : > { %531 = vst.msk [vmem:[#allocation2 + $0x1e0] sm:$0xff] %vm470_vm0, %v14797_v2  ;;  %532 = vst.msk [vmem:[#allocation2 + $0x1e8] sm:$0xff] %vm470_vm0, %v14797_v2  ;;  %1782 = vmatpush1.bf16.msra.mxu0 %v8715_v61 }
  0xc3   : > { %533 = vst.msk [vmem:[#allocation2 + $0x1f0] sm:$0xff] %vm470_vm0, %v14797_v2  ;;  %534 = vst.msk [vmem:[#allocation2 + $0x1f8] sm:$0xff] %vm470_vm0, %v14797_v2  ;;  %1783 = vmatprep.subr.bf16.mxu0 %v14799_v9 }
  0xc4   : > { %535 = vst.msk [vmem:[#allocation2 + $0x200] sm:$0xff] %vm470_vm0, %v14797_v2  ;;  %536 = vst.msk [vmem:[#allocation2 + $0x208] sm:$0xff] %vm470_vm0, %v14797_v2 }
  0xc5   : > { %537 = vst.msk [vmem:[#allocation2 + $0x210] sm:$0xff] %vm470_vm0, %v14797_v2  ;;  %538 = vst.msk [vmem:[#allocation2 + $0x218] sm:$0xff] %vm470_vm0, %v14797_v2 }
  0xc6   : > { %539 = vst.msk [vmem:[#allocation2 + $0x220] sm:$0xff] %vm470_vm0, %v14797_v2  ;;  %540 = vst.msk [vmem:[#allocation2 + $0x228] sm:$0xff] %vm470_vm0, %v14797_v2 }
  0xc7   : > { %541 = vst.msk [vmem:[#allocation2 + $0x230] sm:$0xff] %vm470_vm0, %v14797_v2  ;;  %542 = vst.msk [vmem:[#allocation2 + $0x238] sm:$0xff] %vm470_vm0, %v14797_v2 }
  0xc8   : > { %15020 = vst [vmem:[#allocation30_spill] sm:$0xff] %v9386_v3  ;;  %15021 = vst [vmem:[#allocation31_spill] sm:$0xff] %v9389_v4 }
  0xc9   : > { %15022 = vst [vmem:[#allocation32_spill] sm:$0xff] %v9392_v5  ;;  %586 = vst.msk [vmem:[#allocation2 + $0x28] sm:$0xff] %vm470_vm0, %v9236_v0 }
  0xca   : > { %587 = vst.msk [vmem:[#allocation2 + $0x30] sm:$0xff] %vm470_vm0, %v9239_v1  ;;  %588 = vst.msk [vmem:[#allocation2 + $0x48] sm:$0xff] %vm470_vm0, %v9386_v3 }
  0xcb   : > { %589 = vst.msk [vmem:[#allocation2 + $0x50] sm:$0xff] %vm470_vm0, %v9389_v4  ;;  %15023 = vst [vmem:[#allocation33_spill] sm:$0xff] %v9403_v6 }
  0xcc   : > { %590 = vst.msk [vmem:[#allocation2 + $0x68] sm:$0xff] %vm470_vm0, %v9392_v5  ;;  %15024 = vst [vmem:[#allocation34_spill] sm:$0xff] %v9408_v7 }
  0xcd   : > { %15025 = vst [vmem:[#allocation35_spill] sm:$0xff] %v9411_v8  ;;  %591 = vst.msk [vmem:[#allocation2 + $0x70] sm:$0xff] %vm470_vm0, %v9403_v6 }
  0xce   : > { %592 = vst.msk [vmem:[#allocation2 + $0x88] sm:$0xff] %vm470_vm0, %v9408_v7  ;;  %593 = vst.msk [vmem:[#allocation2 + $0x90] sm:$0xff] %vm470_vm0, %v9411_v8 }
  0xcf   : > { %15026 = vst [vmem:[#allocation36_spill] sm:$0xff] %v9422_v10  ;;  %15027 = vst [vmem:[#allocation37_spill] sm:$0xff] %v9425_v11 }
  0xd0   : > { %15028 = vst [vmem:[#allocation38_spill] sm:$0xff] %v9428_v12  ;;  %594 = vst.msk [vmem:[#allocation2 + $0xa8] sm:$0xff] %vm470_vm0, %v9422_v10  ;;  %v762_v24 = vld [vmem:[#allocation2 + $0x27] sm:$0xff] }
  0xd1   : > { %595 = vst.msk [vmem:[#allocation2 + $0xb0] sm:$0xff] %vm470_vm0, %v9425_v11  ;;  %15029 = vst [vmem:[#allocation39_spill] sm:$0xff] %v9435_v13  ;;  %v763_v25 = vld [vmem:[#allocation2 + $0x2f] sm:$0xff]  ;;  %v907_v35 = vld [vmem:[#allocation2 + $0x47] sm:$0xff] }
  0xd2   : > { %596 = vst.msk [vmem:[#allocation2 + $0xc8] sm:$0xff] %vm470_vm0, %v9428_v12  ;;  %15030 = vst [vmem:[#allocation40_spill] sm:$0xff] %v9440_v14  ;;  %v9468_v27 = vpack.c.bf16 %v763_v25, %v762_v24  ;;  %v810_v28 = vld [vmem:[#allocation2 + $0x28] sm:$0xff]  ;;  %v811_v29 = vld [vmem:[#allocation2 + $0x30] sm:$0xff] }
  0xd3   : > { %15031 = vst [vmem:[#allocation41_spill] sm:$0xff] %v9443_v15  ;;  %597 = vst.msk [vmem:[#allocation2 + $0xd0] sm:$0xff] %vm470_vm0, %v9435_v13  ;;  %v842_v31 = vpack.c.bf16 %v811_v29, %v810_v28  ;;  %v858_v32 = vld [vmem:[#allocation2 + $0x29] sm:$0xff]  ;;  %v859_v33 = vld [vmem:[#allocation2 + $0x31] sm:$0xff] }
  0xd4   : > { %598 = vst.msk [vmem:[#allocation2 + $0xe8] sm:$0xff] %vm470_vm0, %v9440_v14  ;;  %599 = vst.msk [vmem:[#allocation2 + $0xf0] sm:$0xff] %vm470_vm0, %v9443_v15  ;;  %1163 = vrot.lane.b32.xlu1 %v9468_v27, %s8964_s16  ;;  %v860_v34 = vld [vmem:[#allocation2 + $0x49] sm:$0xff]  ;;  %v861_v37 = vld [vmem:[#allocation2 + $0x51] sm:$0xff]  ;;  %v890_v39 = vpack.c.bf16 %v859_v33, %v858_v32 }
  0xd5   : > { %15033 = vst [vmem:[#allocation42_spill] sm:$0xff] %v9455_v17  ;;  %15034 = vst [vmem:[#allocation43_spill] sm:$0xff] %v9458_v18  ;;  %v908_v36 = vld [vmem:[#allocation2 + $0x4f] sm:$0xff]  ;;  %v891_v38 = vpack.c.bf16 %v861_v37, %v860_v34  ;;  %v909_v45 = vld [vmem:[#allocation2 + $0x67] sm:$0xff] }
  0xd6   : > { %600 = vst.msk [vmem:[#allocation2 + $0x108] sm:$0xff] %vm470_vm0, %v9455_v17  ;;  %601 = vst.msk [vmem:[#allocation2 + $0x110] sm:$0xff] %vm470_vm0, %v9458_v18  ;;  %v9476_v40 = vpack.c.bf16 %v908_v36, %v907_v35  ;;  %v955_v41 = vld [vmem:[#allocation2 + $0x48] sm:$0xff]  ;;  %v956_v42 = vld [vmem:[#allocation2 + $0x50] sm:$0xff]  ;;  %1259 = vrot.lane.b32.xlu0 %v890_v39, %s8967_s26 }
  0xd7   : > { %8351 = vmatprep.mubr.msk.bf16.mxu0 %vm470_vm0, %v891_v38  ;;  %v987_v43 = vpack.c.bf16 %v956_v42, %v955_v41  ;;  %15035 = vst [vmem:[#allocation44_spill] sm:$0xff] %v9492_v47  ;;  %15036 = vst [vmem:[#allocation45_spill] sm:$0xff] %v9495_v48  ;;  %v910_v49 = vld [vmem:[#allocation2 + $0x6f] sm:$0xff]  ;;  %v911_v21 = vld [vmem:[#allocation2 + $0x87] sm:$0xff] }
  0xd8   : > { %1211 = vrot.lane.b32.xlu1 %v842_v31, %s8966_s8  ;;  %602 = vst.msk [vmem:[#allocation2 + $0x128] sm:$0xff] %vm470_vm0, %v9492_v47  ;;  %603 = vst.msk [vmem:[#allocation2 + $0x130] sm:$0xff] %vm470_vm0, %v9495_v48  ;;  %v957_v50 = vld [vmem:[#allocation2 + $0x68] sm:$0xff]  ;;  %v958_v51 = vld [vmem:[#allocation2 + $0x70] sm:$0xff]  ;;  %v9505_v52 = vpack.c.bf16 %v910_v49, %v909_v45 }
  0xd9   : > { %v988_v54 = vpack.c.bf16 %v958_v51, %v957_v50  ;;  %15037 = vst [vmem:[#allocation46_spill] sm:$0xff] %v9513_v55  ;;  %15038 = vst [vmem:[#allocation47_spill] sm:$0xff] %v9516_v56  ;;  %v862_v19 = vld [vmem:[#allocation2 + $0x69] sm:$0xff]  ;;  %v863_v20 = vld [vmem:[#allocation2 + $0x71] sm:$0xff] }
  0xda   : > { %1355 = vrot.lane.b32.xlu0 %v987_v43, %s8969_s6  ;;  %604 = vst.msk [vmem:[#allocation2 + $0x148] sm:$0xff] %vm470_vm0, %v9513_v55  ;;  %605 = vst.msk [vmem:[#allocation2 + $0x150] sm:$0xff] %vm470_vm0, %v9516_v56  ;;  %v912_v22 = vld [vmem:[#allocation2 + $0x8f] sm:$0xff]  ;;  %v9567_v23 = vpack.c.bf16 %v863_v20, %v862_v19  ;;  %v8716_v24 = vld [vmem:[%s15032_s1 + $0x38] sm:$0xff]   ;;  %s11215_s1 = sld [smem:[#allocation8 + $0xb]] }
  0xdb   : > { %15039 = vst [vmem:[#allocation48_spill] sm:$0xff] %v9523_v57  ;;  %15040 = vst [vmem:[#allocation49_spill] sm:$0xff] %v9526_v58  ;;  %v9573_v25 = vpack.c.bf16 %v912_v22, %v911_v21  ;;  %v959_v26 = vld [vmem:[#allocation2 + $0x88] sm:$0xff]  ;;  %v960_v28 = vld [vmem:[#allocation2 + $0x90] sm:$0xff]  ;;  %1784 = vmatpush1.bf16.msra.mxu0 %v8716_v24 }
  0xdc   : > { %1307 = vrot.lane.b32.xlu1 %v9476_v40, %s14801_s21  ;;  %15041 = vst [vmem:[#allocation50_spill] sm:$0xff] %v9529_v59  ;;  %606 = vst.msk [vmem:[#allocation2 + $0x168] sm:$0xff] %vm470_vm0, %v9523_v57  ;;  %v989_v29 = vpack.c.bf16 %v960_v28, %v959_v26  ;;  %1785 = vmatprep.subr.bf16.mxu0 %v14799_v9  ;;  %v9588_v32 = vld [vmem:[%s9217_s12 + $0xd8] sm:$0xff]  ;;  %v865_v34 = vld [vmem:[#allocation2 + $0x91] sm:$0xff] }
  0xdd   : > { %607 = vst.msk [vmem:[#allocation2 + $0x170] sm:$0xff] %vm470_vm0, %v9526_v58  ;;  %608 = vst.msk [vmem:[#allocation2 + $0x188] sm:$0xff] %vm470_vm0, %v9529_v59  ;;  %v864_v33 = vld [vmem:[#allocation2 + $0x89] sm:$0xff]  ;;  %v867_v46 = vld [vmem:[#allocation2 + $0xb1] sm:$0xff] }
  0xde   : > { %1117 = vrot.lane.b32.xlu0 %v890_v39, %s8965_s27  ;;  %15042 = vst [vmem:[#allocation51_spill] sm:$0xff] %v9548_v62  ;;  %15043 = vst [vmem:[#allocation52_spill] sm:$0xff] %v9551_v63  ;;  %v9601_v35 = vpack.c.bf16 %v865_v34, %v864_v33  ;;  %v913_v36 = vld [vmem:[#allocation2 + $0xa7] sm:$0xff]  ;;  %v914_v37 = vld [vmem:[#allocation2 + $0xaf] sm:$0xff] }
  0xdf   : > { %15044 = vst [vmem:[#allocation53_spill] sm:$0xff] %v9554_v16  ;;  %609 = vst.msk [vmem:[#allocation2 + $0x190] sm:$0xff] %vm470_vm0, %v9548_v62  ;;  %1786 = vmatpush1.bf16.msra.mxu0 %v8717_v30  ;;  %v962_v39 = vld [vmem:[#allocation2 + $0xb0] sm:$0xff]  ;;  %v9604_v41 = vpack.c.bf16 %v914_v37, %v913_v36  ;;  %v915_v49 = vld [vmem:[#allocation2 + $0xc7] sm:$0xff] }
  0xe0   : > { %1069 = vrot.lane.b32.xlu1 %v842_v31, %s8963_s13  ;;  %610 = vst.msk [vmem:[#allocation2 + $0x1a8] sm:$0xff] %vm470_vm0, %v9551_v63  ;;  %611 = vst.msk [vmem:[#allocation2 + $0x1b0] sm:$0xff] %vm470_vm0, %v9554_v16  ;;  %v9585_v31 = vld [vmem:[%s9217_s12 + $0xd0] sm:$0xff]  ;;  %8578 = vmatprep.subr.bf16.mxu0 %v14797_v2  ;;  %v866_v45 = vld [vmem:[#allocation2 + $0xa9] sm:$0xff] }
  0xe1   : > { %15045 = vst [vmem:[#allocation54_spill] sm:$0xff] %v9585_v31  ;;  %15046 = vst [vmem:[#allocation55_spill] sm:$0xff] %v9588_v32  ;;  %v916_v50 = vld [vmem:[#allocation2 + $0xcf] sm:$0xff]  ;;  %v9626_v51 = vpack.c.bf16 %v867_v46, %v866_v45  ;;  %v9636_v19 = vld [vmem:[%s9217_s12 + $0xf0] sm:$0xff] }
  0xe2   : > { %1213 = vrot.lane.b32.xlu0 %v987_v43, %s8966_s8  ;;  %612 = vst.msk [vmem:[#allocation2 + $0x1c8] sm:$0xff] %vm470_vm0, %v9585_v31  ;;  %613 = vst.msk [vmem:[#allocation2 + $0x1d0] sm:$0xff] %vm470_vm0, %v9588_v32  ;;  %v9629_v53 = vpack.c.bf16 %v916_v50, %v915_v49  ;;  %v964_v60 = vld [vmem:[#allocation2 + $0xd0] sm:$0xff]  ;;  %v9639_v20 = vld [vmem:[%s9217_s12 + $0xf8] sm:$0xff] }
  0xe3   : > { %15048 = vst [vmem:[#allocation57_spill] sm:$0xff] %v9615_v44  ;;  %615 = vst.msk [vmem:[#allocation2 + $0x1f0] sm:$0xff] %vm470_vm0, %v9615_v44  ;;  %v868_v21 = vld [vmem:[#allocation2 + $0xc9] sm:$0xff]  ;;  %v869_v22 = vld [vmem:[#allocation2 + $0xd1] sm:$0xff] }
  0xe4   : > { %1165 = vrot.lane.b32.xlu1 %v9476_v40, %s8964_s16  ;;  %15049 = vst [vmem:[#allocation58_spill] sm:$0xff] %v9636_v19  ;;  %15050 = vst [vmem:[#allocation59_spill] sm:$0xff] %v9639_v20  ;;  %v9651_v24 = vpack.c.bf16 %v869_v22, %v868_v21  ;;  %v917_v26 = vld [vmem:[#allocation2 + $0xe7] sm:$0xff]  ;;  %v918_v28 = vld [vmem:[#allocation2 + $0xef] sm:$0xff] }
  0xe5   : > { %616 = vst.msk [vmem:[#allocation2 + $0x208] sm:$0xff] %vm470_vm0, %v9636_v19  ;;  %617 = vst.msk [vmem:[#allocation2 + $0x210] sm:$0xff] %vm470_vm0, %v9639_v20  ;;  %v966_v30 = vld [vmem:[#allocation2 + $0xf0] sm:$0xff]  ;;  %v9654_v33 = vpack.c.bf16 %v918_v28, %v917_v26  ;;  %v967_v46 = vld [vmem:[#allocation2 + $0x108] sm:$0xff] }
  0xe6   : > { %1309 = vrot.lane.b32.xlu0 %v9505_v52, %s14801_s21  ;;  %v870_v36 = vld [vmem:[#allocation2 + $0xe9] sm:$0xff]  ;;  %v871_v37 = vld [vmem:[#allocation2 + $0xf1] sm:$0xff] }
  0xe7   : > { %v968_v49 = vld [vmem:[#allocation2 + $0x110] sm:$0xff]  ;;  %v921_v21 = vld [vmem:[#allocation2 + $0x127] sm:$0xff] }
  0xe8   : > { %1261 = vrot.lane.b32.xlu1 %v891_v38, %s8967_s26  ;;  %v993_v50 = vpack.c.bf16 %v968_v49, %v967_v46  ;;  %v922_v22 = vld [vmem:[#allocation2 + $0x12f] sm:$0xff]  ;;  %v923_v46 = vld [vmem:[#allocation2 + $0x147] sm:$0xff] }
  0xe9   : > { %v969_v26 = vld [vmem:[#allocation2 + $0x128] sm:$0xff]  ;;  %v970_v28 = vld [vmem:[#allocation2 + $0x130] sm:$0xff] }
  0xea   : > { %1071 = vrot.lane.b32.xlu0 %v987_v43, %s8963_s13  ;;  %v9612_v43 = vld [vmem:[%s9217_s12 + $0xe0] sm:$0xff]  ;;  %s8401_s12 = sld [smem:[#allocation8 + $0x3]] }
  0xeb   : > { %15047 = vst [vmem:[#allocation56_spill] sm:$0xff] %v9612_v43  ;;  %614 = vst.msk [vmem:[#allocation2 + $0x1e8] sm:$0xff] %vm470_vm0, %v9612_v43  ;;  %v924_v49 = vld [vmem:[#allocation2 + $0x14f] sm:$0xff] }
  0xec   : > { %1357 = vrot.lane.b32.xlu1 %v988_v54, %s8969_s6 }
  0xee   : > { %1167 = vrot.lane.b32.xlu0 %v9505_v52, %s8964_s16 }
  0xf0   : > { %1119 = vrot.lane.b32.xlu1 %v891_v38, %s8965_s27  ;;  %v961_v38 = vld [vmem:[#allocation2 + $0xa8] sm:$0xff] }
  0xf1   : > { %v990_v42 = vpack.c.bf16 %v962_v39, %v961_v38  ;;  %v919_v38 = vld [vmem:[#allocation2 + $0x107] sm:$0xff]  ;;  %v920_v39 = vld [vmem:[#allocation2 + $0x10f] sm:$0xff] }
  0xf2   : > { %1263 = vrot.lane.b32.xlu0 %v9567_v23, %s8967_s26  ;;  %v945_v45 = vpack.c.bf16 %v920_v39, %v919_v38  ;;  %v875_v38 = vld [vmem:[#allocation2 + $0x131] sm:$0xff] }
  0xf4   : > { %1215 = vrot.lane.b32.xlu1 %v988_v54, %s8966_s8 }
  0xf6   : > { %1359 = vrot.lane.b32.xlu0 %v989_v29, %s8969_s6 }
  0xf8   : > { %1311 = vrot.lane.b32.xlu1 %v9573_v25, %s14801_s21 }
  0xfa   : > { %1121 = vrot.lane.b32.xlu0 %v9567_v23, %s8965_s27 }
  0xfc   : > { %1073 = vrot.lane.b32.xlu1 %v988_v54, %s8963_s13  ;;  %v963_v54 = vld [vmem:[#allocation2 + $0xc8] sm:$0xff] }
  0xfd   : > { %v991_v61 = vpack.c.bf16 %v964_v60, %v963_v54  ;;  %v872_v54 = vld [vmem:[#allocation2 + $0x109] sm:$0xff]  ;;  %v873_v60 = vld [vmem:[#allocation2 + $0x111] sm:$0xff] }
  0xfe   : > { %1217 = vrot.lane.b32.xlu0 %v989_v29, %s8966_s8 }
 0x100   : > { %1169 = vrot.lane.b32.xlu1 %v9573_v25, %s8964_s16 }
 0x102   : > { %1313 = vrot.lane.b32.xlu0 %v9604_v41, %s14801_s21 }
 0x104   : > { %1265 = vrot.lane.b32.xlu1 %v9601_v35, %s8967_s26 }
 0x106   : > { %1075 = vrot.lane.b32.xlu0 %v989_v29, %s8963_s13  ;;  %v965_v29 = vld [vmem:[#allocation2 + $0xe8] sm:$0xff] }
 0x107   : > { %v992_v34 = vpack.c.bf16 %v966_v30, %v965_v29  ;;  %v9680_v29 = vpack.c.bf16 %v922_v22, %v921_v21  ;;  %v994_v30 = vpack.c.bf16 %v970_v28, %v969_v26  ;;  %v971_v21 = vld [vmem:[#allocation2 + $0x148] sm:$0xff]  ;;  %v972_v22 = vld [vmem:[#allocation2 + $0x150] sm:$0xff] }
 0x108   : > { %1361 = vrot.lane.b32.xlu1 %v990_v42, %s8969_s6 }
 0x10a   : > { %1171 = vrot.lane.b32.xlu0 %v9604_v41, %s8964_s16 }
 0x10c   : > { %1123 = vrot.lane.b32.xlu1 %v9601_v35, %s8965_s27 }
 0x10e   : > { %1267 = vrot.lane.b32.xlu0 %v9626_v51, %s8967_s26 }
 0x110   : > { %1219 = vrot.lane.b32.xlu1 %v990_v42, %s8966_s8 }
 0x112   : > { %1363 = vrot.lane.b32.xlu0 %v991_v61, %s8969_s6 }
 0x114   : > { %1315 = vrot.lane.b32.xlu1 %v9629_v53, %s14801_s21 }
 0x116   : > { %1125 = vrot.lane.b32.xlu0 %v9626_v51, %s8965_s27 }
 0x118   : > { %1077 = vrot.lane.b32.xlu1 %v990_v42, %s8963_s13  ;;  %v9666_v42 = vpack.c.bf16 %v871_v37, %v870_v36  ;;  %v619_v36 = vld [vmem:[#allocation2 + $0xf] sm:$0xff] }
 0x119   : > { %v874_v37 = vld [vmem:[#allocation2 + $0x129] sm:$0xff] }
 0x11a   : > { %1221 = vrot.lane.b32.xlu0 %v991_v61, %s8966_s8 }
 0x11c   : > { %1173 = vrot.lane.b32.xlu1 %v9629_v53, %s8964_s16 }
 0x11e   : > { %1317 = vrot.lane.b32.xlu0 %v9654_v33, %s14801_s21 }
 0x120   : > { %1269 = vrot.lane.b32.xlu1 %v9651_v24, %s8967_s26  ;;  %v1068_v39 = vpop.permute.xlu0 %1067 }
 0x122   : > { %1079 = vrot.lane.b32.xlu0 %v991_v61, %s8963_s13  ;;  %v9677_v61 = vpack.c.bf16 %v873_v60, %v872_v54  ;;  %v9692_v60 = vpack.c.bf16 %v875_v38, %v874_v37  ;;  %v995_v37 = vpack.c.bf16 %v972_v22, %v971_v21  ;;  %v877_v21 = vld [vmem:[#allocation2 + $0x151] sm:$0xff] }
 0x124   : > { %1365 = vrot.lane.b32.xlu1 %v992_v34, %s8969_s6  ;;  %v1116_v28 = vpop.permute.xlu0 %1115 }
 0x126   : > { %1175 = vrot.lane.b32.xlu0 %v9654_v33, %s8964_s16 }
 0x128   : > { %1127 = vrot.lane.b32.xlu1 %v9651_v24, %s8965_s27 }
 0x12a   : > { %1271 = vrot.lane.b32.xlu0 %v9666_v42, %s8967_s26 }
 0x12c   : > { %1223 = vrot.lane.b32.xlu1 %v992_v34, %s8966_s8 }
 0x12e   : > { %1367 = vrot.lane.b32.xlu0 %v993_v50, %s8969_s6 }
 0x130   : > { %1319 = vrot.lane.b32.xlu1 %v945_v45, %s14801_s21 }
 0x132   : > { %1129 = vrot.lane.b32.xlu0 %v9666_v42, %s8965_s27 }
 0x134   : > { %1081 = vrot.lane.b32.xlu1 %v992_v34, %s8963_s13  ;;  %v618_v34 = vld [vmem:[#allocation2 + $0x7] sm:$0xff] }
 0x136   : > { %1225 = vrot.lane.b32.xlu0 %v993_v50, %s8966_s8 }
 0x138   : > { %1177 = vrot.lane.b32.xlu1 %v945_v45, %s8964_s16  ;;  %v650_v45 = vpack.c.bf16 %v619_v36, %v618_v34 }
 0x13a   : > { %1321 = vrot.lane.b32.xlu0 %v9680_v29, %s14801_s21  ;;  %v1389_v26 = vsel %vm470_vm0, %v650_v45, %v1068_v39 }
 0x13b   : > { %v1437_v34 = vsel %vm1435_vm1, %v1389_v26, %v1116_v28  ;;  %v876_v26 = vld [vmem:[#allocation2 + $0x149] sm:$0xff] }
 0x13c   : > { %1273 = vrot.lane.b32.xlu1 %v9677_v61, %s8967_s26  ;;  %v9714_v28 = vpack.c.bf16 %v877_v21, %v876_v26 }
 0x13e   : > { %1083 = vrot.lane.b32.xlu0 %v993_v50, %s8963_s13  ;;  %v9695_v50 = vpack.c.bf16 %v924_v49, %v923_v46 }
 0x140   : > { %1369 = vrot.lane.b32.xlu1 %v994_v30, %s8969_s6 }
 0x142   : > { %1179 = vrot.lane.b32.xlu0 %v9680_v29, %s8964_s16 }
 0x144   : > { %1131 = vrot.lane.b32.xlu1 %v9677_v61, %s8965_s27 }
 0x146   : > { %v1164_v54 = vpop.permute.xlu1 %1163  ;;  %1275 = vrot.lane.b32.xlu0 %v9692_v60, %s8967_s26 }
 0x147   : > { %v1470_v2 = vsel %vm1468_vm2, %v1437_v34, %v1164_v54  ;;  %v925_v34 = vld [vmem:[#allocation2 + $0x167] sm:$0xff] }
 0x148   : > { %1227 = vrot.lane.b32.xlu1 %v994_v30, %s8966_s8  ;;  %v1260_v46 = vpop.permute.xlu0 %1259 }
 0x14a   : > { %v1212_v36 = vpop.permute.xlu1 %1211  ;;  %1371 = vrot.lane.b32.xlu0 %v995_v37, %s8969_s6 }
 0x14b   : > { %v1503_v38 = vsel %vm1501_vm3, %v1470_v2, %v1212_v36  ;;  %v926_v36 = vld [vmem:[#allocation2 + $0x16f] sm:$0xff] }
 0x14c   : > { %1323 = vrot.lane.b32.xlu1 %v9695_v50, %s14801_s21  ;;  %v1536_v39 = vsel %vm1534_vm4, %v1503_v38, %v1260_v46  ;;  %v1356_v54 = vpop.permute.xlu0 %1355  ;;  %v973_v46 = vld [vmem:[#allocation2 + $0x168] sm:$0xff] }
 0x14e   : > { %v1308_v45 = vpop.permute.xlu1 %1307  ;;  %1133 = vrot.lane.b32.xlu0 %v9692_v60, %s8965_s27 }
 0x14f   : > { %v1569_v49 = vsel %vm1567_vm5, %v1536_v39, %v1308_v45  ;;  %v974_v39 = vld [vmem:[#allocation2 + $0x170] sm:$0xff] }
 0x150   : > { %1085 = vrot.lane.b32.xlu1 %v994_v30, %s8963_s13  ;;  %v1602_v2 = vsel %vm1600_vm6, %v1569_v49, %v1356_v54  ;;  %v1118_v38 = vpop.permute.xlu0 %1117  ;;  %v9722_v54 = vpack.c.bf16 %v926_v36, %v925_v34  ;;  %v996_v26 = vpack.c.bf16 %v974_v39, %v973_v46  ;;  %v878_v46 = vld [vmem:[#allocation2 + $0x169] sm:$0xff]  ;;  %v879_v39 = vld [vmem:[#allocation2 + $0x171] sm:$0xff] }
 0x151   : > { %1802 = vmatmul.mubr.bf16.vlgmr.msra.gmra.mrb[0].mxu0 %v1602_v2 }
 0x152   : > { %v1070_v22 = vpop.permute.xlu1 %1069  ;;  %8352 = vmatprep.mubr.msk.bf16.mxu0 %vm470_vm0, %v9567_v23  ;;  %1229 = vrot.lane.b32.xlu0 %v995_v37, %s8966_s8 }
 0x153   : > { %v1392_v30 = vsel %vm470_vm0, %v9468_v27, %v1070_v22 }
 0x154   : > { %1181 = vrot.lane.b32.xlu1 %v9695_v50, %s8964_s16  ;;  %v1439_v45 = vsel %vm1435_vm1, %v1392_v30, %v1118_v38  ;;  %v1214_v23 = vpop.permute.xlu0 %1213 }
 0x156   : > { %v1166_v49 = vpop.permute.xlu1 %1165  ;;  %1325 = vrot.lane.b32.xlu0 %v9722_v54, %s14801_s21 }
 0x157   : > { %v1472_v21 = vsel %vm1468_vm2, %v1439_v45, %v1166_v49  ;;  %v927_v49 = vld [vmem:[#allocation2 + $0x187] sm:$0xff] }
 0x158   : > { %1277 = vrot.lane.b32.xlu1 %v9714_v28, %s8967_s26  ;;  %v1505_v2 = vsel %vm1501_vm3, %v1472_v21, %v1214_v23  ;;  %v1310_v30 = vpop.permute.xlu0 %1309  ;;  %v928_v21 = vld [vmem:[#allocation2 + $0x18f] sm:$0xff] }
 0x15a   : > { %v1262_v27 = vpop.permute.xlu1 %1261  ;;  %1087 = vrot.lane.b32.xlu0 %v995_v37, %s8963_s13  ;;  %v9743_v37 = vpack.c.bf16 %v879_v39, %v878_v46 }
 0x15b   : > { %v1538_v22 = vsel %vm1534_vm4, %v1505_v2, %v1262_v27  ;;  %v9746_v27 = vpack.c.bf16 %v928_v21, %v927_v49 }
 0x15c   : > { %1373 = vrot.lane.b32.xlu1 %v996_v26, %s8969_s6  ;;  %v1571_v34 = vsel %vm1567_vm5, %v1538_v22, %v1310_v30  ;;  %v1072_v45 = vpop.permute.xlu0 %1071  ;;  %v975_v22 = vld [vmem:[#allocation2 + $0x188] sm:$0xff]  ;;  %v976_v30 = vld [vmem:[#allocation2 + $0x190] sm:$0xff] }
 0x15d   : > { %v1395_v23 = vsel %vm470_vm0, %v9476_v40, %v1072_v45  ;;  %v997_v40 = vpack.c.bf16 %v976_v30, %v975_v22 }
 0x15e   : > { %v1358_v36 = vpop.permute.xlu1 %1357  ;;  %1183 = vrot.lane.b32.xlu0 %v9722_v54, %s8964_s16 }
 0x15f   : > { %v1605_v38 = vsel %vm1600_vm6, %v1571_v34, %v1358_v36 }
 0x160   : > { %1135 = vrot.lane.b32.xlu1 %v9714_v28, %s8965_s27  ;;  %1810 = vmatmul.mubr.bf16.gmra.mrb[4].mxu0 %v1605_v38  ;;  %v1168_v36 = vpop.permute.xlu0 %1167 }
 0x161   : > { %8353 = vmatprep.mubr.msk.bf16.mxu0 %vm470_vm0, %v9601_v35 }
 0x162   : > { %v1120_v2 = vpop.permute.xlu1 %1119  ;;  %1279 = vrot.lane.b32.xlu0 %v9743_v37, %s8967_s26 }
 0x163   : > { %v1441_v34 = vsel %vm1435_vm1, %v1395_v23, %v1120_v2  ;;  %v880_v2 = vld [vmem:[#allocation2 + $0x189] sm:$0xff] }
 0x164   : > { %1231 = vrot.lane.b32.xlu1 %v996_v26, %s8966_s8  ;;  %v1474_v35 = vsel %vm1468_vm2, %v1441_v34, %v1168_v36  ;;  %v1264_v39 = vpop.permute.xlu0 %1263  ;;  %v881_v34 = vld [vmem:[#allocation2 + $0x191] sm:$0xff] }
 0x165   : > { %v9764_v30 = vpack.c.bf16 %v881_v34, %v880_v2 }
 0x166   : > { %v1216_v38 = vpop.permute.xlu1 %1215  ;;  %1375 = vrot.lane.b32.xlu0 %v997_v40, %s8969_s6 }
 0x167   : > { %v1507_v46 = vsel %vm1501_vm3, %v1474_v35, %v1216_v38  ;;  %v929_v35 = vld [vmem:[#allocation2 + $0x1a7] sm:$0xff]  ;;  %v930_v38 = vld [vmem:[#allocation2 + $0x1af] sm:$0xff] }
 0x168   : > { %1327 = vrot.lane.b32.xlu1 %v9746_v27, %s14801_s21  ;;  %v1540_v45 = vsel %vm1534_vm4, %v1507_v46, %v1264_v39  ;;  %v1360_v23 = vpop.permute.xlu0 %1359  ;;  %v977_v39 = vld [vmem:[#allocation2 + $0x1a8] sm:$0xff] }
 0x16a   : > { %v1312_v49 = vpop.permute.xlu1 %1311  ;;  %1137 = vrot.lane.b32.xlu0 %v9743_v37, %s8965_s27 }
 0x16b   : > { %v1573_v21 = vsel %vm1567_vm5, %v1540_v45, %v1312_v49  ;;  %v978_v45 = vld [vmem:[#allocation2 + $0x1b0] sm:$0xff] }
 0x16c   : > { %1089 = vrot.lane.b32.xlu1 %v996_v26, %s8963_s13  ;;  %v1608_v22 = vsel %vm1600_vm6, %v1573_v21, %v1360_v23  ;;  %v1122_v46 = vpop.permute.xlu0 %1121  ;;  %v9772_v23 = vpack.c.bf16 %v930_v38, %v929_v35  ;;  %v998_v2 = vpack.c.bf16 %v978_v45, %v977_v39  ;;  %v882_v39 = vld [vmem:[#allocation2 + $0x1a9] sm:$0xff]  ;;  %v883_v45 = vld [vmem:[#allocation2 + $0x1b1] sm:$0xff] }
 0x16d   : > { %1818 = vmatmul.mubr.bf16.gmra.mrb[8].mxu0 %v1608_v22 }
 0x16e   : > { %v1074_v36 = vpop.permute.xlu1 %1073  ;;  %8354 = vmatprep.mubr.msk.bf16.mxu0 %vm470_vm0, %v9626_v51  ;;  %1233 = vrot.lane.b32.xlu0 %v997_v40, %s8966_s8 }
 0x16f   : > { %v1398_v26 = vsel %vm470_vm0, %v9505_v52, %v1074_v36 }
 0x170   : > { %1185 = vrot.lane.b32.xlu1 %v9746_v27, %s8964_s16  ;;  %v1443_v49 = vsel %vm1435_vm1, %v1398_v26, %v1122_v46  ;;  %v1218_v51 = vpop.permute.xlu0 %1217 }
 0x172   : > { %v1170_v21 = vpop.permute.xlu1 %1169  ;;  %1329 = vrot.lane.b32.xlu0 %v9772_v23, %s14801_s21 }
 0x173   : > { %v1476_v34 = vsel %vm1468_vm2, %v1443_v49, %v1170_v21  ;;  %v931_v21 = vld [vmem:[#allocation2 + $0x1c7] sm:$0xff] }
 0x174   : > { %1281 = vrot.lane.b32.xlu1 %v9764_v30, %s8967_s26  ;;  %v1509_v22 = vsel %vm1501_vm3, %v1476_v34, %v1218_v51  ;;  %v1314_v26 = vpop.permute.xlu0 %1313  ;;  %v932_v34 = vld [vmem:[#allocation2 + $0x1cf] sm:$0xff] }
 0x176   : > { %v1266_v52 = vpop.permute.xlu1 %1265  ;;  %1091 = vrot.lane.b32.xlu0 %v997_v40, %s8963_s13  ;;  %v9793_v40 = vpack.c.bf16 %v883_v45, %v882_v39 }
 0x177   : > { %v1542_v36 = vsel %vm1534_vm4, %v1509_v22, %v1266_v52  ;;  %v9796_v52 = vpack.c.bf16 %v932_v34, %v931_v21 }
 0x178   : > { %1377 = vrot.lane.b32.xlu1 %v998_v2, %s8969_s6  ;;  %v1575_v35 = vsel %vm1567_vm5, %v1542_v36, %v1314_v26  ;;  %v1076_v49 = vpop.permute.xlu0 %1075  ;;  %v979_v36 = vld [vmem:[#allocation2 + $0x1c8] sm:$0xff]  ;;  %v980_v26 = vld [vmem:[#allocation2 + $0x1d0] sm:$0xff] }
 0x179   : > { %v1401_v51 = vsel %vm470_vm0, %v9573_v25, %v1076_v49  ;;  %v999_v25 = vpack.c.bf16 %v980_v26, %v979_v36 }
 0x17a   : > { %v1362_v38 = vpop.permute.xlu1 %1361  ;;  %1187 = vrot.lane.b32.xlu0 %v9772_v23, %s8964_s16 }
 0x17b   : > { %v1611_v46 = vsel %vm1600_vm6, %v1575_v35, %v1362_v38 }
 0x17c   : > { %1139 = vrot.lane.b32.xlu1 %v9764_v30, %s8965_s27  ;;  %1826 = vmatmul.mubr.bf16.gmra.mrb[12].mxu0 %v1611_v46  ;;  %v1172_v38 = vpop.permute.xlu0 %1171 }
 0x17d   : > { %8355 = vmatprep.mubr.msk.bf16.mxu0 %vm470_vm0, %v9651_v24 }
 0x17e   : > { %v1124_v22 = vpop.permute.xlu1 %1123  ;;  %1283 = vrot.lane.b32.xlu0 %v9793_v40, %s8967_s26 }
 0x17f   : > { %v1445_v35 = vsel %vm1435_vm1, %v1401_v51, %v1124_v22  ;;  %v884_v22 = vld [vmem:[#allocation2 + $0x1c9] sm:$0xff] }
 0x180   : > { %1235 = vrot.lane.b32.xlu1 %v998_v2, %s8966_s8  ;;  %v1478_v24 = vsel %vm1468_vm2, %v1445_v35, %v1172_v38  ;;  %v1268_v45 = vpop.permute.xlu0 %1267  ;;  %v885_v35 = vld [vmem:[#allocation2 + $0x1d1] sm:$0xff] }
 0x181   : > { %v9814_v26 = vpack.c.bf16 %v885_v35, %v884_v22 }
 0x182   : > { %v1220_v46 = vpop.permute.xlu1 %1219  ;;  %1379 = vrot.lane.b32.xlu0 %v999_v25, %s8969_s6 }
 0x183   : > { %v1511_v39 = vsel %vm1501_vm3, %v1478_v24, %v1220_v46  ;;  %v933_v24 = vld [vmem:[#allocation2 + $0x1e7] sm:$0xff]  ;;  %v934_v46 = vld [vmem:[#allocation2 + $0x1ef] sm:$0xff] }
 0x184   : > { %1331 = vrot.lane.b32.xlu1 %v9796_v52, %s14801_s21  ;;  %v1544_v49 = vsel %vm1534_vm4, %v1511_v39, %v1268_v45  ;;  %v1364_v51 = vpop.permute.xlu0 %1363  ;;  %v981_v45 = vld [vmem:[#allocation2 + $0x1e8] sm:$0xff] }
 0x186   : > { %v1316_v21 = vpop.permute.xlu1 %1315  ;;  %1141 = vrot.lane.b32.xlu0 %v9793_v40, %s8965_s27 }
 0x187   : > { %v1577_v34 = vsel %vm1567_vm5, %v1544_v49, %v1316_v21  ;;  %v982_v49 = vld [vmem:[#allocation2 + $0x1f0] sm:$0xff] }
 0x188   : > { %1093 = vrot.lane.b32.xlu1 %v998_v2, %s8963_s13  ;;  %v1614_v36 = vsel %vm1600_vm6, %v1577_v34, %v1364_v51  ;;  %v1126_v39 = vpop.permute.xlu0 %1125  ;;  %v9822_v51 = vpack.c.bf16 %v934_v46, %v933_v24  ;;  %v1000_v22 = vpack.c.bf16 %v982_v49, %v981_v45  ;;  %v886_v45 = vld [vmem:[#allocation2 + $0x1e9] sm:$0xff]  ;;  %v887_v49 = vld [vmem:[#allocation2 + $0x1f1] sm:$0xff] }
 0x189   : > { %1834 = vmatmul.mubr.bf16.gmra.mrb[16].mxu0 %v1614_v36 }
 0x18a   : > { %v1078_v38 = vpop.permute.xlu1 %1077  ;;  %8356 = vmatprep.mubr.msk.bf16.mxu0 %vm470_vm0, %v9666_v42  ;;  %1237 = vrot.lane.b32.xlu0 %v999_v25, %s8966_s8 }
 0x18b   : > { %v1404_v2 = vsel %vm470_vm0, %v9604_v41, %v1078_v38 }
 0x18c   : > { %1189 = vrot.lane.b32.xlu1 %v9796_v52, %s8964_s16  ;;  %v1447_v21 = vsel %vm1435_vm1, %v1404_v2, %v1126_v39  ;;  %v1222_v42 = vpop.permute.xlu0 %1221 }
 0x18e   : > { %v1174_v34 = vpop.permute.xlu1 %1173  ;;  %1333 = vrot.lane.b32.xlu0 %v9822_v51, %s14801_s21 }
 0x18f   : > { %v1480_v35 = vsel %vm1468_vm2, %v1447_v21, %v1174_v34  ;;  %v935_v34 = vld [vmem:[#allocation2 + $0x207] sm:$0xff] }
 0x190   : > { %1285 = vrot.lane.b32.xlu1 %v9814_v26, %s8967_s26  ;;  %v1513_v36 = vsel %vm1501_vm3, %v1480_v35, %v1222_v42  ;;  %v1318_v2 = vpop.permute.xlu0 %1317  ;;  %v936_v35 = vld [vmem:[#allocation2 + $0x20f] sm:$0xff] }
 0x192   : > { %v1270_v41 = vpop.permute.xlu1 %1269  ;;  %1095 = vrot.lane.b32.xlu0 %v999_v25, %s8963_s13  ;;  %v9843_v25 = vpack.c.bf16 %v887_v49, %v886_v45 }
 0x193   : > { %v1546_v38 = vsel %vm1534_vm4, %v1513_v36, %v1270_v41  ;;  %v953_v41 = vpack.c.bf16 %v936_v35, %v935_v34 }
 0x194   : > { %1381 = vrot.lane.b32.xlu1 %v1000_v22, %s8969_s6  ;;  %v1579_v24 = vsel %vm1567_vm5, %v1546_v38, %v1318_v2  ;;  %v1080_v21 = vpop.permute.xlu0 %1079  ;;  %v983_v38 = vld [vmem:[#allocation2 + $0x208] sm:$0xff]  ;;  %v984_v2 = vld [vmem:[#allocation2 + $0x210] sm:$0xff] }
 0x195   : > { %v1407_v42 = vsel %vm470_vm0, %v9629_v53, %v1080_v21  ;;  %v1001_v53 = vpack.c.bf16 %v984_v2, %v983_v38 }
 0x196   : > { %v1366_v46 = vpop.permute.xlu1 %1365  ;;  %1191 = vrot.lane.b32.xlu0 %v9822_v51, %s8964_s16 }
 0x197   : > { %v1617_v39 = vsel %vm1600_vm6, %v1579_v24, %v1366_v46 }
 0x198   : > { %1143 = vrot.lane.b32.xlu1 %v9814_v26, %s8965_s27  ;;  %1842 = vmatmul.mubr.bf16.gmra.mrb[20].mxu0 %v1617_v39  ;;  %v1176_v46 = vpop.permute.xlu0 %1175 }
 0x199   : > { %8357 = vmatprep.mubr.msk.bf16.mxu0 %vm470_vm0, %v9677_v61 }
 0x19a   : > { %v1128_v36 = vpop.permute.xlu1 %1127  ;;  %1287 = vrot.lane.b32.xlu0 %v9843_v25, %s8967_s26 }
 0x19b   : > { %v1449_v24 = vsel %vm1435_vm1, %v1407_v42, %v1128_v36  ;;  %v888_v36 = vld [vmem:[#allocation2 + $0x209] sm:$0xff] }
 0x19c   : > { %1239 = vrot.lane.b32.xlu1 %v1000_v22, %s8966_s8  ;;  %v1482_v39 = vsel %vm1468_vm2, %v1449_v24, %v1176_v46  ;;  %v1272_v49 = vpop.permute.xlu0 %1271  ;;  %v889_v24 = vld [vmem:[#allocation2 + $0x211] sm:$0xff] }
 0x19d   : > { %v9860_v2 = vpack.c.bf16 %v889_v24, %v888_v36 }
 0x19e   : > { %v1224_v61 = vpop.permute.xlu1 %1223  ;;  %1383 = vrot.lane.b32.xlu0 %v1001_v53, %s8969_s6 }
 0x19f   : > { %v1515_v45 = vsel %vm1501_vm3, %v1482_v39, %v1224_v61  ;;  %v937_v39 = vld [vmem:[#allocation2 + $0x227] sm:$0xff]  ;;  %v938_v61 = vld [vmem:[#allocation2 + $0x22f] sm:$0xff] }
 0x1a0   : > { %1335 = vrot.lane.b32.xlu1 %v953_v41, %s14801_s21  ;;  %v1548_v21 = vsel %vm1534_vm4, %v1515_v45, %v1272_v49  ;;  %v1368_v42 = vpop.permute.xlu0 %1367  ;;  %v985_v49 = vld [vmem:[#allocation2 + $0x228] sm:$0xff] }
 0x1a2   : > { %v1320_v34 = vpop.permute.xlu1 %1319  ;;  %1145 = vrot.lane.b32.xlu0 %v9843_v25, %s8965_s27 }
 0x1a3   : > { %v1581_v35 = vsel %vm1567_vm5, %v1548_v21, %v1320_v34  ;;  %v986_v21 = vld [vmem:[#allocation2 + $0x230] sm:$0xff] }
 0x1a4   : > { %1097 = vrot.lane.b32.xlu1 %v1000_v22, %s8963_s13  ;;  %v1620_v38 = vsel %vm1600_vm6, %v1581_v35, %v1368_v42  ;;  %v1130_v45 = vpop.permute.xlu0 %1129  ;;  %v954_v42 = vpack.c.bf16 %v938_v61, %v937_v39 }
 0x1a5   : > { %1850 = vmatmul.mubr.bf16.gmra.mrb[24].mxu0 %v1620_v38 }
 0x1a6   : > { %v1082_v46 = vpop.permute.xlu1 %1081  ;;  %8358 = vmatprep.mubr.msk.bf16.mxu0 %vm470_vm0, %v9692_v60  ;;  %1241 = vrot.lane.b32.xlu0 %v1001_v53, %s8966_s8 }
 0x1a7   : > { %v1410_v22 = vsel %vm470_vm0, %v9654_v33, %v1082_v46  ;;  %v634_v33 = vld [vmem:[#allocation2 + $0x107] sm:$0xff]  ;;  %v635_v46 = vld [vmem:[#allocation2 + $0x10f] sm:$0xff] }
 0x1a8   : > { %1193 = vrot.lane.b32.xlu1 %v953_v41, %s8964_s16  ;;  %v1451_v34 = vsel %vm1435_vm1, %v1410_v22, %v1130_v45  ;;  %v1002_v41 = vpack.c.bf16 %v986_v21, %v985_v49  ;;  %v1226_v24 = vpop.permute.xlu0 %1225  ;;  %v658_v45 = vpack.c.bf16 %v635_v46, %v634_v33  ;;  %v2164_v49 = vld [vmem:[#allocation2 + $0x9] sm:$0xff]  ;;  %v2165_v21 = vld [vmem:[#allocation2 + $0x11] sm:$0xff] }
 0x1aa   : > { %v1178_v35 = vpop.permute.xlu1 %1177  ;;  %1337 = vrot.lane.b32.xlu0 %v954_v42, %s14801_s21  ;;  %s11185_s21 = sld [smem:[#allocation9 + $0x3]] }
 0x1ab   : > { %v1484_v36 = vsel %vm1468_vm2, %v1451_v34, %v1178_v35  ;;  %v2116_v34 = vld [vmem:[#allocation2 + $0x8] sm:$0xff] }
 0x1ac   : > { %1289 = vrot.lane.b32.xlu1 %v9860_v2, %s8967_s26  ;;  %v1517_v60 = vsel %vm1501_vm3, %v1484_v36, %v1226_v24  ;;  %v1322_v53 = vpop.permute.xlu0 %1321  ;;  %v2196_v36 = vpack.c.bf16 %v2165_v21, %v2164_v49  ;;  %v2117_v24 = vld [vmem:[#allocation2 + $0x10] sm:$0xff] }
 0x1ad   : > { %v2148_v42 = vpack.c.bf16 %v2117_v24, %v2116_v34 }
 0x1ae   : > { %v1274_v38 = vpop.permute.xlu1 %1273 }
 0x1af   : > { %v1550_v22 = vsel %vm1534_vm4, %v1517_v60, %v1274_v38  ;;  %2516 = vrot.lane.b32.xlu0 %v2148_v42, %s8963_s13 }
 0x1b0   : > { %1385 = vrot.lane.b32.xlu1 %v1002_v41, %s8969_s6  ;;  %v1583_v39 = vsel %vm1567_vm5, %v1550_v22, %v1322_v53  ;;  %v1084_v9 = vpop.permute.xlu0 %1083 }
 0x1b1   : > { %v1413_v41 = vsel %vm470_vm0, %v658_v45, %v1084_v9 }
 0x1b2   : > { %v1370_v61 = vpop.permute.xlu1 %1369 }
 0x1b3   : > { %v1623_v35 = vsel %vm1600_vm6, %v1583_v39, %v1370_v61 }
 0x1b4   : > { %1858 = vmatmul.mubr.bf16.gmra.mrb[28].mxu0 %v1623_v35  ;;  %2564 = vrot.lane.b32.xlu1 %v2196_v36, %s8965_s27  ;;  %v1180_v33 = vpop.permute.xlu0 %1179 }
 0x1b5   : > { %8359 = vmatprep.mubr.msk.bf16.mxu0 %vm470_vm0, %v9714_v28 }
 0x1b6   : > { %v1132_v60 = vpop.permute.xlu1 %1131 }
 0x1b7   : > { %v1453_v38 = vsel %vm1435_vm1, %v1413_v41, %v1132_v60 }
 0x1b8   : > { %v1486_v46 = vsel %vm1468_vm2, %v1453_v38, %v1180_v33  ;;  %v1276_v39 = vpop.permute.xlu0 %1275 }
 0x1ba   : > { %v1228_v22 = vpop.permute.xlu1 %1227 }
 0x1bb   : > { %v1519_v53 = vsel %vm1501_vm3, %v1486_v46, %v1228_v22 }
 0x1bc   : > { %v1552_v61 = vsel %vm1534_vm4, %v1519_v53, %v1276_v39  ;;  %v1372_v21 = vpop.permute.xlu0 %1371 }
 0x1be   : > { %v1324_v49 = vpop.permute.xlu1 %1323 }
 0x1bf   : > { %v1585_v28 = vsel %vm1567_vm5, %v1552_v61, %v1324_v49 }
 0x1c0   : > { %v1626_v9 = vsel %vm1600_vm6, %v1585_v28, %v1372_v21  ;;  %v1134_v35 = vpop.permute.xlu0 %1133 }
 0x1c1   : > { %1866 = vmatmul.mubr.bf16.gmra.mrb[32].mxu0 %v1626_v9 }
 0x1c2   : > { %v1086_v34 = vpop.permute.xlu1 %1085  ;;  %8360 = vmatprep.mubr.msk.bf16.mxu0 %vm470_vm0, %v9743_v37 }
 0x1c3   : > { %v1416_v45 = vsel %vm470_vm0, %v9680_v29, %v1086_v34 }
 0x1c4   : > { %v1455_v36 = vsel %vm1435_vm1, %v1416_v45, %v1134_v35  ;;  %v1230_v41 = vpop.permute.xlu0 %1229 }
 0x1c6   : > { %v1182_v24 = vpop.permute.xlu1 %1181 }
 0x1c7   : > { %v1488_v42 = vsel %vm1468_vm2, %v1455_v36, %v1182_v24 }
 0x1c8   : > { %v1521_v60 = vsel %vm1501_vm3, %v1488_v42, %v1230_v41  ;;  %v1326_v46 = vpop.permute.xlu0 %1325 }
 0x1ca   : > { %v1278_v38 = vpop.permute.xlu1 %1277 }
 0x1cb   : > { %v1554_v33 = vsel %vm1534_vm4, %v1521_v60, %v1278_v38 }
 0x1cc   : > { %v1587_v22 = vsel %vm1567_vm5, %v1554_v33, %v1326_v46  ;;  %v1088_v29 = vpop.permute.xlu0 %1087 }
 0x1cd   : > { %v1419_v39 = vsel %vm470_vm0, %v9695_v50, %v1088_v29 }
 0x1ce   : > { %v1374_v53 = vpop.permute.xlu1 %1373 }
 0x1cf   : > { %v1629_v37 = vsel %vm1600_vm6, %v1587_v22, %v1374_v53 }
 0x1d0   : > { %1874 = vmatmul.mubr.bf16.gmra.mrb[36].mxu0 %v1629_v37  ;;  %v1184_v28 = vpop.permute.xlu0 %1183 }
 0x1d1   : > { %8361 = vmatprep.mubr.msk.bf16.mxu0 %vm470_vm0, %v9764_v30 }
 0x1d2   : > { %v1136_v61 = vpop.permute.xlu1 %1135 }
 0x1d3   : > { %v1457_v49 = vsel %vm1435_vm1, %v1419_v39, %v1136_v61 }
 0x1d4   : > { %v1490_v21 = vsel %vm1468_vm2, %v1457_v49, %v1184_v28  ;;  %v1280_v45 = vpop.permute.xlu0 %1279 }
 0x1d6   : > { %v1232_v34 = vpop.permute.xlu1 %1231 }
 0x1d7   : > { %v1523_v9 = vsel %vm1501_vm3, %v1490_v21, %v1232_v34 }
 0x1d8   : > { %v1556_v35 = vsel %vm1534_vm4, %v1523_v9, %v1280_v45  ;;  %v1376_v42 = vpop.permute.xlu0 %1375 }
 0x1da   : > { %v1328_v36 = vpop.permute.xlu1 %1327 }
 0x1db   : > { %v1589_v24 = vsel %vm1567_vm5, %v1556_v35, %v1328_v36 }
 0x1dc   : > { %v1632_v41 = vsel %vm1600_vm6, %v1589_v24, %v1376_v42  ;;  %v1138_v60 = vpop.permute.xlu0 %1137 }
 0x1dd   : > { %1882 = vmatmul.mubr.bf16.gmra.mrb[40].mxu0 %v1632_v41 }
 0x1de   : > { %v1090_v30 = vpop.permute.xlu1 %1089  ;;  %8362 = vmatprep.mubr.msk.bf16.mxu0 %vm470_vm0, %v9793_v40 }
 0x1df   : > { %v1422_v50 = vsel %vm470_vm0, %v9722_v54, %v1090_v30 }
 0x1e0   : > { %v1459_v38 = vsel %vm1435_vm1, %v1422_v50, %v1138_v60  ;;  %v1234_v22 = vpop.permute.xlu0 %1233 }
 0x1e2   : > { %v1186_v33 = vpop.permute.xlu1 %1185 }
 0x1e3   : > { %v1492_v46 = vsel %vm1468_vm2, %v1459_v38, %v1186_v33 }
 0x1e4   : > { %v1525_v53 = vsel %vm1501_vm3, %v1492_v46, %v1234_v22  ;;  %v1330_v39 = vpop.permute.xlu0 %1329 }
 0x1e6   : > { %v1282_v37 = vpop.permute.xlu1 %1281 }
 0x1e7   : > { %v1558_v29 = vsel %vm1534_vm4, %v1525_v53, %v1282_v37 }
 0x1e8   : > { %v1591_v61 = vsel %vm1567_vm5, %v1558_v29, %v1330_v39  ;;  %v1092_v54 = vpop.permute.xlu0 %1091 }
 0x1e9   : > { %v1425_v28 = vsel %vm470_vm0, %v9746_v27, %v1092_v54 }
 0x1ea   : > { %v1378_v49 = vpop.permute.xlu1 %1377 }
 0x1eb   : > { %v1635_v40 = vsel %vm1600_vm6, %v1591_v61, %v1378_v49 }
 0x1ec   : > { %1890 = vmatmul.mubr.bf16.gmra.mrb[44].mxu0 %v1635_v40  ;;  %v1188_v9 = vpop.permute.xlu0 %1187 }
 0x1ed   : > { %8363 = vmatprep.mubr.msk.bf16.mxu0 %vm470_vm0, %v9814_v26 }
 0x1ee   : > { %v1140_v21 = vpop.permute.xlu1 %1139 }
 0x1ef   : > { %v1461_v34 = vsel %vm1435_vm1, %v1425_v28, %v1140_v21 }
 0x1f0   : > { %v1494_v45 = vsel %vm1468_vm2, %v1461_v34, %v1188_v9  ;;  %v1284_v24 = vpop.permute.xlu0 %1283 }
 0x1f2   : > { %v1236_v35 = vpop.permute.xlu1 %1235 }
 0x1f3   : > { %v1527_v36 = vsel %vm1501_vm3, %v1494_v45, %v1236_v35 }
 0x1f4   : > { %v1560_v42 = vsel %vm1534_vm4, %v1527_v36, %v1284_v24  ;;  %v1380_v50 = vpop.permute.xlu0 %1379  ;;  %v1033_v24 = vld [vmem:[#allocation2 + $0x229] sm:$0xff] }
 0x1f6   : > { %v1332_v30 = vpop.permute.xlu1 %1331 }
 0x1f7   : > { %v1593_v41 = vsel %vm1567_vm5, %v1560_v42, %v1332_v30  ;;  %v1034_v42 = vld [vmem:[#allocation2 + $0x231] sm:$0xff] }
 0x1f8   : > { %v1638_v60 = vsel %vm1600_vm6, %v1593_v41, %v1380_v50  ;;  %v1142_v38 = vpop.permute.xlu0 %1141  ;;  %v1050_v50 = vpack.c.bf16 %v1034_v42, %v1033_v24  ;;  %v8722_v24 = vld [vmem:[%s15051_s2 + $0x20] sm:$0xff]  }
 0x1f9   : > { %1898 = vmatmul.mubr.bf16.gmra.mrb[48].mxu0 %v1638_v60 }
 0x1fa   : > { %v1094_v26 = vpop.permute.xlu1 %1093  ;;  %8364 = vmatprep.mubr.msk.bf16.mxu0 %vm470_vm0, %v9843_v25 }
 0x1fb   : > { %v1428_v27 = vsel %vm470_vm0, %v9772_v23, %v1094_v26 }
 0x1fc   : > { %v1463_v33 = vsel %vm1435_vm1, %v1428_v27, %v1142_v38  ;;  %v1238_v53 = vpop.permute.xlu0 %1237  ;;  %v8718_v27 = vld [vmem:[%s15051_s2] sm:$0xff]  }
 0x1fd   : > { %3213 = vmatpush1.bf16.msra.mxu1 %v8718_v27  ;;  %v8724_v27 = vld [vmem:[%s15051_s2 + $0x30] sm:$0xff]  }
 0x1fe   : > { %v1190_v46 = vpop.permute.xlu1 %1189 }
 0x1ff   : > { %v1496_v22 = vsel %vm1468_vm2, %v1463_v33, %v1190_v46 }
 0x200   : > { %v1529_v37 = vsel %vm1501_vm3, %v1496_v22, %v1238_v53  ;;  %v1334_v61 = vpop.permute.xlu0 %1333  ;;  %v15052_v53 = vmov 0  }
 0x201   : > { %3214 = vmatprep.subr.bf16.mxu1 %v15052_v53 }
 0x202   : > { %v1286_v29 = vpop.permute.xlu1 %1285 }
 0x203   : > { %v1562_v39 = vsel %vm1534_vm4, %v1529_v37, %v1286_v29  ;;  %v8719_v37 = vld [vmem:[%s15051_s2 + $0x8] sm:$0xff]  }
 0x204   : > { %v1595_v49 = vsel %vm1567_vm5, %v1562_v39, %v1334_v61  ;;  %v1096_v23 = vpop.permute.xlu0 %1095  ;;  %3215 = vmatpush1.bf16.msra.mxu1 %v8719_v37 }
 0x205   : > { %v1431_v54 = vsel %vm470_vm0, %v9796_v52, %v1096_v23  ;;  %3216 = vmatprep.subr.bf16.mxu1 %v15052_v53 }
 0x206   : > { %v1382_v40 = vpop.permute.xlu1 %1381 }
 0x207   : > { %v1641_v25 = vsel %vm1600_vm6, %v1595_v49, %v1382_v40 }
 0x208   : > { %1906 = vmatmul.mubr.bf16.gmra.mrb[52].mxu0 %v1641_v25  ;;  %v1192_v34 = vpop.permute.xlu0 %1191 }
 0x209   : > { %8365 = vmatprep.mubr.msk.bf16.mxu0 %vm470_vm0, %v9860_v2 }
 0x20a   : > { %v1144_v28 = vpop.permute.xlu1 %1143 }
 0x20b   : > { %v1465_v21 = vsel %vm1435_vm1, %v1431_v54, %v1144_v28 }
 0x20c   : > { %v1498_v9 = vsel %vm1468_vm2, %v1465_v21, %v1192_v34  ;;  %v1288_v36 = vpop.permute.xlu0 %1287  ;;  %v8721_v21 = vld [vmem:[%s15051_s2 + $0x18] sm:$0xff]   ;;  %v9975_v34 = vld [vmem:[%s15053_s3] ss:$0 sm:$0xff] }
 0x20e   : > { %v1240_v45 = vpop.permute.xlu1 %1239 }
 0x20f   : > { %v1531_v35 = vsel %vm1501_vm3, %v1498_v9, %v1240_v45  ;;  %v9980_v9 = vld [vmem:[%s15053_s3 + $0x1] ss:$0 sm:$0xff] }
 0x210   : > { %v1564_v30 = vsel %vm1534_vm4, %v1531_v35, %v1288_v36  ;;  %v1384_v26 = vpop.permute.xlu0 %1383 }
 0x212   : > { %v1336_v41 = vpop.permute.xlu1 %1335 }
 0x213   : > { %v1597_v2 = vsel %vm1567_vm5, %v1564_v30, %v1336_v41 }
 0x214   : > { %v1644_v60 = vsel %vm1600_vm6, %v1597_v2, %v1384_v26  ;;  %v1146_v33 = vpop.permute.xlu0 %1145 }
 0x215   : > { %1914 = vmatmul.mubr.bf16.gmra.mrb[56].mxu0 %v1644_v60 }
 0x216   : > { %v1098_v52 = vpop.permute.xlu1 %1097  ;;  %8366 = vmatprep.mubr.msk.bf16.mxu0 %vm470_vm0, %v1050_v50 }
 0x217   : > { %v1434_v38 = vsel %vm470_vm0, %v9822_v51, %v1098_v52  ;;  %v8720_v51 = vld [vmem:[%s15051_s2 + $0x10] sm:$0xff]   ;;  %v8723_v52 = vld [vmem:[%s15051_s2 + $0x28] sm:$0xff]  }
 0x218   : > { %v1467_v46 = vsel %vm1435_vm1, %v1434_v38, %v1146_v33  ;;  %v1242_v39 = vpop.permute.xlu0 %1241  ;;  %3217 = vmatpush1.bf16.msra.mxu1 %v8720_v51  ;;  %v8725_v33 = vld [vmem:[%s15051_s2 + $0x38] sm:$0xff]  }
 0x219   : > { %3218 = vmatprep.subr.bf16.mxu1 %v15052_v53 }
 0x21a   : > { %v1194_v22 = vpop.permute.xlu1 %1193 }
 0x21b   : > { %v1500_v29 = vsel %vm1468_vm2, %v1467_v46, %v1194_v22 }
 0x21c   : > { %v1533_v61 = vsel %vm1501_vm3, %v1500_v29, %v1242_v39  ;;  %v1338_v25 = vpop.permute.xlu0 %1337  ;;  %3219 = vmatpush1.bf16.msra.mxu1 %v8721_v21 }
 0x21d   : > { %3220 = vmatprep.subr.bf16.mxu1 %v15052_v53 }
 0x21e   : > { %v1290_v49 = vpop.permute.xlu1 %1289 }
 0x21f   : > { %v1566_v40 = vsel %vm1534_vm4, %v1533_v61, %v1290_v49 }
 0x220   : > { %v1599_v23 = vsel %vm1567_vm5, %v1566_v40, %v1338_v25  ;;  %3221 = vmatpush1.bf16.msra.mxu1 %v8722_v24 }
 0x221   : > { %3222 = vmatprep.subr.bf16.mxu1 %v15052_v53 }
 0x222   : > { %v1386_v54 = vpop.permute.xlu1 %1385 }
 0x223   : > { %v1647_v28 = vsel %vm1600_vm6, %v1599_v23, %v1386_v54 }
 0x224   : > { %1922 = vmatmul.mubr.bf16.gmra.mrb[60].mxu0 %v1647_v28  ;;  %v1803_v45 = vpop.f32.mrb[0].mxu0  ;;  %3223 = vmatpush1.bf16.msra.mxu1 %v8723_v52  ;;  %v8726_v28 = vld [vmem:[%s15051_s2 + $0x40] sm:$0xff]   ;;  %s11217_s2 = sld [smem:[#allocation8 + $0xf]] }
 0x225   : > { %v1934_v35 = vmul.f32 %v9975_v34, %v1803_v45  ;;  %v1805_v36 = vpop.f32.mrb[1].mxu0  ;;  %3224 = vmatprep.subr.bf16.mxu1 %v15052_v53 }
 0x226   : > { %v1806_v42 = vpop.f32.mrb[2].mxu0 }
 0x227   : > { %v1970_v30 = vadd.f32 %v9980_v9, %v1934_v35  ;;  %v1935_v41 = vmul.f32 %v9975_v34, %v1806_v42  ;;  %v1808_v50 = vpop.f32.mrb[3].mxu0  ;;  %v15054_v42 = vmov 0.0  }
 0x228   : > { %3225 = vmatpush1.bf16.msra.mxu1 %v8724_v27  ;;  %8580 = vmatprep.mubr.msk.bf16.mxu0 %vm8970_vm7, %v15054_v42  ;;  %544 = vst.msk [vmem:[#allocation3] sm:$0xff] %vm543_vm11, %v15054_v42  ;;  %545 = vst.msk [vmem:[#allocation3 + $0x8] sm:$0xff] %vm543_vm11, %v15054_v42 }
 0x229   : > { %v2002_v2 = vmax.f32 %v1970_v30, 0.0  ;;  %v1971_v26 = vadd.f32 %v9980_v9, %v1935_v41  ;;  %3226 = vmatprep.subr.bf16.mxu1 %v15052_v53  ;;  %548 = vst.msk [vmem:[#allocation3 + $0x18] sm:$0xff] %vm543_vm11, %v15054_v42  ;;  %549 = vst.msk [vmem:[#allocation3 + $0x20] sm:$0xff] %vm543_vm11, %v15054_v42  ;;  %vm5412_vm11 = vcmask 1044480  }
 0x22a   : > { %547 = vst.msk [vmem:[#allocation3 + $0x10] sm:$0x3f] %vm546_vm12, %v15054_v42  ;;  %550 = vst.msk [vmem:[#allocation3 + $0x28] sm:$0x3f] %vm546_vm12, %v15054_v42  ;;  %vm5651_vm12 = vcmask 1043456  }
 0x22b   : > { %2036 = vst.msk [vmem:[#allocation2 + $0x28] sm:$0xff] %vm470_vm0, %v2002_v2  ;;  %v2003_v60 = vmax.f32 %v1971_v26, 0.0 }
 0x22c   : > { %3227 = vmatpush1.bf16.msra.mxu1 %v8725_v33 }
 0x22d   : > { %2037 = vst.msk [vmem:[#allocation2 + $0x30] sm:$0xff] %vm470_vm0, %v2003_v60  ;;  %3228 = vmatprep.subr.bf16.mxu1 %v15052_v53 }
 0x230   : > { %3229 = vmatpush1.bf16.msra.mxu1 %v8726_v28 }
 0x231   : > { %8584 = vmatprep.subr.bf16.mxu1 %v15054_v42 }
 0x232   : > { %v2260_v29 = vld [vmem:[#allocation2 + $0x28] sm:$0xff] }
 0x233   : > { %v1811_v38 = vpop.f32.mrb[4].mxu0  ;;  %v2212_v40 = vld [vmem:[#allocation2 + $0x27] sm:$0xff] }
 0x234   : > { %v1936_v46 = vmul.f32 %v9975_v34, %v1811_v38  ;;  %v1813_v22 = vpop.f32.mrb[5].mxu0  ;;  %v2261_v51 = vld [vmem:[#allocation2 + $0x30] sm:$0xff] }
 0x235   : > { %v1814_v37 = vpop.f32.mrb[6].mxu0  ;;  %v2213_v25 = vld [vmem:[#allocation2 + $0x2f] sm:$0xff]  ;;  %v2292_v23 = vpack.c.bf16 %v2261_v51, %v2260_v29 }
 0x236   : > { %v1972_v39 = vadd.f32 %v9980_v9, %v1936_v46  ;;  %v1937_v61 = vmul.f32 %v9975_v34, %v1814_v37  ;;  %v1816_v49 = vpop.f32.mrb[7].mxu0  ;;  %v10008_v54 = vpack.c.bf16 %v2213_v25, %v2212_v40  ;;  %v2308_v35 = vld [vmem:[#allocation2 + $0x29] sm:$0xff]  ;;  %v2309_v36 = vld [vmem:[#allocation2 + $0x31] sm:$0xff] }
 0x237   : > { %2660 = vrot.lane.b32.xlu1 %v2292_v23, %s8966_s8  ;;  %v2340_v24 = vpack.c.bf16 %v2309_v36, %v2308_v35 }
 0x238   : > { %v2004_v21 = vmax.f32 %v1972_v39, 0.0  ;;  %v1973_v45 = vadd.f32 %v9980_v9, %v1937_v61  ;;  %2612 = vrot.lane.b32.xlu0 %v10008_v54, %s8964_s16 }
 0x23a   : > { %2038 = vst.msk [vmem:[#allocation2 + $0x48] sm:$0xff] %vm470_vm0, %v2004_v21  ;;  %v2005_v53 = vmax.f32 %v1973_v45, 0.0 }
 0x23b   : > { %2518 = vrot.lane.b32.xlu1 %v2292_v23, %s8963_s13 }
 0x23c   : > { %2039 = vst.msk [vmem:[#allocation2 + $0x50] sm:$0xff] %vm470_vm0, %v2005_v53  ;;  %2708 = vrot.lane.b32.xlu0 %v2340_v24, %s8967_s26 }
 0x240   : > { %2566 = vrot.lane.b32.xlu0 %v2340_v24, %s8965_s27  ;;  %v1819_v30 = vpop.f32.mrb[8].mxu0 }
 0x241   : > { %v2404_v41 = vld [vmem:[#allocation2 + $0x48] sm:$0xff]  ;;  %v1938_v50 = vmul.f32 %v9975_v34, %v1819_v30  ;;  %v1821_v2 = vpop.f32.mrb[9].mxu0 }
 0x242   : > { %v1822_v27 = vpop.f32.mrb[10].mxu0  ;;  %v2356_v46 = vld [vmem:[#allocation2 + $0x47] sm:$0xff] }
 0x243   : > { %v2452_v26 = vld [vmem:[#allocation2 + $0x49] sm:$0xff]  ;;  %v2453_v52 = vld [vmem:[#allocation2 + $0x51] sm:$0xff]  ;;  %v1974_v37 = vadd.f32 %v9980_v9, %v1938_v50  ;;  %v1939_v29 = vmul.f32 %v9975_v34, %v1822_v27  ;;  %v1824_v39 = vpop.f32.mrb[11].mxu0 }
 0x244   : > { %v2405_v60 = vld [vmem:[#allocation2 + $0x50] sm:$0xff]  ;;  %v2484_v38 = vpack.c.bf16 %v2453_v52, %v2452_v26 }
 0x245   : > { %v2436_v33 = vpack.c.bf16 %v2405_v60, %v2404_v41  ;;  %v2357_v22 = vld [vmem:[#allocation2 + $0x4f] sm:$0xff]  ;;  %v2006_v49 = vmax.f32 %v1974_v37, 0.0  ;;  %v1975_v51 = vadd.f32 %v9980_v9, %v1939_v29 }
 0x246   : > { %v10026_v61 = vpack.c.bf16 %v2357_v22, %v2356_v46  ;;  %8378 = vmatprep.mubr.msk.bf16.mxu1 %vm470_vm0, %v2484_v38 }
 0x247   : > { %2804 = vrot.lane.b32.xlu0 %v2436_v33, %s8969_s6  ;;  %2040 = vst.msk [vmem:[#allocation2 + $0x68] sm:$0xff] %vm470_vm0, %v2006_v49  ;;  %v2007_v40 = vmax.f32 %v1975_v51, 0.0 }
 0x248   : > { %2756 = vrot.lane.b32.xlu1 %v10026_v61, %s15055_s7 }
 0x249   : > { %2041 = vst.msk [vmem:[#allocation2 + $0x70] sm:$0xff] %vm470_vm0, %v2007_v40 }
 0x24b   : > { %2662 = vrot.lane.b32.xlu0 %v2436_v33, %s8966_s8 }
 0x24c   : > { %2614 = vrot.lane.b32.xlu1 %v10026_v61, %s8964_s16 }
 0x24e   : > { %v2358_v45 = vld [vmem:[#allocation2 + $0x67] sm:$0xff] }
 0x24f   : > { %2520 = vrot.lane.b32.xlu0 %v2436_v33, %s8963_s13  ;;  %v1827_v25 = vpop.f32.mrb[12].mxu0  ;;  %v2406_v30 = vld [vmem:[#allocation2 + $0x68] sm:$0xff] }
 0x250   : > { %2710 = vrot.lane.b32.xlu1 %v2484_v38, %s8967_s26  ;;  %v1940_v23 = vmul.f32 %v9975_v34, %v1827_v25  ;;  %v1829_v28 = vpop.f32.mrb[13].mxu0  ;;  %v2359_v24 = vld [vmem:[#allocation2 + $0x6f] sm:$0xff] }
 0x251   : > { %v1830_v21 = vpop.f32.mrb[14].mxu0  ;;  %v2407_v41 = vld [vmem:[#allocation2 + $0x70] sm:$0xff]  ;;  %v10044_v50 = vpack.c.bf16 %v2359_v24, %v2358_v45 }
 0x252   : > { %v1976_v35 = vadd.f32 %v9980_v9, %v1940_v23  ;;  %v1941_v36 = vmul.f32 %v9975_v34, %v1830_v21  ;;  %v1832_v53 = vpop.f32.mrb[15].mxu0  ;;  %v2437_v2 = vpack.c.bf16 %v2407_v41, %v2406_v30  ;;  %v2312_v27 = vld [vmem:[#allocation2 + $0x69] sm:$0xff]  ;;  %v2313_v33 = vld [vmem:[#allocation2 + $0x71] sm:$0xff] }
 0x253   : > { %2758 = vrot.lane.b32.xlu0 %v10044_v50, %s15055_s7 }
 0x254   : > { %2568 = vrot.lane.b32.xlu1 %v2484_v38, %s8965_s27  ;;  %v2008_v26 = vmax.f32 %v1976_v35, 0.0  ;;  %v1977_v52 = vadd.f32 %v9980_v9, %v1941_v36  ;;  %v10055_v38 = vpack.c.bf16 %v2313_v33, %v2312_v27 }
 0x256   : > { %2042 = vst.msk [vmem:[#allocation2 + $0x88] sm:$0xff] %vm470_vm0, %v2008_v26  ;;  %v2009_v60 = vmax.f32 %v1977_v52, 0.0 }
 0x257   : > { %2616 = vrot.lane.b32.xlu0 %v10044_v50, %s8964_s16 }
 0x258   : > { %2806 = vrot.lane.b32.xlu1 %v2437_v2, %s8969_s6  ;;  %2043 = vst.msk [vmem:[#allocation2 + $0x90] sm:$0xff] %vm470_vm0, %v2009_v60 }
 0x25b   : > { %2712 = vrot.lane.b32.xlu0 %v10055_v38, %s8967_s26 }
 0x25c   : > { %2664 = vrot.lane.b32.xlu1 %v2437_v2, %s8966_s8  ;;  %v1835_v46 = vpop.f32.mrb[16].mxu0 }
 0x25d   : > { %v1942_v22 = vmul.f32 %v9975_v34, %v1835_v46  ;;  %v1837_v37 = vpop.f32.mrb[17].mxu0  ;;  %v2360_v29 = vld [vmem:[#allocation2 + $0x87] sm:$0xff] }
 0x25e   : > { %v1838_v49 = vpop.f32.mrb[18].mxu0  ;;  %v2408_v21 = vld [vmem:[#allocation2 + $0x88] sm:$0xff] }
 0x25f   : > { %v2361_v39 = vld [vmem:[#allocation2 + $0x8f] sm:$0xff]  ;;  %v1978_v25 = vadd.f32 %v9980_v9, %v1942_v22  ;;  %v1943_v23 = vmul.f32 %v9975_v34, %v1838_v49  ;;  %2570 = vrot.lane.b32.xlu0 %v10055_v38, %s8965_s27  ;;  %v1840_v28 = vpop.f32.mrb[19].mxu0 }
 0x260   : > { %2522 = vrot.lane.b32.xlu1 %v2437_v2, %s8963_s13  ;;  %v10061_v51 = vpack.c.bf16 %v2361_v39, %v2360_v29  ;;  %v2409_v40 = vld [vmem:[#allocation2 + $0x90] sm:$0xff] }
 0x261   : > { %v2010_v45 = vmax.f32 %v1978_v25, 0.0  ;;  %v1979_v35 = vadd.f32 %v9980_v9, %v1943_v23  ;;  %v2438_v36 = vpack.c.bf16 %v2409_v40, %v2408_v21  ;;  %v2314_v24 = vld [vmem:[#allocation2 + $0x89] sm:$0xff]  ;;  %v2315_v30 = vld [vmem:[#allocation2 + $0x91] sm:$0xff] }
 0x262   : > { %v10076_v41 = vpack.c.bf16 %v2315_v30, %v2314_v24 }
 0x263   : > { %2044 = vst.msk [vmem:[#allocation2 + $0xa8] sm:$0xff] %vm470_vm0, %v2010_v45  ;;  %v2011_v53 = vmax.f32 %v1979_v35, 0.0  ;;  %2808 = vrot.lane.b32.xlu0 %v2438_v36, %s8969_s6 }
 0x264   : > { %2760 = vrot.lane.b32.xlu1 %v10061_v51, %s15055_s7 }
 0x265   : > { %2045 = vst.msk [vmem:[#allocation2 + $0xb0] sm:$0xff] %vm470_vm0, %v2011_v53 }
 0x267   : > { %2666 = vrot.lane.b32.xlu0 %v2438_v36, %s8966_s8 }
 0x268   : > { %2618 = vrot.lane.b32.xlu1 %v10061_v51, %s8964_s16 }
 0x26a   : > { %v2362_v27 = vld [vmem:[#allocation2 + $0xa7] sm:$0xff] }
 0x26b   : > { %v1843_v2 = vpop.f32.mrb[20].mxu0  ;;  %2524 = vrot.lane.b32.xlu0 %v2438_v36, %s8963_s13  ;;  %v2410_v29 = vld [vmem:[#allocation2 + $0xa8] sm:$0xff] }
 0x26c   : > { %2714 = vrot.lane.b32.xlu1 %v10076_v41, %s8967_s26  ;;  %v1944_v26 = vmul.f32 %v9975_v34, %v1843_v2  ;;  %v1845_v52 = vpop.f32.mrb[21].mxu0  ;;  %v2363_v37 = vld [vmem:[#allocation2 + $0xaf] sm:$0xff] }
 0x26d   : > { %v1846_v60 = vpop.f32.mrb[22].mxu0  ;;  %v2411_v39 = vld [vmem:[#allocation2 + $0xb0] sm:$0xff]  ;;  %v10086_v49 = vpack.c.bf16 %v2363_v37, %v2362_v27 }
 0x26e   : > { %v1980_v33 = vadd.f32 %v9980_v9, %v1944_v26  ;;  %v1945_v46 = vmul.f32 %v9975_v34, %v1846_v60  ;;  %v1848_v22 = vpop.f32.mrb[23].mxu0  ;;  %v2439_v40 = vpack.c.bf16 %v2411_v39, %v2410_v29  ;;  %v2316_v21 = vld [vmem:[#allocation2 + $0xa9] sm:$0xff]  ;;  %v2317_v45 = vld [vmem:[#allocation2 + $0xb1] sm:$0xff] }
 0x26f   : > { %2762 = vrot.lane.b32.xlu0 %v10086_v49, %s15055_s7  ;;  %v10097_v35 = vpack.c.bf16 %v2317_v45, %v2316_v21 }
 0x270   : > { %2572 = vrot.lane.b32.xlu1 %v10076_v41, %s8965_s27  ;;  %v2012_v25 = vmax.f32 %v1980_v33, 0.0  ;;  %v1981_v23 = vadd.f32 %v9980_v9, %v1945_v46 }
 0x272   : > { %2046 = vst.msk [vmem:[#allocation2 + $0xc8] sm:$0xff] %vm470_vm0, %v2012_v25  ;;  %v2013_v28 = vmax.f32 %v1981_v23, 0.0 }
 0x273   : > { %2620 = vrot.lane.b32.xlu0 %v10086_v49, %s8964_s16 }
 0x274   : > { %2810 = vrot.lane.b32.xlu1 %v2439_v40, %s8969_s6  ;;  %2047 = vst.msk [vmem:[#allocation2 + $0xd0] sm:$0xff] %vm470_vm0, %v2013_v28 }
 0x277   : > { %2716 = vrot.lane.b32.xlu0 %v10097_v35, %s8967_s26 }
 0x278   : > { %2668 = vrot.lane.b32.xlu1 %v2439_v40, %s8966_s8  ;;  %v1851_v36 = vpop.f32.mrb[24].mxu0 }
 0x279   : > { %v1946_v53 = vmul.f32 %v9975_v34, %v1851_v36  ;;  %v1853_v24 = vpop.f32.mrb[25].mxu0  ;;  %v2364_v30 = vld [vmem:[#allocation2 + $0xc7] sm:$0xff] }
 0x27a   : > { %v1854_v26 = vpop.f32.mrb[26].mxu0  ;;  %v2412_v22 = vld [vmem:[#allocation2 + $0xc8] sm:$0xff] }
 0x27b   : > { %v2365_v2 = vld [vmem:[#allocation2 + $0xcf] sm:$0xff]  ;;  %v1982_v27 = vadd.f32 %v9980_v9, %v1946_v53  ;;  %v1947_v33 = vmul.f32 %v9975_v34, %v1854_v26  ;;  %2574 = vrot.lane.b32.xlu0 %v10097_v35, %s8965_s27  ;;  %v1856_v46 = vpop.f32.mrb[27].mxu0 }
 0x27c   : > { %2526 = vrot.lane.b32.xlu1 %v2439_v40, %s8963_s13  ;;  %v2392_v52 = vpack.c.bf16 %v2365_v2, %v2364_v30  ;;  %v2413_v60 = vld [vmem:[#allocation2 + $0xd0] sm:$0xff] }
 0x27d   : > { %v2014_v37 = vmax.f32 %v1982_v27, 0.0  ;;  %v1983_v29 = vadd.f32 %v9980_v9, %v1947_v33  ;;  %v2440_v39 = vpack.c.bf16 %v2413_v60, %v2412_v22  ;;  %v2318_v25 = vld [vmem:[#allocation2 + $0xc9] sm:$0xff]  ;;  %v2319_v23 = vld [vmem:[#allocation2 + $0xd1] sm:$0xff] }
 0x27e   : > { %v10114_v28 = vpack.c.bf16 %v2319_v23, %v2318_v25 }
 0x27f   : > { %2048 = vst.msk [vmem:[#allocation2 + $0xe8] sm:$0xff] %vm470_vm0, %v2014_v37  ;;  %v2015_v40 = vmax.f32 %v1983_v29, 0.0  ;;  %2812 = vrot.lane.b32.xlu0 %v2440_v39, %s8969_s6 }
 0x280   : > { %2764 = vrot.lane.b32.xlu1 %v2392_v52, %s15055_s7 }
 0x281   : > { %2049 = vst.msk [vmem:[#allocation2 + $0xf0] sm:$0xff] %vm470_vm0, %v2015_v40 }
 0x283   : > { %2670 = vrot.lane.b32.xlu0 %v2440_v39, %s8966_s8 }
 0x284   : > { %2622 = vrot.lane.b32.xlu1 %v2392_v52, %s8964_s16 }
 0x286   : > { %v2366_v24 = vld [vmem:[#allocation2 + $0xe7] sm:$0xff] }
 0x287   : > { %v1859_v21 = vpop.f32.mrb[28].mxu0  ;;  %2528 = vrot.lane.b32.xlu0 %v2440_v39, %s8963_s13  ;;  %v2414_v60 = vld [vmem:[#allocation2 + $0xe8] sm:$0xff] }
 0x288   : > { %2718 = vrot.lane.b32.xlu1 %v10114_v28, %s8967_s26  ;;  %v1948_v45 = vmul.f32 %v9975_v34, %v1859_v21  ;;  %v1861_v36 = vpop.f32.mrb[29].mxu0  ;;  %v2367_v52 = vld [vmem:[#allocation2 + $0xef] sm:$0xff] }
 0x289   : > { %v1862_v53 = vpop.f32.mrb[30].mxu0  ;;  %v2415_v27 = vld [vmem:[#allocation2 + $0xf0] sm:$0xff]  ;;  %v2393_v33 = vpack.c.bf16 %v2367_v52, %v2366_v24 }
 0x28a   : > { %v1984_v30 = vadd.f32 %v9980_v9, %v1948_v45  ;;  %v1949_v2 = vmul.f32 %v9975_v34, %v1862_v53  ;;  %v1864_v26 = vpop.f32.mrb[31].mxu0  ;;  %v2441_v46 = vpack.c.bf16 %v2415_v27, %v2414_v60  ;;  %v2320_v39 = vld [vmem:[#allocation2 + $0xe9] sm:$0xff]  ;;  %v2321_v40 = vld [vmem:[#allocation2 + $0xf1] sm:$0xff] }
 0x28b   : > { %2766 = vrot.lane.b32.xlu0 %v2393_v33, %s15055_s7  ;;  %v10131_v25 = vpack.c.bf16 %v2321_v40, %v2320_v39 }
 0x28c   : > { %2576 = vrot.lane.b32.xlu1 %v10114_v28, %s8965_s27  ;;  %v2016_v22 = vmax.f32 %v1984_v30, 0.0  ;;  %v1985_v37 = vadd.f32 %v9980_v9, %v1949_v2 }
 0x28e   : > { %2050 = vst.msk [vmem:[#allocation2 + $0x108] sm:$0xff] %vm470_vm0, %v2016_v22  ;;  %v2017_v29 = vmax.f32 %v1985_v37, 0.0 }
 0x28f   : > { %2624 = vrot.lane.b32.xlu0 %v2393_v33, %s8964_s16 }
 0x290   : > { %2814 = vrot.lane.b32.xlu1 %v2441_v46, %s8969_s6  ;;  %2051 = vst.msk [vmem:[#allocation2 + $0x110] sm:$0xff] %vm470_vm0, %v2017_v29 }
 0x293   : > { %2720 = vrot.lane.b32.xlu0 %v10131_v25, %s8967_s26 }
 0x294   : > { %2672 = vrot.lane.b32.xlu1 %v2441_v46, %s8966_s8  ;;  %v1867_v23 = vpop.f32.mrb[32].mxu0 }
 0x295   : > { %v1950_v21 = vmul.f32 %v9975_v34, %v1867_v23  ;;  %v1869_v45 = vpop.f32.mrb[33].mxu0  ;;  %v2368_v36 = vld [vmem:[#allocation2 + $0x107] sm:$0xff] }
 0x296   : > { %v1870_v24 = vpop.f32.mrb[34].mxu0  ;;  %v2416_v27 = vld [vmem:[#allocation2 + $0x108] sm:$0xff] }
 0x297   : > { %v2369_v53 = vld [vmem:[#allocation2 + $0x10f] sm:$0xff]  ;;  %v1986_v26 = vadd.f32 %v9980_v9, %v1950_v21  ;;  %v1951_v52 = vmul.f32 %v9975_v34, %v1870_v24  ;;  %2578 = vrot.lane.b32.xlu0 %v10131_v25, %s8965_s27  ;;  %v1872_v60 = vpop.f32.mrb[35].mxu0 }
 0x298   : > { %2530 = vrot.lane.b32.xlu1 %v2441_v46, %s8963_s13  ;;  %v2394_v30 = vpack.c.bf16 %v2369_v53, %v2368_v36  ;;  %v2417_v2 = vld [vmem:[#allocation2 + $0x110] sm:$0xff]  ;;  %v2517_v53 = vpop.permute.xlu0 %2516 }
 0x299   : > { %v2018_v33 = vmax.f32 %v1986_v26, 0.0  ;;  %v1987_v46 = vadd.f32 %v9980_v9, %v1951_v52  ;;  %v2442_v22 = vpack.c.bf16 %v2417_v2, %v2416_v27  ;;  %v2322_v29 = vld [vmem:[#allocation2 + $0x109] sm:$0xff]  ;;  %v2323_v39 = vld [vmem:[#allocation2 + $0x111] sm:$0xff] }
 0x29a   : > { %v10148_v40 = vpack.c.bf16 %v2323_v39, %v2322_v29  ;;  %v2069_v29 = vld [vmem:[#allocation2 + $0xf] sm:$0xff]  ;;  %v2068_v39 = vld [vmem:[#allocation2 + $0x7] sm:$0xff] }
 0x29b   : > { %2052 = vst.msk [vmem:[#allocation2 + $0x128] sm:$0xff] %vm470_vm0, %v2018_v33  ;;  %v2019_v37 = vmax.f32 %v1987_v46, 0.0  ;;  %2816 = vrot.lane.b32.xlu0 %v2442_v22, %s8969_s6 }
 0x29c   : > { %2768 = vrot.lane.b32.xlu1 %v2394_v30, %s15055_s7 }
 0x29d   : > { %2053 = vst.msk [vmem:[#allocation2 + $0x130] sm:$0xff] %vm470_vm0, %v2019_v37 }
 0x29f   : > { %2674 = vrot.lane.b32.xlu0 %v2442_v22, %s8966_s8 }
 0x2a0   : > { %2626 = vrot.lane.b32.xlu1 %v2394_v30, %s8964_s16 }
 0x2a2   : > { %v2370_v24 = vld [vmem:[#allocation2 + $0x127] sm:$0xff] }
 0x2a3   : > { %v1875_v23 = vpop.f32.mrb[36].mxu0  ;;  %2532 = vrot.lane.b32.xlu0 %v2442_v22, %s8963_s13  ;;  %v2418_v60 = vld [vmem:[#allocation2 + $0x128] sm:$0xff] }
 0x2a4   : > { %2722 = vrot.lane.b32.xlu1 %v10148_v40, %s8967_s26  ;;  %v1952_v21 = vmul.f32 %v9975_v34, %v1875_v23  ;;  %v1877_v45 = vpop.f32.mrb[37].mxu0  ;;  %v2371_v52 = vld [vmem:[#allocation2 + $0x12f] sm:$0xff]  ;;  %v2565_v23 = vpop.permute.xlu1 %2564 }
 0x2a5   : > { %v1878_v36 = vpop.f32.mrb[38].mxu0  ;;  %v2419_v27 = vld [vmem:[#allocation2 + $0x130] sm:$0xff]  ;;  %v10158_v33 = vpack.c.bf16 %v2371_v52, %v2370_v24  ;;  %v2100_v45 = vpack.c.bf16 %v2069_v29, %v2068_v39 }
 0x2a6   : > { %v1988_v2 = vadd.f32 %v9980_v9, %v1952_v21  ;;  %v1953_v30 = vmul.f32 %v9975_v34, %v1878_v36  ;;  %v1880_v26 = vpop.f32.mrb[39].mxu0  ;;  %v2443_v46 = vpack.c.bf16 %v2419_v27, %v2418_v60  ;;  %v2324_v24 = vld [vmem:[#allocation2 + $0x129] sm:$0xff] }
 0x2a7   : > { %2770 = vrot.lane.b32.xlu0 %v10158_v33, %s15055_s7  ;;  %v2325_v26 = vld [vmem:[#allocation2 + $0x131] sm:$0xff] }
 0x2a8   : > { %2580 = vrot.lane.b32.xlu1 %v10148_v40, %s8965_s27  ;;  %v2020_v37 = vmax.f32 %v1988_v2, 0.0  ;;  %v1989_v22 = vadd.f32 %v9980_v9, %v1953_v30  ;;  %v2838_v2 = vsel %vm470_vm0, %v2100_v45, %v2517_v53  ;;  %v10170_v60 = vpack.c.bf16 %v2325_v26, %v2324_v24 }
 0x2a9   : > { %v2661_v30 = vpop.permute.xlu1 %2660  ;;  %v2885_v27 = vsel %vm1435_vm1, %v2838_v2, %v2565_v23 }
 0x2aa   : > { %2054 = vst.msk [vmem:[#allocation2 + $0x148] sm:$0xff] %vm470_vm0, %v2020_v37  ;;  %v2021_v21 = vmax.f32 %v1989_v22, 0.0  ;;  %v2613_v36 = vpop.permute.xlu0 %2612 }
 0x2ab   : > { %2628 = vrot.lane.b32.xlu0 %v10158_v33, %s8964_s16  ;;  %v2917_v24 = vsel %vm1468_vm2, %v2885_v27, %v2613_v36 }
 0x2ac   : > { %2818 = vrot.lane.b32.xlu1 %v2443_v46, %s8969_s6  ;;  %2055 = vst.msk [vmem:[#allocation2 + $0x150] sm:$0xff] %vm470_vm0, %v2021_v21 }
 0x2ad   : > { %v2519_v26 = vpop.permute.xlu1 %2518 }
 0x2ae   : > { %v2709_v52 = vpop.permute.xlu0 %2708 }
 0x2af   : > { %2724 = vrot.lane.b32.xlu0 %v10170_v60, %s8967_s26 }
 0x2b0   : > { %2676 = vrot.lane.b32.xlu1 %v2443_v46, %s8966_s8  ;;  %v1883_v37 = vpop.f32.mrb[40].mxu0 }
 0x2b1   : > { %v1954_v22 = vmul.f32 %v9975_v34, %v1883_v37  ;;  %v1885_v39 = vpop.f32.mrb[41].mxu0  ;;  %v2372_v21 = vld [vmem:[#allocation2 + $0x147] sm:$0xff] }
 0x2b2   : > { %v2567_v29 = vpop.permute.xlu0 %2566  ;;  %v1886_v45 = vpop.f32.mrb[42].mxu0  ;;  %v2420_v2 = vld [vmem:[#allocation2 + $0x148] sm:$0xff] }
 0x2b3   : > { %v2373_v53 = vld [vmem:[#allocation2 + $0x14f] sm:$0xff]  ;;  %v1990_v31 = vadd.f32 %v9980_v9, %v1954_v22  ;;  %v1955_v23 = vmul.f32 %v9975_v34, %v1886_v45  ;;  %2582 = vrot.lane.b32.xlu0 %v10170_v60, %s8965_s27 }
 0x2b4   : > { %2534 = vrot.lane.b32.xlu1 %v2443_v46, %s8963_s13  ;;  %v10177_v19 = vpack.c.bf16 %v2373_v53, %v2372_v21  ;;  %v2421_v20 = vld [vmem:[#allocation2 + $0x150] sm:$0xff]  ;;  %v1888_v46 = vpop.f32.mrb[43].mxu0  ;;  %v2949_v53 = vsel %vm1501_vm3, %v2917_v24, %v2661_v30 }
 0x2b5   : > { %v2022_v37 = vmax.f32 %v1990_v31, 0.0  ;;  %v1991_v39 = vadd.f32 %v9980_v9, %v1955_v23  ;;  %v2444_v21 = vpack.c.bf16 %v2421_v20, %v2420_v2  ;;  %v2981_v27 = vsel %vm1534_vm4, %v2949_v53, %v2709_v52  ;;  %v2326_v31 = vld [vmem:[#allocation2 + $0x149] sm:$0xff]  ;;  %v2327_v32 = vld [vmem:[#allocation2 + $0x151] sm:$0xff] }
 0x2b6   : > { %v10199_v24 = vpack.c.bf16 %v2327_v32, %v2326_v31 }
 0x2b7   : > { %2056 = vst.msk [vmem:[#allocation2 + $0x168] sm:$0xff] %vm470_vm0, %v2022_v37  ;;  %v2023_v22 = vmax.f32 %v1991_v39, 0.0  ;;  %2820 = vrot.lane.b32.xlu0 %v2444_v21, %s8969_s6  ;;  %v2841_v39 = vsel %vm470_vm0, %v10008_v54, %v2519_v26 }
 0x2b8   : > { %2772 = vrot.lane.b32.xlu1 %v10177_v19, %s15055_s7 }
 0x2b9   : > { %v2805_v36 = vpop.permute.xlu0 %2804  ;;  %2057 = vst.msk [vmem:[#allocation2 + $0x170] sm:$0xff] %vm470_vm0, %v2023_v22 }
 0x2ba   : > { %v2757_v45 = vpop.permute.xlu1 %2756 }
 0x2bb   : > { %v3013_v46 = vsel %vm1567_vm5, %v2981_v27, %v2757_v45  ;;  %2678 = vrot.lane.b32.xlu0 %v2444_v21, %s8966_s8 }
 0x2bc   : > { %2630 = vrot.lane.b32.xlu1 %v10177_v19, %s8964_s16  ;;  %v3045_v20 = vsel %vm1600_vm6, %v3013_v46, %v2805_v36 }
 0x2bd   : > { %3245 = vmatmul.mubr.bf16.vlgmr.msra.gmra.mrb[0].mxu1 %v3045_v20  ;;  %v2663_v30 = vpop.permute.xlu0 %2662 }
 0x2be   : > { %v2615_v52 = vpop.permute.xlu1 %2614  ;;  %8379 = vmatprep.mubr.msk.bf16.mxu1 %vm470_vm0, %v10055_v38  ;;  %v2374_v27 = vld [vmem:[#allocation2 + $0x167] sm:$0xff]  ;;  %v2887_v38 = vsel %vm1435_vm1, %v2841_v39, %v2567_v29 }
 0x2bf   : > { %v1891_v23 = vpop.f32.mrb[44].mxu0  ;;  %2536 = vrot.lane.b32.xlu0 %v2444_v21, %s8963_s13  ;;  %v2422_v31 = vld [vmem:[#allocation2 + $0x168] sm:$0xff] }
 0x2c0   : > { %2726 = vrot.lane.b32.xlu1 %v10199_v24, %s8967_s26  ;;  %v1956_v2 = vmul.f32 %v9975_v34, %v1891_v23  ;;  %v1893_v37 = vpop.f32.mrb[45].mxu0  ;;  %v2375_v46 = vld [vmem:[#allocation2 + $0x16f] sm:$0xff]  ;;  %v2919_v23 = vsel %vm1468_vm2, %v2887_v38, %v2615_v52 }
 0x2c1   : > { %v1894_v36 = vpop.f32.mrb[46].mxu0  ;;  %v2423_v20 = vld [vmem:[#allocation2 + $0x170] sm:$0xff]  ;;  %v2521_v37 = vpop.permute.xlu0 %2520  ;;  %v10213_v54 = vpack.c.bf16 %v2375_v46, %v2374_v27 }
 0x2c2   : > { %v2711_v53 = vpop.permute.xlu1 %2710  ;;  %v1992_v32 = vadd.f32 %v9980_v9, %v1956_v2  ;;  %v1957_v22 = vmul.f32 %v9975_v34, %v1894_v36  ;;  %v1896_v45 = vpop.f32.mrb[47].mxu0  ;;  %v2445_v26 = vpack.c.bf16 %v2423_v20, %v2422_v31  ;;  %v2951_v2 = vsel %vm1501_vm3, %v2919_v23, %v2663_v30 }
 0x2c3   : > { %2774 = vrot.lane.b32.xlu0 %v10213_v54, %s15055_s7  ;;  %v2983_v52 = vsel %vm1534_vm4, %v2951_v2, %v2711_v53 }
 0x2c4   : > { %2584 = vrot.lane.b32.xlu1 %v10199_v24, %s8965_s27  ;;  %v2024_v21 = vmax.f32 %v1992_v32, 0.0  ;;  %v1993_v29 = vadd.f32 %v9980_v9, %v1957_v22  ;;  %v2328_v32 = vld [vmem:[#allocation2 + $0x169] sm:$0xff]  ;;  %v2329_v22 = vld [vmem:[#allocation2 + $0x171] sm:$0xff] }
 0x2c5   : > { %v2759_v38 = vpop.permute.xlu0 %2758  ;;  %v10228_v53 = vpack.c.bf16 %v2329_v22, %v2328_v32 }
 0x2c6   : > { %v2569_v39 = vpop.permute.xlu1 %2568  ;;  %2058 = vst.msk [vmem:[#allocation2 + $0x188] sm:$0xff] %vm470_vm0, %v2024_v21  ;;  %v2025_v36 = vmax.f32 %v1993_v29, 0.0  ;;  %v3015_v27 = vsel %vm1567_vm5, %v2983_v52, %v2759_v38  ;;  %v2844_v52 = vsel %vm470_vm0, %v10026_v61, %v2521_v37 }
 0x2c7   : > { %2632 = vrot.lane.b32.xlu0 %v10213_v54, %s8964_s16  ;;  %v2889_v32 = vsel %vm1435_vm1, %v2844_v52, %v2569_v39 }
 0x2c8   : > { %2822 = vrot.lane.b32.xlu1 %v2445_v26, %s8969_s6  ;;  %2059 = vst.msk [vmem:[#allocation2 + $0x190] sm:$0xff] %vm470_vm0, %v2025_v36 }
 0x2c9   : > { %v2617_v30 = vpop.permute.xlu0 %2616 }
 0x2ca   : > { %v2807_v45 = vpop.permute.xlu1 %2806 }
 0x2cb   : > { %v3048_v46 = vsel %vm1600_vm6, %v3015_v27, %v2807_v45  ;;  %2728 = vrot.lane.b32.xlu0 %v10228_v53, %s8967_s26 }
 0x2cc   : > { %3253 = vmatmul.mubr.bf16.gmra.mrb[4].mxu1 %v3048_v46  ;;  %2680 = vrot.lane.b32.xlu1 %v2445_v26, %s8966_s8  ;;  %v1899_v20 = vpop.f32.mrb[48].mxu0 }
 0x2cd   : > { %8380 = vmatprep.mubr.msk.bf16.mxu1 %vm470_vm0, %v10076_v41  ;;  %v1958_v23 = vmul.f32 %v9975_v34, %v1899_v20  ;;  %v2713_v21 = vpop.permute.xlu0 %2712  ;;  %v1901_v29 = vpop.f32.mrb[49].mxu0  ;;  %v2376_v2 = vld [vmem:[#allocation2 + $0x187] sm:$0xff]  ;;  %v2921_v20 = vsel %vm1468_vm2, %v2889_v32, %v2617_v30 }
 0x2ce   : > { %v2665_v31 = vpop.permute.xlu1 %2664  ;;  %v1902_v38 = vpop.f32.mrb[50].mxu0  ;;  %v2424_v29 = vld [vmem:[#allocation2 + $0x188] sm:$0xff] }
 0x2cf   : > { %v2377_v36 = vld [vmem:[#allocation2 + $0x18f] sm:$0xff]  ;;  %v1994_v22 = vadd.f32 %v9980_v9, %v1958_v23  ;;  %2586 = vrot.lane.b32.xlu0 %v10228_v53, %s8965_s27  ;;  %v1904_v46 = vpop.f32.mrb[51].mxu0  ;;  %v2953_v23 = vsel %vm1501_vm3, %v2921_v20, %v2665_v31 }
 0x2d0   : > { %2538 = vrot.lane.b32.xlu1 %v2445_v26, %s8963_s13  ;;  %v10238_v27 = vpack.c.bf16 %v2377_v36, %v2376_v2  ;;  %v2425_v41 = vld [vmem:[#allocation2 + $0x190] sm:$0xff]  ;;  %v1959_v26 = vmul.f32 %v9975_v34, %v1902_v38  ;;  %v2985_v52 = vsel %vm1534_vm4, %v2953_v23, %v2713_v21 }
 0x2d1   : > { %v2026_v63 = vmax.f32 %v1994_v22, 0.0  ;;  %v2571_v37 = vpop.permute.xlu0 %2570  ;;  %v2446_v39 = vpack.c.bf16 %v2425_v41, %v2424_v29  ;;  %v2330_v30 = vld [vmem:[#allocation2 + $0x189] sm:$0xff]  ;;  %v2331_v38 = vld [vmem:[#allocation2 + $0x191] sm:$0xff] }
 0x2d2   : > { %v2523_v45 = vpop.permute.xlu1 %2522  ;;  %v1995_v61 = vadd.f32 %v9980_v9, %v1959_v26 }
 0x2d3   : > { %2060 = vst.msk [vmem:[#allocation2 + $0x1a8] sm:$0xff] %vm470_vm0, %v2026_v63  ;;  %2824 = vrot.lane.b32.xlu0 %v2446_v39, %s8969_s6  ;;  %v10259_v63 = vpack.c.bf16 %v2331_v38, %v2330_v30  ;;  %v2847_v29 = vsel %vm470_vm0, %v10044_v50, %v2523_v45 }
 0x2d4   : > { %2776 = vrot.lane.b32.xlu1 %v10238_v27, %s15055_s7  ;;  %v2027_v2 = vmax.f32 %v1995_v61, 0.0 }
 0x2d5   : > { %v2809_v41 = vpop.permute.xlu0 %2808 }
 0x2d6   : > { %v2761_v36 = vpop.permute.xlu1 %2760  ;;  %2061 = vst.msk [vmem:[#allocation2 + $0x1b0] sm:$0xff] %vm470_vm0, %v2027_v2 }
 0x2d7   : > { %v3017_v32 = vsel %vm1567_vm5, %v2985_v52, %v2761_v36  ;;  %2682 = vrot.lane.b32.xlu0 %v2446_v39, %s8966_s8  ;;  %v2891_v36 = vsel %vm1435_vm1, %v2847_v29, %v2571_v37 }
 0x2d8   : > { %2634 = vrot.lane.b32.xlu1 %v10238_v27, %s8964_s16  ;;  %v3051_v31 = vsel %vm1600_vm6, %v3017_v32, %v2809_v41 }
 0x2d9   : > { %3261 = vmatmul.mubr.bf16.gmra.mrb[8].mxu1 %v3051_v31  ;;  %v2667_v21 = vpop.permute.xlu0 %2666 }
 0x2da   : > { %v2619_v22 = vpop.permute.xlu1 %2618  ;;  %8381 = vmatprep.mubr.msk.bf16.mxu1 %vm470_vm0, %v10097_v35  ;;  %v2378_v2 = vld [vmem:[#allocation2 + $0x1a7] sm:$0xff] }
 0x2db   : > { %v1907_v26 = vpop.f32.mrb[52].mxu0  ;;  %2540 = vrot.lane.b32.xlu0 %v2446_v39, %s8963_s13  ;;  %v2426_v32 = vld [vmem:[#allocation2 + $0x1a8] sm:$0xff]  ;;  %v2923_v31 = vsel %vm1468_vm2, %v2891_v36, %v2619_v22 }
 0x2dc   : > { %2730 = vrot.lane.b32.xlu1 %v10259_v63, %s8967_s26  ;;  %v1960_v46 = vmul.f32 %v9975_v34, %v1907_v26  ;;  %v1909_v20 = vpop.f32.mrb[53].mxu0  ;;  %v2955_v26 = vsel %vm1501_vm3, %v2923_v31, %v2667_v21 }
 0x2dd   : > { %v1910_v23 = vpop.f32.mrb[54].mxu0  ;;  %v2379_v38 = vld [vmem:[#allocation2 + $0x1af] sm:$0xff]  ;;  %v2525_v50 = vpop.permute.xlu0 %2524 }
 0x2de   : > { %v2715_v61 = vpop.permute.xlu1 %2714  ;;  %v1996_v35 = vadd.f32 %v9980_v9, %v1960_v46  ;;  %v1961_v52 = vmul.f32 %v9975_v34, %v1910_v23  ;;  %v1912_v30 = vpop.f32.mrb[55].mxu0  ;;  %v2427_v41 = vld [vmem:[#allocation2 + $0x1b0] sm:$0xff]  ;;  %v10275_v45 = vpack.c.bf16 %v2379_v38, %v2378_v2 }
 0x2df   : > { %v2447_v39 = vpack.c.bf16 %v2427_v41, %v2426_v32  ;;  %v2987_v22 = vsel %vm1534_vm4, %v2955_v26, %v2715_v61  ;;  %v2332_v21 = vld [vmem:[#allocation2 + $0x1a9] sm:$0xff]  ;;  %v2333_v36 = vld [vmem:[#allocation2 + $0x1b1] sm:$0xff]  ;;  %v2850_v32 = vsel %vm470_vm0, %v10061_v51, %v2525_v50 }
 0x2e0   : > { %2588 = vrot.lane.b32.xlu1 %v10259_v63, %s8965_s27  ;;  %v2028_v37 = vmax.f32 %v1996_v35, 0.0  ;;  %v1997_v46 = vadd.f32 %v9980_v9, %v1961_v52  ;;  %2778 = vrot.lane.b32.xlu0 %v10275_v45, %s15055_s7  ;;  %v10290_v61 = vpack.c.bf16 %v2333_v36, %v2332_v21 }
 0x2e1   : > { %v2763_v23 = vpop.permute.xlu0 %2762 }
 0x2e2   : > { %v2573_v20 = vpop.permute.xlu1 %2572  ;;  %2062 = vst.msk [vmem:[#allocation2 + $0x1c8] sm:$0xff] %vm470_vm0, %v2028_v37  ;;  %v2029_v29 = vmax.f32 %v1997_v46, 0.0  ;;  %v3019_v2 = vsel %vm1567_vm5, %v2987_v22, %v2763_v23 }
 0x2e4   : > { %2826 = vrot.lane.b32.xlu1 %v2447_v39, %s8969_s6  ;;  %2063 = vst.msk [vmem:[#allocation2 + $0x1d0] sm:$0xff] %vm470_vm0, %v2029_v29  ;;  %2636 = vrot.lane.b32.xlu0 %v10275_v45, %s8964_s16 }
 0x2e5   : > { %v2621_v30 = vpop.permute.xlu0 %2620 }
 0x2e6   : > { %v2811_v35 = vpop.permute.xlu1 %2810 }
 0x2e7   : > { %v3054_v52 = vsel %vm1600_vm6, %v3019_v2, %v2811_v35  ;;  %v2893_v2 = vsel %vm1435_vm1, %v2850_v32, %v2573_v20 }
 0x2e8   : > { %3269 = vmatmul.mubr.bf16.gmra.mrb[12].mxu1 %v3054_v52  ;;  %2684 = vrot.lane.b32.xlu1 %v2447_v39, %s8966_s8  ;;  %v1915_v41 = vpop.f32.mrb[56].mxu0 }
 0x2e9   : > { %8382 = vmatprep.mubr.msk.bf16.mxu1 %vm470_vm0, %v10114_v28  ;;  %2732 = vrot.lane.b32.xlu0 %v10290_v61, %s8967_s26  ;;  %v1962_v31 = vmul.f32 %v9975_v34, %v1915_v41  ;;  %v2717_v26 = vpop.permute.xlu0 %2716  ;;  %v1917_v37 = vpop.f32.mrb[57].mxu0  ;;  %v2380_v46 = vld [vmem:[#allocation2 + $0x1c7] sm:$0xff] }
 0x2ea   : > { %v2669_v38 = vpop.permute.xlu1 %2668  ;;  %v1918_v22 = vpop.f32.mrb[58].mxu0  ;;  %v2428_v35 = vld [vmem:[#allocation2 + $0x1c8] sm:$0xff] }
 0x2eb   : > { %v2381_v29 = vld [vmem:[#allocation2 + $0x1cf] sm:$0xff]  ;;  %v1998_v21 = vadd.f32 %v9980_v9, %v1962_v31  ;;  %v1963_v51 = vmul.f32 %v9975_v34, %v1918_v22  ;;  %v1920_v50 = vpop.f32.mrb[59].mxu0 }
 0x2ec   : > { %2542 = vrot.lane.b32.xlu1 %v2447_v39, %s8963_s13  ;;  %v10300_v23 = vpack.c.bf16 %v2381_v29, %v2380_v46  ;;  %v2429_v28 = vld [vmem:[#allocation2 + $0x1d0] sm:$0xff]  ;;  %v2925_v39 = vsel %vm1468_vm2, %v2893_v2, %v2621_v30 }
 0x2ed   : > { %2590 = vrot.lane.b32.xlu0 %v10290_v61, %s8965_s27  ;;  %v2030_v52 = vmax.f32 %v1998_v21, 0.0  ;;  %v1999_v41 = vadd.f32 %v9980_v9, %v1963_v51  ;;  %v2575_v37 = vpop.permute.xlu0 %2574  ;;  %v2448_v20 = vpack.c.bf16 %v2429_v28, %v2428_v35  ;;  %v2957_v32 = vsel %vm1501_vm3, %v2925_v39, %v2669_v38  ;;  %v2334_v30 = vld [vmem:[#allocation2 + $0x1c9] sm:$0xff]  ;;  %v2335_v22 = vld [vmem:[#allocation2 + $0x1d1] sm:$0xff] }
 0x2ee   : > { %v2527_v36 = vpop.permute.xlu1 %2526  ;;  %v2989_v29 = vsel %vm1534_vm4, %v2957_v32, %v2717_v26  ;;  %v10321_v21 = vpack.c.bf16 %v2335_v22, %v2334_v30 }
 0x2ef   : > { %2064 = vst.msk [vmem:[#allocation2 + $0x1e8] sm:$0xff] %vm470_vm0, %v2030_v52  ;;  %v2031_v31 = vmax.f32 %v1999_v41, 0.0  ;;  %v2853_v35 = vsel %vm470_vm0, %v10086_v49, %v2527_v36 }
 0x2f0   : > { %2780 = vrot.lane.b32.xlu1 %v10300_v23, %s15055_s7 }
 0x2f1   : > { %2828 = vrot.lane.b32.xlu0 %v2448_v20, %s8969_s6  ;;  %2065 = vst.msk [vmem:[#allocation2 + $0x1f0] sm:$0xff] %vm470_vm0, %v2031_v31  ;;  %v2813_v28 = vpop.permute.xlu0 %2812  ;;  %v2895_v31 = vsel %vm1435_vm1, %v2853_v35, %v2575_v37 }
 0x2f2   : > { %v2765_v46 = vpop.permute.xlu1 %2764 }
 0x2f3   : > { %v3021_v9 = vsel %vm1567_vm5, %v2989_v29, %v2765_v46 }
 0x2f4   : > { %2638 = vrot.lane.b32.xlu1 %v10300_v23, %s8964_s16  ;;  %v3057_v38 = vsel %vm1600_vm6, %v3021_v9, %v2813_v28 }
 0x2f5   : > { %3277 = vmatmul.mubr.bf16.gmra.mrb[16].mxu1 %v3057_v38  ;;  %2686 = vrot.lane.b32.xlu0 %v2448_v20, %s8966_s8  ;;  %v2671_v26 = vpop.permute.xlu0 %2670 }
 0x2f6   : > { %v2623_v2 = vpop.permute.xlu1 %2622  ;;  %8383 = vmatprep.mubr.msk.bf16.mxu1 %vm470_vm0, %v10131_v25  ;;  %v2382_v32 = vld [vmem:[#allocation2 + $0x1e7] sm:$0xff]  ;;  %v8744_v25 = vld [vmem:[%s15053_s3 + $0x1] ss:$0 sm:$0xff] }
 0x2f7   : > { %v1923_v51 = vpop.f32.mrb[60].mxu0  ;;  %v2430_v49 = vld [vmem:[#allocation2 + $0x1e8] sm:$0xff] }
 0x2f8   : > { %2734 = vrot.lane.b32.xlu1 %v10321_v21, %s8967_s26  ;;  %v1964_v50 = vmul.f32 %v9975_v34, %v1923_v51  ;;  %v1925_v39 = vpop.f32.mrb[61].mxu0  ;;  %v8745_v34 = vld [vmem:[%s15053_s3] ss:$0 sm:$0xff]  ;;  %v2383_v22 = vld [vmem:[#allocation2 + $0x1ef] sm:$0xff] }
 0x2f9   : > { %2544 = vrot.lane.b32.xlu0 %v2448_v20, %s8963_s13  ;;  %v1926_v41 = vpop.f32.mrb[62].mxu0  ;;  %v2431_v36 = vld [vmem:[#allocation2 + $0x1f0] sm:$0xff]  ;;  %v2927_v20 = vsel %vm1468_vm2, %v2895_v31, %v2623_v2  ;;  %v2529_v37 = vpop.permute.xlu0 %2528  ;;  %v10341_v9 = vpack.c.bf16 %v2383_v22, %v2382_v32 }
 0x2fa   : > { %v2719_v52 = vpop.permute.xlu1 %2718  ;;  %v2000_v46 = vadd.f32 %v8744_v25, %v1964_v50  ;;  %v1965_v29 = vmul.f32 %v8745_v34, %v1926_v41  ;;  %v1928_v30 = vpop.f32.mrb[63].mxu0  ;;  %v2449_v28 = vpack.c.bf16 %v2431_v36, %v2430_v49  ;;  %v2959_v38 = vsel %vm1501_vm3, %v2927_v20, %v2671_v26  ;;  %v2336_v31 = vld [vmem:[#allocation2 + $0x1e9] sm:$0xff]  ;;  %v2337_v26 = vld [vmem:[#allocation2 + $0x1f1] sm:$0xff] }
 0x2fb   : > { %v2991_v2 = vsel %vm1534_vm4, %v2959_v38, %v2719_v52  ;;  %v10355_v30 = vpack.c.bf16 %v2337_v26, %v2336_v31 }
 0x2fc   : > { %2592 = vrot.lane.b32.xlu1 %v10321_v21, %s8965_s27  ;;  %v2032_v51 = vmax.f32 %v2000_v46, 0.0  ;;  %v2001_v50 = vadd.f32 %v8744_v25, %v1965_v29  ;;  %v2081_v46 = vld [vmem:[#allocation2 + $0xcf] sm:$0xff]  ;;  %v2080_v29 = vld [vmem:[#allocation2 + $0xc7] sm:$0xff] }
 0x2fd   : > { %2782 = vrot.lane.b32.xlu0 %v10341_v9, %s15055_s7  ;;  %v2767_v41 = vpop.permute.xlu0 %2766  ;;  %v2106_v22 = vpack.c.bf16 %v2081_v46, %v2080_v29  ;;  %v2386_v46 = vld [vmem:[#allocation2 + $0x227] sm:$0xff]  ;;  %v2387_v29 = vld [vmem:[#allocation2 + $0x22f] sm:$0xff] }
 0x2fe   : > { %v2577_v39 = vpop.permute.xlu1 %2576  ;;  %2066 = vst.msk [vmem:[#allocation2 + $0x208] sm:$0xff] %vm470_vm0, %v2032_v51  ;;  %v2033_v35 = vmax.f32 %v2001_v50, 0.0  ;;  %v3023_v32 = vsel %vm1567_vm5, %v2991_v2, %v2767_v41 }
 0x2ff   : > { %v2856_v36 = vsel %vm470_vm0, %v2106_v22, %v2529_v37 }
 0x300   : > { %2830 = vrot.lane.b32.xlu1 %v2449_v28, %s8969_s6  ;;  %2067 = vst.msk [vmem:[#allocation2 + $0x210] sm:$0xff] %vm470_vm0, %v2033_v35  ;;  %v2897_v2 = vsel %vm1435_vm1, %v2856_v36, %v2577_v39  ;;  %v2083_v36 = vld [vmem:[#allocation2 + $0xef] sm:$0xff] }
 0x301   : > { %2640 = vrot.lane.b32.xlu0 %v10341_v9, %s8964_s16  ;;  %v2625_v52 = vpop.permute.xlu0 %2624 }
 0x302   : > { %v2815_v25 = vpop.permute.xlu1 %2814 }
 0x303   : > { %v3060_v34 = vsel %vm1600_vm6, %v3023_v32, %v2815_v25 }
 0x304   : > { %3285 = vmatmul.mubr.bf16.gmra.mrb[20].mxu1 %v3060_v34  ;;  %2688 = vrot.lane.b32.xlu1 %v2449_v28, %s8966_s8 }
 0x305   : > { %8384 = vmatprep.mubr.msk.bf16.mxu1 %vm470_vm0, %v10148_v40  ;;  %2736 = vrot.lane.b32.xlu0 %v10355_v30, %s8967_s26  ;;  %v2721_v20 = vpop.permute.xlu0 %2720  ;;  %v2384_v38 = vld [vmem:[#allocation2 + $0x207] sm:$0xff]  ;;  %v2929_v40 = vsel %vm1468_vm2, %v2897_v2, %v2625_v52 }
 0x306   : > { %v2673_v49 = vpop.permute.xlu1 %2672  ;;  %v2432_v32 = vld [vmem:[#allocation2 + $0x208] sm:$0xff] }
 0x307   : > { %v2385_v51 = vld [vmem:[#allocation2 + $0x20f] sm:$0xff] }
 0x308   : > { %2546 = vrot.lane.b32.xlu1 %v2449_v28, %s8963_s13  ;;  %v2402_v50 = vpack.c.bf16 %v2385_v51, %v2384_v38  ;;  %v2433_v35 = vld [vmem:[#allocation2 + $0x210] sm:$0xff]  ;;  %v2961_v28 = vsel %vm1501_vm3, %v2929_v40, %v2673_v49  ;;  %v2434_v51 = vld [vmem:[#allocation2 + $0x228] sm:$0xff]  ;;  %s11187_s13 = sld [smem:[#allocation9]] }
 0x309   : > { %2594 = vrot.lane.b32.xlu0 %v10355_v30, %s8965_s27  ;;  %v2579_v31 = vpop.permute.xlu0 %2578  ;;  %v2450_v37 = vpack.c.bf16 %v2433_v35, %v2432_v32  ;;  %v2993_v25 = vsel %vm1534_vm4, %v2961_v28, %v2721_v20  ;;  %v2338_v39 = vld [vmem:[#allocation2 + $0x209] sm:$0xff]  ;;  %v2339_v34 = vld [vmem:[#allocation2 + $0x211] sm:$0xff]  ;;  %v2403_v20 = vpack.c.bf16 %v2387_v29, %v2386_v46  ;;  %s11191_s27 = sld [smem:[#allocation9 + $0x7]] }
 0x30a   : > { %v2531_v41 = vpop.permute.xlu1 %2530  ;;  %v2435_v35 = vld [vmem:[#allocation2 + $0x230] sm:$0xff]  ;;  %v10375_v2 = vpack.c.bf16 %v2339_v34, %v2338_v39  ;;  %v2082_v40 = vld [vmem:[#allocation2 + $0xe7] sm:$0xff] }
 0x30b   : > { %v2107_v32 = vpack.c.bf16 %v2083_v36, %v2082_v40  ;;  %v2451_v28 = vpack.c.bf16 %v2435_v35, %v2434_v51  ;;  %v2085_v36 = vld [vmem:[#allocation2 + $0x10f] sm:$0xff]  ;;  %v2084_v51 = vld [vmem:[#allocation2 + $0x107] sm:$0xff] }
 0x30c   : > { %2784 = vrot.lane.b32.xlu1 %v2402_v50, %s15055_s7  ;;  %v2108_v35 = vpack.c.bf16 %v2085_v36, %v2084_v51 }
 0x30d   : > { %2832 = vrot.lane.b32.xlu0 %v2450_v37, %s8969_s6  ;;  %v2817_v52 = vpop.permute.xlu0 %2816 }
 0x30e   : > { %v2769_v26 = vpop.permute.xlu1 %2768 }
 0x30f   : > { %v3025_v22 = vsel %vm1567_vm5, %v2993_v25, %v2769_v26  ;;  %v2859_v26 = vsel %vm470_vm0, %v2107_v32, %v2531_v41 }
 0x310   : > { %2642 = vrot.lane.b32.xlu1 %v2402_v50, %s8964_s16  ;;  %v3063_v38 = vsel %vm1600_vm6, %v3025_v22, %v2817_v52  ;;  %s11189_s16 = sld [smem:[#allocation9 + $0x5]] }
 0x311   : > { %3293 = vmatmul.mubr.bf16.gmra.mrb[24].mxu1 %v3063_v38  ;;  %2690 = vrot.lane.b32.xlu0 %v2450_v37, %s8966_s8  ;;  %v2675_v50 = vpop.permute.xlu0 %2674  ;;  %v2899_v37 = vsel %vm1435_vm1, %v2859_v26, %v2579_v31  ;;  %s11193_s8 = sld [smem:[#allocation9 + $0x9]] }
 0x312   : > { %v2627_v49 = vpop.permute.xlu1 %2626  ;;  %8385 = vmatprep.mubr.msk.bf16.mxu1 %vm470_vm0, %v10170_v60 }
 0x313   : > { %v2931_v39 = vsel %vm1468_vm2, %v2899_v37, %v2627_v49 }
 0x314   : > { %2738 = vrot.lane.b32.xlu1 %v10375_v2, %s8967_s26  ;;  %v2963_v60 = vsel %vm1501_vm3, %v2931_v39, %v2675_v50  ;;  %s11195_s26 = sld [smem:[#allocation11 + $0x3]] }
 0x315   : > { %2786 = vrot.lane.b32.xlu0 %v2403_v20, %s15055_s7  ;;  %v2533_v46 = vpop.permute.xlu0 %2532  ;;  %s11201_s7 = sld [smem:[#allocation11 + $0x9]] }
 0x316   : > { %v2723_v25 = vpop.permute.xlu1 %2722  ;;  %v2862_v20 = vsel %vm470_vm0, %v2108_v35, %v2533_v46 }
 0x317   : > { %v2995_v29 = vsel %vm1534_vm4, %v2963_v60, %v2723_v25 }
 0x318   : > { %2834 = vrot.lane.b32.xlu1 %v2451_v28, %s8969_s6  ;;  %s11197_s6 = sld [smem:[#allocation11 + $0x5]] }
 0x319   : > { %v2771_v22 = vpop.permute.xlu0 %2770 }
 0x31a   : > { %v2581_v34 = vpop.permute.xlu1 %2580  ;;  %v3027_v52 = vsel %vm1567_vm5, %v2995_v29, %v2771_v22 }
 0x31b   : > { %v2901_v32 = vsel %vm1435_vm1, %v2862_v20, %v2581_v34 }
 0x31d   : > { %v2629_v31 = vpop.permute.xlu0 %2628 }
 0x31e   : > { %v2819_v41 = vpop.permute.xlu1 %2818  ;;  %v2933_v28 = vsel %vm1468_vm2, %v2901_v32, %v2629_v31 }
 0x31f   : > { %v3066_v38 = vsel %vm1600_vm6, %v3027_v52, %v2819_v41 }
 0x320   : > { %3301 = vmatmul.mubr.bf16.gmra.mrb[28].mxu1 %v3066_v38 }
 0x321   : > { %8386 = vmatprep.mubr.msk.bf16.mxu1 %vm470_vm0, %v10199_v24  ;;  %v2725_v40 = vpop.permute.xlu0 %2724 }
 0x322   : > { %v2677_v49 = vpop.permute.xlu1 %2676 }
 0x323   : > { %v2965_v25 = vsel %vm1501_vm3, %v2933_v28, %v2677_v49 }
 0x324   : > { %v2997_v39 = vsel %vm1534_vm4, %v2965_v25, %v2725_v40 }
 0x325   : > { %v2583_v26 = vpop.permute.xlu0 %2582 }
 0x326   : > { %v2535_v50 = vpop.permute.xlu1 %2534 }
 0x327   : > { %v2865_v34 = vsel %vm470_vm0, %v10158_v33, %v2535_v50 }
 0x328   : > { %v2903_v36 = vsel %vm1435_vm1, %v2865_v34, %v2583_v26 }
 0x329   : > { %v2821_v29 = vpop.permute.xlu0 %2820 }
 0x32a   : > { %v2773_v37 = vpop.permute.xlu1 %2772 }
 0x32b   : > { %v3029_v60 = vsel %vm1567_vm5, %v2997_v39, %v2773_v37 }
 0x32c   : > { %v3069_v24 = vsel %vm1600_vm6, %v3029_v60, %v2821_v29 }
 0x32d   : > { %3309 = vmatmul.mubr.bf16.gmra.mrb[32].mxu1 %v3069_v24  ;;  %v2679_v46 = vpop.permute.xlu0 %2678 }
 0x32e   : > { %v2631_v22 = vpop.permute.xlu1 %2630  ;;  %8387 = vmatprep.mubr.msk.bf16.mxu1 %vm470_vm0, %v10228_v53 }
 0x32f   : > { %v2935_v41 = vsel %vm1468_vm2, %v2903_v36, %v2631_v22 }
 0x330   : > { %v2967_v51 = vsel %vm1501_vm3, %v2935_v41, %v2679_v46 }
 0x331   : > { %v2537_v38 = vpop.permute.xlu0 %2536 }
 0x332   : > { %v2727_v52 = vpop.permute.xlu1 %2726  ;;  %v2868_v50 = vsel %vm470_vm0, %v10177_v19, %v2537_v38 }
 0x333   : > { %v2999_v35 = vsel %vm1534_vm4, %v2967_v51, %v2727_v52 }
 0x335   : > { %v2775_v49 = vpop.permute.xlu0 %2774 }
 0x336   : > { %v2585_v31 = vpop.permute.xlu1 %2584  ;;  %v3031_v20 = vsel %vm1567_vm5, %v2999_v35, %v2775_v49 }
 0x337   : > { %v2905_v26 = vsel %vm1435_vm1, %v2868_v50, %v2585_v31 }
 0x339   : > { %v2633_v32 = vpop.permute.xlu0 %2632 }
 0x33a   : > { %v2823_v40 = vpop.permute.xlu1 %2822  ;;  %v2937_v37 = vsel %vm1468_vm2, %v2905_v26, %v2633_v32 }
 0x33b   : > { %v3072_v53 = vsel %vm1600_vm6, %v3031_v20, %v2823_v40 }
 0x33c   : > { %3317 = vmatmul.mubr.bf16.gmra.mrb[36].mxu1 %v3072_v53 }
 0x33d   : > { %8388 = vmatprep.mubr.msk.bf16.mxu1 %vm470_vm0, %v10259_v63  ;;  %v2729_v28 = vpop.permute.xlu0 %2728 }
 0x33e   : > { %v2681_v33 = vpop.permute.xlu1 %2680 }
 0x33f   : > { %v2969_v60 = vsel %vm1501_vm3, %v2937_v37, %v2681_v33 }
 0x340   : > { %v3001_v24 = vsel %vm1534_vm4, %v2969_v60, %v2729_v28 }
 0x341   : > { %v2587_v39 = vpop.permute.xlu0 %2586 }
 0x342   : > { %v2539_v25 = vpop.permute.xlu1 %2538 }
 0x343   : > { %v2871_v52 = vsel %vm470_vm0, %v10213_v54, %v2539_v25 }
 0x344   : > { %v2907_v41 = vsel %vm1435_vm1, %v2871_v52, %v2587_v39 }
 0x345   : > { %v2825_v46 = vpop.permute.xlu0 %2824 }
 0x346   : > { %v2777_v29 = vpop.permute.xlu1 %2776 }
 0x347   : > { %v3033_v22 = vsel %vm1567_vm5, %v3001_v24, %v2777_v29 }
 0x348   : > { %v3075_v63 = vsel %vm1600_vm6, %v3033_v22, %v2825_v46 }
 0x349   : > { %3325 = vmatmul.mubr.bf16.gmra.mrb[40].mxu1 %v3075_v63  ;;  %v2683_v19 = vpop.permute.xlu0 %2682 }
 0x34a   : > { %v2635_v34 = vpop.permute.xlu1 %2634  ;;  %8389 = vmatprep.mubr.msk.bf16.mxu1 %vm470_vm0, %v10290_v61 }
 0x34b   : > { %v2939_v38 = vsel %vm1468_vm2, %v2907_v41, %v2635_v34 }
 0x34c   : > { %v2971_v31 = vsel %vm1501_vm3, %v2939_v38, %v2683_v19 }
 0x34d   : > { %v2541_v51 = vpop.permute.xlu0 %2540 }
 0x34e   : > { %v2731_v36 = vpop.permute.xlu1 %2730  ;;  %v2874_v33 = vsel %vm470_vm0, %v10238_v27, %v2541_v51 }
 0x34f   : > { %v3003_v49 = vsel %vm1534_vm4, %v2971_v31, %v2731_v36 }
 0x352   : > { %v2589_v35 = vpop.permute.xlu1 %2588  ;;  %v2779_v20 = vpop.permute.xlu0 %2778 }
 0x353   : > { %v3035_v40 = vsel %vm1567_vm5, %v3003_v49, %v2779_v20  ;;  %v2909_v28 = vsel %vm1435_vm1, %v2874_v33, %v2589_v35  ;;  %v8727_v33 = vld [vmem:[%s15056_s4] sm:$0xff]   ;;  %s15092_s4 = smov 127  }
 0x354   : > { %8579 = vmatpush3.bf16.msra.mxu0 %v8727_v33 }
 0x356   : > { %v2827_v53 = vpop.permute.xlu1 %2826  ;;  %v2637_v32 = vpop.permute.xlu0 %2636 }
 0x357   : > { %v3078_v61 = vsel %vm1600_vm6, %v3035_v40, %v2827_v53  ;;  %v2941_v25 = vsel %vm1468_vm2, %v2909_v28, %v2637_v32  ;;  %v2482_v28 = vld [vmem:[#allocation2 + $0x229] sm:$0xff] }
 0x358   : > { %3333 = vmatmul.mubr.bf16.gmra.mrb[44].mxu1 %v3078_v61 }
 0x359   : > { %8390 = vmatprep.mubr.msk.bf16.mxu1 %vm470_vm0, %v10321_v21 }
 0x35a   : > { %v2685_v54 = vpop.permute.xlu1 %2684 }
 0x35b   : > { %v2733_v50 = vpop.permute.xlu0 %2732  ;;  %v2973_v39 = vsel %vm1501_vm3, %v2941_v25, %v2685_v54 }
 0x35c   : > { %v3005_v29 = vsel %vm1534_vm4, %v2973_v39, %v2733_v50 }
 0x35e   : > { %v2543_v26 = vpop.permute.xlu1 %2542 }
 0x35f   : > { %v2591_v37 = vpop.permute.xlu0 %2590  ;;  %v2877_v63 = vsel %vm470_vm0, %v10275_v45, %v2543_v26  ;;  %v2483_v26 = vld [vmem:[#allocation2 + $0x231] sm:$0xff] }
 0x360   : > { %v2911_v19 = vsel %vm1435_vm1, %v2877_v63, %v2591_v37 }
 0x362   : > { %v2781_v60 = vpop.permute.xlu1 %2780 }
 0x363   : > { %v3037_v24 = vsel %vm1567_vm5, %v3005_v29, %v2781_v60  ;;  %v2829_v22 = vpop.permute.xlu0 %2828 }
 0x364   : > { %v3081_v21 = vsel %vm1600_vm6, %v3037_v24, %v2829_v22 }
 0x365   : > { %3341 = vmatmul.mubr.bf16.gmra.mrb[48].mxu1 %v3081_v21 }
 0x366   : > { %v2639_v46 = vpop.permute.xlu1 %2638  ;;  %8391 = vmatprep.mubr.msk.bf16.mxu1 %vm470_vm0, %v10355_v30 }
 0x367   : > { %v2687_v27 = vpop.permute.xlu0 %2686  ;;  %v2943_v52 = vsel %vm1468_vm2, %v2911_v19, %v2639_v46 }
 0x368   : > { %v2975_v41 = vsel %vm1501_vm3, %v2943_v52, %v2687_v27 }
 0x36a   : > { %v2735_v34 = vpop.permute.xlu1 %2734 }
 0x36b   : > { %v2545_v36 = vpop.permute.xlu0 %2544  ;;  %v3007_v51 = vsel %vm1534_vm4, %v2975_v41, %v2735_v34 }
 0x36c   : > { %v2880_v40 = vsel %vm470_vm0, %v10300_v23, %v2545_v36  ;;  %v2499_v23 = vpack.c.bf16 %v2483_v26, %v2482_v28 }
 0x36e   : > { %v2593_v38 = vpop.permute.xlu1 %2592 }
 0x36f   : > { %v2783_v31 = vpop.permute.xlu0 %2782  ;;  %v2913_v61 = vsel %vm1435_vm1, %v2880_v40, %v2593_v38 }
 0x370   : > { %v3039_v35 = vsel %vm1567_vm5, %v3007_v51, %v2783_v31 }
 0x372   : > { %v2831_v49 = vpop.permute.xlu1 %2830 }
 0x373   : > { %v3084_v30 = vsel %vm1600_vm6, %v3039_v35, %v2831_v49  ;;  %v2641_v20 = vpop.permute.xlu0 %2640 }
 0x374   : > { %3349 = vmatmul.mubr.bf16.gmra.mrb[52].mxu1 %v3084_v30  ;;  %v2945_v54 = vsel %vm1468_vm2, %v2913_v61, %v2641_v20 }
 0x375   : > { %8392 = vmatprep.mubr.msk.bf16.mxu1 %vm470_vm0, %v10375_v2 }
 0x376   : > { %v2689_v45 = vpop.permute.xlu1 %2688 }
 0x377   : > { %v2737_v53 = vpop.permute.xlu0 %2736  ;;  %v2977_v2 = vsel %vm1501_vm3, %v2945_v54, %v2689_v45 }
 0x378   : > { %v3009_v37 = vsel %vm1534_vm4, %v2977_v2, %v2737_v53 }
 0x37a   : > { %v2547_v32 = vpop.permute.xlu1 %2546 }
 0x37b   : > { %v2595_v50 = vpop.permute.xlu0 %2594  ;;  %v2883_v24 = vsel %vm470_vm0, %v10341_v9, %v2547_v32 }
 0x37c   : > { %v2915_v21 = vsel %vm1435_vm1, %v2883_v24, %v2595_v50  ;;  %vm4050_vm1 = vcmask 1043459  }
 0x37e   : > { %v2785_v25 = vpop.permute.xlu1 %2784 }
 0x37f   : > { %v3041_v39 = vsel %vm1567_vm5, %v3009_v37, %v2785_v25  ;;  %v2833_v60 = vpop.permute.xlu0 %2832 }
 0x380   : > { %v3087_v29 = vsel %vm1600_vm6, %v3041_v39, %v2833_v60 }
 0x381   : > { %3357 = vmatmul.mubr.bf16.gmra.mrb[56].mxu1 %v3087_v29 }
 0x382   : > { %v2643_v22 = vpop.permute.xlu1 %2642  ;;  %8393 = vmatprep.mubr.msk.bf16.mxu1 %vm470_vm0, %v2499_v23 }
 0x383   : > { %v2947_v46 = vsel %vm1468_vm2, %v2915_v21, %v2643_v22  ;;  %v2691_v27 = vpop.permute.xlu0 %2690  ;;  %vm4052_vm2 = vcmask 1044484  }
 0x384   : > { %v2979_v63 = vsel %vm1501_vm3, %v2947_v46, %v2691_v27  ;;  %vm4054_vm3 = vcmask 1045509  }
 0x386   : > { %v2739_v34 = vpop.permute.xlu1 %2738 }
 0x387   : > { %v3011_v19 = vsel %vm1534_vm4, %v2979_v63, %v2739_v34  ;;  %v2787_v52 = vpop.permute.xlu0 %2786  ;;  %vm4056_vm4 = vcmask 1046534  }
 0x388   : > { %v3043_v36 = vsel %vm1567_vm5, %v3011_v19, %v2787_v52  ;;  %v3645_v52 = vld [vmem:[%s15057_s5] sm:$0x3]  ;;  %vm4058_vm5 = vcmask 1047559   ;;  %s11223_s5 = sld [smem:[#allocation9 + $0xd]] }
 0x38a   : > { %v2835_v41 = vpop.permute.xlu1 %2834 }
 0x38b   : > { %v3090_v9 = vsel %vm1600_vm6, %v3043_v36, %v2835_v41  ;;  %v3652_v36 = vsel %vm3650_vm8, %v3645_v52, 0  ;;  %vm4069_vm6 = vcmask 154648  }
 0x38c   : > { %3365 = vmatmul.mubr.bf16.gmra.mrb[60].mxu1 %v3090_v9 }
 0x38d   : > { %8586 = vmatprep.mubr.msk.bf16.mxu1 %vm8970_vm7, %v15054_v42  ;;  %8585 = vmatpush3.bf16.msra.mxu1 %v3652_v36  ;;  %vm4474_vm7 = vcmask 1046528  }
 0x390   : > { %v3246_v38 = vpop.f32.mrb[0].mxu1 }
 0x391   : > { %v3248_v51 = vpop.f32.mrb[1].mxu1 }
 0x392   : > { %v3249_v31 = vpop.f32.mrb[2].mxu1  ;;  %v10494_v51 = vld [vmem:[%s15053_s3 + $0x2] ss:$0 sm:$0xff] }
 0x393   : > { %v3251_v35 = vpop.f32.mrb[3].mxu1 }
 0x39f   : > { %v3254_v49 = vpop.f32.mrb[4].mxu1 }
 0x3a0   : > { %v3256_v30 = vpop.f32.mrb[5].mxu1 }
 0x3a1   : > { %v3257_v20 = vpop.f32.mrb[6].mxu1  ;;  %v3378_v30 = vmul.f32 %v10494_v51, %v3249_v31 }
 0x3a2   : > { %v3259_v45 = vpop.f32.mrb[7].mxu1  ;;  %v3380_v31 = vmul.f32 %v10494_v51, %v3257_v20 }
 0x3ac   : > { %v3262_v40 = vpop.f32.mrb[8].mxu1 }
 0x3ad   : > { %v3264_v53 = vpop.f32.mrb[9].mxu1 }
 0x3ae   : > { %v3265_v61 = vpop.f32.mrb[10].mxu1  ;;  %v3377_v53 = vmul.f32 %v10494_v51, %v3246_v38 }
 0x3af   : > { %v3267_v32 = vpop.f32.mrb[11].mxu1  ;;  %v3382_v20 = vmul.f32 %v10494_v51, %v3265_v61 }
 0x3b0   : > { %v3379_v32 = vmul.f32 %v10494_v51, %v3254_v49  ;;  %v3381_v49 = vmul.f32 %v10494_v51, %v3262_v40 }
 0x3bb   : > { %v3270_v54 = vpop.f32.mrb[12].mxu1 }
 0x3bc   : > { %v3272_v33 = vpop.f32.mrb[13].mxu1 }
 0x3bd   : > { %v3273_v50 = vpop.f32.mrb[14].mxu1  ;;  %v10504_v33 = vld [vmem:[%s15053_s3 + $0x3] ss:$0 sm:$0xff]  ;;  %s11219_s3 = sld [smem:[#allocation8 + $0x11]] }
 0x3be   : > { %v3275_v28 = vpop.f32.mrb[15].mxu1  ;;  %v3384_v61 = vmul.f32 %v10494_v51, %v3273_v50 }
 0x3bf   : > { %v10507_v28 = vadd.f32 %v10504_v33, %v3378_v30  ;;  %v3383_v30 = vmul.f32 %v10494_v51, %v3270_v54 }
 0x3c1   : > { %v3446_v38 = vsel %vm470_vm0, %v10507_v28, 0.0 }
 0x3c8   : > { %v3278_v26 = vpop.f32.mrb[16].mxu1 }
 0x3c9   : > { %v3280_v2 = vpop.f32.mrb[17].mxu1 }
 0x3ca   : > { %v3281_v25 = vpop.f32.mrb[18].mxu1  ;;  %v10510_v2 = vadd.f32 %v10504_v33, %v3377_v53 }
 0x3cb   : > { %v3283_v37 = vpop.f32.mrb[19].mxu1 }
 0x3cc   : > { %v10513_v37 = vadd.f32 %v10504_v33, %v3379_v32  ;;  %v10540_v32 = vadd.f32 %v10504_v33, %v3382_v20 }
 0x3d7   : > { %v10471_v23 = vpop.f32.mrb[20].mxu1 }
 0x3d8   : > { %v3288_v39 = vpop.f32.mrb[21].mxu1 }
 0x3d9   : > { %v10473_v60 = vpop.f32.mrb[22].mxu1  ;;  %v3445_v39 = vsel %vm470_vm0, %v10510_v2, 0.0 }
 0x3da   : > { %v3291_v29 = vpop.f32.mrb[23].mxu1 }
 0x3db   : > { %v3448_v29 = vsel %vm470_vm0, %v10513_v37, 0.0 }
 0x3e4   : > { %v10475_v24 = vpop.f32.mrb[24].mxu1 }
 0x3e5   : > { %v3296_v22 = vpop.f32.mrb[25].mxu1 }
 0x3e6   : > { %v10477_v21 = vpop.f32.mrb[26].mxu1  ;;  %v10524_v22 = vadd.f32 %v10504_v33, %v3380_v31 }
 0x3e7   : > { %v3299_v46 = vpop.f32.mrb[27].mxu1 }
 0x3e8   : > { %v3447_v46 = vadd.f32 %v3446_v38, %v3445_v39  ;;  %v10543_v38 = vadd.f32 %v10504_v33, %v3383_v30  ;;  %v3454_v39 = vsel %vm470_vm0, %v10540_v32, 0.0 }
 0x3ea   : > { %v3449_v36 = vadd.f32 %v3448_v29, %v3447_v46  ;;  %v3385_v29 = vmul.f32 %v10494_v51, %v3278_v26  ;;  %v3456_v54 = vsel %vm470_vm0, %v10543_v38, 0.0  ;;  %v10552_v46 = vadd.f32 %v10504_v33, %v3384_v61 }
 0x3eb   : > { %v3387_v26 = vmul.f32 %v10494_v51, %v10471_v23 }
 0x3ec   : > { %v3458_v30 = vsel %vm470_vm0, %v10552_v46, 0.0 }
 0x3f3   : > { %v10479_v27 = vpop.f32.mrb[28].mxu1 }
 0x3f4   : > { %v3304_v63 = vpop.f32.mrb[29].mxu1 }
 0x3f5   : > { %v10481_v34 = vpop.f32.mrb[30].mxu1 }
 0x3f6   : > { %v3307_v19 = vpop.f32.mrb[31].mxu1 }
 0x3f7   : > { %v10529_v19 = vadd.f32 %v10504_v33, %v3381_v49 }
 0x3f9   : > { %v3452_v53 = vsel %vm470_vm0, %v10529_v19, 0.0 }
 0x400   : > { %v10489_v41 = vpop.f32.mrb[32].mxu1 }
 0x401   : > { %v3312_v9 = vpop.f32.mrb[33].mxu1  ;;  %v3393_v59 = vmul.f32 %v10494_v51, %v10489_v41 }
 0x402   : > { %v10496_v35 = vpop.f32.mrb[34].mxu1  ;;  %v3450_v9 = vsel %vm470_vm0, %v10524_v22, 0.0 }
 0x403   : > { %v3315_v45 = vpop.f32.mrb[35].mxu1  ;;  %v3451_v31 = vadd.f32 %v3450_v9, %v3449_v36  ;;  %v3386_v36 = vmul.f32 %v10494_v51, %v3281_v25  ;;  %v10568_v25 = vadd.f32 %v10504_v33, %v3387_v26 }
 0x405   : > { %v3453_v49 = vadd.f32 %v3452_v53, %v3451_v31  ;;  %v10565_v61 = vadd.f32 %v10504_v33, %v3386_v36  ;;  %v3532_v17 = vsel %vm470_vm0, %v10568_v25, -inf }
 0x407   : > { %v3455_v20 = vadd.f32 %v3454_v39, %v3453_v49  ;;  %v3462_v23 = vsel %vm470_vm0, %v10565_v61, 0.0 }
 0x409   : > { %v3457_v9 = vadd.f32 %v3456_v54, %v3455_v20  ;;  %v3389_v20 = vmul.f32 %v10494_v51, %v10475_v24  ;;  %v3391_v24 = vmul.f32 %v10494_v51, %v10479_v27 }
 0x40b   : > { %v3459_v39 = vadd.f32 %v3458_v30, %v3457_v9  ;;  %v10582_v30 = vadd.f32 %v10504_v33, %v3389_v20  ;;  %v10596_v16 = vadd.f32 %v10504_v33, %v3391_v24  ;;  %v10610_v24 = vadd.f32 %v10504_v33, %v3393_v59 }
 0x40d   : > { %v3536_v12 = vsel %vm470_vm0, %v10582_v30, -inf }
 0x40f   : > { %v10526_v63 = vpop.f32.mrb[36].mxu1 }
 0x410   : > { %v3320_v52 = vpop.f32.mrb[37].mxu1  ;;  %v3395_v41 = vmul.f32 %v10494_v51, %v10526_v63 }
 0x411   : > { %v10532_v40 = vpop.f32.mrb[38].mxu1  ;;  %v10555_v52 = vadd.f32 %v10504_v33, %v3385_v29  ;;  %v3388_v29 = vmul.f32 %v10494_v51, %v10473_v60  ;;  %v3390_v60 = vmul.f32 %v10494_v51, %v10477_v21  ;;  %v3392_v21 = vmul.f32 %v10494_v51, %v10481_v34 }
 0x412   : > { %v3323_v45 = vpop.f32.mrb[39].mxu1  ;;  %v3394_v34 = vmul.f32 %v10494_v51, %v10496_v35  ;;  %v10624_v59 = vadd.f32 %v10504_v33, %v3395_v41  ;;  %v3396_v35 = vmul.f32 %v10494_v51, %v10532_v40 }
 0x413   : > { %v3460_v31 = vsel %vm470_vm0, %v10555_v52, 0.0  ;;  %v10579_v36 = vadd.f32 %v10504_v33, %v3388_v29  ;;  %v10593_v29 = vadd.f32 %v10504_v33, %v3390_v60  ;;  %v3472_v60 = vsel %vm470_vm0, %v10596_v16, 0.0 }
 0x414   : > { %v3461_v54 = vadd.f32 %v3460_v31, %v3459_v39  ;;  %v3468_v39 = vsel %vm470_vm0, %v10582_v30, 0.0  ;;  %v3528_v48 = vsel %vm470_vm0, %v10555_v52, -inf }
 0x415   : > { %v3466_v31 = vsel %vm470_vm0, %v10579_v36, 0.0  ;;  %v3470_v27 = vsel %vm470_vm0, %v10593_v29, 0.0  ;;  %v3538_v13 = vsel %vm470_vm0, %v10593_v29, -inf }
 0x416   : > { %v3463_v9 = vadd.f32 %v3462_v23, %v3461_v54 }
 0x41c   : > { %v3326_v50 = vpop.f32.mrb[40].mxu1 }
 0x41d   : > { %v3328_v45 = vpop.f32.mrb[41].mxu1  ;;  %v3397_v62 = vmul.f32 %v10494_v51, %v3326_v50 }
 0x41e   : > { %v3329_v53 = vpop.f32.mrb[42].mxu1  ;;  %v3464_v45 = vsel %vm470_vm0, %v10568_v25, 0.0 }
 0x41f   : > { %v3331_v49 = vpop.f32.mrb[43].mxu1  ;;  %v3465_v26 = vadd.f32 %v3464_v45, %v3463_v9  ;;  %v10637_v41 = vadd.f32 %v10504_v33, %v3397_v62  ;;  %v3398_v40 = vmul.f32 %v10494_v51, %v3329_v53 }
 0x421   : > { %v3467_v23 = vadd.f32 %v3466_v31, %v3465_v26  ;;  %v10607_v26 = vadd.f32 %v10504_v33, %v3392_v21  ;;  %v10621_v21 = vadd.f32 %v10504_v33, %v3394_v34  ;;  %v3480_v34 = vsel %vm470_vm0, %v10624_v59, 0.0 }
 0x422   : > { %v10646_v50 = vadd.f32 %v10504_v33, %v3398_v40 }
 0x423   : > { %v3469_v9 = vadd.f32 %v3468_v39, %v3467_v23  ;;  %v3476_v23 = vsel %vm470_vm0, %v10610_v24, 0.0  ;;  %v3478_v63 = vsel %vm470_vm0, %v10621_v21, 0.0 }
 0x425   : > { %v3471_v31 = vadd.f32 %v3470_v27, %v3469_v9 }
 0x427   : > { %v3473_v39 = vadd.f32 %v3472_v60, %v3471_v31 }
 0x42b   : > { %v3334_v49 = vpop.f32.mrb[44].mxu1 }
 0x42c   : > { %v3336_v54 = vpop.f32.mrb[45].mxu1 }
 0x42d   : > { %v3337_v20 = vpop.f32.mrb[46].mxu1  ;;  %v3474_v54 = vsel %vm470_vm0, %v10607_v26, 0.0 }
 0x42e   : > { %v3339_v45 = vpop.f32.mrb[47].mxu1  ;;  %v3400_v62 = vmul.f32 %v10494_v51, %v3337_v20 }
 0x42f   : > { %v3475_v45 = vadd.f32 %v3474_v54, %v3473_v39  ;;  %v10634_v39 = vadd.f32 %v10504_v33, %v3396_v35 }
 0x430   : > { %v10658_v40 = vadd.f32 %v10504_v33, %v3400_v62 }
 0x431   : > { %v3477_v60 = vadd.f32 %v3476_v23, %v3475_v45  ;;  %v3482_v45 = vsel %vm470_vm0, %v10634_v39, 0.0 }
 0x433   : > { %v3479_v54 = vadd.f32 %v3478_v63, %v3477_v60 }
 0x435   : > { %v3481_v23 = vadd.f32 %v3480_v34, %v3479_v54  ;;  %v3486_v34 = vsel %vm470_vm0, %v10646_v50, 0.0 }
 0x437   : > { %v3483_v35 = vadd.f32 %v3482_v45, %v3481_v23 }
 0x438   : > { %v3342_v9 = vpop.f32.mrb[48].mxu1 }
 0x439   : > { %v3344_v27 = vpop.f32.mrb[49].mxu1  ;;  %v3401_v54 = vmul.f32 %v10494_v51, %v3342_v9 }
 0x43a   : > { %v3345_v31 = vpop.f32.mrb[50].mxu1  ;;  %v3399_v27 = vmul.f32 %v10494_v51, %v3334_v49 }
 0x43b   : > { %v3347_v57 = vpop.f32.mrb[51].mxu1  ;;  %v3402_v20 = vmul.f32 %v10494_v51, %v3345_v31 }
 0x43c   : > { %v3484_v57 = vsel %vm470_vm0, %v10637_v41, 0.0  ;;  %v10649_v60 = vadd.f32 %v10504_v33, %v3399_v27  ;;  %v10661_v27 = vadd.f32 %v10504_v33, %v3401_v54  ;;  %v3517_v54 = vsel %vm470_vm0, %v10507_v28, -inf }
 0x43d   : > { %v3485_v63 = vadd.f32 %v3484_v57, %v3483_v35  ;;  %v3490_v35 = vsel %vm470_vm0, %v10658_v40, 0.0  ;;  %v10670_v56 = vadd.f32 %v10504_v33, %v3402_v20  ;;  %v3519_v20 = vsel %vm470_vm0, %v10524_v22, -inf }
 0x43e   : > { %v3488_v55 = vsel %vm470_vm0, %v10649_v60, 0.0 }
 0x43f   : > { %v3487_v45 = vadd.f32 %v3486_v34, %v3485_v63  ;;  %v3520_v63 = vsel %vm470_vm0, %v10529_v19, -inf  ;;  %v3522_v34 = vsel %vm470_vm0, %v10540_v32, -inf }
 0x440   : > { %v3523_v47 = vmax.f32 %v3517_v54, %v3522_v34  ;;  %v3534_v54 = vsel %vm470_vm0, %v10579_v36, -inf }
 0x441   : > { %v3489_v57 = vadd.f32 %v3488_v55, %v3487_v45 }
 0x443   : > { %v3491_v62 = vadd.f32 %v3490_v35, %v3489_v57  ;;  %v3524_v57 = vsel %vm470_vm0, %v10543_v38, -inf  ;;  %v3526_v35 = vsel %vm470_vm0, %v10552_v46, -inf }
 0x447   : > { %v3350_v53 = vpop.f32.mrb[52].mxu1 }
 0x448   : > { %v3352_v49 = vpop.f32.mrb[53].mxu1  ;;  %v3403_v9 = vmul.f32 %v10494_v51, %v3350_v53  ;;  %v3516_v53 = vsel %vm470_vm0, %v10510_v2, -inf }
 0x449   : > { %v3353_v58 = vpop.f32.mrb[54].mxu1  ;;  %v3492_v49 = vsel %vm470_vm0, %v10661_v27, 0.0 }
 0x44a   : > { %v3355_v23 = vpop.f32.mrb[55].mxu1  ;;  %v10677_v55 = vadd.f32 %v10504_v33, %v3403_v9  ;;  %v3404_v31 = vmul.f32 %v10494_v51, %v3353_v58  ;;  %v3493_v45 = vadd.f32 %v3492_v49, %v3491_v62  ;;  %v3494_v58 = vsel %vm470_vm0, %v10670_v56, 0.0 }
 0x44b   : > { %v3518_v23 = vsel %vm470_vm0, %v10513_v37, -inf  ;;  %v3521_v9 = vmax.f32 %v3516_v53, %v3520_v63  ;;  %v3530_v49 = vsel %vm470_vm0, %v10565_v61, -inf  ;;  %v3527_v53 = vmax.f32 %v3519_v20, %v3526_v35 }
 0x44c   : > { %v3496_v18 = vsel %vm470_vm0, %v10677_v55, 0.0  ;;  %v10703_v14 = vadd.f32 %v10504_v33, %v3404_v31  ;;  %v3525_v34 = vmax.f32 %v3518_v23, %v3524_v57  ;;  %v3495_v43 = vadd.f32 %v3494_v58, %v3493_v45 }
 0x44d   : > { %v3531_v23 = vmax.f32 %v3523_v47, %v3530_v49  ;;  %v3540_v45 = vsel %vm470_vm0, %v10596_v16, -inf  ;;  %v3542_v35 = vsel %vm470_vm0, %v10607_v26, -inf  ;;  %v3544_v58 = vsel %vm470_vm0, %v10610_v24, -inf }
 0x44e   : > { %v3533_v20 = vmax.f32 %v3525_v34, %v3532_v17  ;;  %v3497_v57 = vadd.f32 %v3496_v18, %v3495_v43  ;;  %v3535_v11 = vmax.f32 %v3527_v53, %v3534_v54  ;;  %v3546_v47 = vsel %vm470_vm0, %v10621_v21, -inf }
 0x44f   : > { %v3548_v17 = vsel %vm470_vm0, %v10624_v59, -inf  ;;  %v3550_v18 = vsel %vm470_vm0, %v10634_v39, -inf  ;;  %v3552_v53 = vsel %vm470_vm0, %v10637_v41, -inf  ;;  %v3554_v54 = vsel %vm470_vm0, %v10646_v50, -inf }
 0x450   : > { %v3543_v49 = vmax.f32 %v3535_v11, %v3542_v35  ;;  %v3562_v11 = vsel %vm470_vm0, %v10670_v56, -inf }
 0x454   : > { %v3358_v62 = vpop.f32.mrb[56].mxu1 }
 0x455   : > { %v3405_v15 = vmul.f32 %v10494_v51, %v3358_v62  ;;  %v3360_v63 = vpop.f32.mrb[57].mxu1 }
 0x456   : > { %v3361_v44 = vpop.f32.mrb[58].mxu1  ;;  %v3529_v63 = vmax.f32 %v3521_v9, %v3528_v48  ;;  %v3541_v9 = vmax.f32 %v3533_v20, %v3540_v45 }
 0x457   : > { %v10713_v10 = vadd.f32 %v10504_v33, %v3405_v15  ;;  %v3406_v31 = vmul.f32 %v10494_v51, %v3361_v44  ;;  %v3363_v62 = vpop.f32.mrb[59].mxu1  ;;  %v3498_v15 = vsel %vm470_vm0, %v10703_v14, 0.0  ;;  %v3539_v44 = vmax.f32 %v3531_v23, %v3538_v13 }
 0x458   : > { %v3537_v7 = vmax.f32 %v3529_v63, %v3536_v12  ;;  %v3499_v12 = vadd.f32 %v3498_v15, %v3497_v57  ;;  %v3556_v62 = vsel %vm470_vm0, %v10649_v60, -inf  ;;  %v3549_v63 = vmax.f32 %v3541_v9, %v3548_v17 }
 0x459   : > { %v3500_v48 = vsel %vm470_vm0, %v10713_v10, 0.0  ;;  %v10733_v43 = vadd.f32 %v10504_v33, %v3406_v31  ;;  %v3547_v13 = vmax.f32 %v3539_v44, %v3546_v47  ;;  %v3551_v23 = vmax.f32 %v3543_v49, %v3550_v18 }
 0x45a   : > { %v3545_v34 = vmax.f32 %v3537_v7, %v3544_v58  ;;  %v3558_v31 = vsel %vm470_vm0, %v10658_v40, -inf  ;;  %v3501_v8 = vadd.f32 %v3500_v48, %v3499_v12  ;;  %v3560_v7 = vsel %vm470_vm0, %v10661_v27, -inf }
 0x45b   : > { %v3502_v57 = vsel %vm470_vm0, %v10733_v43, 0.0  ;;  %v3555_v15 = vmax.f32 %v3547_v13, %v3554_v54  ;;  %v3557_v44 = vmax.f32 %v3549_v63, %v3556_v62  ;;  %v3564_v47 = vsel %vm470_vm0, %v10677_v55, -inf }
 0x45c   : > { %v3553_v58 = vmax.f32 %v3545_v34, %v3552_v53  ;;  %v3566_v18 = vsel %vm470_vm0, %v10703_v14, -inf  ;;  %v3570_v48 = vsel %vm470_vm0, %v10733_v43, -inf  ;;  %v3503_v53 = vadd.f32 %v3502_v57, %v3501_v8 }
 0x45d   : > { %v3563_v13 = vmax.f32 %v3555_v15, %v3562_v11  ;;  %v3568_v54 = vsel %vm470_vm0, %v10713_v10, -inf }
 0x45e   : > { %v3561_v34 = vmax.f32 %v3553_v58, %v3560_v7 }
 0x45f   : > { %v3366_v20 = vpop.f32.mrb[60].mxu1 }
 0x460   : > { %v3407_v45 = vmul.f32 %v10494_v51, %v3366_v20  ;;  %v3368_v35 = vpop.f32.mrb[61].mxu1  ;;  %v3559_v20 = vmax.f32 %v3551_v23, %v3558_v31  ;;  %v3569_v31 = vmax.f32 %v3561_v34, %v3568_v54 }
 0x461   : > { %v3369_v17 = vpop.f32.mrb[62].mxu1 }
 0x462   : > { %v10757_v9 = vadd.f32 %v10504_v33, %v3407_v45  ;;  %v3408_v49 = vmul.f32 %v10494_v51, %v3369_v17  ;;  %v3371_v12 = vpop.f32.mrb[63].mxu1  ;;  %v3565_v45 = vmax.f32 %v3557_v44, %v3564_v47  ;;  %v3567_v5 = vmax.f32 %v3559_v20, %v3566_v18 }
 0x463   : > { %v3571_v51 = vmax.f32 %v3563_v13, %v3570_v48 }
 0x464   : > { %v3504_v62 = vsel %vm470_vm0, %v10757_v9, 0.0  ;;  %v3572_v63 = vsel %vm470_vm0, %v10757_v9, -inf  ;;  %v10767_v35 = vadd.f32 %v10504_v33, %v3408_v49 }
 0x465   : > { %v3505_v17 = vadd.f32 %v3504_v62, %v3503_v53  ;;  %v3573_v7 = vmax.f32 %v3565_v45, %v3572_v63  ;;  %v3576_v58 = vmax.f32 %v3569_v31, %v3571_v51 }
 0x466   : > { %v3506_v23 = vsel %vm470_vm0, %v10767_v35, 0.0  ;;  %v3574_v8 = vsel %vm470_vm0, %v10767_v35, -inf }
 0x467   : > { %v3507_v11 = vadd.f32 %v3506_v23, %v3505_v17  ;;  %v3575_v57 = vmax.f32 %v3567_v5, %v3574_v8 }
 0x469   : > { %v3508_v15 = vrot.slane %v3507_v11, 4  ;;  %v3577_v12 = vmax.f32 %v3573_v7, %v3575_v57 }
 0x46b   : > { %v3509_v6 = vadd.f32 %v3508_v15, %v3507_v11  ;;  %v3578_v33 = vmax.f32 %v3576_v58, %v3577_v12 }
 0x46d   : > { %v3510_v49 = vrot.slane %v3509_v6, 2  ;;  %v3579_v44 = vrot.slane %v3578_v33, 4 }
 0x46f   : > { %v3511_v47 = vadd.f32 %v3510_v49, %v3509_v6  ;;  %v3580_v18 = vmax.f32 %v3578_v33, %v3579_v44  ;;  %v3700_v49 = vlaneseq }
 0x471   : > { %v3512_v48 = vrot.slane %v3511_v47, 1  ;;  %v3581_v20 = vrot.slane %v3580_v18, 2  ;;  %v10776_v44 = vshrl.u32 %v3700_v49, 7 }
 0x473   : > { %v3513_v13 = vadd.f32 %v3512_v48, %v3511_v47  ;;  %v3582_v53 = vmax.f32 %v3580_v18, %v3581_v20  ;;  %15058 = vst [vmem:[#allocation60_spill] sm:$0xff] %v10776_v44  ;;  %v10779_v47 = vsub.s32 0, %v10776_v44 }
 0x475   : > { %v3583_v62 = vrot.slane %v3582_v53, 1  ;;  %v3515_v3 = vmul.f32 0.00390625, %v3513_v13  ;;  %15059 = vst [vmem:[#allocation61_spill] sm:$0xff] %v10779_v47 }
 0x477   : > { %v3584_v34 = vmax.f32 %v3582_v53, %v3583_v62 }
 0x479   : > { %v3586_v54 = vsel %vm3585_vm9, %v3515_v3, %v3584_v34 }
 0x47a   : > { %v3587_v5 = vpack.c.bf16 %v3586_v54, %v3586_v54 }
 0x47c   : > { %8581 = vmatmul.mubr.msk.bf16.vlgmr.msra.gmra.mrb[64].mxu0 %vm470_vm0, %v3587_v5 }
 0x54f   : > { %v3633_v63 = vpop.f32.mrb[64].mxu0 }
 0x550   : > { %v3639_v45 = vmax.f32 %v3633_v63, 0.0  ;;  %v8582_v51 = vpop.f32.mrb[65].mxu0 }
 0x551   : > { %v3636_v17 = vpop.f32.mrb[66].mxu0 }
 0x552   : > { %v3641_v23 = vrot.slane %v3639_v45, 1  ;;  %v8583_v6 = vpop.f32.mrb[67].mxu0 }
 0x554   : > { %v3643_v8 = vadd.f32 %v3641_v23, %v3639_v45 }
 0x556   : > { %v3644_v31 = vpack.c.bf16 %v3643_v8, %v3643_v8 }
 0x558   : > { %8587 = vmatmul.mubr.msk.bf16.vlgmr.msra.gmra.mrb[64].mxu1 %vm3646_vm10, %v3644_v31  ;;  %vm4613_vm10 = vcmask 1045504  }
 0x62b   : > { %v3688_v7 = vpop.f32.mrb[64].mxu1 }
 0x62c   : > { %v3694_v11 = vsub.f32 0.0, %v3688_v7  ;;  %v8588_v57 = vpop.f32.mrb[65].mxu1 }
 0x62d   : > { %v3691_v58 = vpop.f32.mrb[66].mxu1 }
 0x62e   : > { %v3695_v15 = vmul.f32 1.442695, %v3694_v11  ;;  %v8589_v12 = vpop.f32.mrb[67].mxu1 }
 0x630   : > { %8728 = vpow2.f32 %v3695_v15 }
 0x63a   : > { %v8729_v3 = vpop.eup %8728 }
 0x63b   : > { %v3697_v33 = vadd.f32 1.0, %v8729_v3 }
 0x63d   : > { %8730 = vrcp.f32 %v3697_v33 }
 0x647   : > { %v8731_v18 = vpop.eup %8730 }
 0x648   : > { %v10782_v48 = vrot.slane %v8731_v18, %v10779_v47 }
 0x64a   : > { %v10786_v20 = vmul.f32 %v10782_v48, %v10507_v28  ;;  %v10790_v13 = vmul.f32 %v10782_v48, %v10510_v2  ;;  %v10798_v34 = vmul.f32 %v10782_v48, %v10529_v19  ;;  %v10802_v54 = vmul.f32 %v10782_v48, %v10513_v37 }
 0x64b   : > { %v10810_v5 = vmul.f32 %v10782_v48, %v10543_v38  ;;  %v10814_v19 = vmul.f32 %v10782_v48, %v10524_v22  ;;  %v10822_v45 = vmul.f32 %v10782_v48, %v10555_v52  ;;  %v10826_v38 = vmul.f32 %v10782_v48, %v10540_v32 }
 0x64c   : > { %15060 = vst [vmem:[#allocation62_spill] sm:$0xff] %v10786_v20  ;;  %15061 = vst [vmem:[#allocation63_spill] sm:$0xff] %v10790_v13  ;;  %v3739_v53 = vsel %vm470_vm0, %v10786_v20, 0.0  ;;  %v3736_v62 = vsel %vm470_vm0, %v10790_v13, 0.0  ;;  %v3748_v28 = vsel %vm470_vm0, %v10798_v34, 0.0  ;;  %v3742_v2 = vsel %vm470_vm0, %v10802_v54, 0.0 }
 0x64d   : > { %15062 = vst [vmem:[#allocation64_spill] sm:$0xff] %v10798_v34  ;;  %15063 = vst [vmem:[#allocation65_spill] sm:$0xff] %v10802_v54  ;;  %3740 = vadd.xlane.f32.xlu1 %v3739_v53  ;;  %3737 = vadd.xlane.f32.xlu0 %v3736_v62  ;;  %v3754_v37 = vsel %vm470_vm0, %v10810_v5, 0.0  ;;  %v3745_v63 = vsel %vm470_vm0, %v10814_v19, 0.0  ;;  %v3760_v22 = vsel %vm470_vm0, %v10822_v45, 0.0  ;;  %v3751_v51 = vsel %vm470_vm0, %v10826_v38, 0.0 }
 0x64e   : > { %15064 = vst [vmem:[#allocation66_spill] sm:$0xff] %v10810_v5  ;;  %15065 = vst [vmem:[#allocation67_spill] sm:$0xff] %v10814_v19  ;;  %v10834_v17 = vmul.f32 %v10782_v48, %v10568_v25  ;;  %v10838_v52 = vmul.f32 %v10782_v48, %v10552_v46  ;;  %v10846_v6 = vmul.f32 %v10782_v48, %v10582_v30 }
 0x64f   : > { %15066 = vst [vmem:[#allocation68_spill] sm:$0xff] %v10822_v45  ;;  %15067 = vst [vmem:[#allocation69_spill] sm:$0xff] %v10826_v38  ;;  %v10850_v25 = vmul.f32 %v10782_v48, %v10565_v61  ;;  %v10858_v31 = vmul.f32 %v10782_v48, %v10596_v16  ;;  %v10862_v30 = vmul.f32 %v10782_v48, %v10579_v36 }
 0x650   : > { %15068 = vst [vmem:[#allocation70_spill] sm:$0xff] %v10834_v17  ;;  %15069 = vst [vmem:[#allocation71_spill] sm:$0xff] %v10838_v52  ;;  %v3766_v32 = vsel %vm470_vm0, %v10834_v17, 0.0  ;;  %v3757_v23 = vsel %vm470_vm0, %v10838_v52, 0.0  ;;  %v3772_v46 = vsel %vm470_vm0, %v10846_v6, 0.0  ;;  %v10870_v11 = vmul.f32 %v10782_v48, %v10610_v24 }
 0x651   : > { %3749 = vadd.xlane.f32.xlu1 %v3748_v28  ;;  %3743 = vadd.xlane.f32.xlu0 %v3742_v2  ;;  %15070 = vst [vmem:[#allocation72_spill] sm:$0xff] %v10846_v6  ;;  %15071 = vst [vmem:[#allocation73_spill] sm:$0xff] %v10850_v25  ;;  %v3763_v8 = vsel %vm470_vm0, %v10850_v25, 0.0  ;;  %v3778_v61 = vsel %vm470_vm0, %v10858_v31, 0.0  ;;  %v3769_v7 = vsel %vm470_vm0, %v10862_v30, 0.0  ;;  %v10874_v16 = vmul.f32 %v10782_v48, %v10593_v29 }
 0x652   : > { %15072 = vst [vmem:[#allocation74_spill] sm:$0xff] %v10858_v31  ;;  %15073 = vst [vmem:[#allocation75_spill] sm:$0xff] %v10862_v30  ;;  %v3784_v36 = vsel %vm470_vm0, %v10870_v11, 0.0  ;;  %v10882_v58 = vmul.f32 %v10782_v48, %v10624_v59  ;;  %v10886_v24 = vmul.f32 %v10782_v48, %v10607_v26  ;;  %v10894_v12 = vmul.f32 %v10782_v48, %v10637_v41 }
 0x653   : > { %15074 = vst [vmem:[#allocation76_spill] sm:$0xff] %v10870_v11  ;;  %15075 = vst [vmem:[#allocation77_spill] sm:$0xff] %v10874_v16  ;;  %v3775_v57 = vsel %vm470_vm0, %v10874_v16, 0.0  ;;  %v10898_v59 = vmul.f32 %v10782_v48, %v10621_v21  ;;  %v10906_v33 = vmul.f32 %v10782_v48, %v10649_v60  ;;  %v10910_v41 = vmul.f32 %v10782_v48, %v10634_v39 }
 0x654   : > { %15076 = vst [vmem:[#allocation78_spill] sm:$0xff] %v10882_v58  ;;  %15077 = vst [vmem:[#allocation79_spill] sm:$0xff] %v10886_v24  ;;  %v3790_v29 = vsel %vm470_vm0, %v10882_v58, 0.0  ;;  %v3781_v15 = vsel %vm470_vm0, %v10886_v24, 0.0  ;;  %v3796_v26 = vsel %vm470_vm0, %v10894_v12, 0.0  ;;  %v10918_v53 = vmul.f32 %v10782_v48, %v10661_v27 }
 0x655   : > { %3755 = vadd.xlane.f32.xlu1 %v3754_v37  ;;  %3746 = vadd.xlane.f32.xlu0 %v3745_v63  ;;  %15078 = vst [vmem:[#allocation80_spill] sm:$0xff] %v10894_v12  ;;  %15079 = vst [vmem:[#allocation81_spill] sm:$0xff] %v10898_v59  ;;  %v3787_v3 = vsel %vm470_vm0, %v10898_v59, 0.0  ;;  %v3802_v21 = vsel %vm470_vm0, %v10906_v33, 0.0  ;;  %v3793_v18 = vsel %vm470_vm0, %v10910_v41, 0.0  ;;  %v10922_v60 = vmul.f32 %v10782_v48, %v10646_v50 }
 0x656   : > { %15080 = vst [vmem:[#allocation82_spill] sm:$0xff] %v10906_v33  ;;  %15081 = vst [vmem:[#allocation83_spill] sm:$0xff] %v10910_v41  ;;  %v3808_v39 = vsel %vm470_vm0, %v10918_v53, 0.0  ;;  %v10930_v28 = vmul.f32 %v10782_v48, %v10677_v55  ;;  %v10934_v27 = vmul.f32 %v10782_v48, %v10658_v40  ;;  %v10942_v37 = vmul.f32 %v10782_v48, %v10713_v10 }
 0x657   : > { %15082 = vst [vmem:[#allocation84_spill] sm:$0xff] %v10918_v53  ;;  %15083 = vst [vmem:[#allocation85_spill] sm:$0xff] %v10922_v60  ;;  %v3799_v62 = vsel %vm470_vm0, %v10922_v60, 0.0  ;;  %v10946_v55 = vmul.f32 %v10782_v48, %v10670_v56  ;;  %v10958_v56 = vmul.f32 %v10782_v48, %v10757_v9  ;;  %v10962_v63 = vmul.f32 %v10782_v48, %v10703_v14 }
 0x658   : > { %15084 = vst [vmem:[#allocation86_spill] sm:$0xff] %v10930_v28  ;;  %15085 = vst [vmem:[#allocation87_spill] sm:$0xff] %v10934_v27  ;;  %v3814_v50 = vsel %vm470_vm0, %v10930_v28, 0.0  ;;  %v3805_v2 = vsel %vm470_vm0, %v10934_v27, 0.0  ;;  %v3820_v40 = vsel %vm470_vm0, %v10942_v37, 0.0  ;;  %v4072_v9 = vsel %vm470_vm0, %v10790_v13, -inf }
 0x659   : > { %3761 = vadd.xlane.f32.xlu1 %v3760_v22  ;;  %3752 = vadd.xlane.f32.xlu0 %v3751_v51  ;;  %15086 = vst [vmem:[#allocation88_spill] sm:$0xff] %v10942_v37  ;;  %15087 = vst [vmem:[#allocation89_spill] sm:$0xff] %v10946_v55  ;;  %v3811_v10 = vsel %vm470_vm0, %v10946_v55, 0.0  ;;  %v3826_v22 = vsel %vm470_vm0, %v10958_v56, 0.0  ;;  %v3817_v51 = vsel %vm470_vm0, %v10962_v63, 0.0  ;;  %v4111_v42 = vsel %vm470_vm0, %v10874_v16, -inf }
 0x65a   : > { %15088 = vst [vmem:[#allocation90_spill] sm:$0xff] %v10958_v56  ;;  %15089 = vst [vmem:[#allocation91_spill] sm:$0xff] %v10962_v63  ;;  %v15099_v16 = vstv %s11201_s7 }
 0x65d   : > { %3767 = vadd.xlane.f32.xlu1 %v3766_v32  ;;  %3758 = vadd.xlane.f32.xlu0 %v3757_v23  ;;  %v10970_v32 = vmul.f32 %v10782_v48, %v10733_v43  ;;  %v10978_v23 = vmul.f32 %v10782_v48, %v10767_v35  ;;  %v4090_v35 = vsel %vm470_vm0, %v10810_v5, -inf  ;;  %v4081_v48 = vsel %vm470_vm0, %v10814_v19, -inf }
 0x65f   : > { %15090 = vst [vmem:[#allocation92_spill] sm:$0xff] %v10970_v32  ;;  %v3823_v14 = vsel %vm470_vm0, %v10970_v32, 0.0  ;;  %15091 = vst [vmem:[#allocation93_spill] sm:$0xff] %v10978_v23  ;;  %v3829_v43 = vsel %vm470_vm0, %v10978_v23, 0.0 }
 0x661   : > { %3773 = vadd.xlane.f32.xlu1 %v3772_v46  ;;  %3764 = vadd.xlane.f32.xlu0 %v3763_v8  ;;  %v4078_v46 = vsel %vm470_vm0, %v10802_v54, -inf  ;;  %v4084_v8 = vsel %vm470_vm0, %v10798_v34, -inf }
 0x665   : > { %3779 = vadd.xlane.f32.xlu1 %v3778_v61  ;;  %3770 = vadd.xlane.f32.xlu0 %v3769_v7  ;;  %v4075_v61 = vsel %vm470_vm0, %v10786_v20, -inf  ;;  %v4096_v7 = vsel %vm470_vm0, %v10822_v45, -inf }
 0x669   : > { %3785 = vadd.xlane.f32.xlu1 %v3784_v36  ;;  %3776 = vadd.xlane.f32.xlu0 %v3775_v57  ;;  %v4087_v36 = vsel %vm470_vm0, %v10826_v38, -inf  ;;  %v4102_v57 = vsel %vm470_vm0, %v10834_v17, -inf }
 0x66d   : > { %3791 = vadd.xlane.f32.xlu1 %v3790_v29  ;;  %3782 = vadd.xlane.f32.xlu0 %v3781_v15  ;;  %v4093_v29 = vsel %vm470_vm0, %v10838_v52, -inf  ;;  %v4108_v15 = vsel %vm470_vm0, %v10846_v6, -inf }
 0x671   : > { %3797 = vadd.xlane.f32.xlu1 %v3796_v26  ;;  %3788 = vadd.xlane.f32.xlu0 %v3787_v3  ;;  %v4099_v26 = vsel %vm470_vm0, %v10850_v25, -inf  ;;  %v4114_v3 = vsel %vm470_vm0, %v10858_v31, -inf }
 0x675   : > { %3803 = vadd.xlane.f32.xlu1 %v3802_v21  ;;  %3794 = vadd.xlane.f32.xlu0 %v3793_v18  ;;  %v4105_v21 = vsel %vm470_vm0, %v10862_v30, -inf  ;;  %v4120_v18 = vsel %vm470_vm0, %v10870_v11, -inf }
 0x679   : > { %3809 = vadd.xlane.f32.xlu1 %v3808_v39  ;;  %3800 = vadd.xlane.f32.xlu0 %v3799_v62  ;;  %v4126_v39 = vsel %vm470_vm0, %v10882_v58, -inf  ;;  %v4117_v62 = vsel %vm470_vm0, %v10886_v24, -inf  ;;  %v15098_v24 = vstv %s11199_s14 }
 0x67d   : > { %3815 = vadd.xlane.f32.xlu1 %v3814_v50  ;;  %3806 = vadd.xlane.f32.xlu0 %v3805_v2  ;;  %v4132_v50 = vsel %vm470_vm0, %v10894_v12, -inf  ;;  %v4123_v2 = vsel %vm470_vm0, %v10898_v59, -inf  ;;  %v15097_v59 = vstv %s11197_s6 }
 0x681   : > { %3821 = vadd.xlane.f32.xlu1 %v3820_v40  ;;  %3812 = vadd.xlane.f32.xlu0 %v3811_v10  ;;  %v4138_v40 = vsel %vm470_vm0, %v10906_v33, -inf  ;;  %v4129_v10 = vsel %vm470_vm0, %v10910_v41, -inf }
 0x685   : > { %3827 = vadd.xlane.f32.xlu1 %v3826_v22  ;;  %3818 = vadd.xlane.f32.xlu0 %v3817_v51  ;;  %v4144_v22 = vsel %vm470_vm0, %v10918_v53, -inf  ;;  %v4135_v51 = vsel %vm470_vm0, %v10922_v60, -inf  ;;  %v15096_v60 = vstv %s11195_s26 }
 0x689   : > { %4073 = vmax.xlane.f32.xlu1 %v4072_v9  ;;  %3824 = vadd.xlane.f32.xlu0 %v3823_v14  ;;  %v4150_v9 = vsel %vm470_vm0, %v10930_v28, -inf  ;;  %v4141_v14 = vsel %vm470_vm0, %v10934_v27, -inf }
 0x68d   : > { %4079 = vmax.xlane.f32.xlu1 %v4078_v46  ;;  %3830 = vadd.xlane.f32.xlu0 %v3829_v43  ;;  %v4156_v46 = vsel %vm470_vm0, %v10942_v37, -inf  ;;  %v4147_v43 = vsel %vm470_vm0, %v10946_v55, -inf }
 0x691   : > { %4085 = vmax.xlane.f32.xlu1 %v4084_v8  ;;  %4076 = vmax.xlane.f32.xlu0 %v4075_v61  ;;  %v4162_v8 = vsel %vm470_vm0, %v10958_v56, -inf  ;;  %v4153_v61 = vsel %vm470_vm0, %v10962_v63, -inf }
 0x695   : > { %4091 = vmax.xlane.f32.xlu1 %v4090_v35  ;;  %4082 = vmax.xlane.f32.xlu0 %v4081_v48  ;;  %v4159_v35 = vsel %vm470_vm0, %v10970_v32, -inf  ;;  %v4165_v48 = vsel %vm470_vm0, %v10978_v23, -inf }
 0x699   : > { %4097 = vmax.xlane.f32.xlu1 %v4096_v7  ;;  %4088 = vmax.xlane.f32.xlu0 %v4087_v36 }
 0x69d   : > { %4103 = vmax.xlane.f32.xlu1 %v4102_v57  ;;  %4094 = vmax.xlane.f32.xlu0 %v4093_v29 }
 0x6a1   : > { %4109 = vmax.xlane.f32.xlu1 %v4108_v15  ;;  %4100 = vmax.xlane.f32.xlu0 %v4099_v26 }
 0x6a5   : > { %4115 = vmax.xlane.f32.xlu1 %v4114_v3  ;;  %4106 = vmax.xlane.f32.xlu0 %v4105_v21 }
 0x6a9   : > { %4121 = vmax.xlane.f32.xlu1 %v4120_v18  ;;  %4112 = vmax.xlane.f32.xlu0 %v4111_v42  ;;  %v3898_v18 = vand.u32 127, %v3700_v49 }
 0x6ad   : > { %4127 = vmax.xlane.f32.xlu1 %v4126_v39  ;;  %4118 = vmax.xlane.f32.xlu0 %v4117_v62  ;;  %v3904_v62 = vadd.s32 4294967285, %v3898_v18 }
 0x6b1   : > { %4133 = vmax.xlane.f32.xlu1 %v4132_v50  ;;  %4124 = vmax.xlane.f32.xlu0 %v4123_v2  ;;  %v3899_v50 = vadd.s32 4294967293, %v3898_v18 }
 0x6b5   : > { %4139 = vmax.xlane.f32.xlu1 %v4138_v40  ;;  %4130 = vmax.xlane.f32.xlu0 %v4129_v10  ;;  %v11048_v10 = vsub.s32 %v3904_v62, %v10776_v44 }
 0x6b9   : > { %4145 = vmax.xlane.f32.xlu1 %v4144_v22  ;;  %4136 = vmax.xlane.f32.xlu0 %v4135_v51 }
 0x6bd   : > { %4151 = vmax.xlane.f32.xlu1 %v4150_v9  ;;  %4142 = vmax.xlane.f32.xlu0 %v4141_v14  ;;  %v11051_v9 = vsub.s32 %v3899_v50, %v10776_v44 }
 0x6c1   : > { %4157 = vmax.xlane.f32.xlu1 %v4156_v46  ;;  %4148 = vmax.xlane.f32.xlu0 %v4147_v43 }
 0x6c5   : > { %4163 = vmax.xlane.f32.xlu1 %v4162_v8  ;;  %4154 = vmax.xlane.f32.xlu0 %v4153_v61 }
 0x6c9   : > { %4160 = vmax.xlane.f32.xlu0 %v4159_v35 }
 0x6cd   : > { %4166 = vmax.xlane.f32.xlu0 %v4165_v48 }
 0x6da   : > { %v3741_v7 = vpop.xlane.xlu1 %3740  ;;  %v3738_v36 = vpop.xlane.xlu0 %3737 }
 0x6db   : > { %v3834_v51 = vmul.f32 0.0625, %v3741_v7  ;;  %v3833_v14 = vmul.f32 0.0625, %v3738_v36 }
 0x6dd   : > { %v3908_v62 = vrot.slane %v3834_v51, %v11048_v10  ;;  %v3903_v7 = vrot.slane %v3833_v14, %v11051_v9 }
 0x6de   : > { %v3750_v57 = vpop.xlane.xlu1 %3749  ;;  %v3744_v29 = vpop.xlane.xlu0 %3743 }
 0x6df   : > { %v3835_v43 = vmul.f32 0.0625, %v3744_v29  ;;  %v3837_v61 = vmul.f32 0.0625, %v3750_v57 }
 0x6e1   : > { %v3914_v36 = vrot.slane %v3835_v43, %v11051_v9  ;;  %v3910_v43 = vsel %vm3909_vm13, %v3908_v62, %v3903_v7 }
 0x6e2   : > { %v3756_v15 = vpop.xlane.xlu1 %3755  ;;  %v3747_v26 = vpop.xlane.xlu0 %3746 }
 0x6e3   : > { %v3836_v22 = vmul.f32 0.0625, %v3747_v26  ;;  %v3839_v18 = vmul.f32 0.0625, %v3756_v15 }
 0x6e5   : > { %v3918_v56 = vrot.slane %v3836_v22, %v11048_v10  ;;  %v3932_v51 = vrot.slane %v3839_v18, %v11051_v9 }
 0x6e6   : > { %v3762_v3 = vpop.xlane.xlu1 %3761  ;;  %v3753_v21 = vpop.xlane.xlu0 %3752 }
 0x6e7   : > { %v3838_v46 = vmul.f32 0.0625, %v3753_v21  ;;  %v3841_v26 = vmul.f32 0.0625, %v3762_v3  ;;  %v3923_v21 = vrot.slane %v3837_v61, %v11051_v9  ;;  %v3919_v3 = vsel %vm3909_vm13, %v3918_v56, %v3914_v36 }
 0x6e8   : > { %v4047_v18 = vsel %vm4046_vm14, %v3919_v3, %v3910_v43 }
 0x6e9   : > { %v3927_v50 = vrot.slane %v3838_v46, %v11048_v10 }
 0x6ea   : > { %v3768_v42 = vpop.xlane.xlu1 %3767  ;;  %v3759_v39 = vpop.xlane.xlu0 %3758 }
 0x6eb   : > { %v3840_v8 = vmul.f32 0.0625, %v3759_v39  ;;  %v3843_v29 = vmul.f32 0.0625, %v3768_v42  ;;  %v3941_v42 = vrot.slane %v3841_v26, %v11051_v9 }
 0x6ed   : > { %v3936_v57 = vrot.slane %v3840_v8, %v11048_v10  ;;  %v3928_v8 = vsel %vm3909_vm13, %v3927_v50, %v3923_v21 }
 0x6ee   : > { %v3774_v2 = vpop.xlane.xlu1 %3773  ;;  %v3765_v40 = vpop.xlane.xlu0 %3764  ;;  %v4049_v26 = vsel %vm4048_vm15, %v3928_v8, %v4047_v18 }
 0x6ef   : > { %v3842_v49 = vmul.f32 0.0625, %v3765_v40  ;;  %v3845_v15 = vmul.f32 0.0625, %v3774_v2  ;;  %v3950_v2 = vrot.slane %v3843_v29, %v11051_v9  ;;  %v3937_v61 = vsel %vm3909_vm13, %v3936_v57, %v3932_v51 }
 0x6f0   : > { %v4051_v29 = vsel %vm4050_vm1, %v3937_v61, %v4049_v26 }
 0x6f1   : > { %v3945_v39 = vrot.slane %v3842_v49, %v11048_v10  ;;  %v3959_v56 = vrot.slane %v3845_v15, %v11051_v9 }
 0x6f2   : > { %v3780_v35 = vpop.xlane.xlu1 %3779  ;;  %v3771_v48 = vpop.xlane.xlu0 %3770 }
 0x6f3   : > { %v3844_v23 = vmul.f32 0.0625, %v3771_v48  ;;  %v3847_v49 = vmul.f32 0.0625, %v3780_v35 }
 0x6f5   : > { %v3954_v14 = vrot.slane %v3844_v23, %v11048_v10  ;;  %v3946_v23 = vsel %vm3909_vm13, %v3945_v39, %v3941_v42  ;;  %v3968_v21 = vrot.slane %v3847_v49, %v11051_v9 }
 0x6f6   : > { %v3786_v40 = vpop.xlane.xlu1 %3785  ;;  %v3777_v22 = vpop.xlane.xlu0 %3776  ;;  %v4053_v57 = vsel %vm4052_vm2, %v3946_v23, %v4051_v29 }
 0x6f7   : > { %v3846_v46 = vmul.f32 0.0625, %v3777_v22  ;;  %v3955_v50 = vsel %vm3909_vm13, %v3954_v14, %v3950_v2 }
 0x6f8   : > { %v4055_v39 = vsel %vm4054_vm3, %v3955_v50, %v4053_v57 }
 0x6f9   : > { %v3963_v48 = vrot.slane %v3846_v46, %v11048_v10 }
 0x6fa   : > { %v3792_v62 = vpop.xlane.xlu1 %3791  ;;  %v3783_v7 = vpop.xlane.xlu0 %3782 }
 0x6fb   : > { %v3848_v36 = vmul.f32 0.0625, %v3783_v7  ;;  %v3964_v35 = vsel %vm3909_vm13, %v3963_v48, %v3959_v56  ;;  %v3851_v26 = vmul.f32 0.0625, %v3792_v62 }
 0x6fc   : > { %v4057_v3 = vsel %vm4056_vm4, %v3964_v35, %v4055_v39 }
 0x6fd   : > { %v3972_v15 = vrot.slane %v3848_v36, %v11048_v10  ;;  %v3849_v36 = vmul.f32 0.0625, %v3786_v40 }
 0x6fe   : > { %v3798_v22 = vpop.xlane.xlu1 %3797  ;;  %v3789_v51 = vpop.xlane.xlu0 %3788 }
 0x6ff   : > { %v3973_v14 = vsel %vm3909_vm13, %v3972_v15, %v3968_v21  ;;  %v3850_v23 = vmul.f32 0.0625, %v3789_v51  ;;  %v3853_v29 = vmul.f32 0.0625, %v3798_v22  ;;  %v3977_v40 = vrot.slane %v3849_v36, %v11051_v9 }
 0x700   : > { %v4059_v46 = vsel %vm4058_vm5, %v3973_v14, %v4057_v3 }
 0x701   : > { %4070 = vst.msk [vmem:[#allocation3 + $0x3] sm:$0xff] %vm4069_vm6, %v4059_v46  ;;  %v3981_v14 = vrot.slane %v3850_v23, %v11048_v10  ;;  %v3995_v22 = vrot.slane %v3853_v29, %v11051_v9 }
 0x702   : > { %v3804_v43 = vpop.xlane.xlu1 %3803  ;;  %v3795_v42 = vpop.xlane.xlu0 %3794 }
 0x703   : > { %v3852_v56 = vmul.f32 0.0625, %v3795_v42  ;;  %v3855_v15 = vmul.f32 0.0625, %v3804_v43  ;;  %v3986_v42 = vrot.slane %v3851_v26, %v11051_v9 }
 0x705   : > { %v3990_v39 = vrot.slane %v3852_v56, %v11048_v10  ;;  %v4004_v56 = vrot.slane %v3855_v15, %v11051_v9 }
 0x706   : > { %v3810_v8 = vpop.xlane.xlu1 %3809  ;;  %v3801_v2 = vpop.xlane.xlu0 %3800 }
 0x707   : > { %v3854_v7 = vmul.f32 0.0625, %v3801_v2  ;;  %v3857_v46 = vmul.f32 0.0625, %v3810_v8  ;;  %v3991_v8 = vsel %vm3909_vm13, %v3990_v39, %v3986_v42 }
 0x709   : > { %v3999_v28 = vrot.slane %v3854_v7, %v11048_v10  ;;  %v4013_v26 = vrot.slane %v3857_v46, %v11051_v9 }
 0x70a   : > { %v3816_v61 = vpop.xlane.xlu1 %3815  ;;  %v3807_v49 = vpop.xlane.xlu0 %3806 }
 0x70b   : > { %v3856_v50 = vmul.f32 0.0625, %v3807_v49  ;;  %v3859_v51 = vmul.f32 0.0625, %v3816_v61  ;;  %v3982_v61 = vsel %vm3909_vm13, %v3981_v14, %v3977_v40 }
 0x70d   : > { %v4008_v62 = vrot.slane %v3856_v50, %v11048_v10  ;;  %v4000_v50 = vsel %vm3909_vm13, %v3999_v28, %v3995_v22  ;;  %v4022_v36 = vrot.slane %v3859_v51, %v11051_v9 }
 0x70e   : > { %v3822_v48 = vpop.xlane.xlu1 %3821  ;;  %v3813_v18 = vpop.xlane.xlu0 %3812 }
 0x70f   : > { %v3858_v35 = vmul.f32 0.0625, %v3813_v18  ;;  %v3861_v2 = vmul.f32 0.0625, %v3822_v48  ;;  %v4009_v48 = vsel %vm3909_vm13, %v4008_v62, %v4004_v56 }
 0x711   : > { %v4017_v43 = vrot.slane %v3858_v35, %v11048_v10  ;;  %v4031_v15 = vrot.slane %v3861_v2, %v11051_v9 }
 0x712   : > { %v3828_v57 = vpop.xlane.xlu1 %3827  ;;  %v3819_v21 = vpop.xlane.xlu0 %3818 }
 0x713   : > { %v3860_v3 = vmul.f32 0.0625, %v3819_v21  ;;  %v3863_v29 = vmul.f32 0.0625, %v3828_v57  ;;  %v4060_v21 = vsel %vm4046_vm14, %v3991_v8, %v3982_v61  ;;  %v4018_v39 = vsel %vm3909_vm13, %v4017_v43, %v4013_v26 }
 0x714   : > { %v4061_v14 = vsel %vm4048_vm15, %v4000_v50, %v4060_v21 }
 0x715   : > { %v4026_v23 = vrot.slane %v3860_v3, %v11048_v10  ;;  %v4062_v51 = vsel %vm4050_vm1, %v4009_v48, %v4061_v14  ;;  %v4040_v40 = vrot.slane %v3863_v29, %v11051_v9 }
 0x716   : > { %v4074_v49 = vpop.xlane.xlu1 %4073  ;;  %v3825_v18 = vpop.xlane.xlu0 %3824  ;;  %v4063_v57 = vsel %vm4052_vm2, %v4018_v39, %v4062_v51 }
 0x717   : > { %v3862_v7 = vmul.f32 0.0625, %v3825_v18  ;;  %v4027_v46 = vsel %vm3909_vm13, %v4026_v23, %v4022_v36 }
 0x718   : > { %v4064_v2 = vsel %vm4054_vm3, %v4027_v46, %v4063_v57  ;;  %v4203_v57 = vrot.slane %v4074_v49, %v11051_v9 }
 0x719   : > { %v4035_v35 = vrot.slane %v3862_v7, %v11048_v10 }
 0x71a   : > { %v4080_v3 = vpop.xlane.xlu1 %4079  ;;  %v3831_v42 = vpop.xlane.xlu0 %3830 }
 0x71b   : > { %v3864_v28 = vmul.f32 0.0625, %v3831_v42  ;;  %v4036_v62 = vsel %vm3909_vm13, %v4035_v35, %v4031_v15  ;;  %v4212_v14 = vrot.slane %v4080_v3, %v11051_v9 }
 0x71c   : > { %v4065_v56 = vsel %vm4056_vm4, %v4036_v62, %v4064_v2 }
 0x71d   : > { %v4044_v22 = vrot.slane %v3864_v28, %v11048_v10 }
 0x71e   : > { %v4086_v43 = vpop.xlane.xlu1 %4085  ;;  %v4077_v18 = vpop.xlane.xlu0 %4076 }
 0x71f   : > { %v4045_v8 = vsel %vm3909_vm13, %v4044_v22, %v4040_v40  ;;  %v4207_v46 = vrot.slane %v4077_v18, %v11048_v10  ;;  %v4221_v51 = vrot.slane %v4086_v43, %v11051_v9 }
 0x720   : > { %v4066_v23 = vsel %vm4058_vm5, %v4045_v8, %v4065_v56 }
 0x721   : > { %4071 = vst.msk [vmem:[#allocation3 + $0xb] sm:$0xff] %vm4069_vm6, %v4066_v23  ;;  %v4208_v23 = vsel %vm3909_vm13, %v4207_v46, %v4203_v57 }
 0x722   : > { %v4092_v7 = vpop.xlane.xlu1 %4091  ;;  %v4083_v61 = vpop.xlane.xlu0 %4082 }
 0x723   : > { %v4216_v21 = vrot.slane %v4083_v61, %v11048_v10  ;;  %v4230_v40 = vrot.slane %v4092_v7, %v11051_v9 }
 0x725   : > { %v4217_v22 = vsel %vm3909_vm13, %v4216_v21, %v4212_v14 }
 0x726   : > { %v4098_v26 = vpop.xlane.xlu1 %4097  ;;  %v4089_v50 = vpop.xlane.xlu0 %4088  ;;  %v4344_v7 = vsel %vm4046_vm14, %v4217_v22, %v4208_v23 }
 0x727   : > { %v4225_v15 = vrot.slane %v4089_v50, %v11048_v10  ;;  %v4239_v56 = vrot.slane %v4098_v26, %v11051_v9 }
 0x729   : > { %v4226_v3 = vsel %vm3909_vm13, %v4225_v15, %v4221_v51 }
 0x72a   : > { %v4104_v36 = vpop.xlane.xlu1 %4103  ;;  %v4095_v48 = vpop.xlane.xlu0 %4094  ;;  %v4345_v26 = vsel %vm4048_vm15, %v4226_v3, %v4344_v7  ;;  %v4407_v3 = vstv %s8401_s12  ;;  %s11203_s12 = sld [smem:[#allocation11 + $0xb]] }
 0x72b   : > { %v4234_v28 = vrot.slane %v4095_v48, %v11048_v10  ;;  %v4248_v43 = vrot.slane %v4104_v36, %v11051_v9 }
 0x72d   : > { %v4235_v61 = vsel %vm3909_vm13, %v4234_v28, %v4230_v40 }
 0x72e   : > { %v4110_v29 = vpop.xlane.xlu1 %4109  ;;  %v4101_v35 = vpop.xlane.xlu0 %4100  ;;  %v4346_v21 = vsel %vm4050_vm1, %v4235_v61, %v4345_v26 }
 0x72f   : > { %v4243_v62 = vrot.slane %v4101_v35, %v11048_v10  ;;  %v4257_v50 = vrot.slane %v4110_v29, %v11051_v9 }
 0x730   : > { %v15100_v32 = vstv %s11203_s12 }
 0x731   : > { %v4244_v48 = vsel %vm3909_vm13, %v4243_v62, %v4239_v56 }
 0x732   : > { %v4116_v39 = vpop.xlane.xlu1 %4115  ;;  %v4107_v42 = vpop.xlane.xlu0 %4106  ;;  %v4347_v14 = vsel %vm4052_vm2, %v4244_v48, %v4346_v21 }
 0x733   : > { %v4252_v2 = vrot.slane %v4107_v42, %v11048_v10  ;;  %v4266_v46 = vrot.slane %v4116_v39, %v11051_v9 }
 0x735   : > { %v4253_v35 = vsel %vm3909_vm13, %v4252_v2, %v4248_v43 }
 0x736   : > { %v4122_v8 = vpop.xlane.xlu1 %4121  ;;  %v4113_v18 = vpop.xlane.xlu0 %4112  ;;  %v4348_v29 = vsel %vm4054_vm3, %v4253_v35, %v4347_v14 }
 0x737   : > { %v4261_v49 = vrot.slane %v4113_v18, %v11048_v10 }
 0x739   : > { %v4262_v15 = vsel %vm3909_vm13, %v4261_v49, %v4257_v50 }
 0x73a   : > { %v4128_v42 = vpop.xlane.xlu1 %4127  ;;  %v4119_v36 = vpop.xlane.xlu0 %4118  ;;  %v4349_v51 = vsel %vm4056_vm4, %v4262_v15, %v4348_v29 }
 0x73b   : > { %v4270_v28 = vrot.slane %v4119_v36, %v11048_v10  ;;  %v4284_v21 = vrot.slane %v4128_v42, %v11051_v9 }
 0x73d   : > { %v4271_v62 = vsel %vm3909_vm13, %v4270_v28, %v4266_v46  ;;  %v4275_v28 = vrot.slane %v4122_v8, %v11051_v9 }
 0x73e   : > { %v4350_v57 = vsel %vm4058_vm5, %v4271_v62, %v4349_v51  ;;  %v4134_v40 = vpop.xlane.xlu1 %4133  ;;  %v4125_v22 = vpop.xlane.xlu0 %4124 }
 0x73f   : > { %4361 = vst.msk [vmem:[#allocation3 + $0x1b] sm:$0xff] %vm4069_vm6, %v4350_v57  ;;  %v4279_v15 = vrot.slane %v4125_v22, %v11048_v10  ;;  %v4293_v14 = vrot.slane %v4134_v40, %v11051_v9 }
 0x741   : > { %v4280_v22 = vsel %vm3909_vm13, %v4279_v15, %v4275_v28 }
 0x742   : > { %v4140_v2 = vpop.xlane.xlu1 %4139  ;;  %v4131_v56 = vpop.xlane.xlu0 %4130 }
 0x743   : > { %v4288_v50 = vrot.slane %v4131_v56, %v11048_v10  ;;  %v4302_v29 = vrot.slane %v4140_v2, %v11051_v9 }
 0x745   : > { %v4289_v51 = vsel %vm3909_vm13, %v4288_v50, %v4284_v21 }
 0x746   : > { %v11149_v18 = vld [vmem:[#allocation3 + $0x18] sm:$0xff]  ;;  %v4146_v39 = vpop.xlane.xlu1 %4145  ;;  %v4137_v23 = vpop.xlane.xlu0 %4136  ;;  %v4351_v8 = vsel %vm4046_vm14, %v4289_v51, %v4280_v22 }
 0x747   : > { %v4408_v43 = vmul.f32 %v4407_v3, %v11149_v18  ;;  %v4297_v48 = vrot.slane %v4137_v23, %v11048_v10  ;;  %v4311_v57 = vrot.slane %v4146_v39, %v11051_v9  ;;  %v5946_v31 = vmul.f32 %v15097_v59, %v11149_v18 }
 0x748   : > { %v11387_v6 = vmul.f32 %v15098_v24, %v11149_v18  ;;  %v11396_v37 = vmul.f32 %v15099_v16, %v11149_v18  ;;  %v11401_v17 = vmul.f32 %v15100_v32, %v11149_v18 }
 0x749   : > { %4414 = vrot.lane.b32.xlu1 %v4408_v43, %s14835_s25  ;;  %v4298_v42 = vsel %vm3909_vm13, %v4297_v48, %v4293_v14  ;;  %s11209_s25 = sld [smem:[#allocation11 + $0xd]] }
 0x74a   : > { %v4143_v61 = vpop.xlane.xlu0 %4142  ;;  %v4152_v49 = vpop.xlane.xlu1 %4151  ;;  %v4352_v39 = vsel %vm4048_vm15, %v4298_v42, %v4351_v8  ;;  %v4789_v42 = vstv %s11185_s21  ;;  %s11261_s21 = sld [smem:[#allocation9 + $0x27]]  ;;  %v11266_v8 = vstv %s11193_s8  ;;  %s11279_s8 = sld [smem:[#allocation9 + $0x1]] }
 0x74b   : > { %v4306_v36 = vrot.slane %v4143_v61, %v11048_v10  ;;  %v4320_v23 = vrot.slane %v4152_v49, %v11051_v9 }
 0x74d   : > { %v4307_v40 = vsel %vm3909_vm13, %v4306_v36, %v4302_v29 }
 0x74e   : > { %v4149_v7 = vpop.xlane.xlu0 %4148  ;;  %v4158_v26 = vpop.xlane.xlu1 %4157  ;;  %v4353_v48 = vsel %vm4050_vm1, %v4307_v40, %v4352_v39  ;;  %v11256_v40 = vstv %s11189_s16  ;;  %s11273_s16 = sld [smem:[#allocation9 + $0x2f]]  ;;  %v11334_v39 = vstv %s11248_s11  ;;  %s8420_s11 = sld [smem:[#allocation9 + $0x4]] }
 0x74f   : > { %v4315_v46 = vrot.slane %v4149_v7, %v11048_v10  ;;  %v4329_v2 = vrot.slane %v4158_v26, %v11051_v9 }
 0x750   : > { %v11360_v33 = vstv %s11279_s8  ;;  %s8446_s8 = sld [smem:[#allocation9 + $0x1e]] }
 0x751   : > { %v4316_v61 = vsel %vm3909_vm13, %v4315_v46, %v4311_v57  ;;  %15095 = vst [vmem:[#allocation95_spill] sm:$0xff] %v11360_v33 }
 0x752   : > { %v4155_v35 = vpop.xlane.xlu0 %4154  ;;  %v4164_v7 = vpop.xlane.xlu1 %4163  ;;  %v4354_v21 = vsel %vm4052_vm2, %v4316_v61, %v4353_v48  ;;  %v11328_v48 = vstv %s11243_s15  ;;  %s8553_s15 = sld [smem:[#allocation11 + $0x57]] }
 0x753   : > { %v4324_v62 = vrot.slane %v4155_v35, %v11048_v10  ;;  %v4338_v15 = vrot.slane %v4164_v7, %v11051_v9  ;;  %v11340_v7 = vstv %s11261_s21  ;;  %s8427_s21 = sld [smem:[#allocation9 + $0xb]] }
 0x754   : > { %v11349_v63 = vstv %s11273_s16  ;;  %s8437_s16 = sld [smem:[#allocation9 + $0x15]] }
 0x755   : > { %v4325_v50 = vsel %vm3909_vm13, %v4324_v62, %v4320_v23  ;;  %v4447_v62 = vstv %s8403_s23  ;;  %s11231_s23 = sld [smem:[#allocation9 + $0x13]] }
 0x756   : > { %v4161_v56 = vpop.xlane.xlu0 %4160  ;;  %v4355_v26 = vsel %vm4054_vm3, %v4325_v50, %v4354_v21  ;;  %v11289_v21 = vstv %s11217_s2  ;;  %v11331_v50 = vstv %s11246_s17  ;;  %s11589_s2 = sld [smem:[#allocation8 + $0x2]]  ;;  %s8422_s17 = sld [smem:[#allocation9 + $0x6]] }
 0x757   : > { %v4333_v43 = vrot.slane %v4161_v56, %v11048_v10  ;;  %v11251_v56 = vstv %s11187_s13  ;;  %s11271_s13 = sld [smem:[#allocation9 + $0x2d]] }
 0x758   : > { %15093 = vst [vmem:[#allocation94_spill] sm:$0xff] %v11251_v56 }
 0x759   : > { %v4334_v35 = vsel %vm3909_vm13, %v4333_v43, %v4329_v2  ;;  %v11259_v43 = vstv %s11191_s27  ;;  %s15094_s27 = smov 126  }
 0x75a   : > { %v4167_v49 = vpop.xlane.xlu0 %4166  ;;  %v4356_v14 = vsel %vm4056_vm4, %v4334_v35, %v4355_v26  ;;  %v11283_v35 = vstv %s11213_s0  ;;  %v11295_v26 = vstv %s11219_s3  ;;  %s8973_s0 = smov 125   ;;  %v4870_v58 = vmul.f32 %v11259_v43, %v11149_v18  ;;  %s11615_s3 = sld [smem:[#allocation8 + $0x4]] }
 0x75b   : > { %v4342_v36 = vrot.slane %v4167_v49, %v11048_v10  ;;  %v11286_v49 = vstv %s11215_s1  ;;  %v4532_v55 = vmul.f32 %v11283_v35, %v11149_v18  ;;  %v11377_v41 = vmul.f32 %v11295_v26, %v11149_v18  ;;  %s8974_s1 = smov 124  }
 0x75c   : > { %v4582_v27 = vmul.f32 %v11286_v49, %v11149_v18 }
 0x75d   : > { %v4343_v46 = vsel %vm3909_vm13, %v4342_v36, %v4338_v15  ;;  %v4790_v15 = vmul.f32 %v4789_v42, %v11149_v18  ;;  %v11346_v2 = vstv %s11271_s13  ;;  %v4538_v30 = vrot.slane %v4532_v55, 1  ;;  %s8436_s13 = sld [smem:[#allocation9 + $0x14]] }
 0x75e   : > { %v4357_v28 = vsel %vm4058_vm5, %v4343_v46, %v4356_v14  ;;  %v11298_v14 = vstv %s11223_s5  ;;  %v11301_v46 = vstv %s11225_s9  ;;  %v4588_v16 = vrot.slane %v4582_v27, 1  ;;  %s8975_s5 = smov 123   ;;  %s8976_s9 = smov 122  }
 0x75f   : > { %4362 = vst.msk [vmem:[#allocation3 + $0x23] sm:$0xff] %vm4069_vm6, %v4357_v28  ;;  %v11304_v28 = vstv %s11227_s10  ;;  %v4993_v32 = vmul.f32 %v11298_v14, %v11149_v18  ;;  %v5043_v45 = vmul.f32 %v11301_v46, %v11149_v18  ;;  %v4727_v25 = vrot.slane %v11377_v41, 2  ;;  %s8418_s10 = sld [smem:[#allocation9 + $0x2]] }
 0x760   : > { %vm7222_vm13 = vcmask 1042432  }
 0x761   : > { %v4999_v54 = vrot.slane %v4993_v32, 1  ;;  %v5049_v19 = vrot.slane %v5043_v45, 1 }
 0x766   : > { %v11205_v10 = vld [vmem:[#allocation3 + $0x20] sm:$0xff]  ;;  %v11207_v9 = vld [vmem:[#allocation3 + $0x28] sm:$0x3f] }
 0x767   : > { %v4410_v29 = vmul.f32 %v4407_v3, %v11207_v9  ;;  %v4409_v51 = vmul.f32 %v4407_v3, %v11205_v10  ;;  %v4448_v3 = vmul.f32 %v4447_v62, %v11149_v18  ;;  %v4449_v57 = vmul.f32 %v4447_v62, %v11205_v10 }
 0x768   : > { %v4450_v22 = vmul.f32 %v4447_v62, %v11207_v9  ;;  %v4791_v23 = vmul.f32 %v4789_v42, %v11205_v10  ;;  %v4831_v36 = vmul.f32 %v11256_v40, %v11205_v10  ;;  %v11312_v62 = vld [vmem:[#allocation3 + $0x10] sm:$0x3f]  ;;  %v4911_v11 = vmul.f32 %v11266_v8, %v11205_v10 }
 0x769   : > { %4418 = vrot.lane.b32.xlu1 %v4410_v29, %s15092_s4  ;;  %4416 = vrot.lane.b32.xlu0 %v4409_v51, %s15092_s4  ;;  %v11307_v29 = vstv %s11231_s23  ;;  %v11310_v51 = vstv %s11233_s30  ;;  %v4756_v53 = vmul.f32 %v11251_v56, %v11312_v62  ;;  %v11405_v59 = vmul.f32 %v11283_v35, %v11205_v10  ;;  %s8549_s30 = sld [smem:[#allocation11 + $0x53]]  ;;  %s8426_s23 = sld [smem:[#allocation9 + $0xa]] }
 0x76a   : > { %v11411_v24 = vmul.f32 %v11286_v49, %v11205_v10  ;;  %v11419_v55 = vmul.f32 %v11289_v21, %v11205_v10  ;;  %v4832_v5 = vmul.f32 %v11256_v40, %v11207_v9  ;;  %v11428_v27 = vmul.f32 %v11295_v26, %v11205_v10 }
 0x76b   : > { %v5143_v52 = vmul.f32 %v11307_v29, %v11149_v18  ;;  %v11434_v34 = vmul.f32 %v11310_v51, %v11149_v18  ;;  %v4764_v41 = vmul.f32 %v11360_v33, %v11207_v9  ;;  %v11457_v1 = vmul.f32 %v11301_v46, %v11205_v10 }
 0x76c   : > { %v11469_v45 = vmul.f32 %v11307_v29, %v11205_v10  ;;  %v15102_v32 = vrot.slane %v11405_v59, 1 }
 0x76d   : > { %4454 = vrot.lane.b32.xlu1 %v4448_v3, %s14845_s22  ;;  %4456 = vrot.lane.b32.xlu0 %v4449_v57, %s14845_s22  ;;  %s11263_s22 = sld [smem:[#allocation9 + $0x2b]]  ;;  %v11317_v3 = vstv %s11235_s19  ;;  %v11320_v57 = vstv %s11237_s18  ;;  %v11459_v13 = vadd.f32 %v4764_v41, %v4756_v53  ;;  %v5149_v4 = vrot.slane %v5143_v52, 1  ;;  %s8424_s18 = sld [smem:[#allocation9 + $0x8]] }
 0x76e   : > { %v11441_v38 = vmul.f32 %v11317_v3, %v11149_v18  ;;  %v5237_v47 = vrot.slane %v11434_v34, 2  ;;  %v11474_v0 = vsel %vm4474_vm7, %v4538_v30, %v15102_v32  ;;  %v11483_v34 = vmul.f32 %v11310_v51, %v11205_v10  ;;  %s8543_s19 = sld [smem:[#allocation11 + $0x4d]] }
 0x76f   : > { %15101 = vst [vmem:[#allocation96_spill] sm:$0xff] %v11459_v13  ;;  %15103 = vst [vmem:[#allocation97_spill] sm:$0xff] %v11474_v0  ;;  %v15104_v41 = vrot.slane %v11411_v24, 1  ;;  %v5470_v32 = vmul.f32 %v11328_v48, %v11149_v18  ;;  %v11509_v30 = vmul.f32 %v11320_v57, %v11205_v10  ;;  %v15108_v52 = vrot.slane %v11428_v27, 2 }
 0x770   : > { %v5287_v53 = vrot.slane %v11441_v38, 2 }
 0x771   : > { %4458 = vrot.lane.b32.xlu1 %v4450_v22, %s15094_s27  ;;  %4798 = vrot.lane.b32.xlu0 %v4791_v23, %s15092_s4  ;;  %v11322_v22 = vld [vmem:[#allocation3 + $0x8] sm:$0xff]  ;;  %v11325_v23 = vstv %s11241_s20  ;;  %v11514_v44 = vsel %vm4613_vm10, %v4727_v25, %v15108_v52  ;;  %v11531_v52 = vmul.f32 %v11328_v48, %v11205_v10  ;;  %v15113_v25 = vrot.slane %v11457_v1, 1  ;;  %s8545_s20 = sld [smem:[#allocation11 + $0x4f]] }
 0x772   : > { %v11366_v12 = vmul.f32 %v11251_v56, %v11322_v22  ;;  %v5381_v38 = vmul.f32 %v11325_v23, %v11149_v18  ;;  %15109 = vst [vmem:[#allocation100_spill] sm:$0xff] %v11514_v44  ;;  %v5476_v13 = vrot.slane %v5470_v32, 3 }
 0x773   : > { %v11343_v61 = vstv %s11263_s22  ;;  %v11549_v44 = vsel %vm4474_vm7, %v5049_v19, %v15113_v25  ;;  %v15117_v19 = vrot.slane %v11469_v45, 1  ;;  %s8547_s22 = sld [smem:[#allocation11 + $0x51]] }
 0x774   : > { %15114 = vst [vmem:[#allocation103_spill] sm:$0xff] %v11549_v44  ;;  %v11580_v32 = vmul.f32 %v11343_v61, %v11205_v10  ;;  %v11786_v44 = vmul.f32 %v11289_v21, %v11207_v9 }
 0x775   : > { %4796 = vrot.lane.b32.xlu1 %v4790_v15, %s15092_s4  ;;  %4838 = vrot.lane.b32.xlu0 %v4831_v36, %s15094_s27  ;;  %v4792_v15 = vmul.f32 %v4789_v42, %v11207_v9  ;;  %v4871_v36 = vmul.f32 %v11259_v43, %v11205_v10  ;;  %v4830_v42 = vmul.f32 %v11256_v40, %v11149_v18 }
 0x776   : > { %v11445_v40 = vmul.f32 %v11320_v57, %v11149_v18  ;;  %v11569_v25 = vsel %vm4474_vm7, %v5149_v4, %v15117_v19  ;;  %15119 = vst [vmem:[#allocation106_spill] sm:$0xff] %v11580_v32  ;;  %v5620_v19 = vmul.f32 %v11340_v7, %v11149_v18 }
 0x777   : > { %15118 = vst [vmem:[#allocation105_spill] sm:$0xff] %v11569_v25 }
 0x779   : > { %4800 = vrot.lane.b32.xlu1 %v4792_v15, %s15092_s4  ;;  %4878 = vrot.lane.b32.xlu0 %v4871_v36, %s8973_s0  ;;  %v5918_v15 = vmul.f32 %v15096_v60, %v11149_v18  ;;  %v4671_v36 = vmul.f32 %v11289_v21, %v11149_v18  ;;  %v11391_v60 = vmul.f32 %v11266_v8, %v11149_v18 }
 0x77d   : > { %4836 = vrot.lane.b32.xlu1 %v4830_v42, %s15094_s27  ;;  %4918 = vrot.lane.b32.xlu0 %v4911_v11, %s8974_s1  ;;  %v4677_v42 = vrot.slane %v4671_v36, 2  ;;  %v5093_v11 = vmul.f32 %v11304_v28, %v11149_v18  ;;  %v11452_v36 = vmul.f32 %v11298_v14, %v11205_v10 }
 0x77f   : > { %v5099_v20 = vrot.slane %v5093_v11, 1  ;;  %v5337_v11 = vrot.slane %v11445_v40, 2 }
 0x781   : > { %4840 = vrot.lane.b32.xlu1 %v4832_v5, %s15094_s27  ;;  %5922 = vrot.lane.b32.xlu0 %v5918_v15, %s15092_s4  ;;  %v11464_v15 = vmul.f32 %v11304_v28, %v11205_v10  ;;  %v11488_v5 = vsel %vm4474_vm7, %v4588_v16, %v15104_v41  ;;  %v4872_v16 = vmul.f32 %v11259_v43, %v11207_v9 }
 0x782   : > { %15105 = vst [vmem:[#allocation98_spill] sm:$0xff] %v11488_v5  ;;  %v4763_v43 = vmul.f32 %v11360_v33, %v11205_v10  ;;  %v5520_v41 = vmul.f32 %v11331_v50, %v11149_v18  ;;  %v5387_v33 = vrot.slane %v5381_v38, 2 }
 0x783   : > { %v15115_v38 = vrot.slane %v11464_v15, 1 }
 0x785   : > { %4876 = vrot.lane.b32.xlu1 %v4870_v58, %s8973_s0  ;;  %5950 = vrot.lane.b32.xlu0 %v5946_v31, %s15094_s27  ;;  %v11495_v58 = vmul.f32 %v11317_v3, %v11205_v10  ;;  %v15106_v31 = vrot.slane %v11419_v55, 2 }
 0x787   : > { %v11500_v40 = vsel %vm4613_vm10, %v4677_v42, %v15106_v31  ;;  %v11519_v31 = vmul.f32 %v11325_v23, %v11205_v10  ;;  %v15110_v42 = vrot.slane %v11452_v36, 1 }
 0x788   : > { %15107 = vst [vmem:[#allocation99_spill] sm:$0xff] %v11500_v40  ;;  %v5570_v40 = vmul.f32 %v11334_v39, %v11149_v18 }
 0x789   : > { %4880 = vrot.lane.b32.xlu1 %v4872_v16, %s8973_s0  ;;  %5978 = vrot.lane.b32.xlu0 %v11387_v6, %s8973_s0  ;;  %v11536_v56 = vsel %vm4474_vm7, %v4999_v54, %v15110_v42  ;;  %v11541_v16 = vmul.f32 %v11331_v50, %v11205_v10  ;;  %v11544_v6 = vadd.f32 %v4763_v43, %v11366_v12 }
 0x78a   : > { %15111 = vst [vmem:[#allocation101_spill] sm:$0xff] %v11536_v56  ;;  %v11554_v54 = vmul.f32 %v11334_v39, %v11205_v10  ;;  %v11559_v42 = vsel %vm4474_vm7, %v5099_v20, %v15115_v38  ;;  %v11564_v43 = vmul.f32 %v11340_v7, %v11205_v10  ;;  %v15120_v38 = vrot.slane %v11483_v34, 2 }
 0x78b   : > { %15112 = vst [vmem:[#allocation102_spill] sm:$0xff] %v11544_v6  ;;  %15116 = vst [vmem:[#allocation104_spill] sm:$0xff] %v11559_v42  ;;  %v15123_v20 = vrot.slane %v11495_v58, 2  ;;  %v5526_v6 = vrot.slane %v5520_v41, 3  ;;  %v15132_v41 = vstv %s11209_s25 }
 0x78c   : > { %v11585_v4 = vsel %vm4613_vm10, %v5237_v47, %v15120_v38  ;;  %v5709_v47 = vmul.f32 %v11343_v61, %v11149_v18  ;;  %v4912_v38 = vmul.f32 %v11266_v8, %v11207_v9 }
 0x78d   : > { %4916 = vrot.lane.b32.xlu1 %v11391_v60, %s8974_s1  ;;  %6006 = vrot.lane.b32.xlu0 %v11396_v37, %s8974_s1  ;;  %15121 = vst [vmem:[#allocation107_spill] sm:$0xff] %v11585_v4  ;;  %v11594_v37 = vmul.f32 %v11346_v2, %v11205_v10  ;;  %v11599_v12 = vsel %vm4613_vm10, %v5287_v53, %v15123_v20  ;;  %v15126_v4 = vrot.slane %v11509_v30, 2  ;;  %v15128_v20 = vrot.slane %v11519_v31, 2 }
 0x78e   : > { %15124 = vst [vmem:[#allocation109_spill] sm:$0xff] %v11599_v12  ;;  %v11608_v60 = vmul.f32 %v11349_v63, %v11205_v10  ;;  %v5759_v12 = vmul.f32 %v11346_v2, %v11149_v18 }
 0x78f   : > { %15122 = vst [vmem:[#allocation108_spill] sm:$0xff] %v11594_v37  ;;  %v11613_v25 = vsel %vm4613_vm10, %v5337_v11, %v15126_v4  ;;  %v11621_v8 = vsel %vm4613_vm10, %v5387_v33, %v15128_v20  ;;  %v15130_v4 = vrot.slane %v11531_v52, 3  ;;  %v5809_v33 = vmul.f32 %v11349_v63, %v11149_v18 }
 0x790   : > { %15125 = vst [vmem:[#allocation110_spill] sm:$0xff] %v11608_v60  ;;  %15127 = vst [vmem:[#allocation111_spill] sm:$0xff] %v11613_v25  ;;  %v5576_v25 = vrot.slane %v5570_v40, 3  ;;  %v6058_v20 = vmul.f32 %v15132_v41, %v11149_v18  ;;  %v5626_v11 = vrot.slane %v5620_v19, 3  ;;  %v14885_v40 = vrot.slane %v11608_v60, 4 }
 0x791   : > { %15129 = vst [vmem:[#allocation112_spill] sm:$0xff] %v11621_v8  ;;  %4920 = vrot.lane.b32.xlu1 %v4912_v38, %s8974_s1  ;;  %6034 = vrot.lane.b32.xlu0 %v11401_v17, %s8975_s5  ;;  %v11632_v53 = vsel %vm5412_vm11, %v5476_v13, %v15130_v4  ;;  %v14886_v38 = vrot.slane %v11594_v37, 4  ;;  %v15133_v8 = vrot.slane %v11541_v16, 3  ;;  %v15135_v13 = vstv %s11195_s26  ;;  %s11796_s26 = sld [smem:[#allocation11 + $0x4]] }
 0x792   : > { %15131 = vst [vmem:[#allocation113_spill] sm:$0xff] %v11632_v53  ;;  %v5919_v4 = vmul.f32 %v15135_v13, %v11205_v10  ;;  %v15136_v53 = vrot.slane %v11554_v54, 3  ;;  %v5715_v18 = vrot.slane %v5709_v47, 4  ;;  %v15138_v41 = vrot.slane %v11564_v43, 3 }
 0x793   : > { %v11643_v17 = vsel %vm5412_vm11, %v5526_v6, %v15133_v8  ;;  %v5765_v8 = vrot.slane %v5759_v12, 4  ;;  %v15140_v19 = vrot.slane %v11580_v32, 4  ;;  %v5815_v47 = vrot.slane %v5809_v33, 4 }
 0x794   : > { %15134 = vst [vmem:[#allocation114_spill] sm:$0xff] %v11643_v17  ;;  %v11652_v42 = vsel %vm5412_vm11, %v5576_v25, %v15136_v53  ;;  %v11657_v6 = vsel %vm5412_vm11, %v5626_v11, %v15138_v41  ;;  %v4387_v53 = vstv %s11589_s2  ;;  %v15143_v12 = vstv %s11197_s6  ;;  %s11828_s6 = sld [smem:[#allocation11 + $0x6]]  ;;  %s8447_s2 = sld [smem:[#allocation9 + $0x1f]] }
 0x795   : > { %15137 = vst [vmem:[#allocation115_spill] sm:$0xff] %v11652_v42  ;;  %15139 = vst [vmem:[#allocation116_spill] sm:$0xff] %v11657_v6  ;;  %5924 = vrot.lane.b32.xlu1 %v5919_v4, %s15092_s4  ;;  %6062 = vrot.lane.b32.xlu0 %v6058_v20, %s8976_s9  ;;  %v11664_v25 = vsel %vm5651_vm12, %v5715_v18, %v15140_v19  ;;  %v11670_v11 = vsel %vm5651_vm12, %v5765_v8, %v14886_v38  ;;  %v11681_v18 = vld [vmem:[#allocation3] sm:$0xff]  ;;  %v4427_v33 = vstv %s11615_s3  ;;  %s8483_s3 = sld [smem:[#allocation11 + $0x11]] }
 0x796   : > { %15141 = vst [vmem:[#allocation117_spill] sm:$0xff] %v11664_v25  ;;  %15142 = vst [vmem:[#allocation118_spill] sm:$0xff] %v11670_v11  ;;  %v5947_v13 = vmul.f32 %v15143_v12, %v11205_v10  ;;  %v4389_v4 = vmul.f32 %v4387_v53, %v11322_v22  ;;  %v11679_v20 = vsel %vm5651_vm12, %v5815_v47, %v14885_v40  ;;  %v15145_v41 = vstv %s11199_s14  ;;  %s11854_s14 = sld [smem:[#allocation11 + $0x8]] }
 0x797   : > { %15144 = vst [vmem:[#allocation119_spill] sm:$0xff] %v11679_v20  ;;  %v5975_v8 = vmul.f32 %v15145_v41, %v11205_v10  ;;  %v4428_v19 = vmul.f32 %v4427_v33, %v11681_v18  ;;  %v15146_v47 = vstv %s11201_s7  ;;  %v4430_v40 = vmul.f32 %v4427_v33, %v11312_v62  ;;  %s11864_s7 = sld [smem:[#allocation11 + $0xa]] }
 0x798   : > { %v6003_v12 = vmul.f32 %v15146_v47, %v11205_v10  ;;  %v11696_v38 = vstv %s8418_s10  ;;  %v11712_v20 = vstv %s8420_s11  ;;  %v11772_v42 = vstv %s8553_s15  ;;  %s8456_s10 = sld [smem:[#allocation9 + $0x28]]  ;;  %s8485_s11 = sld [smem:[#allocation11 + $0x13]] }
 0x799   : > { %5952 = vrot.lane.b32.xlu1 %v5947_v13, %s15094_s27  ;;  %4396 = vrot.lane.b32.xlu0 %v4389_v4, %s15092_s4  ;;  %v15147_v13 = vstv %s11203_s12  ;;  %v4770_v41 = vmul.f32 %v11696_v38, %v11681_v18  ;;  %v4772_v47 = vmul.f32 %v11696_v38, %v11312_v62  ;;  %15154 = vst [vmem:[#allocation125_spill] sm:$0xff] %v11772_v42  ;;  %s11874_s12 = sld [smem:[#allocation11 + $0xc]]  ;;  %s8501_s15 = sld [smem:[#allocation11 + $0x23]] }
 0x79a   : > { %v6031_v4 = vmul.f32 %v15147_v13, %v11205_v10  ;;  %v4390_v13 = vmul.f32 %v4387_v53, %v11312_v62 }
 0x79d   : > { %5980 = vrot.lane.b32.xlu1 %v5975_v8, %s8973_s0  ;;  %4434 = vrot.lane.b32.xlu0 %v4428_v19, %s15094_s27  ;;  %v15148_v8 = vstv %s11209_s25  ;;  %s11766_s25 = sld [smem:[#allocation11 + $0x2]] }
 0x79e   : > { %v6059_v19 = vmul.f32 %v15148_v8, %v11205_v10  ;;  %v4429_v8 = vmul.f32 %v4427_v33, %v11322_v22 }
 0x7a1   : > { %6008 = vrot.lane.b32.xlu1 %v6003_v12, %s8974_s1  ;;  %4438 = vrot.lane.b32.xlu0 %v4430_v40, %s15094_s27  ;;  %v4388_v40 = vmul.f32 %v4387_v53, %v11681_v18  ;;  %v4810_v12 = vmul.f32 %v11712_v20, %v11681_v18  ;;  %v11735_v53 = vstv %s8424_s18  ;;  %s8489_s18 = sld [smem:[#allocation11 + $0x17]] }
 0x7a2   : > { %v4890_v17 = vmul.f32 %v11735_v53, %v11681_v18  ;;  %v4892_v37 = vmul.f32 %v11735_v53, %v11312_v62 }
 0x7a3   : > { %v14903_v32 = vstv %s11766_s25 }
 0x7a5   : > { %6036 = vrot.lane.b32.xlu1 %v6031_v4, %s8975_s5  ;;  %4776 = vrot.lane.b32.xlu0 %v4770_v41, %s15092_s4  ;;  %v4812_v4 = vmul.f32 %v11712_v20, %v11312_v62  ;;  %v11724_v41 = vstv %s8422_s17  ;;  %s8487_s17 = sld [smem:[#allocation11 + $0x15]] }
 0x7a6   : > { %v4852_v33 = vmul.f32 %v11724_v41, %v11312_v62 }
 0x7a9   : > { %6064 = vrot.lane.b32.xlu1 %v6059_v19, %s8976_s9  ;;  %4780 = vrot.lane.b32.xlu0 %v4772_v47, %s15092_s4  ;;  %v4850_v19 = vmul.f32 %v11724_v41, %v11681_v18  ;;  %v11733_v47 = vmul.f32 %v11283_v35, %v11207_v9  ;;  %v11751_v35 = vstv %s8549_s30  ;;  %s8499_s30 = sld [smem:[#allocation11 + $0x21]] }
 0x7aa   : > { %15153 = vst [vmem:[#allocation124_spill] sm:$0xff] %v11751_v35  ;;  %v11770_v6 = vmul.f32 %v11751_v35, %v11205_v10 }
 0x7ab   : > { %v14887_v11 = vrot.slane %v11733_v47, 1 }
 0x7ad   : > { %4394 = vrot.lane.b32.xlu1 %v4388_v40, %s15092_s4  ;;  %4816 = vrot.lane.b32.xlu0 %v4810_v12, %s15094_s27  ;;  %v11739_v40 = vstv %s8543_s19  ;;  %v11741_v12 = vstv %s8545_s20  ;;  %s8491_s19 = sld [smem:[#allocation11 + $0x19]]  ;;  %s8493_s20 = sld [smem:[#allocation11 + $0x1b]] }
 0x7ae   : > { %15149 = vst [vmem:[#allocation120_spill] sm:$0xff] %v11739_v40  ;;  %15150 = vst [vmem:[#allocation121_spill] sm:$0xff] %v11741_v12  ;;  %v7358_v5 = vmul.f32 %v11739_v40, %v11207_v9  ;;  %v7400_v60 = vmul.f32 %v11741_v12, %v11207_v9 }
 0x7b0   : > { %v7365_v21 = vrot.slane %v7358_v5, 5  ;;  %v7560_v5 = vmul.f32 %v11772_v42, %v11207_v9 }
 0x7b1   : > { %4398 = vrot.lane.b32.xlu1 %v4390_v13, %s15092_s4  ;;  %4820 = vrot.lane.b32.xlu0 %v4812_v4, %s15094_s27  ;;  %v11747_v13 = vmul.f32 %v11739_v40, %v11205_v10  ;;  %v11749_v4 = vstv %s8547_s22  ;;  %v7484_v40 = vmul.f32 %v11751_v35, %v11207_v9  ;;  %s8497_s22 = sld [smem:[#allocation11 + $0x1f]] }
 0x7b2   : > { %15152 = vst [vmem:[#allocation123_spill] sm:$0xff] %v11749_v4  ;;  %v11764_v25 = vmul.f32 %v11749_v4, %v11205_v10  ;;  %v7442_v56 = vmul.f32 %v11749_v4, %v11207_v9 }
 0x7b3   : > { %15151 = vst [vmem:[#allocation122_spill] sm:$0xff] %v11747_v13  ;;  %v15155_v4 = vrot.slane %v11747_v13, 5  ;;  %v7567_v13 = vrot.slane %v7560_v5, 6  ;;  %v14902_v5 = vstv %s11796_s26 }
 0x7b5   : > { %4436 = vrot.lane.b32.xlu1 %v4429_v8, %s15094_s27  ;;  %4856 = vrot.lane.b32.xlu0 %v4850_v19, %s8973_s0  ;;  %v11756_v8 = vmul.f32 %v11286_v49, %v11207_v9  ;;  %v11760_v19 = vmul.f32 %v11741_v12, %v11205_v10  ;;  %v11780_v49 = vmul.f32 %v11772_v42, %v11205_v10  ;;  %v7491_v12 = vrot.slane %v7484_v40, 5 }
 0x7b6   : > { %v11815_v35 = vsel %vm7222_vm13, %v15155_v4, %v7365_v21  ;;  %v15159_v4 = vrot.slane %v11764_v25, 5  ;;  %v15161_v40 = vrot.slane %v11770_v6, 5  ;;  %v5904_v21 = vmul.f32 %v14903_v32, %v11681_v18 }
 0x7b7   : > { %15156 = vst [vmem:[#allocation126_spill] sm:$0xff] %v11815_v35  ;;  %v15157_v0 = vrot.slane %v11760_v19, 5 }
 0x7b9   : > { %4547 = vrot.lane.b32.xlu1 %v14887_v11, %s15092_s4  ;;  %4860 = vrot.lane.b32.xlu0 %v4852_v33, %s8973_s0  ;;  %v14893_v11 = vrot.slane %v11756_v8, 1  ;;  %v7407_v33 = vrot.slane %v7400_v60, 5  ;;  %v11820_v60 = vmul.f32 %v11295_v26, %v11207_v9  ;;  %v11838_v26 = vsel %vm7222_vm13, %v15161_v40, %v7491_v12 }
 0x7ba   : > { %15162 = vst [vmem:[#allocation129_spill] sm:$0xff] %v11838_v26  ;;  %v5932_v12 = vmul.f32 %v14902_v5, %v11681_v18  ;;  %v14900_v40 = vstv %s11854_s14 }
 0x7bb   : > { %v11825_v42 = vsel %vm7222_vm13, %v15157_v0, %v7407_v33  ;;  %v15163_v0 = vrot.slane %v11780_v49, 6 }
 0x7bc   : > { %15158 = vst [vmem:[#allocation127_spill] sm:$0xff] %v11825_v42 }
 0x7bd   : > { %4597 = vrot.lane.b32.xlu1 %v14893_v11, %s15094_s27  ;;  %4896 = vrot.lane.b32.xlu0 %v4890_v17, %s8974_s1  ;;  %v7449_v11 = vrot.slane %v7442_v56, 5  ;;  %v4680_v17 = vrot.slane %v11786_v44, 2  ;;  %v11847_v33 = vsel %vm3650_vm8, %v15163_v0, %v7567_v13  ;;  %v14901_v13 = vstv %s11828_s6 }
 0x7be   : > { %15164 = vst [vmem:[#allocation130_spill] sm:$0xff] %v11847_v33  ;;  %v5988_v0 = vmul.f32 %v14900_v40, %v11681_v18 }
 0x7bf   : > { %v11833_v56 = vsel %vm7222_vm13, %v15159_v4, %v7449_v11  ;;  %v4730_v11 = vrot.slane %v11820_v60, 2  ;;  %v4811_v60 = vmul.f32 %v11712_v20, %v11322_v22  ;;  %v5960_v4 = vmul.f32 %v14901_v13, %v11681_v18 }
 0x7c0   : > { %15160 = vst [vmem:[#allocation128_spill] sm:$0xff] %v11833_v56  ;;  %v4891_v20 = vmul.f32 %v11735_v53, %v11322_v22  ;;  %v5045_v53 = vmul.f32 %v11301_v46, %v11207_v9 }
 0x7c1   : > { %4686 = vrot.lane.b32.xlu1 %v4680_v17, %s15092_s4  ;;  %4900 = vrot.lane.b32.xlu0 %v4892_v37, %s8974_s1  ;;  %v4771_v37 = vmul.f32 %v11696_v38, %v11322_v22  ;;  %v4851_v38 = vmul.f32 %v11724_v41, %v11322_v22  ;;  %v11896_v41 = vpop.permute.xlu1 %4414 }
 0x7c2   : > { %15165 = vst [vmem:[#allocation131_spill] sm:$0xff] %v11896_v41 }
 0x7c5   : > { %4736 = vrot.lane.b32.xlu1 %v4730_v11, %s15094_s27  ;;  %5908 = vrot.lane.b32.xlu0 %v5904_v21, %s15092_s4  ;;  %v14898_v21 = vstv %s11864_s7 }
 0x7c9   : > { %4778 = vrot.lane.b32.xlu1 %v4771_v37, %s15092_s4  ;;  %5936 = vrot.lane.b32.xlu0 %v5932_v12, %s15094_s27  ;;  %v6016_v37 = vmul.f32 %v14898_v21, %v11681_v18  ;;  %v4995_v12 = vmul.f32 %v11298_v14, %v11207_v9  ;;  %v15169_v21 = vrot.slane %v11405_v59, 1 }
 0x7cd   : > { %4818 = vrot.lane.b32.xlu1 %v4811_v60, %s15094_s27  ;;  %5964 = vrot.lane.b32.xlu0 %v5960_v4, %s8973_s0  ;;  %v14899_v60 = vstv %s11874_s12  ;;  %v5002_v4 = vrot.slane %v4995_v12, 1  ;;  %v15168_v12 = vrot.slane %v11733_v47, 1  ;;  %v15173_v47 = vrot.slane %v11411_v24, 1 }
 0x7d1   : > { %4858 = vrot.lane.b32.xlu1 %v4851_v38, %s8973_s0  ;;  %5992 = vrot.lane.b32.xlu0 %v5988_v0, %s8974_s1  ;;  %v6044_v38 = vmul.f32 %v14899_v60, %v11681_v18  ;;  %v4542_v18 = vsel %vm4474_vm7, %v15169_v21, %v15168_v12 }
 0x7d5   : > { %4898 = vrot.lane.b32.xlu1 %v4891_v20, %s8974_s1  ;;  %6020 = vrot.lane.b32.xlu0 %v6016_v37, %s8975_s5  ;;  %v5052_v20 = vrot.slane %v5045_v53, 1  ;;  %v5095_v37 = vmul.f32 %v11304_v28, %v11207_v9  ;;  %v5145_v53 = vmul.f32 %v11307_v29, %v11207_v9  ;;  %v15172_v28 = vrot.slane %v11756_v8, 1 }
 0x7d6   : > { %v15175_v29 = vrot.slane %v11419_v55, 2 }
 0x7d7   : > { %v5102_v60 = vrot.slane %v5095_v37, 1  ;;  %v4592_v59 = vsel %vm4474_vm7, %v15173_v47, %v15172_v28  ;;  %v5233_v37 = vmul.f32 %v11310_v51, %v11207_v9  ;;  %v15177_v51 = vrot.slane %v11428_v27, 2 }
 0x7d8   : > { %v4681_v24 = vsel %vm4613_vm10, %v15175_v29, %v4680_v17  ;;  %v5333_v29 = vmul.f32 %v11320_v57, %v11207_v9 }
 0x7d9   : > { %5008 = vrot.lane.b32.xlu1 %v5002_v4, %s15092_s4  ;;  %6048 = vrot.lane.b32.xlu0 %v6044_v38, %s8976_s9  ;;  %v5240_v47 = vrot.slane %v5233_v37, 2  ;;  %v4731_v44 = vsel %vm4613_vm10, %v15177_v51, %v4730_v11  ;;  %v15179_v37 = vrot.slane %v11452_v36, 1  ;;  %v11972_v51 = vmul.f32 %v11325_v23, %v11207_v9 }
 0x7da   : > { %v11986_v23 = vmul.f32 %v11328_v48, %v11207_v9  ;;  %v15187_v48 = vrot.slane %v11469_v45, 1 }
 0x7db   : > { %v11905_v0 = vpop.permute.xlu1 %4418  ;;  %v11907_v14 = vpop.permute.xlu0 %4416 }
 0x7dc   : > { %15166 = vst [vmem:[#allocation132_spill] sm:$0xff] %v11905_v0  ;;  %15167 = vst [vmem:[#allocation133_spill] sm:$0xff] %v11907_v14 }
 0x7dd   : > { %5058 = vrot.lane.b32.xlu1 %v5052_v20, %s15094_s27  ;;  %4545 = vrot.lane.b32.xlu0 %v4542_v18, %s15092_s4  ;;  %v5152_v18 = vrot.slane %v5145_v53, 1  ;;  %v5283_v53 = vmul.f32 %v11317_v3, %v11207_v9  ;;  %v5003_v3 = vsel %vm4474_vm7, %v15179_v37, %v5002_v4 }
 0x7df   : > { %v11918_v46 = vpop.permute.xlu1 %4454  ;;  %v11920_v38 = vpop.permute.xlu0 %4456 }
 0x7e0   : > { %15170 = vst [vmem:[#allocation134_spill] sm:$0xff] %v11918_v46  ;;  %15171 = vst [vmem:[#allocation135_spill] sm:$0xff] %v11920_v38 }
 0x7e1   : > { %5108 = vrot.lane.b32.xlu1 %v5102_v60, %s8973_s0  ;;  %4595 = vrot.lane.b32.xlu0 %v4592_v59, %s15094_s27  ;;  %v5290_v59 = vrot.slane %v5283_v53, 2  ;;  %v15182_v53 = vrot.slane %v11457_v1, 1  ;;  %v15184_v1 = vrot.slane %v11464_v15, 1  ;;  %v5153_v15 = vsel %vm4474_vm7, %v15187_v48, %v5152_v18 }
 0x7e2   : > { %v15191_v48 = vrot.slane %v11483_v34, 2 }
 0x7e3   : > { %v11931_v21 = vpop.permute.xlu1 %4458  ;;  %v11933_v12 = vpop.permute.xlu0 %4798  ;;  %v5053_v57 = vsel %vm4474_vm7, %v15182_v53, %v5052_v20  ;;  %v5103_v20 = vsel %vm4474_vm7, %v15184_v1, %v5102_v60  ;;  %v12005_v53 = vstv %s8426_s23  ;;  %v12007_v60 = vstv %s8427_s21  ;;  %s8517_s23 = sld [smem:[#allocation11 + $0x33]]  ;;  %s8519_s21 = sld [smem:[#allocation11 + $0x35]] }
 0x7e4   : > { %15174 = vst [vmem:[#allocation136_spill] sm:$0xff] %v11931_v21  ;;  %15188 = vst [vmem:[#allocation144_spill] sm:$0xff] %v12005_v53  ;;  %v12035_v40 = vmul.f32 %v12005_v53, %v11322_v22  ;;  %v12039_v13 = vmul.f32 %v12007_v60, %v11205_v10 }
 0x7e5   : > { %5158 = vrot.lane.b32.xlu1 %v5152_v18, %s8974_s1  ;;  %4684 = vrot.lane.b32.xlu0 %v4681_v24, %s15092_s4  ;;  %v5340_v24 = vrot.slane %v5333_v29, 2  ;;  %15189 = vst [vmem:[#allocation145_spill] sm:$0xff] %v12007_v60 }
 0x7e6   : > { %15192 = vst [vmem:[#allocation147_spill] sm:$0xff] %v12035_v40  ;;  %15193 = vst [vmem:[#allocation148_spill] sm:$0xff] %v12039_v13  ;;  %v14905_v34 = vrot.slane %v12035_v40, 1 }
 0x7e7   : > { %v11944_v8 = vpop.permute.xlu1 %4796  ;;  %v11946_v28 = vpop.permute.xlu0 %4838 }
 0x7e8   : > { %15176 = vst [vmem:[#allocation137_spill] sm:$0xff] %v11944_v8 }
 0x7e9   : > { %5246 = vrot.lane.b32.xlu1 %v5240_v47, %s15092_s4  ;;  %4734 = vrot.lane.b32.xlu0 %v4731_v44, %s15094_s27  ;;  %v5390_v44 = vrot.slane %v11972_v51, 2  ;;  %v12000_v51 = vmul.f32 %v11331_v50, %v11207_v9  ;;  %v12019_v50 = vmul.f32 %v12007_v60, %v11207_v9 }
 0x7eb   : > { %v11955_v55 = vpop.permute.xlu1 %4800  ;;  %v11957_v17 = vpop.permute.xlu0 %4878  ;;  %v5529_v1 = vrot.slane %v12000_v51, 3 }
 0x7ec   : > { %15178 = vst [vmem:[#allocation138_spill] sm:$0xff] %v11957_v17 }
 0x7ed   : > { %5296 = vrot.lane.b32.xlu1 %v5290_v59, %s15094_s27  ;;  %5006 = vrot.lane.b32.xlu0 %v5003_v3, %s15092_s4  ;;  %v14904_v3 = vrot.slane %v11986_v23, 3 }
 0x7ef   : > { %v11966_v27 = vpop.permute.xlu1 %4836  ;;  %v11968_v11 = vpop.permute.xlu0 %4918 }
 0x7f0   : > { %15180 = vst [vmem:[#allocation139_spill] sm:$0xff] %v11966_v27  ;;  %15181 = vst [vmem:[#allocation140_spill] sm:$0xff] %v11968_v11 }
 0x7f1   : > { %5346 = vrot.lane.b32.xlu1 %v5340_v24, %s8973_s0  ;;  %5056 = vrot.lane.b32.xlu0 %v5053_v57, %s15094_s27  ;;  %v12015_v57 = vmul.f32 %v12005_v53, %v11312_v62 }
 0x7f3   : > { %v11979_v36 = vpop.permute.xlu1 %4840  ;;  %v11981_v4 = vpop.permute.xlu0 %5922  ;;  %v14906_v51 = vrot.slane %v12015_v57, 1 }
 0x7f4   : > { %15183 = vst [vmem:[#allocation141_spill] sm:$0xff] %v11981_v4 }
 0x7f5   : > { %5396 = vrot.lane.b32.xlu1 %v5390_v44, %s8974_s1  ;;  %5106 = vrot.lane.b32.xlu0 %v5103_v20, %s8973_s0  ;;  %v12028_v20 = vmul.f32 %v11334_v39, %v11207_v9 }
 0x7f7   : > { %v11993_v29 = vpop.permute.xlu1 %4876  ;;  %v11995_v37 = vpop.permute.xlu0 %5950  ;;  %v5579_v32 = vrot.slane %v12028_v20, 3  ;;  %v15198_v20 = vrot.slane %v12019_v50, 1 }
 0x7f8   : > { %15185 = vst [vmem:[#allocation142_spill] sm:$0xff] %v11993_v29  ;;  %15186 = vst [vmem:[#allocation143_spill] sm:$0xff] %v11995_v37 }
 0x7f9   : > { %5485 = vrot.lane.b32.xlu1 %v14904_v3, %s15092_s4  ;;  %5156 = vrot.lane.b32.xlu0 %v5153_v15, %s8974_s1  ;;  %v5241_v15 = vsel %vm4613_vm10, %v15191_v48, %v5240_v47  ;;  %v12054_v3 = vmul.f32 %v11340_v7, %v11207_v9  ;;  %v12066_v47 = vsel %vm4474_vm7, %v14905_v34, %v14906_v51  ;;  %v15199_v7 = vrot.slane %v12039_v13, 1 }
 0x7fa   : > { %15197 = vst [vmem:[#allocation151_spill] sm:$0xff] %v12066_v47  ;;  %v15202_v34 = vrot.slane %v11509_v30, 2 }
 0x7fb   : > { %v12021_v45 = vpop.permute.xlu1 %4880  ;;  %v12023_v18 = vpop.permute.xlu0 %5978  ;;  %v12073_v38 = vsel %vm4474_vm7, %v15199_v7, %v15198_v20  ;;  %v12089_v20 = vstv %s8436_s13  ;;  %v12091_v7 = vstv %s8437_s16  ;;  %s8521_s13 = sld [smem:[#allocation11 + $0x37]]  ;;  %s8525_s16 = sld [smem:[#allocation11 + $0x3b]] }
 0x7fc   : > { %15190 = vst [vmem:[#allocation146_spill] sm:$0xff] %v12023_v18  ;;  %15200 = vst [vmem:[#allocation152_spill] sm:$0xff] %v12073_v38  ;;  %v5341_v51 = vsel %vm4613_vm10, %v15202_v34, %v5340_v24  ;;  %v12095_v21 = vmul.f32 %v12089_v20, %v11312_v62  ;;  %v15209_v34 = vrot.slane %v11519_v31, 2  ;;  %v12115_v0 = vmul.f32 %v12089_v20, %v11322_v22  ;;  %v15246_v18 = vld [vmem:[#allocation106_spill] sm:$0xff] }
 0x7fd   : > { %5535 = vrot.lane.b32.xlu1 %v5529_v1, %s15094_s27  ;;  %5244 = vrot.lane.b32.xlu0 %v5241_v15, %s15092_s4  ;;  %v15196_v15 = vrot.slane %v11495_v58, 2  ;;  %15203 = vst [vmem:[#allocation154_spill] sm:$0xff] %v12089_v20  ;;  %15204 = vst [vmem:[#allocation155_spill] sm:$0xff] %v12091_v7 }
 0x7fe   : > { %15205 = vst [vmem:[#allocation156_spill] sm:$0xff] %v12095_v21  ;;  %v5391_v14 = vsel %vm4613_vm10, %v15209_v34, %v5390_v44  ;;  %15210 = vst [vmem:[#allocation160_spill] sm:$0xff] %v12115_v0  ;;  %v15216_v31 = vrot.slane %v12095_v21, 2 }
 0x7ff   : > { %v12047_v48 = vpop.permute.xlu1 %4916  ;;  %v12049_v5 = vpop.permute.xlu0 %6006  ;;  %v5291_v39 = vsel %vm4613_vm10, %v15196_v15, %v5290_v59  ;;  %v12082_v15 = vmul.f32 %v11343_v61, %v11207_v9  ;;  %v12099_v61 = vmul.f32 %v12091_v7, %v11207_v9 }
 0x800   : > { %15194 = vst [vmem:[#allocation149_spill] sm:$0xff] %v12047_v48  ;;  %15195 = vst [vmem:[#allocation150_spill] sm:$0xff] %v12049_v5 }
 0x801   : > { %5585 = vrot.lane.b32.xlu1 %v5579_v32, %s8973_s0  ;;  %5294 = vrot.lane.b32.xlu0 %v5291_v39, %s15094_s27  ;;  %v5629_v39 = vrot.slane %v12054_v3, 3  ;;  %15206 = vst [vmem:[#allocation157_spill] sm:$0xff] %v12099_v61  ;;  %v5718_v24 = vrot.slane %v12082_v15, 4  ;;  %v12121_v15 = vmul.f32 %v12091_v7, %v11205_v10 }
 0x803   : > { %v12075_v58 = vpop.permute.xlu1 %4920  ;;  %v12077_v59 = vpop.permute.xlu0 %6034  ;;  %15211 = vst [vmem:[#allocation161_spill] sm:$0xff] %v12121_v15 }
 0x804   : > { %15201 = vst [vmem:[#allocation153_spill] sm:$0xff] %v12077_v59  ;;  %v15214_v59 = vrot.slane %v11986_v23, 3  ;;  %v15220_v23 = vrot.slane %v12121_v15, 2 }
 0x805   : > { %5635 = vrot.lane.b32.xlu1 %v5629_v39, %s8974_s1  ;;  %5344 = vrot.lane.b32.xlu0 %v5341_v51, %s8973_s0  ;;  %v12108_v51 = vmul.f32 %v11346_v2, %v11207_v9  ;;  %v15215_v2 = vrot.slane %v11531_v52, 3 }
 0x807   : > { %v12101_v3 = vpop.permute.xlu1 %5924  ;;  %v12103_v30 = vpop.permute.xlu0 %6062  ;;  %v5768_v41 = vrot.slane %v12108_v51, 4  ;;  %v5480_v46 = vsel %vm5412_vm11, %v15215_v2, %v15214_v59  ;;  %v15217_v51 = vrot.slane %v12115_v0, 2 }
 0x808   : > { %15207 = vst [vmem:[#allocation158_spill] sm:$0xff] %v12101_v3  ;;  %15208 = vst [vmem:[#allocation159_spill] sm:$0xff] %v12103_v30  ;;  %v15219_v30 = vrot.slane %v12099_v61, 2  ;;  %v12330_v3 = vstv %s8489_s18  ;;  %s8539_s18 = sld [smem:[#allocation11 + $0x49]] }
 0x809   : > { %5724 = vrot.lane.b32.xlu1 %v5718_v24, %s15092_s4  ;;  %5394 = vrot.lane.b32.xlu0 %v5391_v14, %s8974_s1  ;;  %v12133_v14 = vmul.f32 %v11349_v63, %v11207_v9  ;;  %v12148_v63 = vsel %vm4613_vm10, %v15217_v51, %v15216_v31  ;;  %v12167_v31 = vstv %s8446_s8  ;;  %v12173_v51 = vstv %s8447_s2  ;;  %s8527_s8 = sld [smem:[#allocation11 + $0x3d]]  ;;  %s8465_s2 = sld [smem:[#allocation9 + $0x31]] }
 0x80a   : > { %15218 = vst [vmem:[#allocation164_spill] sm:$0xff] %v12148_v63  ;;  %v12155_v52 = vsel %vm4613_vm10, %v15220_v23, %v15219_v30  ;;  %15225 = vst [vmem:[#allocation168_spill] sm:$0xff] %v12167_v31  ;;  %v12171_v30 = vmul.f32 %v12167_v31, %v11312_v62  ;;  %v12305_v63 = vstv %s8487_s17  ;;  %s8535_s17 = sld [smem:[#allocation11 + $0x45]] }
 0x80b   : > { %v12126_v44 = vpop.permute.xlu1 %5952  ;;  %v12128_v34 = vpop.permute.xlu0 %4396  ;;  %15221 = vst [vmem:[#allocation165_spill] sm:$0xff] %v12155_v52  ;;  %15227 = vst [vmem:[#allocation170_spill] sm:$0xff] %v12173_v51 }
 0x80c   : > { %15212 = vst [vmem:[#allocation162_spill] sm:$0xff] %v12126_v44  ;;  %15213 = vst [vmem:[#allocation163_spill] sm:$0xff] %v12128_v34  ;;  %v15224_v34 = vrot.slane %v11541_v16, 3  ;;  %v15230_v16 = vstv %s11766_s25  ;;  %s8503_s25 = sld [smem:[#allocation11 + $0x25]] }
 0x80d   : > { %5774 = vrot.lane.b32.xlu1 %v5768_v41, %s15094_s27  ;;  %5483 = vrot.lane.b32.xlu0 %v5480_v46, %s15092_s4  ;;  %v5818_v46 = vrot.slane %v12133_v14, 4  ;;  %15226 = vst [vmem:[#allocation169_spill] sm:$0xff] %v12171_v30 }
 0x80e   : > { %v5530_v5 = vsel %vm5412_vm11, %v15224_v34, %v5529_v1  ;;  %v5905_v1 = vmul.f32 %v15230_v16, %v11322_v22  ;;  %v12184_v34 = vmul.f32 %v12173_v51, %v11207_v9  ;;  %v12198_v16 = vmul.f32 %v12173_v51, %v11205_v10 }
 0x80f   : > { %v12157_v59 = vpop.permute.xlu1 %5980  ;;  %v12159_v2 = vpop.permute.xlu0 %4434 }
 0x810   : > { %15222 = vst [vmem:[#allocation166_spill] sm:$0xff] %v12157_v59  ;;  %15223 = vst [vmem:[#allocation167_spill] sm:$0xff] %v12159_v2  ;;  %v15238_v59 = vrot.slane %v11564_v43, 3  ;;  %v15243_v10 = vrot.slane %v12184_v34, 3 }
 0x811   : > { %5824 = vrot.lane.b32.xlu1 %v5818_v46, %s8973_s0  ;;  %5533 = vrot.lane.b32.xlu0 %v5530_v5, %s15094_s27  ;;  %15231 = vst [vmem:[#allocation173_spill] sm:$0xff] %v12184_v34  ;;  %v15232_v5 = vrot.slane %v11554_v54, 3  ;;  %15234 = vst [vmem:[#allocation175_spill] sm:$0xff] %v12198_v16 }
 0x813   : > { %v12175_v23 = vpop.permute.xlu1 %6008  ;;  %v12177_v14 = vpop.permute.xlu0 %4438  ;;  %v5580_v2 = vsel %vm5412_vm11, %v15232_v5, %v5579_v32  ;;  %v15237_v32 = vstv %s11796_s26  ;;  %s8505_s26 = sld [smem:[#allocation11 + $0x27]] }
 0x814   : > { %15228 = vst [vmem:[#allocation171_spill] sm:$0xff] %v12175_v23  ;;  %15229 = vst [vmem:[#allocation172_spill] sm:$0xff] %v12177_v14  ;;  %v12193_v23 = vmul.f32 %v12167_v31, %v11322_v22  ;;  %v5630_v14 = vsel %vm5412_vm11, %v15238_v59, %v5629_v39  ;;  %v15242_v39 = vstv %s11828_s6  ;;  %s8507_s6 = sld [smem:[#allocation11 + $0x29]] }
 0x815   : > { %5910 = vrot.lane.b32.xlu1 %v5905_v1, %s15092_s4  ;;  %5583 = vrot.lane.b32.xlu0 %v5580_v2, %s8973_s0  ;;  %v5933_v1 = vmul.f32 %v15237_v32, %v11322_v22  ;;  %v5961_v59 = vmul.f32 %v15242_v39, %v11322_v22 }
 0x816   : > { %15233 = vst [vmem:[#allocation174_spill] sm:$0xff] %v12193_v23  ;;  %v14908_v5 = vrot.slane %v12193_v23, 3  ;;  %v15247_v23 = vrot.slane %v15246_v18, 4 }
 0x817   : > { %v12200_v9 = vpop.permute.xlu1 %6036  ;;  %v12202_v54 = vpop.permute.xlu0 %4776 }
 0x818   : > { %15235 = vst [vmem:[#allocation176_spill] sm:$0xff] %v12200_v9  ;;  %15236 = vst [vmem:[#allocation177_spill] sm:$0xff] %v12202_v54  ;;  %v15239_v9 = vrot.slane %v12171_v30, 3 }
 0x819   : > { %5938 = vrot.lane.b32.xlu1 %v5933_v1, %s15094_s27  ;;  %5633 = vrot.lane.b32.xlu0 %v5630_v14, %s8974_s1  ;;  %v15244_v1 = vrot.slane %v12198_v16, 3  ;;  %v12248_v16 = vstv %s8483_s3  ;;  %s8529_s3 = sld [smem:[#allocation11 + $0x3f]] }
 0x81a   : > { %v12220_v32 = vsel %vm5412_vm11, %v14908_v5, %v15239_v9  ;;  %v5719_v9 = vsel %vm5651_vm12, %v15247_v23, %v5718_v24  ;;  %v12253_v24 = vld [vmem:[#allocation3 + $0x20] sm:$0xff] }
 0x81b   : > { %15240 = vst [vmem:[#allocation178_spill] sm:$0xff] %v12220_v32  ;;  %v12222_v2 = vpop.permute.xlu1 %6064  ;;  %v12224_v43 = vpop.permute.xlu0 %4780  ;;  %v12234_v14 = vsel %vm5412_vm11, %v15244_v1, %v15243_v10  ;;  %v15251_v10 = vld [vmem:[#allocation108_spill] sm:$0xff]  ;;  %v12257_v23 = vmul.f32 %v12253_v24, %v12248_v16 }
 0x81c   : > { %15241 = vst [vmem:[#allocation179_spill] sm:$0xff] %v12222_v2  ;;  %15245 = vst [vmem:[#allocation180_spill] sm:$0xff] %v12234_v14  ;;  %v15250_v2 = vstv %s11854_s14  ;;  %v15252_v1 = vrot.slane %v15251_v10, 4  ;;  %s8511_s14 = sld [smem:[#allocation11 + $0x2d]] }
 0x81d   : > { %5966 = vrot.lane.b32.xlu1 %v5961_v59, %s8973_s0  ;;  %5722 = vrot.lane.b32.xlu0 %v5719_v9, %s15092_s4  ;;  %v5989_v32 = vmul.f32 %v15250_v2, %v11322_v22  ;;  %v12259_v59 = vstv %s8456_s10  ;;  %v12267_v9 = vld [vmem:[#allocation3 + $0x18] sm:$0xff]  ;;  %s8531_s10 = sld [smem:[#allocation11 + $0x41]] }
 0x81e   : > { %v5769_v18 = vsel %vm5651_vm12, %v15252_v1, %v5768_v41  ;;  %15253 = vst [vmem:[#allocation108_spill] sm:$0xff] %v12259_v59  ;;  %v12265_v2 = vmul.f32 %v12259_v59, %v11312_v62  ;;  %v6127_v41 = vmul.f32 %v12267_v9, %v12248_v16  ;;  %v12282_v62 = vmul.f32 %v12259_v59, %v11322_v22 }
 0x81f   : > { %v12241_v5 = vpop.permute.xlu1 %4394  ;;  %v12243_v39 = vpop.permute.xlu0 %4816 }
 0x820   : > { %15248 = vst [vmem:[#allocation106_spill] sm:$0xff] %v12241_v5  ;;  %15249 = vst [vmem:[#allocation181_spill] sm:$0xff] %v12243_v39  ;;  %v15256_v5 = vstv %s11864_s7  ;;  %v6133_v59 = vrot.slane %v6127_v41, 1  ;;  %v12313_v41 = vmul.f32 %v12253_v24, %v12305_v63  ;;  %s8513_s7 = sld [smem:[#allocation11 + $0x2f]] }
 0x821   : > { %5994 = vrot.lane.b32.xlu1 %v5989_v32, %s8974_s1  ;;  %5772 = vrot.lane.b32.xlu0 %v5769_v18, %s15094_s27  ;;  %15254 = vst [vmem:[#allocation182_spill] sm:$0xff] %v12265_v2  ;;  %v6017_v14 = vmul.f32 %v15256_v5, %v11322_v22  ;;  %v12278_v32 = vstv %s8485_s11  ;;  %15257 = vst [vmem:[#allocation184_spill] sm:$0xff] %v12282_v62  ;;  %v15258_v18 = vld [vmem:[#allocation110_spill] sm:$0xff]  ;;  %v14914_v5 = vrot.slane %v12265_v2, 4  ;;  %s12668_s11 = sld [smem:[#allocation11 + $0x43]] }
 0x822   : > { %v15259_v44 = vrot.slane %v15258_v18, 4  ;;  %v6169_v18 = vmul.f32 %v12267_v9, %v12278_v32 }
 0x823   : > { %v12271_v10 = vpop.permute.xlu1 %4398  ;;  %v12273_v1 = vpop.permute.xlu0 %4820 }
 0x824   : > { %15255 = vst [vmem:[#allocation183_spill] sm:$0xff] %v12271_v10  ;;  %v5819_v51 = vsel %vm5651_vm12, %v15259_v44, %v5818_v46  ;;  %v12290_v10 = vmul.f32 %v12253_v24, %v12278_v32  ;;  %v15262_v46 = vstv %s11874_s12  ;;  %s8515_s12 = sld [smem:[#allocation11 + $0x31]] }
 0x825   : > { %6022 = vrot.lane.b32.xlu1 %v6017_v14, %s8975_s5  ;;  %5822 = vrot.lane.b32.xlu0 %v5819_v51, %s8973_s0  ;;  %v6045_v31 = vmul.f32 %v15262_v46, %v11322_v22  ;;  %v15263_v51 = vrot.slane %v12257_v23, 1  ;;  %v15264_v22 = vrot.slane %v12282_v62, 4  ;;  %v14918_v62 = vrot.slane %v12313_v41, 1 }
 0x827   : > { %v12298_v37 = vpop.permute.xlu1 %4436  ;;  %v12300_v44 = vpop.permute.xlu0 %4856  ;;  %v6135_v14 = vsel %vm4474_vm7, %v6133_v59, %v15263_v51  ;;  %v12322_v46 = vsel %vm5651_vm12, %v15264_v22, %v14914_v5  ;;  %v6211_v59 = vmul.f32 %v12267_v9, %v12305_v63  ;;  %v12338_v22 = vmul.f32 %v12253_v24, %v12330_v3 }
 0x828   : > { %15260 = vst [vmem:[#allocation110_spill] sm:$0xff] %v12298_v37  ;;  %15261 = vst [vmem:[#allocation185_spill] sm:$0xff] %v12300_v44  ;;  %v6175_v37 = vrot.slane %v6169_v18, 1  ;;  %v15268_v18 = vld [vmem:[#allocation97_spill] sm:$0xff] }
 0x829   : > { %6050 = vrot.lane.b32.xlu1 %v6045_v31, %s8976_s9  ;;  %6138 = vrot.lane.b32.xlu0 %v6135_v14, %s15092_s4  ;;  %15265 = vst [vmem:[#allocation186_spill] sm:$0xff] %v12322_v46  ;;  %v15267_v31 = vrot.slane %v12290_v10, 1  ;;  %v6217_v5 = vrot.slane %v6211_v59, 1  ;;  %v14922_v15 = vrot.slane %v12338_v22, 1  ;;  %v15271_v59 = vld [vmem:[#allocation98_spill] sm:$0xff] }
 0x82b   : > { %v12326_v51 = vpop.permute.xlu1 %4547  ;;  %v12328_v52 = vpop.permute.xlu0 %4860  ;;  %v6177_v14 = vsel %vm4474_vm7, %v6175_v37, %v15267_v31  ;;  %v12349_v37 = vstv %s8491_s19  ;;  %v6219_v31 = vsel %vm4474_vm7, %v6217_v5, %v14918_v62  ;;  %v12368_v5 = vstv %s8493_s20  ;;  %s8541_s19 = sld [smem:[#allocation11 + $0x4b]]  ;;  %s8406_s20 = sld [smem:[#allocation8 + $0x8]] }
 0x82c   : > { %15266 = vst [vmem:[#allocation187_spill] sm:$0xff] %v12326_v51  ;;  %v6253_v51 = vmul.f32 %v12267_v9, %v12330_v3 }
 0x82d   : > { %4543 = vrot.lane.b32.xlu1 %v15268_v18, %s15092_s4  ;;  %6180 = vrot.lane.b32.xlu0 %v6177_v14, %s15094_s27  ;;  %v12357_v14 = vmul.f32 %v12253_v24, %v12349_v37 }
 0x82e   : > { %v6259_v18 = vrot.slane %v6253_v51, 1  ;;  %v15273_v51 = vld [vmem:[#allocation99_spill] sm:$0xff] }
 0x82f   : > { %v12345_v46 = vpop.permute.xlu1 %4597  ;;  %v12347_v4 = vpop.permute.xlu0 %4896  ;;  %v14924_v20 = vrot.slane %v12357_v14, 1 }
 0x830   : > { %15269 = vst [vmem:[#allocation97_spill] sm:$0xff] %v12345_v46  ;;  %15270 = vst [vmem:[#allocation188_spill] sm:$0xff] %v12347_v4  ;;  %v6295_v46 = vmul.f32 %v12267_v9, %v12349_v37  ;;  %v6261_v62 = vsel %vm4474_vm7, %v6259_v18, %v14922_v15  ;;  %v12387_v18 = vstv %s8497_s22  ;;  %s8408_s22 = sld [smem:[#allocation8 + $0xa]] }
 0x831   : > { %4593 = vrot.lane.b32.xlu1 %v15271_v59, %s15094_s27  ;;  %6222 = vrot.lane.b32.xlu0 %v6219_v31, %s8973_s0  ;;  %v12376_v31 = vmul.f32 %v12253_v24, %v12368_v5 }
 0x832   : > { %v6301_v59 = vrot.slane %v6295_v46, 1  ;;  %v15276_v46 = vld [vmem:[#allocation100_spill] sm:$0xff] }
 0x833   : > { %v12364_v0 = vpop.permute.xlu1 %4686  ;;  %v12366_v7 = vpop.permute.xlu0 %4900  ;;  %v14926_v60 = vrot.slane %v12376_v31, 1 }
 0x834   : > { %15272 = vst [vmem:[#allocation98_spill] sm:$0xff] %v12364_v0  ;;  %v6337_v0 = vmul.f32 %v12267_v9, %v12368_v5  ;;  %v6303_v15 = vsel %vm4474_vm7, %v6301_v59, %v14924_v20  ;;  %v12406_v59 = vstv %s8499_s30  ;;  %s8412_s30 = sld [smem:[#allocation8 + $0xe]] }
 0x835   : > { %4682 = vrot.lane.b32.xlu1 %v15273_v51, %s15092_s4  ;;  %6264 = vrot.lane.b32.xlu0 %v6261_v62, %s8974_s1  ;;  %v12395_v62 = vmul.f32 %v12253_v24, %v12387_v18 }
 0x836   : > { %v6343_v51 = vrot.slane %v6337_v0, 1  ;;  %v15278_v0 = vld [vmem:[#allocation101_spill] sm:$0xff] }
 0x837   : > { %v12383_v13 = vpop.permute.xlu1 %4736  ;;  %v12385_v40 = vpop.permute.xlu0 %5908  ;;  %v14928_v53 = vrot.slane %v12395_v62, 2 }
 0x838   : > { %15274 = vst [vmem:[#allocation99_spill] sm:$0xff] %v12383_v13  ;;  %15275 = vst [vmem:[#allocation189_spill] sm:$0xff] %v12385_v40  ;;  %v6413_v13 = vmul.f32 %v12267_v9, %v12387_v18  ;;  %v6345_v20 = vsel %vm4474_vm7, %v6343_v51, %v14926_v60  ;;  %v12425_v51 = vstv %s8501_s15  ;;  %s8414_s15 = sld [smem:[#allocation8 + $0x10]] }
 0x839   : > { %4732 = vrot.lane.b32.xlu1 %v15276_v46, %s15094_s27  ;;  %6306 = vrot.lane.b32.xlu0 %v6303_v15, %s8975_s5  ;;  %v12414_v15 = vmul.f32 %v12253_v24, %v12406_v59 }
 0x83a   : > { %v6419_v46 = vrot.slane %v6413_v13, 2  ;;  %v15280_v13 = vld [vmem:[#allocation103_spill] sm:$0xff] }
 0x83b   : > { %v12402_v40 = vpop.permute.xlu1 %4778  ;;  %v12404_v48 = vpop.permute.xlu0 %5936  ;;  %v14929_v44 = vrot.slane %v12414_v15, 2 }
 0x83c   : > { %15277 = vst [vmem:[#allocation100_spill] sm:$0xff] %v12404_v48  ;;  %v6455_v48 = vmul.f32 %v12267_v9, %v12406_v59  ;;  %v6421_v60 = vsel %vm4613_vm10, %v6419_v46, %v14928_v53  ;;  %v12444_v46 = vstv %s8503_s25  ;;  %s8428_s25 = sld [smem:[#allocation9 + $0xc]] }
 0x83d   : > { %5004 = vrot.lane.b32.xlu1 %v15278_v0, %s15092_s4  ;;  %6348 = vrot.lane.b32.xlu0 %v6345_v20, %s8976_s9  ;;  %v12433_v20 = vmul.f32 %v12253_v24, %v12425_v51 }
 0x83e   : > { %v6461_v0 = vrot.slane %v6455_v48, 2  ;;  %v15282_v48 = vld [vmem:[#allocation104_spill] sm:$0xff] }
 0x83f   : > { %v12421_v4 = vpop.permute.xlu1 %4818  ;;  %v12423_v29 = vpop.permute.xlu0 %5964  ;;  %v14933_v39 = vrot.slane %v12433_v20, 2 }
 0x840   : > { %15279 = vst [vmem:[#allocation101_spill] sm:$0xff] %v12423_v29  ;;  %v6497_v29 = vmul.f32 %v12267_v9, %v12425_v51  ;;  %v6463_v53 = vsel %vm4613_vm10, %v6461_v0, %v14929_v44  ;;  %v12463_v0 = vstv %s8505_s26  ;;  %s8430_s26 = sld [smem:[#allocation9 + $0xe]] }
 0x841   : > { %5054 = vrot.lane.b32.xlu1 %v15280_v13, %s15094_s27  ;;  %6424 = vrot.lane.b32.xlu0 %v6421_v60, %s15092_s4  ;;  %v12452_v60 = vmul.f32 %v12253_v24, %v12444_v46 }
 0x842   : > { %v6503_v13 = vrot.slane %v6497_v29, 2  ;;  %v15285_v29 = vld [vmem:[#allocation105_spill] sm:$0xff] }
 0x843   : > { %v12440_v27 = vpop.permute.xlu1 %4858  ;;  %v12442_v2 = vpop.permute.xlu0 %5992  ;;  %v14935_v34 = vrot.slane %v12452_v60, 2 }
 0x844   : > { %15281 = vst [vmem:[#allocation103_spill] sm:$0xff] %v12442_v2  ;;  %v6539_v2 = vmul.f32 %v12267_v9, %v12444_v46  ;;  %v6505_v44 = vsel %vm4613_vm10, %v6503_v13, %v14933_v39  ;;  %v12482_v13 = vstv %s8507_s6  ;;  %s8432_s6 = sld [smem:[#allocation9 + $0x10]] }
 0x845   : > { %5104 = vrot.lane.b32.xlu1 %v15282_v48, %s8973_s0  ;;  %6466 = vrot.lane.b32.xlu0 %v6463_v53, %s15094_s27  ;;  %v12471_v53 = vmul.f32 %v12253_v24, %v12463_v0 }
 0x846   : > { %v6545_v48 = vrot.slane %v6539_v2, 2  ;;  %v15288_v2 = vld [vmem:[#allocation107_spill] sm:$0xff] }
 0x847   : > { %v12459_v8 = vpop.permute.xlu1 %4898  ;;  %v12461_v54 = vpop.permute.xlu0 %6020  ;;  %v14936_v21 = vrot.slane %v12471_v53, 2 }
 0x848   : > { %15283 = vst [vmem:[#allocation104_spill] sm:$0xff] %v12459_v8  ;;  %15284 = vst [vmem:[#allocation190_spill] sm:$0xff] %v12461_v54  ;;  %v6581_v54 = vmul.f32 %v12267_v9, %v12463_v0  ;;  %v6547_v39 = vsel %vm4613_vm10, %v6545_v48, %v14935_v34  ;;  %v12501_v48 = vstv %s8511_s14  ;;  %s8434_s14 = sld [smem:[#allocation9 + $0x12]] }
 0x849   : > { %5154 = vrot.lane.b32.xlu1 %v15285_v29, %s8974_s1  ;;  %6508 = vrot.lane.b32.xlu0 %v6505_v44, %s8973_s0  ;;  %v12490_v44 = vmul.f32 %v12253_v24, %v12482_v13 }
 0x84a   : > { %v6587_v29 = vrot.slane %v6581_v54, 2  ;;  %v15291_v54 = vld [vmem:[#allocation109_spill] sm:$0xff] }
 0x84b   : > { %v12478_v30 = vpop.permute.xlu1 %5008  ;;  %v12480_v61 = vpop.permute.xlu0 %6048  ;;  %v14937_v26 = vrot.slane %v12490_v44, 2 }
 0x84c   : > { %15286 = vst [vmem:[#allocation105_spill] sm:$0xff] %v12478_v30  ;;  %15287 = vst [vmem:[#allocation191_spill] sm:$0xff] %v12480_v61  ;;  %v6623_v61 = vmul.f32 %v12267_v9, %v12482_v13  ;;  %v6589_v34 = vsel %vm4613_vm10, %v6587_v29, %v14936_v21  ;;  %v12520_v29 = vstv %s8513_s7  ;;  %s8438_s7 = sld [smem:[#allocation9 + $0x16]] }
 0x84d   : > { %5242 = vrot.lane.b32.xlu1 %v15288_v2, %s15092_s4  ;;  %6550 = vrot.lane.b32.xlu0 %v6547_v39, %s8974_s1  ;;  %v12509_v39 = vmul.f32 %v12253_v24, %v12501_v48 }
 0x84e   : > { %v6629_v2 = vrot.slane %v6623_v61, 2  ;;  %v15294_v61 = vld [vmem:[#allocation111_spill] sm:$0xff] }
 0x84f   : > { %v12497_v30 = vpop.permute.xlu1 %5058  ;;  %v12499_v33 = vpop.permute.xlu0 %4545  ;;  %v14938_v42 = vrot.slane %v12509_v39, 3 }
 0x850   : > { %15289 = vst [vmem:[#allocation107_spill] sm:$0xff] %v12497_v30  ;;  %15290 = vst [vmem:[#allocation192_spill] sm:$0xff] %v12499_v33  ;;  %v6699_v33 = vmul.f32 %v12267_v9, %v12501_v48  ;;  %v6631_v21 = vsel %vm4613_vm10, %v6629_v2, %v14937_v26  ;;  %v12539_v2 = vstv %s8515_s12  ;;  %s8440_s12 = sld [smem:[#allocation9 + $0x18]] }
 0x851   : > { %5292 = vrot.lane.b32.xlu1 %v15291_v54, %s15094_s27  ;;  %6592 = vrot.lane.b32.xlu0 %v6589_v34, %s8975_s5  ;;  %v12528_v34 = vmul.f32 %v12253_v24, %v12520_v29 }
 0x852   : > { %v6705_v54 = vrot.slane %v6699_v33, 3  ;;  %v15298_v33 = vld [vmem:[#allocation112_spill] sm:$0xff] }
 0x853   : > { %v12516_v30 = vpop.permute.xlu1 %5108  ;;  %v12518_v56 = vpop.permute.xlu0 %4595  ;;  %v14939_v38 = vrot.slane %v12528_v34, 3 }
 0x854   : > { %15292 = vst [vmem:[#allocation109_spill] sm:$0xff] %v12516_v30  ;;  %15293 = vst [vmem:[#allocation193_spill] sm:$0xff] %v12518_v56  ;;  %v6741_v56 = vmul.f32 %v12267_v9, %v12520_v29  ;;  %v6707_v26 = vsel %vm5412_vm11, %v6705_v54, %v14938_v42  ;;  %v12558_v54 = vstv %s8517_s23  ;;  %s8442_s23 = sld [smem:[#allocation9 + $0x1a]] }
 0x855   : > { %5342 = vrot.lane.b32.xlu1 %v15294_v61, %s8973_s0  ;;  %6634 = vrot.lane.b32.xlu0 %v6631_v21, %s8976_s9  ;;  %v12547_v21 = vmul.f32 %v12253_v24, %v12539_v2  ;;  %15301 = vst [vmem:[#allocation197_spill] sm:$0xff] %v12558_v54  ;;  %v6825_v8 = vmul.f32 %v12267_v9, %v12558_v54 }
 0x856   : > { %v6747_v61 = vrot.slane %v6741_v56, 3  ;;  %v15302_v56 = vld [vmem:[#allocation113_spill] sm:$0xff] }
 0x857   : > { %v12535_v30 = vpop.permute.xlu1 %5158  ;;  %v12537_v35 = vpop.permute.xlu0 %4684  ;;  %15297 = vst [vmem:[#allocation195_spill] sm:$0xff] %v12547_v21  ;;  %v14941_v11 = vrot.slane %v12547_v21, 3 }
 0x858   : > { %15295 = vst [vmem:[#allocation111_spill] sm:$0xff] %v12535_v30  ;;  %15296 = vst [vmem:[#allocation194_spill] sm:$0xff] %v12537_v35  ;;  %v6783_v35 = vmul.f32 %v12267_v9, %v12539_v2  ;;  %v6749_v42 = vsel %vm5412_vm11, %v6747_v61, %v14939_v38  ;;  %v12579_v38 = vstv %s8519_s21  ;;  %s8444_s21 = sld [smem:[#allocation9 + $0x1c]] }
 0x859   : > { %5392 = vrot.lane.b32.xlu1 %v15298_v33, %s8974_s1  ;;  %6710 = vrot.lane.b32.xlu0 %v6707_v26, %s15092_s4  ;;  %v12566_v26 = vmul.f32 %v12253_v24, %v12558_v54  ;;  %v15303_v33 = vld [vmem:[#allocation96_spill] sm:$0xff] }
 0x85b   : > { %v12554_v30 = vpop.permute.xlu1 %5246  ;;  %v12556_v47 = vpop.permute.xlu0 %4734  ;;  %v15311_v54 = vrot.slane %v12566_v26, 3 }
 0x85c   : > { %15299 = vst [vmem:[#allocation112_spill] sm:$0xff] %v12554_v30  ;;  %15300 = vst [vmem:[#allocation196_spill] sm:$0xff] %v12556_v47  ;;  %v4787_v47 = vadd.f32 %v12224_v43, %v15303_v33  ;;  %v6789_v30 = vrot.slane %v6783_v35, 3  ;;  %v12587_v43 = vmul.f32 %v12253_v24, %v12579_v38  ;;  %v15307_v35 = vld [vmem:[#allocation114_spill] sm:$0xff] }
 0x85d   : > { %5481 = vrot.lane.b32.xlu1 %v15302_v56, %s15092_s4  ;;  %6752 = vrot.lane.b32.xlu0 %v6749_v42, %s15094_s27 }
 0x85e   : > { %v6791_v56 = vsel %vm5412_vm11, %v6789_v30, %v14941_v11  ;;  %15306 = vst [vmem:[#allocation198_spill] sm:$0xff] %v12587_v43  ;;  %v4807_v33 = vadd.f32 %v11955_v55, %v4787_v47  ;;  %v12599_v11 = vstv %s8521_s13  ;;  %v15313_v55 = vld [vmem:[#allocation115_spill] sm:$0xff]  ;;  %s8448_s13 = sld [smem:[#allocation9 + $0x20]] }
 0x85f   : > { %v12575_v17 = vpop.permute.xlu1 %5296  ;;  %v12577_v61 = vpop.permute.xlu0 %5006  ;;  %15310 = vst [vmem:[#allocation200_spill] sm:$0xff] %v12599_v11 }
 0x860   : > { %15304 = vst [vmem:[#allocation113_spill] sm:$0xff] %v12575_v17  ;;  %15305 = vst [vmem:[#allocation96_spill] sm:$0xff] %v12577_v61  ;;  %v6831_v61 = vrot.slane %v6825_v8, 3  ;;  %v6867_v17 = vmul.f32 %v12267_v9, %v12579_v38  ;;  %v4827_v42 = vadd.f32 %v12273_v1, %v4807_v33  ;;  %v12608_v8 = vmul.f32 %v12253_v24, %v12599_v11 }
 0x861   : > { %5531 = vrot.lane.b32.xlu1 %v15307_v35, %s15094_s27  ;;  %6794 = vrot.lane.b32.xlu0 %v6791_v56, %s8973_s0  ;;  %v14943_v56 = vrot.slane %v12587_v43, 3 }
 0x862   : > { %v6833_v35 = vsel %vm5412_vm11, %v6831_v61, %v15311_v54  ;;  %15312 = vst [vmem:[#allocation201_spill] sm:$0xff] %v12608_v8  ;;  %v6873_v47 = vrot.slane %v6867_v17, 3  ;;  %v12619_v54 = vstv %s8525_s16  ;;  %v4847_v61 = vadd.f32 %v11979_v36, %v4827_v42  ;;  %s8450_s16 = sld [smem:[#allocation9 + $0x22]] }
 0x863   : > { %v12595_v21 = vpop.permute.xlu1 %5346  ;;  %v12597_v30 = vpop.permute.xlu0 %5056  ;;  %15316 = vst [vmem:[#allocation203_spill] sm:$0xff] %v12619_v54  ;;  %v12628_v17 = vmul.f32 %v12253_v24, %v12619_v54  ;;  %v6985_v36 = vmul.f32 %v12267_v9, %v12619_v54 }
 0x864   : > { %15308 = vst [vmem:[#allocation114_spill] sm:$0xff] %v12595_v21  ;;  %15309 = vst [vmem:[#allocation199_spill] sm:$0xff] %v12597_v30  ;;  %v6909_v30 = vmul.f32 %v12267_v9, %v12599_v11  ;;  %v15318_v21 = vld [vmem:[#allocation116_spill] sm:$0xff] }
 0x865   : > { %5581 = vrot.lane.b32.xlu1 %v15313_v55, %s8973_s0  ;;  %6836 = vrot.lane.b32.xlu0 %v6833_v35, %s8974_s1  ;;  %v6875_v55 = vsel %vm5412_vm11, %v6873_v47, %v14943_v56  ;;  %v14945_v35 = vrot.slane %v12608_v8, 3  ;;  %15317 = vst [vmem:[#allocation204_spill] sm:$0xff] %v12628_v17  ;;  %v12640_v56 = vstv %s8527_s8  ;;  %v12666_v8 = vstv %s8529_s3  ;;  %s8452_s8 = sld [smem:[#allocation9 + $0x24]]  ;;  %s8458_s3 = sld [smem:[#allocation9 + $0x2a]] }
 0x866   : > { %15321 = vst [vmem:[#allocation206_spill] sm:$0xff] %v12640_v56  ;;  %15327 = vst [vmem:[#allocation210_spill] sm:$0xff] %v12666_v8 }
 0x867   : > { %v12615_v1 = vpop.permute.xlu1 %5396  ;;  %v12617_v33 = vpop.permute.xlu0 %5106 }
 0x868   : > { %15314 = vst [vmem:[#allocation115_spill] sm:$0xff] %v12615_v1  ;;  %15315 = vst [vmem:[#allocation202_spill] sm:$0xff] %v12617_v33  ;;  %v4867_v33 = vadd.f32 %v12328_v52, %v4847_v61  ;;  %v6915_v1 = vrot.slane %v6909_v30, 3  ;;  %v12648_v52 = vmul.f32 %v12253_v24, %v12640_v56  ;;  %v15322_v30 = vld [vmem:[#allocation117_spill] sm:$0xff] }
 0x869   : > { %5631 = vrot.lane.b32.xlu1 %v15318_v21, %s8974_s1  ;;  %6878 = vrot.lane.b32.xlu0 %v6875_v55, %s8975_s5  ;;  %v6991_v55 = vrot.slane %v6985_v36, 4  ;;  %v15333_v36 = vld [vmem:[#allocation119_spill] sm:$0xff] }
 0x86a   : > { %v6917_v43 = vsel %vm5412_vm11, %v6915_v1, %v14945_v35  ;;  %v4887_v61 = vadd.f32 %v12021_v45, %v4867_v33 }
 0x86b   : > { %v12636_v42 = vpop.permute.xlu1 %5485  ;;  %v12638_v47 = vpop.permute.xlu0 %5156 }
 0x86c   : > { %15319 = vst [vmem:[#allocation116_spill] sm:$0xff] %v12636_v42  ;;  %15320 = vst [vmem:[#allocation205_spill] sm:$0xff] %v12638_v47  ;;  %v7027_v47 = vmul.f32 %v12267_v9, %v12640_v56  ;;  %v12656_v42 = vstv %s8465_s2  ;;  %v4907_v45 = vadd.f32 %v12366_v7, %v4887_v61  ;;  %v7069_v7 = vmul.f32 %v12267_v9, %v12666_v8  ;;  %s8454_s2 = sld [smem:[#allocation9 + $0x26]] }
 0x86d   : > { %5720 = vrot.lane.b32.xlu1 %v15322_v30, %s15092_s4  ;;  %6920 = vrot.lane.b32.xlu0 %v6917_v43, %s8976_s9  ;;  %15323 = vst [vmem:[#allocation117_spill] sm:$0xff] %v12656_v42  ;;  %v12664_v21 = vmul.f32 %v12253_v24, %v12656_v42  ;;  %v15328_v43 = vrot.slane %v12628_v17, 4  ;;  %v12677_v30 = vmul.f32 %v12253_v24, %v12666_v8  ;;  %v12686_v61 = vstv %s8531_s10  ;;  %v12693_v17 = vld [vmem:[#allocation3 + $0x28] sm:$0x3f]  ;;  %s8460_s10 = sld [smem:[#allocation9 + $0x2c]] }
 0x86e   : > { %v7033_v56 = vrot.slane %v7027_v47, 4  ;;  %v4927_v47 = vadd.f32 %v12075_v58, %v4907_v45  ;;  %v7111_v8 = vmul.f32 %v12267_v9, %v12686_v61  ;;  %v7075_v54 = vrot.slane %v7069_v7, 4 }
 0x86f   : > { %v12658_v1 = vpop.permute.xlu1 %5535  ;;  %v12660_v35 = vpop.permute.xlu0 %5244  ;;  %15326 = vst [vmem:[#allocation209_spill] sm:$0xff] %v12664_v21  ;;  %v6993_v33 = vsel %vm5651_vm12, %v6991_v55, %v15328_v43  ;;  %v15336_v45 = vrot.slane %v12664_v21, 4  ;;  %v6171_v7 = vmul.f32 %v12693_v17, %v12278_v32  ;;  %v15338_v21 = vrot.slane %v12015_v57, 1 }
 0x870   : > { %15324 = vst [vmem:[#allocation207_spill] sm:$0xff] %v12658_v1  ;;  %15325 = vst [vmem:[#allocation208_spill] sm:$0xff] %v12660_v35  ;;  %v15329_v35 = vld [vmem:[#allocation118_spill] sm:$0xff]  ;;  %v5859_v1 = vmul.f32 %v12267_v9, %v12656_v42  ;;  %v15332_v42 = vrot.slane %v12648_v52, 4 }
 0x871   : > { %5770 = vrot.lane.b32.xlu1 %v15329_v35, %s15094_s27  ;;  %6996 = vrot.lane.b32.xlu0 %v6993_v33, %s15092_s4  ;;  %v6129_v35 = vmul.f32 %v12693_v17, %v12248_v16  ;;  %v12699_v33 = vmul.f32 %v12253_v24, %v12686_v61 }
 0x872   : > { %v5865_v16 = vrot.slane %v5859_v1, 4  ;;  %v15337_v1 = vrot.slane %v12677_v30, 4 }
 0x873   : > { %v12688_v55 = vpop.permute.xlu1 %5585  ;;  %v12690_v43 = vpop.permute.xlu0 %5294 }
 0x874   : > { %15330 = vst [vmem:[#allocation118_spill] sm:$0xff] %v12688_v55  ;;  %15331 = vst [vmem:[#allocation211_spill] sm:$0xff] %v12690_v43  ;;  %v7035_v55 = vsel %vm5651_vm12, %v7033_v56, %v15332_v42  ;;  %v5867_v56 = vsel %vm5651_vm12, %v5865_v16, %v15336_v45  ;;  %v6136_v42 = vrot.slane %v6129_v35, 1  ;;  %v7117_v35 = vrot.slane %v7111_v8, 4 }
 0x875   : > { %5820 = vrot.lane.b32.xlu1 %v15333_v36, %s8973_s0  ;;  %7038 = vrot.lane.b32.xlu0 %v7035_v55, %s15094_s27  ;;  %v12720_v36 = vstv %s12668_s11  ;;  %v7077_v55 = vsel %vm5651_vm12, %v7075_v54, %v15337_v1  ;;  %v15339_v54 = vrot.slane %v12019_v50, 1  ;;  %v15342_v43 = vrot.slane %v12257_v23, 1  ;;  %s8462_s11 = sld [smem:[#allocation9 + $0x2e]] }
 0x876   : > { %v7153_v16 = vmul.f32 %v12267_v9, %v12720_v36  ;;  %v12751_v8 = vstv %s8535_s17  ;;  %s8464_s17 = sld [smem:[#allocation9 + $0x30]] }
 0x877   : > { %v12711_v11 = vpop.permute.xlu1 %5635  ;;  %v12713_v58 = vpop.permute.xlu0 %5344  ;;  %v6137_v57 = vsel %vm4474_vm7, %v15342_v43, %v6136_v42  ;;  %v7195_v43 = vmul.f32 %v12267_v9, %v12751_v8  ;;  %v12764_v42 = vstv %s8539_s18  ;;  %s8482_s18 = sld [smem:[#allocation11 + $0x10]] }
 0x878   : > { %15334 = vst [vmem:[#allocation119_spill] sm:$0xff] %v12711_v11  ;;  %15335 = vst [vmem:[#allocation212_spill] sm:$0xff] %v12713_v58  ;;  %v12729_v11 = vmul.f32 %v12253_v24, %v12720_v36  ;;  %v4946_v58 = vadd.f32 %v15338_v21, %v4927_v47  ;;  %v15343_v21 = vrot.slane %v12699_v33, 4  ;;  %v7159_v23 = vrot.slane %v7153_v16, 4 }
 0x879   : > { %5870 = vrot.lane.b32.xlu1 %v5867_v56, %s8974_s1  ;;  %7080 = vrot.lane.b32.xlu0 %v7077_v55, %s8973_s0  ;;  %v6178_v56 = vrot.slane %v6171_v7, 1  ;;  %v12758_v55 = vmul.f32 %v12253_v24, %v12751_v8 }
 0x87a   : > { %v12739_v45 = vadd.f32 %v15339_v54, %v4946_v58  ;;  %v7119_v47 = vsel %vm5651_vm12, %v7117_v35, %v15343_v21  ;;  %v14955_v50 = vrot.slane %v12729_v11, 4  ;;  %v6213_v58 = vmul.f32 %v12693_v17, %v12305_v63 }
 0x87b   : > { %v12741_v32 = vpop.permute.xlu1 %5724  ;;  %v12743_v1 = vpop.permute.xlu0 %5394  ;;  %v6255_v63 = vmul.f32 %v12693_v17, %v12330_v3  ;;  %v12774_v54 = vmul.f32 %v12253_v24, %v12764_v42  ;;  %v7201_v3 = vrot.slane %v7195_v43, 4 }
 0x87c   : > { %15340 = vst [vmem:[#allocation213_spill] sm:$0xff] %v12741_v32  ;;  %15341 = vst [vmem:[#allocation214_spill] sm:$0xff] %v12743_v1  ;;  %v7161_v21 = vsel %vm5651_vm12, %v7159_v23, %v14955_v50  ;;  %v7272_v32 = vmul.f32 %v12267_v9, %v12764_v42  ;;  %v12792_v1 = vstv %s8541_s19  ;;  %v15352_v50 = vld [vmem:[#allocation120_spill] sm:$0xff]  ;;  %s8484_s19 = sld [smem:[#allocation11 + $0x12]] }
 0x87d   : > { %6140 = vrot.lane.b32.xlu1 %v6137_v57, %s15092_s4  ;;  %7122 = vrot.lane.b32.xlu0 %v7119_v47, %s8974_s1  ;;  %v15346_v57 = vrot.slane %v12290_v10, 1  ;;  %v6220_v47 = vrot.slane %v6213_v58, 1  ;;  %v15349_v58 = vrot.slane %v12313_v41, 1  ;;  %v7314_v41 = vmul.f32 %v12267_v9, %v12792_v1 }
 0x87f   : > { %v12766_v7 = vpop.permute.xlu1 %5774  ;;  %v12768_v35 = vpop.permute.xlu0 %5483  ;;  %v6179_v16 = vsel %vm4474_vm7, %v15346_v57, %v6178_v56  ;;  %v6262_v56 = vrot.slane %v6255_v63, 1  ;;  %v14956_v57 = vrot.slane %v12774_v54, 5  ;;  %v6221_v23 = vsel %vm4474_vm7, %v15349_v58, %v6220_v47 }
 0x880   : > { %15344 = vst [vmem:[#allocation215_spill] sm:$0xff] %v12766_v7  ;;  %15345 = vst [vmem:[#allocation216_spill] sm:$0xff] %v12768_v35  ;;  %v14954_v7 = vrot.slane %v12758_v55, 4  ;;  %v7278_v63 = vrot.slane %v7272_v32, 5  ;;  %v6339_v32 = vmul.f32 %v12693_v17, %v12368_v5 }
 0x881   : > { %6182 = vrot.lane.b32.xlu1 %v6179_v16, %s15094_s27  ;;  %7164 = vrot.lane.b32.xlu0 %v7161_v21, %s8975_s5  ;;  %v6297_v16 = vmul.f32 %v12693_v17, %v12349_v37  ;;  %v12804_v21 = vmul.f32 %v12253_v24, %v12792_v1 }
 0x882   : > { %v7203_v43 = vsel %vm5651_vm12, %v7201_v3, %v14954_v7  ;;  %v15351_v3 = vrot.slane %v12338_v22, 1  ;;  %v7280_v24 = vsel %vm7222_vm13, %v7278_v63, %v14956_v57  ;;  %v7356_v22 = vmul.f32 %v12267_v9, %v15352_v50 }
 0x883   : > { %v12787_v35 = vpop.permute.xlu1 %5824  ;;  %v12789_v10 = vpop.permute.xlu0 %5533  ;;  %v6304_v7 = vrot.slane %v6297_v16, 1  ;;  %v15354_v63 = vrot.slane %v12357_v14, 1 }
 0x884   : > { %15347 = vst [vmem:[#allocation217_spill] sm:$0xff] %v12787_v35  ;;  %15348 = vst [vmem:[#allocation218_spill] sm:$0xff] %v12789_v10  ;;  %v6263_v37 = vsel %vm4474_vm7, %v15351_v3, %v6262_v56  ;;  %v6346_v3 = vrot.slane %v6339_v32, 1  ;;  %v7362_v50 = vrot.slane %v7356_v22, 5  ;;  %v15359_v32 = vld [vmem:[#allocation122_spill] sm:$0xff]  ;;  %v13299_v10 = vld [vmem:[#allocation3 + $0x8] sm:$0xff] }
 0x885   : > { %6224 = vrot.lane.b32.xlu1 %v6221_v23, %s8973_s0  ;;  %7206 = vrot.lane.b32.xlu0 %v7203_v43, %s8976_s9  ;;  %v14957_v23 = vrot.slane %v12804_v21, 5  ;;  %v7320_v43 = vrot.slane %v7314_v41, 5  ;;  %v6305_v16 = vsel %vm4474_vm7, %v15354_v63, %v6304_v7  ;;  %v15355_v41 = vld [vmem:[#allocation121_spill] sm:$0xff]  ;;  %v15358_v7 = vrot.slane %v12376_v31, 1 }
 0x886   : > { %v15360_v63 = vrot.slane %v15359_v32, 5  ;;  %v15366_v32 = vld [vmem:[#allocation124_spill] sm:$0xff] }
 0x887   : > { %v12810_v47 = vpop.permute.xlu1 %5910  ;;  %v12812_v58 = vpop.permute.xlu0 %5583  ;;  %v7322_v5 = vsel %vm7222_vm13, %v7320_v43, %v14957_v23  ;;  %v6347_v43 = vsel %vm4474_vm7, %v15358_v7, %v6346_v3  ;;  %v15364_v3 = vrot.slane %v12395_v62, 2 }
 0x888   : > { %15350 = vst [vmem:[#allocation219_spill] sm:$0xff] %v12812_v58 }
 0x889   : > { %6266 = vrot.lane.b32.xlu1 %v6263_v37, %s8974_s1  ;;  %7283 = vrot.lane.b32.xlu0 %v7280_v24, %s15092_s4  ;;  %v6415_v37 = vmul.f32 %v12693_v17, %v12387_v18  ;;  %v7398_v24 = vmul.f32 %v12267_v9, %v15355_v41  ;;  %v7364_v18 = vsel %vm7222_vm13, %v7362_v50, %v15360_v63 }
 0x88a   : > { %v7482_v63 = vmul.f32 %v12267_v9, %v15366_v32 }
 0x88b   : > { %v12827_v35 = vpop.permute.xlu1 %5938  ;;  %v12829_v56 = vpop.permute.xlu0 %5633  ;;  %v6422_v23 = vrot.slane %v6415_v37, 2  ;;  %v7404_v22 = vrot.slane %v7398_v24, 5  ;;  %v15365_v37 = vrot.slane %v11760_v19, 5  ;;  %v15369_v19 = vrot.slane %v12414_v15, 2 }
 0x88c   : > { %15353 = vst [vmem:[#allocation120_spill] sm:$0xff] %v12829_v56 }
 0x88d   : > { %6308 = vrot.lane.b32.xlu1 %v6305_v16, %s8975_s5  ;;  %7325 = vrot.lane.b32.xlu0 %v7322_v5, %s15094_s27  ;;  %v6457_v16 = vmul.f32 %v12693_v17, %v12406_v59  ;;  %v15361_v5 = vld [vmem:[#allocation123_spill] sm:$0xff]  ;;  %v6423_v50 = vsel %vm4613_vm10, %v15364_v3, %v6422_v23  ;;  %v7406_v59 = vsel %vm7222_vm13, %v7404_v22, %v15365_v37  ;;  %v15371_v3 = vld [vmem:[#allocation125_spill] sm:$0xff] }
 0x88e   : > { %v7440_v41 = vmul.f32 %v12267_v9, %v15361_v5  ;;  %v6541_v5 = vmul.f32 %v12693_v17, %v12444_v46 }
 0x88f   : > { %v12843_v57 = vpop.permute.xlu1 %5966  ;;  %v12845_v14 = vpop.permute.xlu0 %5722  ;;  %v6464_v7 = vrot.slane %v6457_v16, 2  ;;  %v15370_v16 = vrot.slane %v11764_v25, 5  ;;  %v15374_v25 = vrot.slane %v12433_v20, 2 }
 0x890   : > { %15356 = vst [vmem:[#allocation121_spill] sm:$0xff] %v12843_v57  ;;  %15357 = vst [vmem:[#allocation220_spill] sm:$0xff] %v12845_v14  ;;  %v7446_v24 = vrot.slane %v7440_v41, 5  ;;  %v7488_v41 = vrot.slane %v7482_v63, 5 }
 0x891   : > { %6350 = vrot.lane.b32.xlu1 %v6347_v43, %s8976_s9  ;;  %7367 = vrot.lane.b32.xlu0 %v7364_v18, %s8973_s0  ;;  %v6499_v43 = vmul.f32 %v12693_v17, %v12425_v51  ;;  %v6465_v18 = vsel %vm4613_vm10, %v15369_v19, %v6464_v7  ;;  %v15375_v7 = vrot.slane %v11770_v6, 5  ;;  %v12907_v19 = vstv %s8406_s20  ;;  %s13577_s20 = sld [smem:[#allocation11 + $0x14]] }
 0x892   : > { %v7448_v51 = vsel %vm7222_vm13, %v7446_v24, %v15370_v16  ;;  %v6583_v24 = vmul.f32 %v12693_v17, %v12463_v0  ;;  %v15379_v16 = vrot.slane %v12452_v60, 2 }
 0x893   : > { %v12859_v14 = vpop.permute.xlu1 %5994  ;;  %v12861_v31 = vpop.permute.xlu0 %5772  ;;  %v6506_v22 = vrot.slane %v6499_v43, 2  ;;  %v7490_v46 = vsel %vm7222_vm13, %v7488_v41, %v15375_v7  ;;  %v6548_v43 = vrot.slane %v6541_v5, 2  ;;  %v6625_v41 = vmul.f32 %v12693_v17, %v12482_v13 }
 0x894   : > { %15362 = vst [vmem:[#allocation122_spill] sm:$0xff] %v12859_v14  ;;  %15363 = vst [vmem:[#allocation123_spill] sm:$0xff] %v12861_v31  ;;  %v6590_v5 = vrot.slane %v6583_v24, 2  ;;  %v15383_v13 = vrot.slane %v12471_v53, 2  ;;  %v12951_v24 = vstv %s8412_s30  ;;  %v15405_v31 = vld [vmem:[#allocation203_spill] sm:$0xff]  ;;  %s13602_s30 = sld [smem:[#allocation11 + $0x18]] }
 0x895   : > { %6426 = vrot.lane.b32.xlu1 %v6423_v50, %s15092_s4  ;;  %7409 = vrot.lane.b32.xlu0 %v7406_v59, %s8974_s1  ;;  %v7558_v50 = vmul.f32 %v12267_v9, %v15371_v3  ;;  %v6507_v59 = vsel %vm4613_vm10, %v15374_v25, %v6506_v22  ;;  %v15376_v9 = vld [vmem:[#allocation102_spill] sm:$0xff]  ;;  %v4647_v57 = vmul.f32 %v13299_v10, %v12951_v24 }
 0x896   : > { %v4786_v32 = vadd.f32 %v12402_v40, %v15376_v9  ;;  %v15380_v40 = vrot.slane %v11780_v49, 6  ;;  %v6591_v7 = vsel %vm4613_vm10, %v15383_v13, %v6590_v5 }
 0x897   : > { %v12875_v62 = vpop.permute.xlu1 %6022  ;;  %v12877_v23 = vpop.permute.xlu0 %5822  ;;  %v7564_v63 = vrot.slane %v7558_v50, 6  ;;  %v12930_v50 = vstv %s8408_s22  ;;  %s13594_s22 = sld [smem:[#allocation11 + $0x16]] }
 0x898   : > { %15367 = vst [vmem:[#allocation124_spill] sm:$0xff] %v12875_v62  ;;  %15368 = vst [vmem:[#allocation221_spill] sm:$0xff] %v12877_v23  ;;  %v4806_v3 = vadd.f32 %v11933_v12, %v4786_v32  ;;  %v6701_v12 = vmul.f32 %v12693_v17, %v12501_v48 }
 0x899   : > { %6468 = vrot.lane.b32.xlu1 %v6465_v18, %s15094_s27  ;;  %7451 = vrot.lane.b32.xlu0 %v7448_v51, %s8975_s5  ;;  %v12913_v18 = vld [vmem:[#allocation3 + $0x10] sm:$0x3f]  ;;  %v6549_v51 = vsel %vm4613_vm10, %v15379_v16, %v6548_v43  ;;  %v7566_v22 = vsel %vm3650_vm8, %v7564_v63, %v15380_v40  ;;  %v15386_v63 = vrot.slane %v12490_v44, 2 }
 0x89a   : > { %v12917_v0 = vmul.f32 %v12913_v18, %v12907_v19  ;;  %v4826_v43 = vadd.f32 %v12421_v4, %v4806_v3  ;;  %v12960_v48 = vmul.f32 %v12913_v18, %v12951_v24  ;;  %v6743_v4 = vmul.f32 %v12693_v17, %v12520_v29 }
 0x89b   : > { %v12891_v15 = vpop.permute.xlu1 %6050  ;;  %v12893_v37 = vpop.permute.xlu0 %6138  ;;  %v15389_v3 = vrot.slane %v12509_v39, 3 }
 0x89c   : > { %15372 = vst [vmem:[#allocation125_spill] sm:$0xff] %v12891_v15  ;;  %15373 = vst [vmem:[#allocation222_spill] sm:$0xff] %v12893_v37  ;;  %v14961_v49 = vrot.slane %v12917_v0, 1  ;;  %v4846_v40 = vadd.f32 %v11946_v28, %v4826_v43  ;;  %v6785_v28 = vmul.f32 %v12693_v17, %v12539_v2 }
 0x89d   : > { %6510 = vrot.lane.b32.xlu1 %v6507_v59, %s8973_s0  ;;  %7493 = vrot.lane.b32.xlu0 %v7490_v46, %s8976_s9  ;;  %v12939_v59 = vmul.f32 %v12913_v18, %v12930_v50  ;;  %v6632_v46 = vrot.slane %v6625_v41, 2  ;;  %v14958_v41 = vrot.slane %v12960_v48, 2 }
 0x89f   : > { %v12909_v20 = vpop.permute.xlu1 %4543  ;;  %v12911_v6 = vpop.permute.xlu0 %6180  ;;  %v14959_v32 = vrot.slane %v12939_v59, 1  ;;  %v6633_v16 = vsel %vm4613_vm10, %v15386_v63, %v6632_v46  ;;  %v4866_v46 = vadd.f32 %v12440_v27, %v4846_v40  ;;  %v15393_v40 = vld [vmem:[#allocation138_spill] sm:$0xff] }
 0x8a0   : > { %15377 = vst [vmem:[#allocation102_spill] sm:$0xff] %v12909_v20  ;;  %15378 = vst [vmem:[#allocation223_spill] sm:$0xff] %v12911_v6  ;;  %v13056_v20 = vstv %s8434_s14  ;;  %s13689_s14 = sld [smem:[#allocation11 + $0x22]] }
 0x8a1   : > { %6552 = vrot.lane.b32.xlu1 %v6549_v51, %s8974_s1  ;;  %7569 = vrot.lane.b32.xlu0 %v7566_v22, %s15092_s4  ;;  %v6708_v51 = vrot.slane %v6701_v12, 3  ;;  %v12972_v22 = vstv %s8414_s15  ;;  %v12993_v12 = vstv %s8428_s25  ;;  %s13622_s15 = sld [smem:[#allocation11 + $0x1a]]  ;;  %s13631_s25 = sld [smem:[#allocation11 + $0x59]] }
 0x8a2   : > { %v12981_v29 = vmul.f32 %v12913_v18, %v12972_v22  ;;  %v13002_v2 = vmul.f32 %v12913_v18, %v12993_v12 }
 0x8a3   : > { %v12932_v60 = vpop.permute.xlu1 %4593  ;;  %v12934_v25 = vpop.permute.xlu0 %6222  ;;  %v6709_v13 = vsel %vm5412_vm11, %v15389_v3, %v6708_v51  ;;  %v15392_v3 = vld [vmem:[#allocation197_spill] sm:$0xff] }
 0x8a4   : > { %15381 = vst [vmem:[#allocation224_spill] sm:$0xff] %v12932_v60  ;;  %15382 = vst [vmem:[#allocation225_spill] sm:$0xff] %v12934_v25  ;;  %v14960_v63 = vrot.slane %v12981_v29, 2  ;;  %v6827_v27 = vmul.f32 %v12693_v17, %v15392_v3 }
 0x8a5   : > { %6594 = vrot.lane.b32.xlu1 %v6591_v7, %s8975_s5  ;;  %4522 = vrot.lane.b32.xlu0 %v14961_v49, %s15092_s4  ;;  %v6750_v7 = vrot.slane %v6743_v4, 3  ;;  %v6792_v4 = vrot.slane %v6785_v28, 3 }
 0x8a7   : > { %v12953_v9 = vpop.permute.xlu1 %4682  ;;  %v12955_v53 = vpop.permute.xlu0 %6264 }
 0x8a8   : > { %15384 = vst [vmem:[#allocation226_spill] sm:$0xff] %v12953_v9  ;;  %15385 = vst [vmem:[#allocation227_spill] sm:$0xff] %v12955_v53  ;;  %v15411_v53 = vld [vmem:[#allocation152_spill] sm:$0xff] }
 0x8a9   : > { %6636 = vrot.lane.b32.xlu1 %v6633_v16, %s8976_s9  ;;  %4572 = vrot.lane.b32.xlu0 %v14959_v32, %s15094_s27  ;;  %v15391_v16 = vrot.slane %v12528_v34, 3 }
 0x8ab   : > { %v12974_v5 = vpop.permute.xlu1 %4732  ;;  %v12976_v44 = vpop.permute.xlu0 %6306  ;;  %v6751_v51 = vsel %vm5412_vm11, %v15391_v16, %v6750_v7  ;;  %v14962_v7 = vrot.slane %v13002_v2, 1  ;;  %v15395_v16 = vld [vmem:[#allocation195_spill] sm:$0xff] }
 0x8ac   : > { %15387 = vst [vmem:[#allocation228_spill] sm:$0xff] %v12974_v5  ;;  %15388 = vst [vmem:[#allocation229_spill] sm:$0xff] %v12976_v44  ;;  %v13035_v5 = vstv %s8432_s6  ;;  %s13672_s6 = sld [smem:[#allocation11 + $0x20]] }
 0x8ad   : > { %6712 = vrot.lane.b32.xlu1 %v6709_v13, %s15092_s4  ;;  %4661 = vrot.lane.b32.xlu0 %v14958_v41, %s15092_s4  ;;  %v4886_v13 = vadd.f32 %v15393_v40, %v4866_v46  ;;  %v13014_v41 = vstv %s8430_s26  ;;  %v6869_v46 = vmul.f32 %v12693_v17, %v12579_v38  ;;  %v15397_v40 = vld [vmem:[#allocation104_spill] sm:$0xff]  ;;  %v13044_v38 = vmul.f32 %v12913_v18, %v13035_v5  ;;  %s13651_s26 = sld [smem:[#allocation11 + $0x1e]] }
 0x8ae   : > { %v13023_v28 = vmul.f32 %v12913_v18, %v13014_v41 }
 0x8af   : > { %v12995_v43 = vpop.permute.xlu1 %5004  ;;  %v12997_v39 = vpop.permute.xlu0 %6348  ;;  %v4906_v49 = vadd.f32 %v15397_v40, %v4886_v13  ;;  %v15401_v40 = vld [vmem:[#allocation140_spill] sm:$0xff] }
 0x8b0   : > { %15390 = vst [vmem:[#allocation230_spill] sm:$0xff] %v12997_v39  ;;  %v15410_v39 = vld [vmem:[#allocation206_spill] sm:$0xff] }
 0x8b1   : > { %6754 = vrot.lane.b32.xlu1 %v6751_v51, %s15094_s27  ;;  %4711 = vrot.lane.b32.xlu0 %v14960_v63, %s15094_s27  ;;  %v15396_v51 = vrot.slane %v15395_v16, 3  ;;  %v6834_v63 = vrot.slane %v6827_v27, 3  ;;  %v15399_v27 = vrot.slane %v12566_v26, 3  ;;  %v4926_v60 = vadd.f32 %v15401_v40, %v4906_v49 }
 0x8b2   : > { %v6987_v49 = vmul.f32 %v12693_v17, %v15405_v31  ;;  %v13076_v40 = vstv %s8438_s7  ;;  %v7029_v44 = vmul.f32 %v12693_v17, %v15410_v39  ;;  %s13694_s7 = sld [smem:[#allocation11]] }
 0x8b3   : > { %v13016_v32 = vpop.permute.xlu1 %5054  ;;  %v13018_v34 = vpop.permute.xlu0 %6424  ;;  %v6793_v3 = vsel %vm5412_vm11, %v15396_v51, %v6792_v4  ;;  %v14963_v4 = vrot.slane %v13023_v28, 1  ;;  %v6835_v51 = vsel %vm5412_vm11, %v15399_v27, %v6834_v63  ;;  %v14964_v63 = vrot.slane %v13044_v38, 1 }
 0x8b4   : > { %15394 = vst [vmem:[#allocation197_spill] sm:$0xff] %v13018_v34  ;;  %v13086_v31 = vmul.f32 %v12913_v18, %v13076_v40 }
 0x8b5   : > { %6796 = vrot.lane.b32.xlu1 %v6793_v3, %s8973_s0  ;;  %4983 = vrot.lane.b32.xlu0 %v14962_v7, %s15092_s4  ;;  %v6876_v3 = vrot.slane %v6869_v46, 3  ;;  %v15400_v7 = vld [vmem:[#allocation200_spill] sm:$0xff]  ;;  %v15403_v46 = vld [vmem:[#allocation198_spill] sm:$0xff] }
 0x8b6   : > { %v6911_v13 = vmul.f32 %v12693_v17, %v15400_v7  ;;  %v13065_v7 = vmul.f32 %v12913_v18, %v13056_v20  ;;  %v15404_v27 = vrot.slane %v15403_v46, 3 }
 0x8b7   : > { %v13037_v9 = vpop.permute.xlu1 %5104  ;;  %v13039_v16 = vpop.permute.xlu0 %6466 }
 0x8b8   : > { %15398 = vst [vmem:[#allocation138_spill] sm:$0xff] %v13039_v16 }
 0x8b9   : > { %6838 = vrot.lane.b32.xlu1 %v6835_v51, %s8974_s1  ;;  %5033 = vrot.lane.b32.xlu0 %v14963_v4, %s15094_s27  ;;  %v6877_v51 = vsel %vm5412_vm11, %v15404_v27, %v6876_v3  ;;  %v6918_v4 = vrot.slane %v6911_v13, 3  ;;  %v14965_v3 = vrot.slane %v13065_v7, 1  ;;  %v15408_v13 = vld [vmem:[#allocation201_spill] sm:$0xff] }
 0x8ba   : > { %v15409_v27 = vrot.slane %v15408_v13, 3 }
 0x8bb   : > { %v13058_v23 = vpop.permute.xlu1 %5154  ;;  %v13060_v26 = vpop.permute.xlu0 %6508 }
 0x8bc   : > { %15402 = vst [vmem:[#allocation195_spill] sm:$0xff] %v13060_v26  ;;  %v15406_v26 = vld [vmem:[#allocation151_spill] sm:$0xff] }
 0x8bd   : > { %6880 = vrot.lane.b32.xlu1 %v6877_v51, %s8975_s5  ;;  %5083 = vrot.lane.b32.xlu0 %v14964_v63, %s8973_s0  ;;  %v4945_v16 = vadd.f32 %v15406_v26, %v4926_v60  ;;  %v6919_v51 = vsel %vm5412_vm11, %v15409_v27, %v6918_v4  ;;  %v6994_v63 = vrot.slane %v6987_v49, 4  ;;  %v13100_v26 = vstv %s8440_s12  ;;  %s13698_s12 = sld [smem:[#allocation11 + $0xe]] }
 0x8be   : > { %v14966_v4 = vrot.slane %v13086_v31, 2  ;;  %v13109_v39 = vmul.f32 %v12913_v18, %v13100_v26  ;;  %v7036_v27 = vrot.slane %v7029_v44, 4 }
 0x8bf   : > { %v13079_v34 = vpop.permute.xlu1 %5242  ;;  %v13081_v46 = vpop.permute.xlu0 %6550  ;;  %v13094_v60 = vadd.f32 %v15411_v53, %v4945_v16  ;;  %v15414_v53 = vld [vmem:[#allocation204_spill] sm:$0xff] }
 0x8c0   : > { %15407 = vst [vmem:[#allocation104_spill] sm:$0xff] %v13081_v46  ;;  %v15415_v16 = vrot.slane %v15414_v53, 4  ;;  %v14967_v53 = vrot.slane %v13109_v39, 2 }
 0x8c1   : > { %6922 = vrot.lane.b32.xlu1 %v6919_v51, %s8976_s9  ;;  %5133 = vrot.lane.b32.xlu0 %v14965_v3, %s8974_s1  ;;  %v15416_v51 = vld [vmem:[#allocation210_spill] sm:$0xff] }
 0x8c2   : > { %v6995_v49 = vsel %vm5651_vm12, %v15415_v16, %v6994_v63  ;;  %v7071_v3 = vmul.f32 %v12693_v17, %v15416_v51  ;;  %v15419_v63 = vrot.slane %v12648_v52, 4  ;;  %v7113_v51 = vmul.f32 %v12693_v17, %v12686_v61 }
 0x8c3   : > { %v13102_v46 = vpop.permute.xlu1 %5292  ;;  %v13104_v13 = vpop.permute.xlu0 %6592  ;;  %v15422_v61 = vrot.slane %v12677_v30, 4 }
 0x8c4   : > { %15412 = vst [vmem:[#allocation200_spill] sm:$0xff] %v13102_v46  ;;  %15413 = vst [vmem:[#allocation140_spill] sm:$0xff] %v13104_v13  ;;  %v13120_v13 = vstv %s8442_s23  ;;  %v7037_v16 = vsel %vm5651_vm12, %v15419_v63, %v7036_v27  ;;  %v7120_v63 = vrot.slane %v7113_v51, 4  ;;  %v4653_v46 = vrot.slane %v4647_v57, 2  ;;  %s13712_s23 = sld [smem:[#allocation11 + $0x24]] }
 0x8c5   : > { %6998 = vrot.lane.b32.xlu1 %v6995_v49, %s15092_s4  ;;  %5221 = vrot.lane.b32.xlu0 %v14966_v4, %s15092_s4  ;;  %v13129_v44 = vmul.f32 %v12913_v18, %v13120_v13  ;;  %v7078_v49 = vrot.slane %v7071_v3, 4  ;;  %v13140_v4 = vstv %s8444_s21  ;;  %s13719_s21 = sld [smem:[#allocation11 + $0x1]] }
 0x8c6   : > { %v13149_v3 = vmul.f32 %v12913_v18, %v13140_v4 }
 0x8c7   : > { %v13122_v25 = vpop.permute.xlu1 %5342  ;;  %v13124_v6 = vpop.permute.xlu0 %6634  ;;  %v14968_v52 = vrot.slane %v13129_v44, 2  ;;  %v7079_v27 = vsel %vm5651_vm12, %v15422_v61, %v7078_v49 }
 0x8c8   : > { %15417 = vst [vmem:[#allocation198_spill] sm:$0xff] %v13122_v25  ;;  %15418 = vst [vmem:[#allocation203_spill] sm:$0xff] %v13124_v6  ;;  %v14969_v30 = vrot.slane %v13149_v3, 2 }
 0x8c9   : > { %7040 = vrot.lane.b32.xlu1 %v7037_v16, %s15094_s27  ;;  %5271 = vrot.lane.b32.xlu0 %v14967_v53, %s15094_s27  ;;  %v7155_v16 = vmul.f32 %v12693_v17, %v12720_v36  ;;  %v13160_v53 = vstv %s8448_s13  ;;  %v15425_v36 = vrot.slane %v12699_v33, 4  ;;  %s13730_s13 = sld [smem:[#allocation11 + $0x26]] }
 0x8ca   : > { %v13169_v49 = vmul.f32 %v12913_v18, %v13160_v53 }
 0x8cb   : > { %v13142_v6 = vpop.permute.xlu1 %5392  ;;  %v13144_v37 = vpop.permute.xlu0 %6710  ;;  %v7121_v51 = vsel %vm5651_vm12, %v15425_v36, %v7120_v63  ;;  %v7162_v61 = vrot.slane %v7155_v16, 4 }
 0x8cc   : > { %15420 = vst [vmem:[#allocation151_spill] sm:$0xff] %v13142_v6  ;;  %15421 = vst [vmem:[#allocation201_spill] sm:$0xff] %v13144_v37  ;;  %v14970_v33 = vrot.slane %v13169_v49, 3  ;;  %v4558_v6 = vmul.f32 %v13299_v10, %v12930_v50 }
 0x8cd   : > { %7082 = vrot.lane.b32.xlu1 %v7079_v27, %s8973_s0  ;;  %5321 = vrot.lane.b32.xlu0 %v14968_v52, %s8973_s0  ;;  %v7197_v27 = vmul.f32 %v12693_v17, %v12751_v8  ;;  %v13180_v52 = vstv %s8450_s16  ;;  %v15428_v8 = vrot.slane %v12729_v11, 4  ;;  %s13751_s16 = sld [smem:[#allocation11 + $0x28]] }
 0x8ce   : > { %v13189_v63 = vmul.f32 %v12913_v18, %v13180_v52  ;;  %v4564_v25 = vrot.slane %v4558_v6, 1 }
 0x8cf   : > { %v13162_v37 = vpop.permute.xlu1 %5481  ;;  %v13164_v56 = vpop.permute.xlu0 %6752  ;;  %v7163_v16 = vsel %vm5651_vm12, %v15428_v8, %v7162_v61  ;;  %v7204_v36 = vrot.slane %v7197_v27, 4 }
 0x8d0   : > { %15423 = vst [vmem:[#allocation206_spill] sm:$0xff] %v13162_v37  ;;  %15424 = vst [vmem:[#allocation152_spill] sm:$0xff] %v13164_v56  ;;  %v14971_v11 = vrot.slane %v13189_v63, 3 }
 0x8d1   : > { %7124 = vrot.lane.b32.xlu1 %v7121_v51, %s8974_s1  ;;  %5371 = vrot.lane.b32.xlu0 %v14969_v30, %s8974_s1  ;;  %v7274_v51 = vmul.f32 %v12693_v17, %v12764_v42  ;;  %v13200_v30 = vstv %s8452_s8  ;;  %v15431_v42 = vrot.slane %v12758_v55, 4  ;;  %s13758_s8 = sld [smem:[#allocation11 + $0xf]] }
 0x8d2   : > { %v13209_v61 = vmul.f32 %v12913_v18, %v13200_v30 }
 0x8d3   : > { %v13182_v56 = vpop.permute.xlu1 %5531  ;;  %v13184_v58 = vpop.permute.xlu0 %6794  ;;  %v7205_v27 = vsel %vm5651_vm12, %v15431_v42, %v7204_v36  ;;  %v7281_v8 = vrot.slane %v7274_v51, 5  ;;  %v13238_v42 = vstv %s8458_s3  ;;  %s13785_s3 = sld [smem:[#allocation11 + $0x2c]] }
 0x8d4   : > { %15426 = vst [vmem:[#allocation204_spill] sm:$0xff] %v13182_v56  ;;  %15427 = vst [vmem:[#allocation210_spill] sm:$0xff] %v13184_v58  ;;  %v14972_v55 = vrot.slane %v13209_v61, 3  ;;  %v15446_v56 = vld [vmem:[#allocation128_spill] sm:$0xff] }
 0x8d5   : > { %7166 = vrot.lane.b32.xlu1 %v7163_v16, %s8975_s5  ;;  %5460 = vrot.lane.b32.xlu0 %v14970_v33, %s15092_s4  ;;  %v7316_v16 = vmul.f32 %v12693_v17, %v12792_v1  ;;  %v13220_v33 = vstv %s8454_s2  ;;  %v15434_v17 = vrot.slane %v12774_v54, 5  ;;  %v13247_v54 = vmul.f32 %v12913_v18, %v13238_v42  ;;  %s13773_s2 = sld [smem:[#allocation11 + $0x5b]] }
 0x8d6   : > { %v13229_v36 = vmul.f32 %v12913_v18, %v13220_v33 }
 0x8d7   : > { %v13202_v58 = vpop.permute.xlu1 %5581  ;;  %v13204_v15 = vpop.permute.xlu0 %6836  ;;  %v7282_v1 = vsel %vm7222_vm13, %v15434_v17, %v7281_v8  ;;  %v7323_v51 = vrot.slane %v7316_v16, 5  ;;  %v15437_v8 = vrot.slane %v12804_v21, 5  ;;  %v13256_v17 = vstv %s8460_s10  ;;  %s13815_s10 = sld [smem:[#allocation11 + $0x2e]] }
 0x8d8   : > { %15429 = vst [vmem:[#allocation231_spill] sm:$0xff] %v13202_v58  ;;  %15430 = vst [vmem:[#allocation232_spill] sm:$0xff] %v13204_v15  ;;  %v13265_v21 = vmul.f32 %v12913_v18, %v13256_v17 }
 0x8d9   : > { %7208 = vrot.lane.b32.xlu1 %v7205_v27, %s8976_s9  ;;  %5510 = vrot.lane.b32.xlu0 %v14971_v11, %s15094_s27  ;;  %v7324_v16 = vsel %vm7222_vm13, %v15437_v8, %v7323_v51  ;;  %v15440_v51 = vld [vmem:[#allocation126_spill] sm:$0xff]  ;;  %v13272_v8 = vstv %s8462_s11  ;;  %s13838_s11 = sld [smem:[#allocation11 + $0x30]] }
 0x8db   : > { %v13222_v15 = vpop.permute.xlu1 %5631  ;;  %v13224_v58 = vpop.permute.xlu0 %6878 }
 0x8dc   : > { %15432 = vst [vmem:[#allocation233_spill] sm:$0xff] %v13222_v15  ;;  %15433 = vst [vmem:[#allocation234_spill] sm:$0xff] %v13224_v58  ;;  %v14973_v58 = vrot.slane %v13229_v36, 3 }
 0x8dd   : > { %7285 = vrot.lane.b32.xlu1 %v7282_v1, %s15092_s4  ;;  %5560 = vrot.lane.b32.xlu0 %v14972_v55, %s8973_s0 }
 0x8df   : > { %v13240_v27 = vpop.permute.xlu1 %5720  ;;  %v13242_v11 = vpop.permute.xlu0 %6920 }
 0x8e0   : > { %15435 = vst [vmem:[#allocation235_spill] sm:$0xff] %v13240_v27  ;;  %15436 = vst [vmem:[#allocation236_spill] sm:$0xff] %v13242_v11  ;;  %v14974_v11 = vrot.slane %v13247_v54, 4  ;;  %v15443_v27 = vld [vmem:[#allocation127_spill] sm:$0xff] }
 0x8e1   : > { %7327 = vrot.lane.b32.xlu1 %v7324_v16, %s15094_s27  ;;  %5610 = vrot.lane.b32.xlu0 %v14973_v58, %s8974_s1 }
 0x8e3   : > { %v13258_v1 = vpop.permute.xlu1 %5770  ;;  %v13260_v55 = vpop.permute.xlu0 %6996 }
 0x8e4   : > { %15438 = vst [vmem:[#allocation237_spill] sm:$0xff] %v13258_v1  ;;  %15439 = vst [vmem:[#allocation238_spill] sm:$0xff] %v13260_v55  ;;  %v14975_v55 = vrot.slane %v13265_v21, 4  ;;  %v13281_v1 = vmul.f32 %v12913_v18, %v13272_v8 }
 0x8e5   : > { %7369 = vrot.lane.b32.xlu1 %v15440_v51, %s8973_s0  ;;  %5699 = vrot.lane.b32.xlu0 %v14974_v11, %s15092_s4  ;;  %v13288_v51 = vstv %s8464_s17  ;;  %s13861_s17 = sld [smem:[#allocation11 + $0x32]] }
 0x8e6   : > { %v13297_v15 = vmul.f32 %v12913_v18, %v13288_v51 }
 0x8e7   : > { %v13274_v16 = vpop.permute.xlu1 %5820  ;;  %v13276_v58 = vpop.permute.xlu0 %7038 }
 0x8e8   : > { %15441 = vst [vmem:[#allocation126_spill] sm:$0xff] %v13274_v16  ;;  %15442 = vst [vmem:[#allocation239_spill] sm:$0xff] %v13276_v58  ;;  %v14976_v58 = vrot.slane %v13281_v1, 4  ;;  %v14977_v37 = vrot.slane %v13297_v15, 4 }
 0x8e9   : > { %7411 = vrot.lane.b32.xlu1 %v15443_v27, %s8974_s1  ;;  %5749 = vrot.lane.b32.xlu0 %v14975_v55, %s15094_s27  ;;  %v4508_v27 = vmul.f32 %v13299_v10, %v12907_v19  ;;  %v13308_v55 = vld [vmem:[#allocation3] sm:$0xff] }
 0x8eb   : > { %v13290_v11 = vpop.permute.xlu1 %5870  ;;  %v13292_v16 = vpop.permute.xlu0 %7080  ;;  %v4514_v14 = vrot.slane %v4508_v27, 1 }
 0x8ec   : > { %15444 = vst [vmem:[#allocation127_spill] sm:$0xff] %v13290_v11  ;;  %15445 = vst [vmem:[#allocation240_spill] sm:$0xff] %v13292_v16  ;;  %v4507_v16 = vmul.f32 %v13308_v55, %v12907_v19  ;;  %v4557_v19 = vmul.f32 %v13308_v55, %v12930_v50 }
 0x8ed   : > { %7453 = vrot.lane.b32.xlu1 %v15446_v56, %s8975_s5  ;;  %5799 = vrot.lane.b32.xlu0 %v14976_v58, %s8973_s0  ;;  %v15449_v56 = vld [vmem:[#allocation129_spill] sm:$0xff] }
 0x8ee   : > { %v4513_v58 = vrot.slane %v4507_v16, 1  ;;  %v4646_v16 = vmul.f32 %v13308_v55, %v12951_v24  ;;  %v4696_v24 = vmul.f32 %v13308_v55, %v12972_v22 }
 0x8ef   : > { %v13312_v11 = vpop.permute.xlu1 %6140  ;;  %v13314_v62 = vpop.permute.xlu0 %7122 }
 0x8f0   : > { %15447 = vst [vmem:[#allocation128_spill] sm:$0xff] %v13312_v11  ;;  %15448 = vst [vmem:[#allocation241_spill] sm:$0xff] %v13314_v62  ;;  %v4515_v27 = vsel %vm4474_vm7, %v4513_v58, %v4514_v14 }
 0x8f1   : > { %7495 = vrot.lane.b32.xlu1 %v15449_v56, %s8976_s9  ;;  %5849 = vrot.lane.b32.xlu0 %v14977_v37, %s8974_s1  ;;  %v15452_v56 = vld [vmem:[#allocation130_spill] sm:$0xff]  ;;  %v4563_v37 = vrot.slane %v4557_v19, 1  ;;  %v4652_v19 = vrot.slane %v4646_v16, 2  ;;  %v4702_v16 = vrot.slane %v4696_v24, 2 }
 0x8f3   : > { %v13326_v11 = vpop.permute.xlu1 %6182  ;;  %v13328_v62 = vpop.permute.xlu0 %7164  ;;  %v4565_v6 = vsel %vm4474_vm7, %v4563_v37, %v4564_v25  ;;  %v4654_v57 = vsel %vm4613_vm10, %v4652_v19, %v4653_v46 }
 0x8f4   : > { %15450 = vst [vmem:[#allocation129_spill] sm:$0xff] %v13326_v11  ;;  %15451 = vst [vmem:[#allocation242_spill] sm:$0xff] %v13328_v62  ;;  %v15454_v62 = vrot.slane %v12917_v0, 1  ;;  %v4969_v0 = vmul.f32 %v13299_v10, %v12993_v12 }
 0x8f5   : > { %7571 = vrot.lane.b32.xlu1 %v15452_v56, %s15092_s4  ;;  %4518 = vrot.lane.b32.xlu0 %v4515_v27, %s15092_s4  ;;  %v4697_v56 = vmul.f32 %v13299_v10, %v12972_v22  ;;  %v4968_v22 = vmul.f32 %v13308_v55, %v12993_v12  ;;  %v5018_v12 = vmul.f32 %v13308_v55, %v13014_v41 }
 0x8f6   : > { %v4517_v58 = vsel %vm4474_vm7, %v4514_v14, %v15454_v62  ;;  %v15456_v14 = vrot.slane %v12939_v59, 1  ;;  %v4975_v19 = vrot.slane %v4969_v0, 1 }
 0x8f7   : > { %v13338_v50 = vpop.permute.xlu1 %6224  ;;  %v13340_v11 = vpop.permute.xlu0 %7206  ;;  %v4703_v37 = vrot.slane %v4697_v56, 2  ;;  %v4974_v24 = vrot.slane %v4968_v22, 1  ;;  %v5024_v22 = vrot.slane %v5018_v12, 1 }
 0x8f8   : > { %15453 = vst [vmem:[#allocation130_spill] sm:$0xff] %v13340_v11  ;;  %v4567_v62 = vsel %vm4474_vm7, %v4564_v25, %v15456_v14  ;;  %v15458_v25 = vrot.slane %v12960_v48, 2  ;;  %v5019_v14 = vmul.f32 %v13299_v10, %v13014_v41  ;;  %v15460_v48 = vrot.slane %v12981_v29, 2 }
 0x8f9   : > { %4520 = vrot.lane.b32.xlu1 %v4517_v58, %s15092_s4  ;;  %4568 = vrot.lane.b32.xlu0 %v4565_v6, %s15094_s27  ;;  %v4704_v56 = vsel %vm4613_vm10, %v4702_v16, %v4703_v37  ;;  %v4976_v0 = vsel %vm4474_vm7, %v4974_v24, %v4975_v19  ;;  %v5068_v41 = vmul.f32 %v13308_v55, %v13035_v5  ;;  %v15462_v29 = vrot.slane %v13002_v2, 1 }
 0x8fa   : > { %v4656_v59 = vsel %vm4613_vm10, %v4653_v46, %v15458_v25  ;;  %v4706_v46 = vsel %vm4613_vm10, %v4703_v37, %v15460_v48  ;;  %v5025_v16 = vrot.slane %v5019_v14, 1  ;;  %v5069_v25 = vmul.f32 %v13299_v10, %v13035_v5 }
 0x8fb   : > { %v13352_v27 = vpop.permute.xlu1 %6266  ;;  %v13354_v11 = vpop.permute.xlu0 %7283  ;;  %v4978_v37 = vsel %vm4474_vm7, %v4975_v19, %v15462_v29  ;;  %v5119_v48 = vmul.f32 %v13299_v10, %v13056_v20  ;;  %v5074_v12 = vrot.slane %v5068_v41, 1  ;;  %v5118_v5 = vmul.f32 %v13308_v55, %v13056_v20 }
 0x8fc   : > { %15455 = vst [vmem:[#allocation243_spill] sm:$0xff] %v13354_v11  ;;  %v5026_v14 = vsel %vm4474_vm7, %v5024_v22, %v5025_v16  ;;  %v5075_v24 = vrot.slane %v5069_v25, 1  ;;  %v15464_v2 = vrot.slane %v13023_v28, 1  ;;  %v5207_v29 = vmul.f32 %v13299_v10, %v13076_v40 }
 0x8fd   : > { %4570 = vrot.lane.b32.xlu1 %v4567_v62, %s15094_s27  ;;  %4657 = vrot.lane.b32.xlu0 %v4654_v57, %s15092_s4  ;;  %v5125_v22 = vrot.slane %v5119_v48, 1  ;;  %v5124_v41 = vrot.slane %v5118_v5, 1  ;;  %v5206_v20 = vmul.f32 %v13308_v55, %v13076_v40  ;;  %v15466_v28 = vrot.slane %v13044_v38, 1 }
 0x8fe   : > { %v5028_v19 = vsel %vm4474_vm7, %v5025_v16, %v15464_v2  ;;  %v5076_v25 = vsel %vm4474_vm7, %v5074_v12, %v5075_v24  ;;  %v5213_v12 = vrot.slane %v5207_v29, 2  ;;  %v5257_v2 = vmul.f32 %v13299_v10, %v13100_v26 }
 0x8ff   : > { %v13366_v58 = vpop.permute.xlu1 %6308  ;;  %v13368_v6 = vpop.permute.xlu0 %7325  ;;  %v5078_v16 = vsel %vm4474_vm7, %v5075_v24, %v15466_v28  ;;  %v5126_v48 = vsel %vm4474_vm7, %v5124_v41, %v5125_v22  ;;  %v5212_v5 = vrot.slane %v5206_v20, 2  ;;  %v5256_v40 = vmul.f32 %v13308_v55, %v13100_v26 }
 0x900   : > { %15457 = vst [vmem:[#allocation244_spill] sm:$0xff] %v13368_v6  ;;  %v15468_v38 = vrot.slane %v13065_v7, 1  ;;  %v5263_v41 = vrot.slane %v5257_v2, 2  ;;  %v5307_v28 = vmul.f32 %v13299_v10, %v13120_v13  ;;  %v5306_v26 = vmul.f32 %v13308_v55, %v13120_v13 }
 0x901   : > { %4659 = vrot.lane.b32.xlu1 %v4656_v59, %s15092_s4  ;;  %4707 = vrot.lane.b32.xlu0 %v4704_v56, %s15094_s27  ;;  %v5214_v29 = vsel %vm4613_vm10, %v5212_v5, %v5213_v12  ;;  %v5262_v20 = vrot.slane %v5256_v40, 2  ;;  %v15470_v7 = vrot.slane %v13086_v31, 2  ;;  %v5356_v13 = vmul.f32 %v13308_v55, %v13140_v4 }
 0x902   : > { %v5128_v24 = vsel %vm4474_vm7, %v5125_v22, %v15468_v38  ;;  %v5313_v5 = vrot.slane %v5307_v28, 2  ;;  %v5357_v38 = vmul.f32 %v13299_v10, %v13140_v4  ;;  %v5312_v40 = vrot.slane %v5306_v26, 2 }
 0x903   : > { %v13380_v62 = vpop.permute.xlu1 %6350  ;;  %v13382_v57 = vpop.permute.xlu0 %7367  ;;  %v5216_v22 = vsel %vm4613_vm10, %v5213_v12, %v15470_v7  ;;  %v5264_v2 = vsel %vm4613_vm10, %v5262_v20, %v5263_v41  ;;  %v15472_v31 = vrot.slane %v13109_v39, 2  ;;  %v5446_v7 = vmul.f32 %v13299_v10, %v13160_v53 }
 0x904   : > { %15459 = vst [vmem:[#allocation245_spill] sm:$0xff] %v13382_v57  ;;  %v5314_v28 = vsel %vm4613_vm10, %v5312_v40, %v5313_v5  ;;  %v5363_v20 = vrot.slane %v5357_v38, 2  ;;  %v5362_v26 = vrot.slane %v5356_v13, 2  ;;  %v5445_v4 = vmul.f32 %v13308_v55, %v13160_v53 }
 0x905   : > { %4709 = vrot.lane.b32.xlu1 %v4706_v46, %s15094_s27  ;;  %4979 = vrot.lane.b32.xlu0 %v4976_v0, %s15092_s4  ;;  %v5266_v12 = vsel %vm4613_vm10, %v5263_v41, %v15472_v31  ;;  %v15474_v39 = vrot.slane %v13129_v44, 2  ;;  %v5452_v40 = vrot.slane %v5446_v7, 3  ;;  %v5496_v31 = vmul.f32 %v13299_v10, %v13180_v52 }
 0x906   : > { %v5364_v38 = vsel %vm4613_vm10, %v5362_v26, %v5363_v20  ;;  %v5451_v13 = vrot.slane %v5445_v4, 3  ;;  %v5495_v53 = vmul.f32 %v13308_v55, %v13180_v52  ;;  %v15476_v44 = vrot.slane %v13149_v3, 2 }
 0x907   : > { %v13394_v59 = vpop.permute.xlu1 %6426  ;;  %v13396_v56 = vpop.permute.xlu0 %7409  ;;  %v5316_v41 = vsel %vm4613_vm10, %v5313_v5, %v15474_v39  ;;  %v5502_v26 = vrot.slane %v5496_v31, 3  ;;  %v5546_v39 = vmul.f32 %v13299_v10, %v13200_v30  ;;  %v5545_v52 = vmul.f32 %v13308_v55, %v13200_v30  ;;  %v15478_v30 = vld [vmem:[#allocation105_spill] sm:$0xff] }
 0x908   : > { %15461 = vst [vmem:[#allocation246_spill] sm:$0xff] %v13396_v56  ;;  %v5366_v5 = vsel %vm4613_vm10, %v5363_v20, %v15476_v44  ;;  %v5453_v7 = vsel %vm5412_vm11, %v5451_v13, %v5452_v40  ;;  %v5501_v4 = vrot.slane %v5495_v53, 3  ;;  %v15477_v3 = vrot.slane %v13169_v49, 3 }
 0x909   : > { %4981 = vrot.lane.b32.xlu1 %v4978_v37, %s15092_s4  ;;  %5029 = vrot.lane.b32.xlu0 %v5026_v14, %s15094_s27  ;;  %v5552_v44 = vrot.slane %v5546_v39, 3  ;;  %v5595_v49 = vmul.f32 %v13308_v55, %v13220_v33  ;;  %v6559_v6 = vstv %s13730_s13  ;;  %s14125_s13 = sld [smem:[#allocation11 + $0x4e]] }
 0x90a   : > { %v5455_v20 = vsel %vm5412_vm11, %v5452_v40, %v15477_v3  ;;  %v5503_v13 = vsel %vm5412_vm11, %v5501_v4, %v5502_v26  ;;  %v15479_v4 = vrot.slane %v13189_v63, 3 }
 0x90b   : > { %v13408_v46 = vpop.permute.xlu1 %6468  ;;  %v13410_v0 = vpop.permute.xlu0 %7451 }
 0x90c   : > { %15463 = vst [vmem:[#allocation247_spill] sm:$0xff] %v13410_v0 }
 0x90d   : > { %5031 = vrot.lane.b32.xlu1 %v5028_v19, %s15094_s27  ;;  %5079 = vrot.lane.b32.xlu0 %v5076_v25, %s8973_s0 }
 0x90f   : > { %v13422_v37 = vpop.permute.xlu1 %6510  ;;  %v13424_v14 = vpop.permute.xlu0 %7493 }
 0x910   : > { %15465 = vst [vmem:[#allocation248_spill] sm:$0xff] %v13424_v14 }
 0x911   : > { %5081 = vrot.lane.b32.xlu1 %v5078_v16, %s8973_s0  ;;  %5129 = vrot.lane.b32.xlu0 %v5126_v48, %s8974_s1 }
 0x913   : > { %v13436_v19 = vpop.permute.xlu1 %6552  ;;  %v13438_v25 = vpop.permute.xlu0 %7569 }
 0x914   : > { %15467 = vst [vmem:[#allocation249_spill] sm:$0xff] %v13438_v25 }
 0x915   : > { %5131 = vrot.lane.b32.xlu1 %v5128_v24, %s8974_s1  ;;  %5217 = vrot.lane.b32.xlu0 %v5214_v29, %s15092_s4 }
 0x917   : > { %v13450_v16 = vpop.permute.xlu1 %6594  ;;  %v13452_v48 = vpop.permute.xlu0 %4522 }
 0x918   : > { %15469 = vst [vmem:[#allocation250_spill] sm:$0xff] %v13452_v48 }
 0x919   : > { %5219 = vrot.lane.b32.xlu1 %v5216_v22, %s15092_s4  ;;  %5267 = vrot.lane.b32.xlu0 %v5264_v2, %s15094_s27 }
 0x91b   : > { %v13464_v24 = vpop.permute.xlu1 %6636  ;;  %v13466_v29 = vpop.permute.xlu0 %4572 }
 0x91c   : > { %15471 = vst [vmem:[#allocation251_spill] sm:$0xff] %v13466_v29  ;;  %v15502_v29 = vld [vmem:[#allocation173_spill] sm:$0xff] }
 0x91d   : > { %5269 = vrot.lane.b32.xlu1 %v5266_v12, %s15094_s27  ;;  %5317 = vrot.lane.b32.xlu0 %v5314_v28, %s8973_s0 }
 0x91f   : > { %v13478_v22 = vpop.permute.xlu1 %6712  ;;  %v13480_v2 = vpop.permute.xlu0 %4661 }
 0x920   : > { %15473 = vst [vmem:[#allocation252_spill] sm:$0xff] %v13480_v2 }
 0x921   : > { %5319 = vrot.lane.b32.xlu1 %v5316_v41, %s8973_s0  ;;  %5367 = vrot.lane.b32.xlu0 %v5364_v38, %s8974_s1 }
 0x923   : > { %v13492_v12 = vpop.permute.xlu1 %6754  ;;  %v13494_v28 = vpop.permute.xlu0 %4711 }
 0x924   : > { %15475 = vst [vmem:[#allocation253_spill] sm:$0xff] %v13494_v28 }
 0x925   : > { %5369 = vrot.lane.b32.xlu1 %v5366_v5, %s8974_s1  ;;  %5456 = vrot.lane.b32.xlu0 %v5453_v7, %s15092_s4  ;;  %v5596_v5 = vmul.f32 %v13299_v10, %v13220_v33  ;;  %v5551_v7 = vrot.slane %v5545_v52, 3  ;;  %v15480_v52 = vld [vmem:[#allocation107_spill] sm:$0xff] }
 0x927   : > { %v13506_v41 = vpop.permute.xlu1 %6796  ;;  %v4984_v38 = vpop.permute.xlu0 %4983  ;;  %v5553_v3 = vsel %vm5412_vm11, %v5551_v7, %v5552_v44 }
 0x928   : > { %v4990_v31 = vadd.f32 %v4984_v38, %v12739_v45  ;;  %v5685_v45 = vmul.f32 %v13299_v10, %v13238_v42  ;;  %v5505_v38 = vsel %vm5412_vm11, %v5502_v26, %v15479_v4  ;;  %v15481_v26 = vrot.slane %v13209_v61, 3 }
 0x929   : > { %5458 = vrot.lane.b32.xlu1 %v5455_v20, %s15092_s4  ;;  %5506 = vrot.lane.b32.xlu0 %v5503_v13, %s15094_s27  ;;  %v5602_v20 = vrot.slane %v5596_v5, 3  ;;  %v5684_v13 = vmul.f32 %v13308_v55, %v13238_v42  ;;  %v5735_v4 = vmul.f32 %v13299_v10, %v13256_v17 }
 0x92a   : > { %v5015_v53 = vadd.f32 %v15478_v30, %v4990_v31  ;;  %v5601_v31 = vrot.slane %v5595_v49, 3  ;;  %v5555_v7 = vsel %vm5412_vm11, %v5552_v44, %v15481_v26  ;;  %v15482_v49 = vld [vmem:[#allocation109_spill] sm:$0xff]  ;;  %v15483_v44 = vrot.slane %v13229_v36, 3 }
 0x92b   : > { %v13520_v28 = vpop.permute.xlu1 %6838  ;;  %v5034_v40 = vpop.permute.xlu0 %5033  ;;  %v5784_v36 = vmul.f32 %v13308_v55, %v13272_v8 }
 0x92c   : > { %v5040_v39 = vadd.f32 %v5034_v40, %v5015_v53  ;;  %v5691_v40 = vrot.slane %v5685_v45, 4  ;;  %v5603_v5 = vsel %vm5412_vm11, %v5601_v31, %v5602_v20  ;;  %v5734_v45 = vmul.f32 %v13308_v55, %v13256_v17  ;;  %v15484_v17 = vld [vmem:[#allocation111_spill] sm:$0xff] }
 0x92d   : > { %5508 = vrot.lane.b32.xlu1 %v5505_v38, %s15094_s27  ;;  %5556 = vrot.lane.b32.xlu0 %v5553_v3, %s8973_s0  ;;  %v5605_v3 = vsel %vm5412_vm11, %v5602_v20, %v15483_v44  ;;  %v5741_v31 = vrot.slane %v5735_v4, 4 }
 0x92e   : > { %v5065_v33 = vadd.f32 %v15480_v52, %v5040_v39  ;;  %v5690_v39 = vrot.slane %v5684_v13, 4 }
 0x92f   : > { %v13533_v30 = vpop.permute.xlu1 %6880  ;;  %v5084_v53 = vpop.permute.xlu0 %5083 }
 0x930   : > { %v5090_v63 = vadd.f32 %v5084_v53, %v5065_v33  ;;  %v5692_v33 = vsel %vm5651_vm12, %v5690_v39, %v5691_v40  ;;  %v5785_v53 = vmul.f32 %v13299_v10, %v13272_v8  ;;  %v15488_v8 = vld [vmem:[#allocation157_spill] sm:$0xff] }
 0x931   : > { %5558 = vrot.lane.b32.xlu1 %v5555_v7, %s8973_s0  ;;  %5606 = vrot.lane.b32.xlu0 %v5603_v5, %s8974_s1  ;;  %v5835_v7 = vmul.f32 %v13299_v10, %v13288_v51  ;;  %v15485_v5 = vld [vmem:[#allocation156_spill] sm:$0xff]  ;;  %v15489_v44 = vrot.slane %v15488_v8, 2  ;;  %v6147_v8 = vstv %s8484_s19  ;;  %s13882_s19 = sld [smem:[#allocation11 + $0x36]] }
 0x932   : > { %v5115_v42 = vadd.f32 %v15482_v49, %v5090_v63  ;;  %v5740_v63 = vrot.slane %v5734_v45, 4  ;;  %v15486_v4 = vrot.slane %v15485_v5, 2  ;;  %v5791_v45 = vrot.slane %v5785_v53, 4 }
 0x933   : > { %v13546_v38 = vpop.permute.xlu1 %6922  ;;  %v5134_v61 = vpop.permute.xlu0 %5133  ;;  %v6105_v5 = vstv %s8482_s18  ;;  %v15490_v53 = vrot.slane %v13265_v21, 4  ;;  %v15492_v21 = vrot.slane %v13281_v1, 4  ;;  %s13875_s18 = sld [smem:[#allocation11 + $0x34]] }
 0x934   : > { %v5140_v52 = vadd.f32 %v5134_v61, %v5115_v42  ;;  %v15487_v42 = vrot.slane %v13247_v54, 4  ;;  %v5742_v61 = vsel %vm5651_vm12, %v5740_v63, %v5741_v31  ;;  %v5841_v54 = vrot.slane %v5835_v7, 4 }
 0x935   : > { %5608 = vrot.lane.b32.xlu1 %v5605_v3, %s8974_s1  ;;  %5695 = vrot.lane.b32.xlu0 %v5692_v33, %s15092_s4  ;;  %v5834_v33 = vmul.f32 %v13308_v55, %v13288_v51  ;;  %v5744_v63 = vsel %vm5651_vm12, %v5741_v31, %v15490_v53  ;;  %v15491_v51 = vld [vmem:[#allocation112_spill] sm:$0xff]  ;;  %v6106_v7 = vmul.f32 %v13308_v55, %v6105_v5 }
 0x936   : > { %v5165_v13 = vadd.f32 %v15484_v17, %v5140_v52  ;;  %v5694_v39 = vsel %vm5651_vm12, %v5691_v40, %v15487_v42  ;;  %v5790_v52 = vrot.slane %v5784_v36, 4  ;;  %v5794_v31 = vsel %vm5651_vm12, %v5791_v45, %v15492_v21 }
 0x937   : > { %v13559_v26 = vpop.permute.xlu1 %6998  ;;  %v5222_v20 = vpop.permute.xlu0 %5221  ;;  %v5840_v42 = vrot.slane %v5834_v33, 4  ;;  %v6149_v33 = vmul.f32 %v13299_v10, %v6147_v8  ;;  %v6112_v53 = vrot.slane %v6106_v7, 1 }
 0x938   : > { %v5184_v49 = vadd.f32 %v15486_v4, %v5165_v13  ;;  %v5792_v4 = vsel %vm5651_vm12, %v5790_v52, %v5791_v45  ;;  %v6148_v45 = vmul.f32 %v13308_v55, %v6147_v8 }
 0x939   : > { %5697 = vrot.lane.b32.xlu1 %v5694_v39, %s15092_s4  ;;  %5745 = vrot.lane.b32.xlu0 %v5742_v61, %s15094_s27  ;;  %v6108_v61 = vmul.f32 %v12913_v18, %v6105_v5  ;;  %v6155_v7 = vrot.slane %v6149_v33, 1 }
 0x93a   : > { %v5203_v3 = vadd.f32 %v15489_v44, %v5184_v49  ;;  %v6107_v49 = vmul.f32 %v13299_v10, %v6105_v5 }
 0x93b   : > { %v13575_v17 = vpop.permute.xlu1 %7040  ;;  %v5272_v13 = vpop.permute.xlu0 %5271 }
 0x93c   : > { %v5228_v40 = vadd.f32 %v5222_v20, %v5203_v3  ;;  %v5842_v3 = vsel %vm5651_vm12, %v5840_v42, %v5841_v54  ;;  %v6113_v52 = vrot.slane %v6107_v49, 1  ;;  %v6115_v49 = vrot.slane %v6108_v61, 1 }
 0x93d   : > { %5747 = vrot.lane.b32.xlu1 %v5744_v63, %s15094_s27  ;;  %5795 = vrot.lane.b32.xlu0 %v5792_v4, %s8973_s0 }
 0x93e   : > { %v5253_v36 = vadd.f32 %v15491_v51, %v5228_v40  ;;  %v15493_v40 = vld [vmem:[#allocation113_spill] sm:$0xff]  ;;  %v6150_v51 = vmul.f32 %v12913_v18, %v6147_v8  ;;  %v6114_v21 = vsel %vm4474_vm7, %v6112_v53, %v6113_v52 }
 0x93f   : > { %v13588_v39 = vpop.permute.xlu1 %7082  ;;  %v5322_v20 = vpop.permute.xlu0 %5321 }
 0x940   : > { %v5278_v44 = vadd.f32 %v5272_v13, %v5253_v36  ;;  %v15495_v13 = vrot.slane %v13297_v15, 4  ;;  %v6189_v36 = vstv %s13577_s20  ;;  %v6154_v15 = vrot.slane %v6148_v45, 1  ;;  %s13919_s20 = sld [smem:[#allocation11 + $0x5d]] }
 0x941   : > { %5797 = vrot.lane.b32.xlu1 %v5794_v31, %s8973_s0  ;;  %5845 = vrot.lane.b32.xlu0 %v5842_v3, %s8974_s1  ;;  %v6191_v31 = vmul.f32 %v13299_v10, %v6189_v36  ;;  %v6192_v33 = vmul.f32 %v12913_v18, %v6189_v36 }
 0x942   : > { %v5303_v1 = vadd.f32 %v15493_v40, %v5278_v44  ;;  %v5844_v4 = vsel %vm5651_vm12, %v5841_v54, %v15495_v13  ;;  %v15496_v44 = vld [vmem:[#allocation114_spill] sm:$0xff]  ;;  %v6190_v54 = vmul.f32 %v13308_v55, %v6189_v36  ;;  %v6157_v40 = vrot.slane %v6150_v51, 1 }
 0x943   : > { %v13604_v5 = vpop.permute.xlu1 %7124  ;;  %v5372_v63 = vpop.permute.xlu0 %5371  ;;  %v6156_v13 = vsel %vm4474_vm7, %v6154_v15, %v6155_v7  ;;  %v15500_v15 = vld [vmem:[#allocation169_spill] sm:$0xff] }
 0x944   : > { %15494 = vst [vmem:[#allocation105_spill] sm:$0xff] %v13604_v5  ;;  %v5328_v42 = vadd.f32 %v5322_v20, %v5303_v1  ;;  %v6116_v20 = vsel %vm4474_vm7, %v6113_v52, %v6115_v49  ;;  %v6231_v1 = vstv %s13594_s22  ;;  %v6273_v49 = vstv %s13602_s30  ;;  %s13926_s22 = sld [smem:[#allocation9 + $0x29]]  ;;  %s13942_s30 = sld [smem:[#allocation11 + $0x3a]] }
 0x945   : > { %5847 = vrot.lane.b32.xlu1 %v5844_v4, %s8974_s1  ;;  %6117 = vrot.lane.b32.xlu0 %v6114_v21, %s15092_s4  ;;  %v6197_v4 = vrot.slane %v6191_v31, 1  ;;  %v6233_v45 = vmul.f32 %v13299_v10, %v6231_v1  ;;  %v6232_v52 = vmul.f32 %v13308_v55, %v6231_v1  ;;  %v6158_v36 = vsel %vm4474_vm7, %v6155_v7, %v6157_v40 }
 0x946   : > { %v5353_v3 = vadd.f32 %v15496_v44, %v5328_v42  ;;  %v15498_v42 = vld [vmem:[#allocation115_spill] sm:$0xff]  ;;  %v6196_v44 = vrot.slane %v6190_v54, 1  ;;  %v6199_v31 = vrot.slane %v6192_v33, 1  ;;  %v6274_v2 = vmul.f32 %v13308_v55, %v6273_v49 }
 0x947   : > { %v13617_v61 = vpop.permute.xlu1 %7166  ;;  %v5461_v8 = vpop.permute.xlu0 %5460  ;;  %v6239_v54 = vrot.slane %v6233_v45, 1  ;;  %v15503_v7 = vrot.slane %v15502_v29, 3  ;;  %v6238_v33 = vrot.slane %v6232_v52, 1  ;;  %v6276_v45 = vmul.f32 %v12913_v18, %v6273_v49  ;;  %v15505_v52 = vld [vmem:[#allocation95_spill] sm:$0xff] }
 0x948   : > { %15497 = vst [vmem:[#allocation107_spill] sm:$0xff] %v13617_v61  ;;  %v5378_v53 = vadd.f32 %v5372_v63, %v5353_v3  ;;  %v6234_v3 = vmul.f32 %v12913_v18, %v6231_v1 }
 0x949   : > { %6119 = vrot.lane.b32.xlu1 %v6116_v20, %s15092_s4  ;;  %6159 = vrot.lane.b32.xlu0 %v6156_v13, %s15094_s27  ;;  %v15501_v20 = vrot.slane %v15500_v15, 3  ;;  %v6283_v0 = vrot.slane %v6276_v45, 1 }
 0x94a   : > { %v5403_v21 = vadd.f32 %v15498_v42, %v5378_v53  ;;  %v6198_v53 = vsel %vm4474_vm7, %v6196_v44, %v6197_v4  ;;  %v6275_v42 = vmul.f32 %v13299_v10, %v6273_v49  ;;  %v6241_v15 = vrot.slane %v6234_v3, 1  ;;  %v15506_v49 = vld [vmem:[#allocation116_spill] sm:$0xff] }
 0x94b   : > { %v13633_v51 = vpop.permute.xlu1 %7208  ;;  %v5511_v63 = vpop.permute.xlu0 %5510  ;;  %v6315_v44 = vstv %s13622_s15  ;;  %s13957_s15 = sld [smem:[#allocation11 + $0x3c]] }
 0x94c   : > { %15499 = vst [vmem:[#allocation109_spill] sm:$0xff] %v13633_v51  ;;  %v5423_v13 = vadd.f32 %v15501_v20, %v5403_v21  ;;  %v6200_v21 = vsel %vm4474_vm7, %v6197_v4, %v6199_v31  ;;  %v6240_v20 = vsel %vm4474_vm7, %v6238_v33, %v6239_v54  ;;  %v6317_v29 = vmul.f32 %v13299_v10, %v6315_v44 }
 0x94d   : > { %6161 = vrot.lane.b32.xlu1 %v6158_v36, %s15094_s27  ;;  %6201 = vrot.lane.b32.xlu0 %v6198_v53, %s8973_s0  ;;  %v6281_v53 = vrot.slane %v6275_v42, 1  ;;  %v6280_v4 = vrot.slane %v6274_v2, 1  ;;  %v6316_v3 = vmul.f32 %v13308_v55, %v6315_v44  ;;  %v15507_v42 = vld [vmem:[#allocation94_spill] sm:$0xff] }
 0x94e   : > { %v5442_v40 = vadd.f32 %v15503_v7, %v5423_v13  ;;  %v13655_v13 = vld [vmem:[#allocation3 + $0x18] sm:$0xff]  ;;  %v4754_v33 = vmul.f32 %v13308_v55, %v15507_v42 }
 0x94f   : > { %v13646_v48 = vpop.permute.xlu1 %7285  ;;  %v5561_v1 = vpop.permute.xlu0 %5560  ;;  %v4762_v7 = vmul.f32 %v13655_v13, %v15505_v52  ;;  %v13669_v52 = vld [vmem:[#allocation3 + $0x20] sm:$0xff]  ;;  %v6322_v56 = vrot.slane %v6316_v3, 1 }
 0x950   : > { %15504 = vst [vmem:[#allocation111_spill] sm:$0xff] %v13646_v48  ;;  %v5467_v36 = vadd.f32 %v5461_v8, %v5442_v40  ;;  %v6318_v8 = vmul.f32 %v12913_v18, %v6315_v44  ;;  %v7599_v40 = vstv %s13631_s25  ;;  %v6282_v18 = vsel %vm4474_vm7, %v6280_v4, %v6281_v53  ;;  %v13685_v4 = vld [vmem:[#allocation3 + $0x28] sm:$0x3f]  ;;  %s13974_s25 = sld [smem:[#allocation11 + $0x3e]] }
 0x951   : > { %6203 = vrot.lane.b32.xlu1 %v6200_v21, %s8973_s0  ;;  %6243 = vrot.lane.b32.xlu0 %v6240_v20, %s8974_s1  ;;  %v7601_v21 = vmul.f32 %v13669_v52, %v7599_v40  ;;  %v6323_v44 = vrot.slane %v6317_v29, 1  ;;  %v7600_v20 = vmul.f32 %v13655_v13, %v7599_v40  ;;  %v4765_v45 = vadd.f32 %v4762_v7, %v4754_v33 }
 0x952   : > { %v5492_v31 = vadd.f32 %v15506_v49, %v5467_v36  ;;  %v6242_v36 = vsel %vm4474_vm7, %v6239_v54, %v6241_v15  ;;  %v15509_v49 = vld [vmem:[#allocation207_spill] sm:$0xff]  ;;  %v6325_v57 = vrot.slane %v6318_v8, 1  ;;  %v6284_v54 = vsel %vm4474_vm7, %v6281_v53, %v6283_v0  ;;  %v15513_v53 = vld [vmem:[#allocation118_spill] sm:$0xff] }
 0x953   : > { %v13667_v25 = vpop.permute.xlu1 %7327  ;;  %v5611_v14 = vpop.permute.xlu0 %5610  ;;  %v7607_v15 = vrot.slane %v7601_v21, 6  ;;  %v7602_v29 = vmul.f32 %v13685_v4, %v7599_v40  ;;  %v6324_v3 = vsel %vm4474_vm7, %v6322_v56, %v6323_v44  ;;  %v7606_v0 = vrot.slane %v7600_v20, 6 }
 0x954   : > { %15508 = vst [vmem:[#allocation156_spill] sm:$0xff] %v13667_v25  ;;  %v5517_v2 = vadd.f32 %v5511_v63, %v5492_v31  ;;  %v6391_v31 = vstv %s13651_s26  ;;  %v6326_v21 = vsel %vm4474_vm7, %v6323_v44, %v6325_v57  ;;  %v6433_v20 = vstv %s13672_s6  ;;  %s13992_s26 = sld [smem:[#allocation11 + $0x40]]  ;;  %s14005_s6 = sld [smem:[#allocation11 + $0x42]] }
 0x955   : > { %6245 = vrot.lane.b32.xlu1 %v6242_v36, %s8974_s1  ;;  %6285 = vrot.lane.b32.xlu0 %v6282_v18, %s8975_s5  ;;  %v15512_v36 = vld [vmem:[#allocation177_spill] sm:$0xff]  ;;  %v6393_v8 = vmul.f32 %v13299_v10, %v6391_v31  ;;  %v7608_v18 = vsel %vm3650_vm8, %v7606_v0, %v7607_v15  ;;  %v6561_v48 = vmul.f32 %v13299_v10, %v6559_v6 }
 0x956   : > { %v5542_v42 = vadd.f32 %v15509_v49, %v5517_v2  ;;  %v4785_v7 = vadd.f32 %v15512_v36, %v4765_v45  ;;  %v7609_v45 = vrot.slane %v7602_v29, 6  ;;  %v13708_v49 = vld [vmem:[#allocation3 + $0x10] sm:$0x3f] }
 0x957   : > { %v13680_v25 = vpop.permute.xlu1 %7369  ;;  %v13682_v63 = vpop.permute.xlu0 %5699  ;;  %v6399_v44 = vrot.slane %v6393_v8, 2 }
 0x958   : > { %15510 = vst [vmem:[#allocation157_spill] sm:$0xff] %v13680_v25  ;;  %15511 = vst [vmem:[#allocation112_spill] sm:$0xff] %v13682_v63  ;;  %v5567_v33 = vadd.f32 %v5561_v1, %v5542_v42  ;;  %v6392_v1 = vmul.f32 %v13308_v55, %v6391_v31  ;;  %v6394_v42 = vmul.f32 %v13708_v49, %v6391_v31  ;;  %v15518_v31 = vld [vmem:[#allocation119_spill] sm:$0xff]  ;;  %v6517_v25 = vstv %s13712_s23  ;;  %s14082_s23 = sld [smem:[#allocation11 + $0x4a]] }
 0x959   : > { %6287 = vrot.lane.b32.xlu1 %v6284_v54, %s8975_s5  ;;  %6327 = vrot.lane.b32.xlu0 %v6324_v3, %s8976_s9  ;;  %v15516_v54 = vld [vmem:[#allocation137_spill] sm:$0xff]  ;;  %v7610_v8 = vsel %vm3650_vm8, %v7607_v15, %v7609_v45  ;;  %v15524_v15 = vld [vmem:[#allocation139_spill] sm:$0xff] }
 0x95a   : > { %v5592_v40 = vadd.f32 %v15513_v53, %v5567_v33  ;;  %v4805_v36 = vadd.f32 %v15516_v54, %v4785_v7  ;;  %v6435_v33 = vmul.f32 %v13299_v10, %v6433_v20  ;;  %v15517_v3 = vld [vmem:[#allocation181_spill] sm:$0xff]  ;;  %v6398_v53 = vrot.slane %v6392_v1, 2  ;;  %v15521_v54 = vld [vmem:[#allocation182_spill] sm:$0xff] }
 0x95b   : > { %v13703_v2 = vpop.permute.xlu1 %7411  ;;  %v13705_v56 = vpop.permute.xlu0 %5749 }
 0x95c   : > { %15514 = vst [vmem:[#allocation113_spill] sm:$0xff] %v13703_v2  ;;  %15515 = vst [vmem:[#allocation114_spill] sm:$0xff] %v13705_v56  ;;  %v5617_v57 = vadd.f32 %v5611_v14, %v5592_v40  ;;  %v4825_v29 = vadd.f32 %v15517_v3, %v4805_v36  ;;  %v6434_v2 = vmul.f32 %v13308_v55, %v6433_v20  ;;  %v6401_v40 = vrot.slane %v6394_v42, 2 }
 0x95d   : > { %6329 = vrot.lane.b32.xlu1 %v6326_v21, %s8976_s9  ;;  %7611 = vrot.lane.b32.xlu0 %v7608_v18, %s15094_s27  ;;  %v6436_v21 = vmul.f32 %v13708_v49, %v6433_v20  ;;  %v6475_v18 = vstv %s13689_s14  ;;  %v15522_v36 = vrot.slane %v15521_v54, 4  ;;  %v6400_v1 = vsel %vm4613_vm10, %v6398_v53, %v6399_v44  ;;  %s14022_s14 = sld [smem:[#allocation11 + $0x44]] }
 0x95e   : > { %v5642_v0 = vadd.f32 %v15518_v31, %v5617_v57  ;;  %v6441_v57 = vrot.slane %v6435_v33, 2  ;;  %v6477_v31 = vmul.f32 %v13299_v10, %v6475_v18  ;;  %v4845_v45 = vadd.f32 %v15524_v15, %v4825_v29 }
 0x95f   : > { %v13723_v7 = vpop.permute.xlu1 %7453  ;;  %v13725_v14 = vpop.permute.xlu0 %5799  ;;  %v6071_v42 = vstv %s13698_s12  ;;  %v6440_v20 = vrot.slane %v6434_v2, 2  ;;  %v6402_v33 = vsel %vm4613_vm10, %v6399_v44, %v6401_v40  ;;  %v6443_v53 = vrot.slane %v6436_v21, 2  ;;  %s14063_s12 = sld [smem:[#allocation11 + $0x48]] }
 0x960   : > { %15519 = vst [vmem:[#allocation115_spill] sm:$0xff] %v13723_v7  ;;  %15520 = vst [vmem:[#allocation169_spill] sm:$0xff] %v13725_v14  ;;  %v13734_v3 = vadd.f32 %v15522_v36, %v5642_v0  ;;  %v5891_v7 = vstv %s13694_s7  ;;  %v6476_v14 = vmul.f32 %v13308_v55, %v6475_v18  ;;  %v6478_v36 = vmul.f32 %v13708_v49, %v6475_v18  ;;  %s14039_s7 = sld [smem:[#allocation11 + $0x5f]] }
 0x961   : > { %7613 = vrot.lane.b32.xlu1 %v7610_v8, %s15094_s27  ;;  %6403 = vrot.lane.b32.xlu0 %v6400_v1, %s15092_s4  ;;  %v15527_v8 = vld [vmem:[#allocation185_spill] sm:$0xff]  ;;  %v6442_v29 = vsel %vm4613_vm10, %v6440_v20, %v6441_v57  ;;  %v6483_v2 = vrot.slane %v6477_v31, 2  ;;  %v6519_v15 = vmul.f32 %v13299_v10, %v6517_v25  ;;  %v6074_v44 = vmul.f32 %v13708_v49, %v6071_v42 }
 0x962   : > { %15523 = vst [vmem:[#allocation173_spill] sm:$0xff] %v13734_v3  ;;  %v4865_v1 = vadd.f32 %v15527_v8, %v4845_v45  ;;  %v6482_v21 = vrot.slane %v6476_v14, 2  ;;  %v6518_v18 = vmul.f32 %v13308_v55, %v6517_v25  ;;  %v6520_v31 = vmul.f32 %v13708_v49, %v6517_v25 }
 0x963   : > { %v13744_v54 = vpop.permute.xlu1 %7495  ;;  %v13746_v0 = vpop.permute.xlu0 %5849  ;;  %v5892_v45 = vmul.f32 %v13308_v55, %v5891_v7  ;;  %v6444_v56 = vsel %vm4613_vm10, %v6441_v57, %v6443_v53  ;;  %v6525_v40 = vrot.slane %v6519_v15, 2  ;;  %v15531_v25 = vstv %s13719_s21  ;;  %v15532_v57 = vld [vmem:[#allocation188_spill] sm:$0xff] }
 0x964   : > { %15525 = vst [vmem:[#allocation95_spill] sm:$0xff] %v13744_v54  ;;  %15526 = vst [vmem:[#allocation116_spill] sm:$0xff] %v13746_v0  ;;  %v6072_v54 = vmul.f32 %v13308_v55, %v6071_v42  ;;  %v6073_v0 = vmul.f32 %v13299_v10, %v6071_v42  ;;  %v6485_v42 = vrot.slane %v6478_v36, 2  ;;  %v6484_v14 = vsel %vm4613_vm10, %v6482_v21, %v6483_v2 }
 0x965   : > { %6405 = vrot.lane.b32.xlu1 %v6402_v33, %s15092_s4  ;;  %6445 = vrot.lane.b32.xlu0 %v6442_v29, %s15094_s27  ;;  %v15530_v33 = vld [vmem:[#allocation142_spill] sm:$0xff]  ;;  %v5898_v11 = vmul.f32 %v13655_v13, %v15531_v25  ;;  %v6524_v36 = vrot.slane %v6518_v18, 2  ;;  %v6560_v15 = vmul.f32 %v13308_v55, %v6559_v6  ;;  %v13788_v21 = vmul.f32 %v13299_v10, %v5891_v7 }
 0x966   : > { %v4885_v29 = vadd.f32 %v15530_v33, %v4865_v1  ;;  %v6079_v63 = vrot.slane %v6073_v0, 1  ;;  %v6527_v1 = vrot.slane %v6520_v31, 2  ;;  %v6601_v0 = vstv %s13751_s16  ;;  %s14146_s16 = sld [smem:[#allocation11 + $0x50]] }
 0x967   : > { %v13767_v20 = vpop.permute.xlu1 %7571  ;;  %v13769_v8 = vpop.permute.xlu0 %4518  ;;  %v6526_v18 = vsel %vm4613_vm10, %v6524_v36, %v6525_v40  ;;  %v6567_v31 = vrot.slane %v6561_v48, 2  ;;  %v6603_v25 = vmul.f32 %v13299_v10, %v6601_v0  ;;  %v6566_v36 = vrot.slane %v6560_v15, 2 }
 0x968   : > { %15528 = vst [vmem:[#allocation94_spill] sm:$0xff] %v13767_v20  ;;  %15529 = vst [vmem:[#allocation207_spill] sm:$0xff] %v13769_v8  ;;  %v6078_v20 = vrot.slane %v6072_v54, 1  ;;  %v6081_v8 = vrot.slane %v6074_v44, 1  ;;  %v4905_v53 = vadd.f32 %v15532_v57, %v4885_v29  ;;  %v15535_v44 = vld [vmem:[#allocation144_spill] sm:$0xff]  ;;  %v13801_v57 = vadd.f32 %v5898_v11, %v5892_v45 }
 0x969   : > { %6447 = vrot.lane.b32.xlu1 %v6444_v56, %s15094_s27  ;;  %6487 = vrot.lane.b32.xlu0 %v6484_v14, %s8973_s0  ;;  %v6486_v56 = vsel %vm4613_vm10, %v6483_v2, %v6485_v42  ;;  %v4930_v29 = vmul.f32 %v13308_v55, %v15535_v44  ;;  %v6562_v14 = vmul.f32 %v13708_v49, %v6559_v6  ;;  %v15536_v42 = vld [vmem:[#allocation149_spill] sm:$0xff] }
 0x96a   : > { %v13804_v7 = vsel %vm4474_vm7, %v6078_v20, %v6079_v63  ;;  %v13808_v2 = vsel %vm4474_vm7, %v6079_v63, %v6081_v8  ;;  %v4925_v48 = vadd.f32 %v15536_v42, %v4905_v53  ;;  %v6528_v6 = vsel %vm4613_vm10, %v6525_v40, %v6527_v1  ;;  %v15539_v63 = vld [vmem:[#allocation145_spill] sm:$0xff] }
 0x96b   : > { %v13790_v33 = vpop.permute.xlu1 %4520  ;;  %v13792_v54 = vpop.permute.xlu0 %4568  ;;  %v6602_v11 = vmul.f32 %v13308_v55, %v6601_v0  ;;  %v4936_v44 = vrot.slane %v4930_v29, 1  ;;  %v4949_v8 = vmul.f32 %v13655_v13, %v15539_v63  ;;  %v6568_v53 = vsel %vm4613_vm10, %v6566_v36, %v6567_v31  ;;  %v15540_v29 = vld [vmem:[#allocation147_spill] sm:$0xff] }
 0x96c   : > { %15533 = vst [vmem:[#allocation177_spill] sm:$0xff] %v13790_v33  ;;  %15534 = vst [vmem:[#allocation118_spill] sm:$0xff] %v13792_v54  ;;  %v6088_v33 = vstv %s13758_s8  ;;  %v6569_v40 = vrot.slane %v6562_v14, 2  ;;  %v6609_v1 = vrot.slane %v6603_v25, 2  ;;  %v15541_v63 = vrot.slane %v15540_v29, 1  ;;  %s14175_s8 = sld [smem:[#allocation11 + $0x52]] }
 0x96d   : > { %6489 = vrot.lane.b32.xlu1 %v6486_v56, %s8973_s0  ;;  %6529 = vrot.lane.b32.xlu0 %v6526_v18, %s8974_s1  ;;  %v6604_v56 = vmul.f32 %v13708_v49, %v6601_v0  ;;  %v7641_v18 = vstv %s13773_s2  ;;  %v6089_v42 = vmul.f32 %v13655_v13, %v6088_v33  ;;  %v6677_v25 = vstv %s13785_s3  ;;  %s14183_s2 = sld [smem:[#allocation11 + $0x1c]]  ;;  %s14193_s3 = sld [smem:[#allocation11 + $0x1d]] }
 0x96e   : > { %v7643_v15 = vmul.f32 %v13669_v52, %v7641_v18  ;;  %v4938_v0 = vsel %vm4474_vm7, %v4936_v44, %v15541_v63  ;;  %v7642_v14 = vmul.f32 %v13655_v13, %v7641_v18  ;;  %v4955_v3 = vrot.slane %v4949_v8, 1  ;;  %v15545_v8 = vld [vmem:[#allocation148_spill] sm:$0xff] }
 0x96f   : > { %v13817_v45 = vpop.permute.xlu1 %4570  ;;  %v13819_v20 = vpop.permute.xlu0 %4657  ;;  %v4944_v36 = vadd.f32 %v4938_v0, %v4925_v48  ;;  %v6611_v61 = vrot.slane %v6604_v56, 2  ;;  %v15544_v29 = vstv %s13719_s21  ;;  %v6570_v48 = vsel %vm4613_vm10, %v6567_v31, %v6569_v40  ;;  %s14095_s21 = sld [smem:[#allocation11 + $0x4c]] }
 0x970   : > { %15537 = vst [vmem:[#allocation137_spill] sm:$0xff] %v13817_v45  ;;  %15538 = vst [vmem:[#allocation181_spill] sm:$0xff] %v13819_v20  ;;  %v13829_v45 = vmul.f32 %v13669_v52, %v6088_v33  ;;  %v6608_v20 = vrot.slane %v6602_v11, 2  ;;  %v5899_v11 = vmul.f32 %v13669_v52, %v15544_v29  ;;  %v7649_v63 = vrot.slane %v7643_v15, 6 }
 0x971   : > { %6531 = vrot.lane.b32.xlu1 %v6528_v6, %s8974_s1  ;;  %6571 = vrot.lane.b32.xlu0 %v6568_v53, %s8975_s5  ;;  %v7644_v6 = vmul.f32 %v13685_v4, %v7641_v18  ;;  %v6679_v53 = vmul.f32 %v13299_v10, %v6677_v25  ;;  %v15546_v56 = vrot.slane %v15545_v8, 1  ;;  %v7648_v5 = vrot.slane %v7642_v14, 6 }
 0x972   : > { %v6610_v44 = vsel %vm4613_vm10, %v6608_v20, %v6609_v1  ;;  %v6096_v0 = vrot.slane %v13829_v45, 1  ;;  %v6680_v31 = vmul.f32 %v13708_v49, %v6677_v25  ;;  %v6719_v20 = vstv %s13815_s10  ;;  %s14207_s10 = sld [smem:[#allocation11 + $0x56]] }
 0x973   : > { %v13840_v54 = vpop.permute.xlu1 %4659  ;;  %v13842_v51 = vpop.permute.xlu0 %4707  ;;  %v4957_v18 = vsel %vm4474_vm7, %v4955_v3, %v15546_v56  ;;  %v6095_v45 = vrot.slane %v6089_v42, 1  ;;  %v6612_v15 = vsel %vm4613_vm10, %v6609_v1, %v6611_v61  ;;  %v7650_v3 = vsel %vm3650_vm8, %v7648_v5, %v7649_v63 }
 0x974   : > { %15542 = vst [vmem:[#allocation119_spill] sm:$0xff] %v13840_v54  ;;  %15543 = vst [vmem:[#allocation182_spill] sm:$0xff] %v13842_v51  ;;  %v6091_v54 = vmul.f32 %v13685_v4, %v6088_v33  ;;  %v6678_v51 = vmul.f32 %v13308_v55, %v6677_v25  ;;  %v4963_v29 = vadd.f32 %v4957_v18, %v4944_v36 }
 0x975   : > { %6573 = vrot.lane.b32.xlu1 %v6570_v48, %s8975_s5  ;;  %6613 = vrot.lane.b32.xlu0 %v6610_v44, %s8976_s9  ;;  %v7651_v48 = vrot.slane %v7644_v6, 6  ;;  %v6685_v44 = vrot.slane %v6679_v53, 3  ;;  %v6721_v36 = vmul.f32 %v13299_v10, %v6719_v20  ;;  %v6722_v14 = vmul.f32 %v13708_v49, %v6719_v20 }
 0x976   : > { %v13870_v25 = vsel %vm4474_vm7, %v6095_v45, %v6096_v0  ;;  %v6098_v56 = vrot.slane %v6091_v54, 1  ;;  %v6684_v42 = vrot.slane %v6678_v51, 3  ;;  %v6720_v61 = vmul.f32 %v13308_v55, %v6719_v20  ;;  %v15548_v20 = vld [vmem:[#allocation154_spill] sm:$0xff] }
 0x977   : > { %v13863_v40 = vpop.permute.xlu1 %4709  ;;  %v4980_v33 = vpop.permute.xlu0 %4979  ;;  %v13878_v1 = vadd.f32 %v5899_v11, %v13788_v21  ;;  %v6687_v6 = vrot.slane %v6680_v31, 3  ;;  %v6761_v53 = vstv %s13838_s11  ;;  %v5168_v21 = vmul.f32 %v13308_v55, %v15548_v20  ;;  %v13915_v20 = vld [vmem:[#allocation3] sm:$0xff]  ;;  %s14226_s11 = sld [smem:[#allocation11 + $0x58]] }
 0x978   : > { %15547 = vst [vmem:[#allocation139_spill] sm:$0xff] %v13863_v40  ;;  %v4988_v8 = vadd.f32 %v4980_v33, %v4963_v29  ;;  %v7652_v29 = vsel %vm3650_vm8, %v7649_v63, %v7651_v48  ;;  %v6686_v45 = vsel %vm5412_vm11, %v6684_v42, %v6685_v44  ;;  %v13887_v51 = vmul.f32 %v13299_v10, %v6761_v53  ;;  %v15549_v10 = vld [vmem:[#allocation155_spill] sm:$0xff] }
 0x979   : > { %6615 = vrot.lane.b32.xlu1 %v6612_v15, %s8976_s9  ;;  %7653 = vrot.lane.b32.xlu0 %v7650_v3, %s8973_s0  ;;  %v6727_v31 = vrot.slane %v6721_v36, 3  ;;  %v6729_v33 = vrot.slane %v6722_v14, 3  ;;  %v13893_v15 = vsel %vm4474_vm7, %v6096_v0, %v6098_v56  ;;  %v6726_v63 = vrot.slane %v6720_v61, 3  ;;  %v15550_v3 = vld [vmem:[#allocation96_spill] sm:$0xff] }
 0x97a   : > { %v5013_v5 = vadd.f32 %v12995_v43, %v4988_v8  ;;  %v6762_v48 = vmul.f32 %v13308_v55, %v6761_v53  ;;  %v5187_v8 = vmul.f32 %v13655_v13, %v15549_v10  ;;  %v6688_v36 = vsel %vm5412_vm11, %v6685_v44, %v6687_v6  ;;  %v15552_v10 = vld [vmem:[#allocation199_spill] sm:$0xff] }
 0x97b   : > { %v4982_v18 = vpop.permute.xlu1 %4981  ;;  %v5030_v54 = vpop.permute.xlu0 %5029  ;;  %v6803_v14 = vstv %s13861_s17  ;;  %v6769_v56 = vrot.slane %v13887_v51, 3  ;;  %v6764_v61 = vmul.f32 %v13708_v49, %v6761_v53  ;;  %v6730_v44 = vsel %vm5412_vm11, %v6727_v31, %v6729_v33  ;;  %s14258_s17 = sld [smem:[#allocation11 + $0x5a]] }
 0x97c   : > { %v4989_v11 = vadd.f32 %v4982_v18, %v13094_v60  ;;  %v5038_v43 = vadd.f32 %v5030_v54, %v5013_v5  ;;  %v5174_v18 = vrot.slane %v5168_v21, 2  ;;  %v13906_v54 = vld [vmem:[#allocation3 + $0x8] sm:$0xff]  ;;  %v6768_v6 = vrot.slane %v6762_v48, 3 }
 0x97d   : > { %7655 = vrot.lane.b32.xlu1 %v7652_v29, %s8973_s0  ;;  %6689 = vrot.lane.b32.xlu0 %v6686_v45, %s15092_s4  ;;  %v13909_v55 = vmul.f32 %v13906_v54, %v6803_v14  ;;  %v5193_v51 = vrot.slane %v5187_v8, 2  ;;  %v6804_v53 = vmul.f32 %v13915_v20, %v6803_v14  ;;  %v6845_v21 = vstv %s13875_s18  ;;  %s14269_s18 = sld [smem:[#allocation11 + $0x5c]] }
 0x97e   : > { %v5014_v42 = vadd.f32 %v15550_v3, %v4989_v11  ;;  %v5063_v60 = vadd.f32 %v13016_v32, %v5038_v43  ;;  %v6728_v32 = vsel %vm5412_vm11, %v6726_v63, %v6727_v31  ;;  %v15551_v11 = vld [vmem:[#allocation189_spill] sm:$0xff]  ;;  %v6887_v33 = vstv %s13882_s19  ;;  %s14296_s19 = sld [smem:[#allocation11 + $0x5e]] }
 0x97f   : > { %v5032_v5 = vpop.permute.xlu1 %5031  ;;  %v5080_v0 = vpop.permute.xlu0 %5079  ;;  %v5914_v43 = vadd.f32 %v15551_v11, %v13801_v57  ;;  %v6770_v8 = vsel %vm5412_vm11, %v6768_v6, %v6769_v56  ;;  %v6810_v6 = vrot.slane %v6804_v53, 3 }
 0x980   : > { %v5039_v29 = vadd.f32 %v5032_v5, %v5014_v42  ;;  %v5088_v45 = vadd.f32 %v5080_v0, %v5063_v60  ;;  %v6771_v42 = vrot.slane %v6764_v61, 3  ;;  %v6811_v60 = vrot.slane %v13909_v55, 3 }
 0x981   : > { %6691 = vrot.lane.b32.xlu1 %v6688_v36, %s15092_s4  ;;  %6731 = vrot.lane.b32.xlu0 %v6728_v32, %s15094_s27  ;;  %v6806_v36 = vmul.f32 %v13708_v49, %v6803_v14  ;;  %v15553_v32 = vld [vmem:[#allocation160_spill] sm:$0xff]  ;;  %v6846_v55 = vmul.f32 %v13915_v20, %v6845_v21  ;;  %v6848_v14 = vmul.f32 %v13708_v49, %v6845_v21 }
 0x982   : > { %v5064_v63 = vadd.f32 %v15552_v10, %v5039_v29  ;;  %v5113_v31 = vadd.f32 %v13037_v9, %v5088_v45  ;;  %v15554_v57 = vrot.slane %v15553_v32, 2  ;;  %v6847_v9 = vmul.f32 %v13906_v54, %v6845_v21  ;;  %v15555_v45 = vld [vmem:[#allocation161_spill] sm:$0xff] }
 0x983   : > { %v5082_v3 = vpop.permute.xlu1 %5081  ;;  %v5130_v48 = vpop.permute.xlu0 %5129  ;;  %v15556_v11 = vrot.slane %v15555_v45, 2  ;;  %v15557_v10 = vld [vmem:[#allocation141_spill] sm:$0xff]  ;;  %v6812_v53 = vsel %vm5412_vm11, %v6810_v6, %v6811_v60  ;;  %v6813_v32 = vrot.slane %v6806_v36, 3  ;;  %v6889_v21 = vmul.f32 %v13906_v54, %v6887_v33 }
 0x984   : > { %v5089_v5 = vadd.f32 %v5082_v3, %v5064_v63  ;;  %v5138_v0 = vadd.f32 %v5130_v48, %v5113_v31  ;;  %v5176_v29 = vsel %vm4613_vm10, %v5174_v18, %v15554_v57  ;;  %v5928_v63 = vadd.f32 %v15557_v10, %v5914_v43  ;;  %v15558_v31 = vld [vmem:[#allocation202_spill] sm:$0xff]  ;;  %v15561_v6 = vld [vmem:[#allocation205_spill] sm:$0xff] }
 0x985   : > { %6733 = vrot.lane.b32.xlu1 %v6730_v44, %s15094_s27  ;;  %6773 = vrot.lane.b32.xlu0 %v6770_v8, %s8973_s0  ;;  %v5195_v61 = vsel %vm4613_vm10, %v5193_v51, %v15556_v11  ;;  %v5915_v18 = vadd.f32 %v12810_v47, %v13878_v1  ;;  %v6772_v51 = vsel %vm5412_vm11, %v6769_v56, %v6771_v42  ;;  %v6853_v45 = vrot.slane %v6847_v9, 3  ;;  %v15559_v42 = vld [vmem:[#allocation100_spill] sm:$0xff] }
 0x986   : > { %v5163_v44 = vadd.f32 %v13058_v23, %v5138_v0  ;;  %v5114_v3 = vadd.f32 %v15558_v31, %v5089_v5  ;;  %v6890_v47 = vmul.f32 %v13708_v49, %v6887_v33  ;;  %v6852_v23 = vrot.slane %v6846_v55, 3  ;;  %v15560_v0 = vld [vmem:[#allocation158_spill] sm:$0xff] }
 0x987   : > { %v5132_v48 = vpop.permute.xlu1 %5131  ;;  %v5218_v8 = vpop.permute.xlu0 %5217  ;;  %v6855_v1 = vrot.slane %v6848_v14, 3  ;;  %v6888_v5 = vmul.f32 %v13915_v20, %v6887_v33  ;;  %v7683_v56 = vstv %s13919_s20  ;;  %v5942_v36 = vadd.f32 %v15559_v42, %v5928_v63  ;;  %s14303_s20 = sld [smem:[#allocation11 + $0x60]] }
 0x988   : > { %v5139_v57 = vadd.f32 %v5132_v48, %v5114_v3  ;;  %v5182_v43 = vadd.f32 %v5176_v29, %v5163_v44  ;;  %v5929_v11 = vadd.f32 %v15560_v0, %v5915_v18  ;;  %v13963_v10 = vstv %s13926_s22  ;;  %v15562_v48 = vld [vmem:[#allocation164_spill] sm:$0xff]  ;;  %s14317_s22 = sld [smem:[#allocation14 + $0x1]] }
 0x989   : > { %6775 = vrot.lane.b32.xlu1 %v6772_v51, %s8973_s0  ;;  %6815 = vrot.lane.b32.xlu0 %v6812_v53, %s8974_s1  ;;  %v6814_v55 = vsel %vm5412_vm11, %v6811_v60, %v6813_v32  ;;  %v6895_v14 = vrot.slane %v6889_v21, 3  ;;  %v7685_v33 = vmul.f32 %v13669_v52, %v7683_v56  ;;  %v6854_v63 = vsel %vm5412_vm11, %v6852_v23, %v6853_v45  ;;  %v15563_v60 = vld [vmem:[#allocation143_spill] sm:$0xff]  ;;  %v15564_v21 = vld [vmem:[#allocation165_spill] sm:$0xff] }
 0x98a   : > { %v5164_v29 = vadd.f32 %v15561_v6, %v5139_v57  ;;  %v5201_v9 = vadd.f32 %v5195_v61, %v5182_v43  ;;  %v6897_v53 = vrot.slane %v6890_v47, 3  ;;  %v6856_v61 = vsel %vm5412_vm11, %v6853_v45, %v6855_v1  ;;  %v15565_v1 = vld [vmem:[#allocation168_spill] sm:$0xff] }
 0x98b   : > { %v5220_v44 = vpop.permute.xlu1 %5219  ;;  %v5268_v31 = vpop.permute.xlu0 %5267  ;;  %v6894_v18 = vrot.slane %v6888_v5, 3  ;;  %v7684_v57 = vmul.f32 %v13655_v13, %v7683_v56  ;;  %v6963_v43 = vstv %s13942_s30  ;;  %v5956_v32 = vadd.f32 %v15563_v60, %v5942_v36  ;;  %s14324_s30 = sld [smem:[#allocation11 + $0x61]] }
 0x98c   : > { %v5226_v3 = vadd.f32 %v5218_v8, %v5201_v9  ;;  %v5183_v51 = vadd.f32 %v15562_v48, %v5164_v29  ;;  %v5943_v8 = vadd.f32 %v12827_v35, %v5929_v11  ;;  %v7691_v45 = vrot.slane %v7685_v33, 6  ;;  %v15566_v11 = vld [vmem:[#allocation170_spill] sm:$0xff] }
 0x98d   : > { %6817 = vrot.lane.b32.xlu1 %v6814_v55, %s8974_s1  ;;  %6857 = vrot.lane.b32.xlu0 %v6854_v63, %s8975_s5  ;;  %v6896_v6 = vsel %vm5412_vm11, %v6894_v18, %v6895_v14  ;;  %v5406_v5 = vmul.f32 %v13915_v20, %v15565_v1  ;;  %v7686_v29 = vmul.f32 %v13685_v4, %v7683_v56  ;;  %v7005_v48 = vstv %s13957_s15  ;;  %v15567_v56 = vld [vmem:[#allocation101_spill] sm:$0xff]  ;;  %s14352_s15 = sld [smem:[#allocation11 + $0x2b]] }
 0x98e   : > { %v5202_v42 = vadd.f32 %v15564_v21, %v5183_v51  ;;  %v5251_v47 = vadd.f32 %v13079_v34, %v5226_v3  ;;  %v6898_v36 = vsel %vm5412_vm11, %v6895_v14, %v6897_v53  ;;  %v6965_v35 = vmul.f32 %v13906_v54, %v6963_v43  ;;  %v15569_v14 = vld [vmem:[#allocation208_spill] sm:$0xff] }
 0x98f   : > { %v5270_v23 = vpop.permute.xlu1 %5269  ;;  %v5318_v0 = vpop.permute.xlu0 %5317  ;;  %v7690_v34 = vrot.slane %v7684_v57, 6  ;;  %v5426_v3 = vmul.f32 %v13655_v13, %v15566_v11  ;;  %v6964_v33 = vmul.f32 %v13915_v20, %v6963_v43  ;;  %v15570_v53 = vld [vmem:[#allocation200_spill] sm:$0xff]  ;;  %v5413_v21 = vrot.slane %v5406_v5, 3  ;;  %v15571_v5 = vld [vmem:[#allocation146_spill] sm:$0xff] }
 0x990   : > { %v5227_v9 = vadd.f32 %v5220_v44, %v5202_v42  ;;  %v5276_v55 = vadd.f32 %v5268_v31, %v5251_v47  ;;  %v5970_v44 = vadd.f32 %v15567_v56, %v5956_v32  ;;  %v15568_v31 = vld [vmem:[#allocation162_spill] sm:$0xff]  ;;  %v7693_v42 = vrot.slane %v7686_v29, 6 }
 0x991   : > { %6859 = vrot.lane.b32.xlu1 %v6856_v61, %s8975_s5  ;;  %6899 = vrot.lane.b32.xlu0 %v6896_v6, %s8976_s9  ;;  %v5957_v51 = vadd.f32 %v15568_v31, %v5943_v8  ;;  %v7692_v57 = vsel %vm3650_vm8, %v7690_v34, %v7691_v45  ;;  %v6966_v47 = vmul.f32 %v13708_v49, %v6963_v43  ;;  %v6971_v11 = vrot.slane %v6965_v35, 4  ;;  %v15572_v34 = vld [vmem:[#allocation121_spill] sm:$0xff]  ;;  %v15574_v35 = vld [vmem:[#allocation198_spill] sm:$0xff] }
 0x992   : > { %v5252_v63 = vadd.f32 %v15569_v14, %v5227_v9  ;;  %v5301_v18 = vadd.f32 %v15570_v53, %v5276_v55  ;;  %v7007_v32 = vmul.f32 %v13906_v54, %v7005_v48  ;;  %v5432_v8 = vrot.slane %v5426_v3, 3 }
 0x993   : > { %v5320_v61 = vpop.permute.xlu1 %5319  ;;  %v5368_v60 = vpop.permute.xlu0 %5367  ;;  %v6970_v9 = vrot.slane %v6964_v33, 4  ;;  %v7006_v55 = vmul.f32 %v13915_v20, %v7005_v48  ;;  %v7047_v56 = vstv %s13974_s25  ;;  %v5984_v29 = vadd.f32 %v15571_v5, %v5970_v44  ;;  %s8537_s25 = sld [smem:[#allocation11 + $0x47]] }
 0x994   : > { %v5277_v6 = vadd.f32 %v5270_v23, %v5252_v63  ;;  %v5326_v1 = vadd.f32 %v5318_v0, %v5301_v18  ;;  %v5971_v43 = vadd.f32 %v15572_v34, %v5957_v51  ;;  %v15573_v23 = vld [vmem:[#allocation211_spill] sm:$0xff]  ;;  %v7694_v63 = vsel %vm3650_vm8, %v7691_v45, %v7693_v42  ;;  %v15575_v51 = vld [vmem:[#allocation174_spill] sm:$0xff] }
 0x995   : > { %6901 = vrot.lane.b32.xlu1 %v6898_v36, %s8976_s9  ;;  %7695 = vrot.lane.b32.xlu0 %v7692_v57, %s8974_s1  ;;  %v6973_v3 = vrot.slane %v6966_v47, 4  ;;  %v7008_v33 = vmul.f32 %v13708_v49, %v7005_v48  ;;  %v7049_v53 = vmul.f32 %v13906_v54, %v7047_v56  ;;  %v6972_v44 = vsel %vm5651_vm12, %v6970_v9, %v6971_v11  ;;  %v15577_v48 = vld [vmem:[#allocation103_spill] sm:$0xff] }
 0x996   : > { %v5302_v0 = vadd.f32 %v15573_v23, %v5277_v6  ;;  %v5351_v31 = vadd.f32 %v15574_v35, %v5326_v1  ;;  %v7013_v5 = vrot.slane %v7007_v32, 4  ;;  %v15576_v34 = vrot.slane %v15575_v51, 3  ;;  %v15579_v9 = vld [vmem:[#allocation151_spill] sm:$0xff]  ;;  %v15580_v23 = vld [vmem:[#allocation212_spill] sm:$0xff] }
 0x997   : > { %v5370_v14 = vpop.permute.xlu1 %5369  ;;  %v5457_v36 = vpop.permute.xlu0 %5456  ;;  %v7012_v1 = vrot.slane %v7006_v55, 4  ;;  %v7048_v45 = vmul.f32 %v13915_v20, %v7047_v56  ;;  %v7089_v42 = vstv %s13992_s26  ;;  %v7055_v55 = vrot.slane %v7049_v53, 4  ;;  %s8550_s26 = sld [smem:[#allocation11 + $0x54]] }
 0x998   : > { %v5327_v18 = vadd.f32 %v5320_v61, %v5302_v0  ;;  %v5376_v57 = vadd.f32 %v5368_v60, %v5351_v31  ;;  %v5415_v6 = vsel %vm5412_vm11, %v5413_v21, %v15576_v34  ;;  %v5998_v61 = vadd.f32 %v15577_v48, %v5984_v29  ;;  %v15578_v60 = vld [vmem:[#allocation166_spill] sm:$0xff] }
 0x999   : > { %7697 = vrot.lane.b32.xlu1 %v7694_v63, %s8974_s1  ;;  %6975 = vrot.lane.b32.xlu0 %v6972_v44, %s15092_s4  ;;  %v5985_v47 = vadd.f32 %v15578_v60, %v5971_v43  ;;  %v6974_v31 = vsel %vm5651_vm12, %v6971_v11, %v6973_v3  ;;  %v7015_v63 = vrot.slane %v7008_v33, 4  ;;  %v7050_v44 = vmul.f32 %v13708_v49, %v7047_v56  ;;  %v15581_v43 = vld [vmem:[#allocation175_spill] sm:$0xff]  ;;  %v15583_v56 = vld [vmem:[#allocation150_spill] sm:$0xff] }
 0x99a   : > { %v5401_v32 = vadd.f32 %v15579_v9, %v5376_v57  ;;  %v5352_v0 = vadd.f32 %v15580_v23, %v5327_v18  ;;  %v7014_v40 = vsel %vm5651_vm12, %v7012_v1, %v7013_v5  ;;  %v7091_v29 = vmul.f32 %v13906_v54, %v7089_v42  ;;  %v15584_v33 = vld [vmem:[#allocation122_spill] sm:$0xff] }
 0x99b   : > { %v5459_v21 = vpop.permute.xlu1 %5458  ;;  %v5507_v35 = vpop.permute.xlu0 %5506  ;;  %v15582_v48 = vrot.slane %v15581_v43, 3  ;;  %v7054_v18 = vrot.slane %v7048_v45, 4  ;;  %v7090_v11 = vmul.f32 %v13915_v20, %v7089_v42  ;;  %v7131_v3 = vstv %s14005_s6  ;;  %s8551_s6 = sld [smem:[#allocation11 + $0x55]] }
 0x99c   : > { %v5377_v51 = vadd.f32 %v5370_v14, %v5352_v0  ;;  %v5421_v34 = vadd.f32 %v5415_v6, %v5401_v32  ;;  %v6012_v14 = vadd.f32 %v15583_v56, %v5998_v61  ;;  %v5999_v53 = vadd.f32 %v15584_v33, %v5985_v47  ;;  %v15585_v6 = vld [vmem:[#allocation214_spill] sm:$0xff] }
 0x99d   : > { %v5434_v57 = vsel %vm5412_vm11, %v5432_v8, %v15582_v48  ;;  %6977 = vrot.lane.b32.xlu1 %v6974_v31, %s15092_s4  ;;  %7017 = vrot.lane.b32.xlu0 %v7014_v40, %s15094_s27  ;;  %v7016_v32 = vsel %vm5651_vm12, %v7013_v5, %v7015_v63  ;;  %v7057_v23 = vrot.slane %v7050_v44, 4  ;;  %v7092_v40 = vmul.f32 %v13708_v49, %v7089_v42  ;;  %v15586_v31 = vld [vmem:[#allocation178_spill] sm:$0xff] }
 0x99e   : > { %v5402_v1 = vadd.f32 %v15585_v6, %v5377_v51  ;;  %v5440_v60 = vadd.f32 %v5434_v57, %v5421_v34  ;;  %v14047_v45 = vmul.f32 %v13906_v54, %v7131_v3  ;;  %v7056_v61 = vsel %vm5651_vm12, %v7054_v18, %v7055_v55  ;;  %v15587_v44 = vld [vmem:[#allocation190_spill] sm:$0xff]  ;;  %v15589_v57 = vld [vmem:[#allocation180_spill] sm:$0xff] }
 0x99f   : > { %v5509_v9 = vpop.permute.xlu1 %5508  ;;  %v5557_v8 = vpop.permute.xlu0 %5556  ;;  %v7097_v47 = vrot.slane %v7091_v29, 4  ;;  %v14053_v51 = vmul.f32 %v13685_v4, %v13963_v10  ;;  %v7096_v5 = vrot.slane %v7090_v11, 4  ;;  %v7132_v42 = vmul.f32 %v13915_v20, %v7131_v3  ;;  %v15590_v18 = vld [vmem:[#allocation206_spill] sm:$0xff] }
 0x9a0   : > { %v5465_v0 = vadd.f32 %v5457_v36, %v5440_v60  ;;  %v5422_v43 = vadd.f32 %v15586_v31, %v5402_v1  ;;  %v7173_v63 = vstv %s14022_s14  ;;  %v6026_v34 = vadd.f32 %v15587_v44, %v6012_v14  ;;  %v15588_v36 = vld [vmem:[#allocation171_spill] sm:$0xff]  ;;  %v15594_v44 = vld [vmem:[#allocation216_spill] sm:$0xff]  ;;  %s8466_s14 = sld [smem:[#allocation14 + $0x2]] }
 0x9a1   : > { %7019 = vrot.lane.b32.xlu1 %v7016_v32, %s15094_s27  ;;  %7059 = vrot.lane.b32.xlu0 %v7056_v61, %s8973_s0  ;;  %v6013_v48 = vadd.f32 %v15588_v36, %v5999_v53  ;;  %v7058_v1 = vsel %vm5651_vm12, %v7055_v55, %v7057_v23  ;;  %v7099_v60 = vrot.slane %v7092_v40, 4  ;;  %v7139_v11 = vrot.slane %v14047_v45, 4  ;;  %v15592_v45 = vld [vmem:[#allocation153_spill] sm:$0xff]  ;;  %v15595_v36 = vld [vmem:[#allocation204_spill] sm:$0xff] }
 0x9a2   : > { %v5441_v56 = vadd.f32 %v15589_v57, %v5422_v43  ;;  %v5490_v29 = vadd.f32 %v15590_v18, %v5465_v0  ;;  %v7134_v32 = vmul.f32 %v13708_v49, %v7131_v3  ;;  %v7098_v53 = vsel %vm5651_vm12, %v7096_v5, %v7097_v47  ;;  %v15591_v0 = vld [vmem:[#allocation108_spill] sm:$0xff] }
 0x9a3   : > { %v5559_v33 = vpop.permute.xlu1 %5558  ;;  %v5607_v6 = vpop.permute.xlu0 %5606  ;;  %v7175_v43 = vmul.f32 %v13906_v54, %v7173_v63  ;;  %v14074_v61 = vmul.f32 %v13915_v20, %v15591_v0  ;;  %v7138_v55 = vrot.slane %v7132_v42, 4  ;;  %v7174_v23 = vmul.f32 %v13915_v20, %v7173_v63 }
 0x9a4   : > { %v5466_v31 = vadd.f32 %v5459_v21, %v5441_v56  ;;  %v5515_v14 = vadd.f32 %v5507_v35, %v5490_v29  ;;  %v7725_v40 = vstv %s14039_s7  ;;  %v6040_v3 = vadd.f32 %v15592_v45, %v6026_v34  ;;  %v15593_v21 = vld [vmem:[#allocation124_spill] sm:$0xff]  ;;  %s8565_s7 = sld [smem:[#allocation12 + $0x2]] }
 0x9a5   : > { %7061 = vrot.lane.b32.xlu1 %v7058_v1, %s8973_s0  ;;  %7101 = vrot.lane.b32.xlu0 %v7098_v53, %s8974_s1  ;;  %v6027_v35 = vadd.f32 %v15593_v21, %v6013_v48  ;;  %v7100_v29 = vsel %vm5651_vm12, %v7097_v47, %v7099_v60  ;;  %v7140_v42 = vsel %vm5651_vm12, %v7138_v55, %v7139_v11  ;;  %v7141_v1 = vrot.slane %v7134_v32, 4  ;;  %v15596_v32 = vld [vmem:[#allocation191_spill] sm:$0xff] }
 0x9a6   : > { %v5491_v5 = vadd.f32 %v15594_v44, %v5466_v31  ;;  %v5540_v57 = vadd.f32 %v15595_v36, %v5515_v14  ;;  %v7176_v53 = vmul.f32 %v13708_v49, %v7173_v63  ;;  %v7181_v48 = vrot.slane %v7175_v43, 4  ;;  %v15598_v43 = vld [vmem:[#allocation218_spill] sm:$0xff]  ;;  %v15599_v44 = vld [vmem:[#allocation231_spill] sm:$0xff] }
 0x9a7   : > { %v5609_v56 = vpop.permute.xlu1 %5608  ;;  %v14084_v18 = vpop.permute.xlu0 %5695  ;;  %v7727_v31 = vmul.f32 %v13669_v52, %v7725_v40  ;;  %v5652_v45 = vrot.slane %v14074_v61, 4  ;;  %v7180_v47 = vrot.slane %v7174_v23, 4  ;;  %v7726_v60 = vmul.f32 %v13655_v13, %v7725_v40 }
 0x9a8   : > { %v5516_v34 = vadd.f32 %v5509_v9, %v5491_v5  ;;  %v5565_v0 = vadd.f32 %v5557_v8, %v5540_v57  ;;  %v6054_v63 = vadd.f32 %v15596_v32, %v6040_v3  ;;  %v15597_v9 = vld [vmem:[#allocation176_spill] sm:$0xff]  ;;  %v7250_v21 = vstv %s14063_s12  ;;  %s8978_s12 = smov 2  }
 0x9a9   : > { %7103 = vrot.lane.b32.xlu1 %v7100_v29, %s8974_s1  ;;  %7143 = vrot.lane.b32.xlu0 %v7140_v42, %s8975_s5  ;;  %v6041_v8 = vadd.f32 %v15597_v9, %v6027_v35  ;;  %v7142_v29 = vsel %vm5651_vm12, %v7139_v11, %v7141_v1  ;;  %v7183_v23 = vrot.slane %v7176_v53, 4  ;;  %v7728_v42 = vmul.f32 %v13685_v4, %v7725_v40  ;;  %v15601_v1 = vld [vmem:[#allocation125_spill] sm:$0xff] }
 0x9aa   : > { %v5541_v55 = vadd.f32 %v15598_v43, %v5516_v34  ;;  %v5590_v5 = vadd.f32 %v15599_v44, %v5565_v0  ;;  %v7182_v3 = vsel %vm5651_vm12, %v7180_v47, %v7181_v48  ;;  %v7733_v32 = vrot.slane %v7727_v31, 6  ;;  %v15602_v31 = vld [vmem:[#allocation219_spill] sm:$0xff] }
 0x9ab   : > { %v14102_v36 = vpop.permute.xlu1 %5697  ;;  %v14104_v57 = vpop.permute.xlu0 %5745  ;;  %v7252_v35 = vmul.f32 %v13906_v54, %v7250_v21  ;;  %v14112_v34 = vmul.f32 %v13655_v13, %v13963_v10  ;;  %v14116_v0 = vmul.f32 %v13669_v52, %v13963_v10  ;;  %v7732_v11 = vrot.slane %v7726_v60, 6 }
 0x9ac   : > { %v5566_v14 = vadd.f32 %v5559_v33, %v5541_v55  ;;  %v7251_v4 = vmul.f32 %v13915_v20, %v7250_v21  ;;  %v15600_v33 = vld [vmem:[#allocation159_spill] sm:$0xff]  ;;  %v6055_v53 = vadd.f32 %v15601_v1, %v6041_v8  ;;  %v7292_v9 = vstv %s14082_s23  ;;  %s8399_s23 = sld [smem:[#allocation8 + $0x1]] }
 0x9ad   : > { %7145 = vrot.lane.b32.xlu1 %v7142_v29, %s8975_s5  ;;  %7185 = vrot.lane.b32.xlu0 %v7182_v3, %s8976_s9  ;;  %v6068_v40 = vadd.f32 %v15600_v33, %v6054_v63  ;;  %v5615_v13 = vadd.f32 %v5607_v6, %v5590_v5  ;;  %v7184_v43 = vsel %vm5651_vm12, %v7181_v48, %v7183_v23  ;;  %v7735_v60 = vrot.slane %v7728_v42, 6  ;;  %v15604_v42 = vld [vmem:[#allocation120_spill] sm:$0xff] }
 0x9ae   : > { %v5591_v47 = vadd.f32 %v15602_v31, %v5566_v14  ;;  %v7253_v55 = vmul.f32 %v13708_v49, %v7250_v21  ;;  %v7734_v63 = vsel %vm3650_vm8, %v7732_v11, %v7733_v32  ;;  %v7258_v8 = vrot.slane %v7252_v35, 5  ;;  %v15605_v11 = vld [vmem:[#allocation233_spill] sm:$0xff] }
 0x9af   : > { %v14127_v52 = vpop.permute.xlu1 %5747  ;;  %v14129_v10 = vpop.permute.xlu0 %5795  ;;  %v14135_v14 = vmul.f32 %v13906_v54, %v7292_v9  ;;  %v5671_v29 = vrot.slane %v14112_v34, 4  ;;  %v5672_v6 = vrot.slane %v14116_v0, 4  ;;  %v7293_v48 = vmul.f32 %v13915_v20, %v7292_v9 }
 0x9b0   : > { %v5616_v44 = vadd.f32 %v5609_v56, %v5591_v47  ;;  %v7334_v5 = vstv %s14095_s21  ;;  %v6085_v21 = vadd.f32 %v13804_v7, %v6068_v40  ;;  %v15603_v56 = vld [vmem:[#allocation179_spill] sm:$0xff]  ;;  %v7257_v35 = vrot.slane %v7251_v4, 5  ;;  %v15606_v7 = vld [vmem:[#allocation186_spill] sm:$0xff]  ;;  %s4370_s21 = sld [smem:[#allocation8]] }
 0x9b1   : > { %7187 = vrot.lane.b32.xlu1 %v7184_v43, %s8976_s9  ;;  %7737 = vrot.lane.b32.xlu0 %v7734_v63, %s8975_s5  ;;  %v6069_v23 = vadd.f32 %v15603_v56, %v6055_v53  ;;  %v5640_v34 = vadd.f32 %v15605_v11, %v5615_v13  ;;  %v7736_v1 = vsel %vm3650_vm8, %v7733_v32, %v7735_v60  ;;  %v7260_v31 = vrot.slane %v7253_v55, 5 }
 0x9b2   : > { %v5641_v3 = vadd.f32 %v15604_v42, %v5616_v44  ;;  %v7295_v47 = vmul.f32 %v13708_v49, %v7292_v9  ;;  %v7259_v53 = vsel %vm7222_vm13, %v7257_v35, %v7258_v8  ;;  %v7300_v4 = vrot.slane %v14135_v14, 5  ;;  %v15607_v44 = vld [vmem:[#allocation184_spill] sm:$0xff] }
 0x9b3   : > { %v14149_v33 = vpop.permute.xlu1 %5797  ;;  %v14151_v0 = vpop.permute.xlu0 %5845  ;;  %v7336_v43 = vmul.f32 %v13906_v54, %v7334_v5  ;;  %v15608_v13 = vrot.slane %v15607_v44, 4  ;;  %v15609_v32 = vrot.slane %v14053_v51, 4  ;;  %v7299_v9 = vrot.slane %v7293_v48, 5 }
 0x9b4   : > { %v5661_v40 = vadd.f32 %v15606_v7, %v5641_v3  ;;  %v7335_v55 = vmul.f32 %v13915_v20, %v7334_v5  ;;  %v6102_v14 = vadd.f32 %v13870_v25, %v6085_v21  ;;  %v6086_v56 = vadd.f32 %v13808_v2, %v6069_v23 }
 0x9b5   : > { %v5654_v63 = vsel %vm5651_vm12, %v5652_v45, %v15608_v13  ;;  %v5675_v60 = vsel %vm5651_vm12, %v5672_v6, %v15609_v32  ;;  %7739 = vrot.lane.b32.xlu1 %v7736_v1, %s8975_s5  ;;  %7262 = vrot.lane.b32.xlu0 %v7259_v53, %s15092_s4  ;;  %v7376_v61 = vstv %s14125_s13  ;;  %v7261_v11 = vsel %vm7222_vm13, %v7258_v8, %v7260_v31  ;;  %v15610_v31 = vld [vmem:[#allocation222_spill] sm:$0xff]  ;;  %s8404_s13 = sld [smem:[#allocation8 + $0x6]] }
 0x9b6   : > { %v14172_v42 = vadd.f32 %v5675_v60, %v5661_v40  ;;  %v5660_v45 = vadd.f32 %v5654_v63, %v5640_v34  ;;  %v7337_v48 = vmul.f32 %v13708_v49, %v7334_v5  ;;  %v7378_v1 = vmul.f32 %v13906_v54, %v7376_v61 }
 0x9b7   : > { %v14177_v3 = vpop.permute.xlu1 %5847  ;;  %v6118_v35 = vpop.permute.xlu0 %6117  ;;  %v7301_v25 = vsel %vm7222_vm13, %v7299_v9, %v7300_v4  ;;  %v7302_v2 = vrot.slane %v7295_v47, 5  ;;  %v7342_v21 = vrot.slane %v7336_v43, 5  ;;  %v5673_v23 = vsel %vm5651_vm12, %v5671_v29, %v5672_v6 }
 0x9b8   : > { %v6123_v7 = vadd.f32 %v6118_v35, %v6102_v14  ;;  %v7377_v8 = vmul.f32 %v13915_v20, %v7376_v61  ;;  %v7379_v34 = vmul.f32 %v13708_v49, %v7376_v61  ;;  %v6103_v5 = vadd.f32 %v13893_v15, %v6086_v56  ;;  %v15611_v56 = vld [vmem:[#allocation128_spill] sm:$0xff] }
 0x9b9   : > { %7264 = vrot.lane.b32.xlu1 %v7261_v11, %s15092_s4  ;;  %7304 = vrot.lane.b32.xlu0 %v7301_v25, %s15094_s27  ;;  %v7341_v53 = vrot.slane %v7335_v55, 5  ;;  %v7418_v44 = vstv %s14146_s16  ;;  %v5679_v47 = vadd.f32 %v5673_v23, %v5660_v45  ;;  %v7344_v29 = vrot.slane %v7337_v48, 5  ;;  %v15612_v45 = vld [vmem:[#allocation223_spill] sm:$0xff]  ;;  %v14203_v11 = vld [vmem:[#allocation3 + $0x10] sm:$0x3f]  ;;  %s8405_s16 = sld [smem:[#allocation8 + $0x7]] }
 0x9ba   : > { %v6144_v40 = vadd.f32 %v15610_v31, %v6123_v7  ;;  %v7384_v6 = vrot.slane %v7378_v1, 5  ;;  %v7420_v63 = vmul.f32 %v13906_v54, %v7418_v44  ;;  %v7303_v49 = vsel %vm7222_vm13, %v7300_v4, %v7302_v2 }
 0x9bb   : > { %v6120_v43 = vpop.permute.xlu1 %6119  ;;  %v6160_v13 = vpop.permute.xlu0 %6159  ;;  %v7343_v15 = vsel %vm7222_vm13, %v7341_v53, %v7342_v21  ;;  %v7383_v9 = vrot.slane %v7377_v8, 5  ;;  %v7386_v55 = vrot.slane %v7379_v34, 5  ;;  %v7419_v14 = vmul.f32 %v13915_v20, %v7418_v44 }
 0x9bc   : > { %v6124_v32 = vadd.f32 %v6120_v43, %v6103_v5  ;;  %v6165_v60 = vadd.f32 %v6160_v13, %v6144_v40  ;;  %v7421_v48 = vmul.f32 %v14203_v11, %v7418_v44  ;;  %v7460_v4 = vstv %s14175_s8  ;;  %v15614_v13 = vld [vmem:[#allocation225_spill] sm:$0xff]  ;;  %s8410_s8 = sld [smem:[#allocation8 + $0xc]] }
 0x9bd   : > { %7306 = vrot.lane.b32.xlu1 %v7303_v49, %s15094_s27  ;;  %7346 = vrot.lane.b32.xlu0 %v7343_v15, %s8973_s0  ;;  %v5704_v1 = vadd.f32 %v14084_v18, %v5679_v47  ;;  %v7345_v2 = vsel %vm7222_vm13, %v7342_v21, %v7344_v29  ;;  %v7385_v23 = vsel %vm7222_vm13, %v7383_v9, %v7384_v6  ;;  %v7426_v8 = vrot.slane %v7420_v63, 5  ;;  %v15613_v47 = vld [vmem:[#allocation129_spill] sm:$0xff] }
 0x9be   : > { %v6145_v61 = vadd.f32 %v15611_v56, %v6124_v32  ;;  %v6186_v35 = vadd.f32 %v15612_v45, %v6165_v60  ;;  %v14213_v31 = vmul.f32 %v13906_v54, %v7460_v4  ;;  %v6357_v40 = vstv %s14183_s2  ;;  %v15615_v60 = vld [vmem:[#allocation235_spill] sm:$0xff]  ;;  %s8411_s2 = sld [smem:[#allocation8 + $0xd]] }
 0x9bf   : > { %v6162_v7 = vpop.permute.xlu1 %6161  ;;  %v6202_v25 = vpop.permute.xlu0 %6201  ;;  %v7387_v18 = vsel %vm7222_vm13, %v7384_v6, %v7386_v55  ;;  %v7425_v53 = vrot.slane %v7419_v14, 5  ;;  %v7461_v44 = vmul.f32 %v13915_v20, %v7460_v4  ;;  %v14221_v21 = vmul.f32 %v13906_v54, %v6357_v40 }
 0x9c0   : > { %v6166_v34 = vadd.f32 %v6162_v7, %v6145_v61  ;;  %v6207_v5 = vadd.f32 %v6202_v25, %v6186_v35  ;;  %v7428_v63 = vrot.slane %v7421_v48, 5  ;;  %v6374_v32 = vstv %s14193_s3  ;;  %v14233_v35 = vld [vmem:[#allocation3 + $0x28] sm:$0x3f]  ;;  %v15616_v48 = vld [vmem:[#allocation117_spill] sm:$0xff]  ;;  %s4369_s3 = sld [smem:[#allocation14]] }
 0x9c1   : > { %7348 = vrot.lane.b32.xlu1 %v7345_v2, %s8973_s0  ;;  %7388 = vrot.lane.b32.xlu0 %v7385_v23, %s8974_s1  ;;  %v5729_v49 = vadd.f32 %v15615_v60, %v5704_v1  ;;  %v7427_v6 = vsel %vm7222_vm13, %v7425_v53, %v7426_v8  ;;  %v6358_v55 = vmul.f32 %v13915_v20, %v6357_v40  ;;  %v7468_v45 = vrot.slane %v14213_v31, 5  ;;  %v14242_v2 = vld [vmem:[#allocation3 + $0x18] sm:$0xff]  ;;  %v14245_v23 = vld [vmem:[#allocation3 + $0x20] sm:$0xff]  ;;  %v15617_v31 = vld [vmem:[#allocation227_spill] sm:$0xff] }
 0x9c2   : > { %v6187_v43 = vadd.f32 %v15613_v47, %v6166_v34  ;;  %v6228_v29 = vadd.f32 %v15614_v13, %v6207_v5  ;;  %v7463_v14 = vmul.f32 %v14203_v11, %v7460_v4  ;;  %v14237_v7 = vmul.f32 %v14233_v35, %v15616_v48 }
 0x9c3   : > { %v6204_v15 = vpop.permute.xlu1 %6203  ;;  %v6244_v9 = vpop.permute.xlu0 %6243  ;;  %v7467_v1 = vrot.slane %v7461_v44, 5  ;;  %v6365_v25 = vrot.slane %v14221_v21, 2  ;;  %v6375_v4 = vmul.f32 %v14242_v2, %v6374_v32  ;;  %v14248_v34 = vmul.f32 %v14245_v23, %v6374_v32 }
 0x9c4   : > { %v6208_v56 = vadd.f32 %v6204_v15, %v6187_v43  ;;  %v6249_v61 = vadd.f32 %v6244_v9, %v6228_v29  ;;  %v7536_v47 = vstv %s14207_s10  ;;  %v5754_v44 = vadd.f32 %v14104_v57, %v5729_v49  ;;  %s7792_s10 = sld [smem:[#allocation12]] }
 0x9c5   : > { %7390 = vrot.lane.b32.xlu1 %v7387_v18, %s8974_s1  ;;  %7430 = vrot.lane.b32.xlu0 %v7427_v6, %s8975_s5  ;;  %v7429_v18 = vsel %vm7222_vm13, %v7426_v8, %v7428_v63  ;;  %v6364_v29 = vrot.slane %v6358_v55, 2  ;;  %v7470_v60 = vrot.slane %v7463_v14, 5  ;;  %v14256_v15 = vmul.f32 %v13906_v54, %v7536_v47  ;;  %v15618_v14 = vld [vmem:[#allocation229_spill] sm:$0xff] }
 0x9c6   : > { %v6229_v5 = vadd.f32 %v13338_v50, %v6208_v56  ;;  %v6270_v53 = vadd.f32 %v15617_v31, %v6249_v61  ;;  %v7469_v50 = vsel %vm7222_vm13, %v7467_v1, %v7468_v45  ;;  %v5868_v56 = vrot.slane %v14237_v7, 4  ;;  %v15619_v1 = vld [vmem:[#allocation237_spill] sm:$0xff] }
 0x9c7   : > { %v6246_v43 = vpop.permute.xlu1 %6245  ;;  %v6286_v13 = vpop.permute.xlu0 %6285  ;;  %v6366_v57 = vsel %vm4613_vm10, %v6364_v29, %v6365_v25  ;;  %v6381_v8 = vrot.slane %v6375_v4, 2  ;;  %v6382_v63 = vrot.slane %v14248_v34, 2  ;;  %v7537_v49 = vmul.f32 %v13915_v20, %v7536_v47  ;;  %v15620_v29 = vld [vmem:[#allocation209_spill] sm:$0xff] }
 0x9c8   : > { %v6250_v9 = vadd.f32 %v6246_v43, %v6229_v5  ;;  %v6291_v6 = vadd.f32 %v6286_v13, %v6270_v53  ;;  %v6360_v48 = vmul.f32 %v14203_v11, %v6357_v40  ;;  %v7578_v7 = vstv %s14226_s11  ;;  %s8566_s11 = sld [smem:[#allocation14 + $0x3]] }
 0x9c9   : > { %7432 = vrot.lane.b32.xlu1 %v7429_v18, %s8975_s5  ;;  %7472 = vrot.lane.b32.xlu0 %v7469_v50, %s8976_s9  ;;  %v5779_v5 = vadd.f32 %v15619_v1, %v5754_v44  ;;  %v7471_v18 = vsel %vm7222_vm13, %v7468_v45, %v7470_v60  ;;  %v7544_v4 = vrot.slane %v14256_v15, 6  ;;  %v7539_v34 = vmul.f32 %v14203_v11, %v7536_v47  ;;  %v15622_v15 = vld [vmem:[#allocation230_spill] sm:$0xff] }
 0x9ca   : > { %v6271_v55 = vadd.f32 %v13352_v27, %v6250_v9  ;;  %v6312_v61 = vadd.f32 %v15618_v14, %v6291_v6  ;;  %v15621_v50 = vrot.slane %v15620_v29, 4  ;;  %v7580_v9 = vmul.f32 %v13906_v54, %v7578_v7 }
 0x9cb   : > { %v6288_v31 = vpop.permute.xlu1 %6287  ;;  %v6328_v53 = vpop.permute.xlu0 %6327  ;;  %v6383_v40 = vsel %vm4613_vm10, %v6381_v8, %v6382_v63  ;;  %v6377_v45 = vmul.f32 %v14233_v35, %v6374_v32  ;;  %v7543_v44 = vrot.slane %v7537_v49, 6  ;;  %v7579_v47 = vmul.f32 %v13915_v20, %v7578_v7 }
 0x9cc   : > { %v6292_v43 = vadd.f32 %v6288_v31, %v6271_v55  ;;  %v6333_v13 = vadd.f32 %v6328_v53, %v6312_v61  ;;  %v5869_v27 = vsel %vm5651_vm12, %v15621_v50, %v5868_v56  ;;  %v6367_v55 = vrot.slane %v6360_v48, 2  ;;  %v15623_v50 = vld [vmem:[#allocation126_spill] sm:$0xff] }
 0x9cd   : > { %7474 = vrot.lane.b32.xlu1 %v7471_v18, %s8976_s9  ;;  %5872 = vrot.lane.b32.xlu0 %v5869_v27, %s8974_s1  ;;  %v7581_v14 = vmul.f32 %v14203_v11, %v7578_v7  ;;  %v5804_v61 = vadd.f32 %v14129_v10, %v5779_v5  ;;  %v7545_v31 = vsel %vm3650_vm8, %v7543_v44, %v7544_v4  ;;  %v7546_v53 = vrot.slane %v7539_v34, 6 }
 0x9ce   : > { %v6313_v60 = vadd.f32 %v13366_v58, %v6292_v43  ;;  %v6354_v6 = vadd.f32 %v15622_v15, %v6333_v13  ;;  %v7620_v32 = vstv %s14258_s17  ;;  %v7586_v58 = vrot.slane %v7580_v9, 6  ;;  %s15716_s17 = sshll.u32 %s9211_s29, 8 }
 0x9cf   : > { %v6330_v8 = vpop.permute.xlu1 %6329  ;;  %v14292_v1 = vpop.permute.xlu0 %7611  ;;  %v7622_v43 = vmul.f32 %v13906_v54, %v7620_v32  ;;  %v6384_v48 = vrot.slane %v6377_v45, 2  ;;  %v7585_v10 = vrot.slane %v7579_v47, 6  ;;  %v7623_v7 = vmul.f32 %v14203_v11, %v7620_v32 }
 0x9d0   : > { %v6371_v49 = vadd.f32 %v6366_v57, %v6354_v6  ;;  %v6334_v18 = vadd.f32 %v6330_v8, %v6313_v60  ;;  %v7662_v5 = vstv %s14269_s18  ;;  %v7588_v29 = vrot.slane %v7581_v14, 6  ;;  %s14606_s18 = scalar_lea.vmem [#allocation15], %s15716_s17 }
 0x9d1   : > { %5874 = vrot.lane.b32.xlu1 %v5868_v56, %s8974_s1  ;;  %7548 = vrot.lane.b32.xlu0 %v7545_v31, %s15092_s4  ;;  %v7621_v57 = vmul.f32 %v13915_v20, %v7620_v32  ;;  %v5829_v27 = vadd.f32 %v15623_v50, %v5804_v61  ;;  %v6368_v56 = vsel %vm4613_vm10, %v6365_v25, %v6367_v55  ;;  %v7628_v15 = vrot.slane %v7622_v43, 6  ;;  %v15624_v55 = vld [vmem:[#allocation197_spill] sm:$0xff] }
 0x9d2   : > { %v6388_v34 = vadd.f32 %v6383_v40, %v6371_v49  ;;  %v6355_v13 = vadd.f32 %v13380_v62, %v6334_v18  ;;  %v7547_v44 = vsel %vm3650_vm8, %v7544_v4, %v7546_v53  ;;  %v14315_v47 = vmul.f32 %v13906_v54, %v7662_v5 }
 0x9d3   : > { %v14311_v9 = vpop.permute.xlu1 %7613  ;;  %v6404_v45 = vpop.permute.xlu0 %6403  ;;  %v7587_v60 = vsel %vm3650_vm8, %v7585_v10, %v7586_v58  ;;  %v6385_v21 = vsel %vm4613_vm10, %v6382_v63, %v6384_v48  ;;  %v7630_v25 = vrot.slane %v7623_v7, 6  ;;  %v7663_v4 = vmul.f32 %v13915_v20, %v7662_v5 }
 0x9d4   : > { %v6372_v62 = vadd.f32 %v6368_v56, %v6355_v13  ;;  %v6409_v40 = vadd.f32 %v6404_v45, %v6388_v34  ;;  %v7589_v61 = vsel %vm3650_vm8, %v7586_v58, %v7588_v29  ;;  %v7627_v8 = vrot.slane %v7621_v57, 6  ;;  %v15625_v29 = vld [vmem:[#allocation138_spill] sm:$0xff] }
 0x9d5   : > { %7550 = vrot.lane.b32.xlu1 %v7547_v44, %s15092_s4  ;;  %7590 = vrot.lane.b32.xlu0 %v7587_v60, %s15094_s27  ;;  %v5854_v31 = vadd.f32 %v14151_v0, %v5829_v27  ;;  %v7670_v32 = vrot.slane %v14315_v47, 6  ;;  %v7665_v49 = vmul.f32 %v14203_v11, %v7662_v5  ;;  %v7704_v18 = vstv %s14296_s19  ;;  %s14342_s4 = sld [smem:[#allocation11 + $0x2a]]  ;;  %v15626_v27 = vld [vmem:[#allocation127_spill] sm:$0xff]  ;;  %s8573_s19 = sshll.u32 %s9066_s24, 12 }
 0x9d6   : > { %v6389_v6 = vadd.f32 %v6385_v21, %v6372_v62  ;;  %v6430_v14 = vadd.f32 %v15624_v55, %v6409_v40  ;;  %v7629_v10 = vsel %vm3650_vm8, %v7627_v8, %v7628_v15  ;;  %v7706_v7 = vmul.f32 %v13906_v54, %v7704_v18  ;;  %v15627_v55 = vld [vmem:[#allocation195_spill] sm:$0xff]  ;;  %s8187_s24 = scalar_lea.sflag [#allocation6], %s9211_s29 }
 0x9d7   : > { %v6406_v53 = vpop.permute.xlu1 %6405  ;;  %v6446_v63 = vpop.permute.xlu0 %6445  ;;  %v7631_v0 = vsel %vm3650_vm8, %v7628_v15, %v7630_v25  ;;  %v7669_v58 = vrot.slane %v7663_v4, 6  ;;  %v7746_v34 = vstv %s14303_s20  ;;  %v7705_v57 = vmul.f32 %v13915_v20, %v7704_v18  ;;  %s8200_s20 = sshll.u32 %s14606_s18, 4  ;;  %s14733_s20 = int_to_ptr.vmem [resolvable:$true] %s8200_s20 }
 0x9d8   : > { %v6410_v43 = vadd.f32 %v6406_v53, %v6389_v6  ;;  %v6451_v48 = vadd.f32 %v6446_v63, %v6430_v14  ;;  %v7707_v50 = vmul.f32 %v14203_v11, %v7704_v18  ;;  %v5879_v56 = vadd.f32 %v15626_v27, %v5854_v31 }
 0x9d9   : > { %7592 = vrot.lane.b32.xlu1 %v7589_v61, %s15094_s27  ;;  %7632 = vrot.lane.b32.xlu0 %v7629_v10, %s8973_s0  ;;  %v7671_v47 = vsel %vm3650_vm8, %v7669_v58, %v7670_v32  ;;  %v7672_v62 = vrot.slane %v7665_v49, 6  ;;  %v7748_v40 = vmul.f32 %v13906_v54, %v7746_v34  ;;  %v14348_v60 = vstv %s14317_s22  ;;  %s14350_s27 = sld [smem:[#allocation12 + $0x1]] }
 0x9da   : > { %v6431_v13 = vadd.f32 %v13394_v59, %v6410_v43  ;;  %v6472_v5 = vadd.f32 %v15625_v29, %v6451_v48  ;;  %v7712_v21 = vrot.slane %v7706_v7, 6  ;;  %v7747_v25 = vmul.f32 %v13915_v20, %v7746_v34 }
 0x9db   : > { %v6448_v45 = vpop.permute.xlu1 %6447  ;;  %v6488_v44 = vpop.permute.xlu0 %6487  ;;  %v7749_v4 = vmul.f32 %v14203_v11, %v7746_v34  ;;  %v7767_v6 = vstv %s14324_s30  ;;  %v7711_v61 = vrot.slane %v7705_v57, 6  ;;  %v7714_v8 = vrot.slane %v7707_v50, 6 }
 0x9dc   : > { %v6452_v59 = vadd.f32 %v6448_v45, %v6431_v13  ;;  %v6493_v15 = vadd.f32 %v6488_v44, %v6472_v5  ;;  %v5883_v31 = vadd.f32 %v14348_v60, %v5879_v56  ;;  %v7754_v49 = vrot.slane %v7748_v40, 6  ;;  %v15628_v13 = vld [vmem:[#allocation104_spill] sm:$0xff]  ;;  %v14374_v44 = vld [vmem:[#allocation3 + $0x8] sm:$0xff] }
 0x9dd   : > { %7634 = vrot.lane.b32.xlu1 %v7631_v0, %s8973_s0  ;;  %7674 = vrot.lane.b32.xlu0 %v7671_v47, %s8974_s1  ;;  %v7769_v18 = vmul.f32 %v14245_v23, %v7767_v6  ;;  %v7673_v20 = vsel %vm3650_vm8, %v7670_v32, %v7672_v62  ;;  %v7713_v10 = vsel %vm3650_vm8, %v7711_v61, %v7712_v21  ;;  %v7756_v7 = vrot.slane %v7749_v4, 6  ;;  %s8977_s0 = smov 1  }
 0x9de   : > { %v6473_v54 = vadd.f32 %v13408_v46, %v6452_v59  ;;  %v6514_v14 = vadd.f32 %v15627_v55, %v6493_v15  ;;  %v7753_v46 = vrot.slane %v7747_v25, 6  ;;  %v7768_v0 = vmul.f32 %v14242_v2, %v7767_v6  ;;  %v14383_v15 = vld [vmem:[#allocation3] sm:$0xff] }
 0x9df   : > { %v6490_v53 = vpop.permute.xlu1 %6489  ;;  %v6530_v63 = vpop.permute.xlu0 %6529  ;;  %v7770_v58 = vmul.f32 %v14233_v35, %v7767_v6  ;;  %v7715_v32 = vsel %vm3650_vm8, %v7712_v21, %v7714_v8  ;;  %v6643_v5 = vstv %s14342_s4  ;;  %v5886_v57 = vmax.f32 %v5883_v31, 0.0  ;;  %v15629_v6 = vld [vmem:[#allocation140_spill] sm:$0xff]  ;;  %s15775_s4 = sld [smem:[#allocation265_spill]] }
 0x9e0   : > { %v6494_v43 = vadd.f32 %v6490_v53, %v6473_v54  ;;  %v6535_v48 = vadd.f32 %v6530_v63, %v6514_v14  ;;  %v7755_v56 = vsel %vm3650_vm8, %v7753_v46, %v7754_v49  ;;  %v7775_v45 = vrot.slane %v7769_v18, 6 }
 0x9e1   : > { %7676 = vrot.lane.b32.xlu1 %v7673_v20, %s8974_s1  ;;  %7716 = vrot.lane.b32.xlu0 %v7713_v10, %s8975_s5  ;;  %v6645_v47 = vmul.f32 %v14374_v44, %v6643_v5  ;;  %v14378_v59 = vstv %s14350_s27  ;;  %v6644_v21 = vmul.f32 %v14383_v15, %v6643_v5  ;;  %v7757_v55 = vsel %vm3650_vm8, %v7754_v49, %v7756_v7  ;;  %v15630_v7 = vld [vmem:[#allocation203_spill] sm:$0xff]  ;;  %s8522_s1 = sld [smem:[#allocation11 + $0x38]] }
 0x9e2   : > { %v6515_v34 = vadd.f32 %v13422_v37, %v6494_v43  ;;  %v6556_v29 = vadd.f32 %v15628_v13, %v6535_v48  ;;  %v6660_v37 = vstv %s14352_s15  ;;  %v7774_v14 = vrot.slane %v7768_v0, 6  ;;  %s8873_s15 = scalar_lea.vmem %s14733_s20, 4096 }
 0x9e3   : > { %v6532_v50 = vpop.permute.xlu1 %6531  ;;  %v6572_v27 = vpop.permute.xlu0 %6571  ;;  %v6662_v25 = vmul.f32 %v14245_v23, %v6660_v37  ;;  %v14391_v31 = vmul.f32 %v14378_v59, %v5886_v57  ;;  %v6651_v53 = vrot.slane %v6645_v47, 3  ;;  %v6661_v63 = vmul.f32 %v14242_v2, %v6660_v37  ;;  %p8874_p13 = scmp.ne.s32.totalorder %s14733_s20, %s8873_s15 }
 0x9e4   : > { %v6536_v62 = vadd.f32 %v6532_v50, %v6515_v34  ;;  %v6577_v40 = vadd.f32 %v6572_v27, %v6556_v29  ;;  %v6646_v18 = vmul.f32 %v14203_v11, %v6643_v5  ;;  %v7776_v20 = vsel %vm3650_vm8, %v7774_v14, %v7775_v45 }
 0x9e5   : > { %7718 = vrot.lane.b32.xlu1 %v7715_v32, %s8975_s5  ;;  %7758 = vrot.lane.b32.xlu0 %v7755_v56, %s8976_s9  ;;  %v6650_v49 = vrot.slane %v6644_v21, 3  ;;  %v6668_v10 = vrot.slane %v6662_v25, 3  ;;  %v6663_v46 = vmul.f32 %v14233_v35, %v6660_v37  ;;  %v7805_v32 = vrot.slane %v14391_v31, 7  ;;  %s8523_s5 = sld [smem:[#allocation11 + $0x39]]  ;;  %s14731_s27 = scalar_lea.hbm %s15775_s4, %s8573_s19 }
 0x9e6   : > { %v6557_v4 = vadd.f32 %v13436_v19, %v6536_v62  ;;  %v6598_v54 = vadd.f32 %v15629_v6, %v6577_v40  ;;  %v7777_v19 = vrot.slane %v7770_v58, 6  ;;  %v6667_v58 = vrot.slane %v6661_v63, 3  ;;  %p8875_p4 = pnand %p8874_p13, %p15776_p2 }
 0x9e7   : > { %v6574_v61 = vpop.permute.xlu1 %6573  ;;  %v6614_v8 = vpop.permute.xlu0 %6613  ;;  %v6652_v5 = vsel %vm5412_vm11, %v6650_v49, %v6651_v53  ;;  %v6653_v57 = vrot.slane %v6646_v18, 3  ;;  %v6670_v47 = vrot.slane %v6663_v46, 3 }
 0x9e8   : > { %v6578_v43 = vadd.f32 %v6574_v61, %v6557_v4  ;;  %v6619_v48 = vadd.f32 %v6614_v8, %v6598_v54  ;;  %v7778_v27 = vsel %vm3650_vm8, %v7775_v45, %v7777_v19  ;;  %p8876_p5 = pneg %p8875_p4 }
 0x9e9   : > { %7760 = vrot.lane.b32.xlu1 %v7757_v55, %s8976_s9  ;;  %7779 = vrot.lane.b32.xlu0 %v7776_v20, %s8976_s9  ;;  %v6654_v25 = vsel %vm5412_vm11, %v6651_v53, %v6653_v57  ;;  %v6671_v6 = vsel %vm5412_vm11, %v6668_v10, %v6670_v47  ;;  %v15631_v55 = vld [vmem:[#allocation201_spill] sm:$0xff]  ;;  %v15634_v57 = vld [vmem:[#allocation232_spill] sm:$0xff] }
 0x9ea   : > { %v6640_v0 = vadd.f32 %v15630_v7, %v6619_v48  ;;  %v6599_v34 = vadd.f32 %v13450_v16, %v6578_v43  ;;  %v6669_v16 = vsel %vm5412_vm11, %v6667_v58, %v6668_v10  ;;  %v15633_v10 = vld [vmem:[#allocation210_spill] sm:$0xff] }
 0x9eb   : > { %v6616_v13 = vpop.permute.xlu1 %6615  ;;  %v14401_v29 = vpop.permute.xlu0 %7653 }
 0x9ec   : > { %v6620_v50 = vadd.f32 %v6616_v13, %v6599_v34  ;;  %v6657_v56 = vadd.f32 %v6652_v5, %v6640_v0 }
 0x9ed   : > { %7781 = vrot.lane.b32.xlu1 %v7778_v27, %s8976_s9  ;;  %7810 = vrot.lane.b32.xlu0 %v7805_v32, %s8977_s0  ;;  %s8536_s9 = sld [smem:[#allocation11 + $0x46]] }
 0x9ee   : > { %v6641_v62 = vadd.f32 %v13464_v24, %v6620_v50  ;;  %v6674_v40 = vadd.f32 %v6669_v16, %v6657_v56  ;;  %v15632_v24 = vld [vmem:[#allocation152_spill] sm:$0xff]  ;;  %v6929_v50 = vstv %s8522_s1 }
 0x9ef   : > { %v14412_v37 = vpop.permute.xlu1 %7655  ;;  %v6690_v21 = vpop.permute.xlu0 %6689  ;;  %v6931_v16 = vmul.f32 %v14374_v44, %v6929_v50 }
 0x9f0   : > { %v6695_v45 = vadd.f32 %v6690_v21, %v6674_v40  ;;  %v6658_v4 = vadd.f32 %v6654_v25, %v6641_v62  ;;  %v6946_v40 = vstv %s8523_s5 }
 0x9f1   : > { %v6948_v21 = vmul.f32 %v14245_v23, %v6946_v40 }
 0x9f2   : > { %v6675_v54 = vadd.f32 %v6671_v6, %v6658_v4  ;;  %v6716_v14 = vadd.f32 %v15631_v55, %v6695_v45  ;;  %v15635_v45 = vld [vmem:[#allocation234_spill] sm:$0xff]  ;;  %v6947_v55 = vmul.f32 %v14242_v2, %v6946_v40 }
 0x9f3   : > { %v6692_v61 = vpop.permute.xlu1 %6691  ;;  %v6732_v8 = vpop.permute.xlu0 %6731 }
 0x9f4   : > { %v6696_v63 = vadd.f32 %v6692_v61, %v6675_v54  ;;  %v6737_v18 = vadd.f32 %v6732_v8, %v6716_v14  ;;  %v6937_v54 = vrot.slane %v6931_v16, 4  ;;  %v6932_v14 = vmul.f32 %v14203_v11, %v6929_v50  ;;  %v15637_v16 = vld [vmem:[#allocation238_spill] sm:$0xff] }
 0x9f6   : > { %v6717_v43 = vadd.f32 %v13478_v22, %v6696_v63  ;;  %v6758_v48 = vadd.f32 %v15632_v24, %v6737_v18  ;;  %v6954_v18 = vrot.slane %v6948_v21, 4  ;;  %v15636_v24 = vld [vmem:[#allocation236_spill] sm:$0xff] }
 0x9f7   : > { %v6734_v20 = vpop.permute.xlu1 %6733  ;;  %v6774_v19 = vpop.permute.xlu0 %6773 }
 0x9f8   : > { %v6738_v49 = vadd.f32 %v6734_v20, %v6717_v43  ;;  %v6779_v53 = vadd.f32 %v6774_v19, %v6758_v48  ;;  %v6949_v43 = vmul.f32 %v14233_v35, %v6946_v40 }
 0x9fa   : > { %v6759_v46 = vadd.f32 %v13492_v12, %v6738_v49  ;;  %v6800_v7 = vadd.f32 %v15633_v10, %v6779_v53  ;;  %v6930_v12 = vmul.f32 %v14383_v15, %v6929_v50  ;;  %v6953_v53 = vrot.slane %v6947_v55, 4 }
 0x9fb   : > { %v6776_v0 = vpop.permute.xlu1 %6775  ;;  %v6816_v34 = vpop.permute.xlu0 %6815 }
 0x9fc   : > { %v6780_v13 = vadd.f32 %v6776_v0, %v6759_v46  ;;  %v6821_v5 = vadd.f32 %v6816_v34, %v6800_v7  ;;  %v6936_v63 = vrot.slane %v6930_v12, 4  ;;  %v6939_v46 = vrot.slane %v6932_v14, 4  ;;  %v15639_v14 = vld [vmem:[#allocation240_spill] sm:$0xff] }
 0x9fd   : > { %v6955_v0 = vsel %vm5651_vm12, %v6953_v53, %v6954_v18  ;;  %v6956_v34 = vrot.slane %v6949_v43, 4 }
 0x9fe   : > { %v6801_v58 = vadd.f32 %v13506_v41, %v6780_v13  ;;  %v6842_v22 = vadd.f32 %v15634_v57, %v6821_v5  ;;  %v6938_v49 = vsel %vm5651_vm12, %v6936_v63, %v6937_v54 }
 0x9ff   : > { %v6818_v27 = vpop.permute.xlu1 %6817  ;;  %v6858_v56 = vpop.permute.xlu0 %6857 }
 0xa00   : > { %v6822_v47 = vadd.f32 %v6818_v27, %v6801_v58  ;;  %v6863_v62 = vadd.f32 %v6858_v56, %v6842_v22  ;;  %v6957_v27 = vsel %vm5651_vm12, %v6954_v18, %v6956_v34  ;;  %v15641_v34 = vld [vmem:[#allocation105_spill] sm:$0xff] }
 0xa02   : > { %v6843_v25 = vadd.f32 %v13520_v28, %v6822_v47  ;;  %v6884_v4 = vadd.f32 %v15635_v45, %v6863_v62 }
 0xa03   : > { %v6860_v6 = vpop.permute.xlu1 %6859  ;;  %v6900_v41 = vpop.permute.xlu0 %6899 }
 0xa04   : > { %v6864_v61 = vadd.f32 %v6860_v6, %v6843_v25  ;;  %v6905_v8 = vadd.f32 %v6900_v41, %v6884_v4 }
 0xa06   : > { %v6926_v48 = vadd.f32 %v15636_v24, %v6905_v8  ;;  %v6885_v20 = vadd.f32 %v13533_v30, %v6864_v61  ;;  %v6940_v30 = vsel %vm5651_vm12, %v6937_v54, %v6939_v46 }
 0xa07   : > { %v6902_v28 = vpop.permute.xlu1 %6901  ;;  %v14433_v19 = vpop.permute.xlu0 %7695 }
 0xa08   : > { %v6906_v10 = vadd.f32 %v6902_v28, %v6885_v20  ;;  %v6943_v7 = vadd.f32 %v6938_v49, %v6926_v48  ;;  %v15640_v48 = vld [vmem:[#allocation241_spill] sm:$0xff]  ;;  %v7215_v20 = vstv %s8536_s9 }
 0xa09   : > { %v7217_v53 = vmul.f32 %v14374_v44, %v7215_v20 }
 0xa0a   : > { %v6927_v13 = vadd.f32 %v13546_v38, %v6906_v10  ;;  %v6960_v5 = vadd.f32 %v6955_v0, %v6943_v7  ;;  %v15638_v38 = vld [vmem:[#allocation239_spill] sm:$0xff]  ;;  %v7233_v7 = vstv %s8537_s25 }
 0xa0b   : > { %v14438_v58 = vpop.permute.xlu1 %7697  ;;  %v6976_v57 = vpop.permute.xlu0 %6975  ;;  %v7235_v0 = vmul.f32 %v14245_v23, %v7233_v7 }
 0xa0c   : > { %v6981_v22 = vadd.f32 %v6976_v57, %v6960_v5  ;;  %v6944_v50 = vadd.f32 %v6940_v30, %v6927_v13  ;;  %v15642_v5 = vld [vmem:[#allocation242_spill] sm:$0xff] }
 0xa0e   : > { %v6961_v56 = vadd.f32 %v6957_v27, %v6944_v50  ;;  %v7002_v47 = vadd.f32 %v15637_v16, %v6981_v22  ;;  %v7224_v22 = vrot.slane %v7217_v53, 5  ;;  %v7234_v50 = vmul.f32 %v14242_v2, %v7233_v7 }
 0xa0f   : > { %v6978_v62 = vpop.permute.xlu1 %6977  ;;  %v7018_v40 = vpop.permute.xlu0 %7017  ;;  %v7218_v27 = vmul.f32 %v14203_v11, %v7215_v20 }
 0xa10   : > { %v6982_v12 = vadd.f32 %v6978_v62, %v6961_v56  ;;  %v7023_v21 = vadd.f32 %v7018_v40, %v7002_v47  ;;  %v7241_v62 = vrot.slane %v7235_v0, 5  ;;  %v7236_v40 = vmul.f32 %v14233_v35, %v7233_v7 }
 0xa12   : > { %v7003_v25 = vadd.f32 %v13559_v26, %v6982_v12  ;;  %v7044_v45 = vadd.f32 %v15638_v38, %v7023_v21  ;;  %v15643_v12 = vld [vmem:[#allocation130_spill] sm:$0xff] }
 0xa13   : > { %v7020_v4 = vpop.permute.xlu1 %7019  ;;  %v7060_v6 = vpop.permute.xlu0 %7059 }
 0xa14   : > { %v7024_v41 = vadd.f32 %v7020_v4, %v7003_v25  ;;  %v7065_v54 = vadd.f32 %v7060_v6, %v7044_v45  ;;  %v15644_v25 = vld [vmem:[#allocation107_spill] sm:$0xff] }
 0xa16   : > { %v7045_v55 = vadd.f32 %v13575_v17, %v7024_v41  ;;  %v7086_v61 = vadd.f32 %v15639_v14, %v7065_v54  ;;  %v7216_v17 = vmul.f32 %v14383_v15, %v7215_v20  ;;  %v7240_v41 = vrot.slane %v7234_v50, 5  ;;  %v15651_v50 = vld [vmem:[#allocation213_spill] sm:$0xff] }
 0xa17   : > { %v7062_v8 = vpop.permute.xlu1 %7061  ;;  %v7102_v63 = vpop.permute.xlu0 %7101  ;;  %v7226_v54 = vrot.slane %v7218_v27, 5 }
 0xa18   : > { %v7066_v18 = vadd.f32 %v7062_v8, %v7045_v55  ;;  %v7107_v43 = vadd.f32 %v7102_v63, %v7086_v61  ;;  %v7223_v47 = vrot.slane %v7216_v17, 5  ;;  %v7242_v61 = vsel %vm7222_vm13, %v7240_v41, %v7241_v62  ;;  %v15645_v63 = vld [vmem:[#allocation173_spill] sm:$0xff]  ;;  %v15648_v17 = vld [vmem:[#allocation112_spill] sm:$0xff] }
 0xa19   : > { %v7243_v8 = vrot.slane %v7236_v40, 5  ;;  %v7227_v53 = vsel %vm7222_vm13, %v7224_v22, %v7226_v54  ;;  %v15656_v54 = vld [vmem:[#allocation156_spill] sm:$0xff] }
 0xa1a   : > { %v7087_v24 = vadd.f32 %v13588_v39, %v7066_v18  ;;  %v7128_v26 = vadd.f32 %v15640_v48, %v7107_v43  ;;  %v7225_v6 = vsel %vm7222_vm13, %v7223_v47, %v7224_v22  ;;  %v15646_v18 = vrot.slane %v14053_v51, 4  ;;  %v15647_v48 = vld [vmem:[#allocation109_spill] sm:$0xff]  ;;  %v15653_v47 = vld [vmem:[#allocation244_spill] sm:$0xff] }
 0xa1b   : > { %v7104_v28 = vpop.permute.xlu1 %7103  ;;  %v7144_v49 = vpop.permute.xlu0 %7143  ;;  %v7244_v7 = vsel %vm7222_vm13, %v7241_v62, %v7243_v8 }
 0xa1c   : > { %v7108_v46 = vadd.f32 %v7104_v28, %v7087_v24  ;;  %v7149_v10 = vadd.f32 %v7144_v49, %v7128_v26  ;;  %v5681_v43 = vadd.f32 %v15646_v18, %v15645_v63  ;;  %v5705_v24 = vadd.f32 %v14102_v36, %v14172_v42 }
 0xa1e   : > { %v7129_v13 = vadd.f32 %v15641_v34, %v7108_v46  ;;  %v7170_v57 = vadd.f32 %v15642_v5, %v7149_v10  ;;  %v5706_v0 = vadd.f32 %v15648_v17, %v5681_v43  ;;  %v15649_v34 = vld [vmem:[#allocation220_spill] sm:$0xff]  ;;  %v15650_v5 = vld [vmem:[#allocation243_spill] sm:$0xff]  ;;  %v7502_v43 = vstv %s8550_s26 }
 0xa1f   : > { %v7146_v30 = vpop.permute.xlu1 %7145  ;;  %v7186_v39 = vpop.permute.xlu0 %7185  ;;  %v5730_v51 = vadd.f32 %v15649_v34, %v5705_v24  ;;  %v15658_v24 = vld [vmem:[#allocation215_spill] sm:$0xff]  ;;  %v7504_v17 = vmul.f32 %v14374_v44, %v7502_v43 }
 0xa20   : > { %v7150_v56 = vadd.f32 %v7146_v30, %v7129_v13  ;;  %v7191_v16 = vadd.f32 %v7186_v39, %v7170_v57  ;;  %v5731_v27 = vadd.f32 %v15651_v50, %v5706_v0  ;;  %v15664_v50 = vld [vmem:[#allocation247_spill] sm:$0xff] }
 0xa21   : > { %v5755_v22 = vadd.f32 %v14127_v52, %v5730_v51  ;;  %v7519_v51 = vstv %s8551_s6 }
 0xa22   : > { %v7212_v21 = vadd.f32 %v15643_v12, %v7191_v16  ;;  %v7171_v38 = vadd.f32 %v15644_v25, %v7150_v56  ;;  %v15652_v56 = vld [vmem:[#allocation111_spill] sm:$0xff] }
 0xa23   : > { %v7188_v45 = vpop.permute.xlu1 %7187  ;;  %v14459_v4 = vpop.permute.xlu0 %7737 }
 0xa24   : > { %v7192_v55 = vadd.f32 %v7188_v45, %v7171_v38  ;;  %v7230_v14 = vadd.f32 %v7225_v6, %v7212_v21  ;;  %v15654_v38 = vld [vmem:[#allocation114_spill] sm:$0xff]  ;;  %v15655_v6 = vld [vmem:[#allocation123_spill] sm:$0xff] }
 0xa25   : > { %v5756_v45 = vadd.f32 %v15654_v38, %v5731_v27  ;;  %v5780_v41 = vadd.f32 %v15655_v6, %v5755_v22  ;;  %v7522_v38 = vmul.f32 %v14233_v35, %v7519_v51 }
 0xa26   : > { %v7213_v26 = vadd.f32 %v15647_v48, %v7192_v55  ;;  %v7247_v20 = vadd.f32 %v7242_v61, %v7230_v14  ;;  %v15657_v14 = vld [vmem:[#allocation245_spill] sm:$0xff] }
 0xa27   : > { %v14469_v28 = vpop.permute.xlu1 %7739  ;;  %v7263_v49 = vpop.permute.xlu0 %7262  ;;  %v5781_v48 = vadd.f32 %v15658_v24, %v5756_v45  ;;  %v15665_v45 = vld [vmem:[#allocation217_spill] sm:$0xff] }
 0xa28   : > { %v7268_v46 = vadd.f32 %v7263_v49, %v7247_v20  ;;  %v7231_v10 = vadd.f32 %v7227_v53, %v7213_v26  ;;  %v5805_v26 = vadd.f32 %v14149_v33, %v5780_v41  ;;  %v15659_v20 = vld [vmem:[#allocation157_spill] sm:$0xff]  ;;  %v15660_v53 = vld [vmem:[#allocation246_spill] sm:$0xff] }
 0xa29   : > { %v15663_v33 = vld [vmem:[#allocation113_spill] sm:$0xff] }
 0xa2a   : > { %v7248_v13 = vadd.f32 %v7244_v7, %v7231_v10  ;;  %v7289_v57 = vadd.f32 %v15650_v5, %v7268_v46  ;;  %v7521_v5 = vmul.f32 %v14245_v23, %v7519_v51 }
 0xa2b   : > { %v7265_v36 = vpop.permute.xlu1 %7264  ;;  %v7305_v42 = vpop.permute.xlu0 %7304 }
 0xa2c   : > { %v7269_v30 = vadd.f32 %v7265_v36, %v7248_v13  ;;  %v7310_v39 = vadd.f32 %v7305_v42, %v7289_v57  ;;  %v7503_v13 = vmul.f32 %v14383_v15, %v7502_v43  ;;  %v15661_v57 = vld [vmem:[#allocation169_spill] sm:$0xff] }
 0xa2d   : > { %v5806_v36 = vadd.f32 %v15661_v57, %v5781_v48  ;;  %v15662_v42 = vld [vmem:[#allocation221_spill] sm:$0xff] }
 0xa2e   : > { %v7290_v16 = vadd.f32 %v15652_v56, %v7269_v30  ;;  %v7331_v62 = vadd.f32 %v15653_v47, %v7310_v39  ;;  %v5830_v30 = vadd.f32 %v15662_v42, %v5805_v26  ;;  %v7520_v47 = vmul.f32 %v14242_v2, %v7519_v51 }
 0xa2f   : > { %v7307_v40 = vpop.permute.xlu1 %7306  ;;  %v7347_v12 = vpop.permute.xlu0 %7346  ;;  %v5831_v6 = vadd.f32 %v15665_v45, %v5806_v36 }
 0xa30   : > { %v7311_v21 = vadd.f32 %v7307_v40, %v7290_v16  ;;  %v7352_v25 = vadd.f32 %v7347_v12, %v7331_v62  ;;  %v7510_v16 = vrot.slane %v7504_v17, 6  ;;  %v7505_v62 = vmul.f32 %v14203_v11, %v7502_v43 }
 0xa31   : > { %v5855_v41 = vadd.f32 %v14177_v3, %v5830_v30 }
 0xa32   : > { %v7332_v55 = vadd.f32 %v15656_v54, %v7311_v21  ;;  %v7373_v61 = vadd.f32 %v15657_v14, %v7352_v25  ;;  %v7509_v21 = vrot.slane %v7503_v13, 6  ;;  %v7527_v25 = vrot.slane %v7521_v5, 6  ;;  %v15666_v54 = vld [vmem:[#allocation248_spill] sm:$0xff]  ;;  %v15667_v14 = vld [vmem:[#allocation115_spill] sm:$0xff] }
 0xa33   : > { %v7349_v8 = vpop.permute.xlu1 %7348  ;;  %v7389_v63 = vpop.permute.xlu0 %7388  ;;  %v7512_v11 = vrot.slane %v7505_v62, 6 }
 0xa34   : > { %v7353_v52 = vadd.f32 %v7349_v8, %v7332_v55  ;;  %v7394_v18 = vadd.f32 %v7389_v63, %v7373_v61 }
 0xa36   : > { %v7374_v49 = vadd.f32 %v15659_v20, %v7353_v52  ;;  %v7415_v46 = vadd.f32 %v15660_v53, %v7394_v18  ;;  %v7511_v52 = vsel %vm3650_vm8, %v7509_v21, %v7510_v16  ;;  %v7526_v18 = vrot.slane %v7520_v47, 6 }
 0xa37   : > { %v7391_v10 = vpop.permute.xlu1 %7390  ;;  %v7431_v7 = vpop.permute.xlu0 %7430  ;;  %v7529_v20 = vrot.slane %v7522_v38, 6 }
 0xa38   : > { %v7395_v0 = vadd.f32 %v7391_v10, %v7374_v49  ;;  %v7436_v34 = vadd.f32 %v7431_v7, %v7415_v46  ;;  %v7528_v26 = vsel %vm3650_vm8, %v7526_v18, %v7527_v25  ;;  %v15668_v49 = vld [vmem:[#allocation116_spill] sm:$0xff]  ;;  %v15669_v46 = vld [vmem:[#allocation95_spill] sm:$0xff] }
 0xa39   : > { %v5856_v53 = vadd.f32 %v15668_v49, %v5831_v6  ;;  %v7530_v36 = vsel %vm3650_vm8, %v7527_v25, %v7529_v20 }
 0xa3a   : > { %v7416_v39 = vadd.f32 %v15663_v33, %v7395_v0  ;;  %v7457_v27 = vadd.f32 %v15664_v50, %v7436_v34  ;;  %v7513_v34 = vsel %vm3650_vm8, %v7510_v16, %v7512_v11 }
 0xa3b   : > { %v7433_v22 = vpop.permute.xlu1 %7432  ;;  %v7473_v56 = vpop.permute.xlu0 %7472 }
 0xa3c   : > { %v7437_v40 = vadd.f32 %v7433_v22, %v7416_v39  ;;  %v7478_v12 = vadd.f32 %v7473_v56, %v7457_v27  ;;  %v15670_v39 = vld [vmem:[#allocation249_spill] sm:$0xff] }
 0xa3e   : > { %v7499_v55 = vadd.f32 %v15666_v54, %v7478_v12  ;;  %v7458_v61 = vadd.f32 %v15667_v14, %v7437_v40  ;;  %v15671_v12 = vld [vmem:[#allocation94_spill] sm:$0xff] }
 0xa3f   : > { %v7475_v8 = vpop.permute.xlu1 %7474  ;;  %v5873_v63 = vpop.permute.xlu0 %5872 }
 0xa40   : > { %v7479_v43 = vadd.f32 %v7475_v8, %v7458_v61  ;;  %v5880_v24 = vadd.f32 %v5873_v63, %v5855_v41  ;;  %v7516_v48 = vadd.f32 %v7511_v52, %v7499_v55 }
 0xa42   : > { %v7500_v3 = vadd.f32 %v15669_v46, %v7479_v43  ;;  %v5884_v10 = vadd.f32 %v14348_v60, %v5880_v24  ;;  %v7533_v7 = vadd.f32 %v7528_v26, %v7516_v48 }
 0xa43   : > { %v5875_v17 = vpop.permute.xlu1 %5874  ;;  %v7549_v0 = vpop.permute.xlu0 %7548 }
 0xa44   : > { %v5887_v51 = vmax.f32 %v5884_v10, 0.0  ;;  %v5881_v13 = vadd.f32 %v5875_v17, %v5856_v53  ;;  %v7554_v5 = vadd.f32 %v7549_v0, %v7533_v7  ;;  %v7517_v57 = vadd.f32 %v7513_v34, %v7500_v3 }
 0xa45   : > { %v7823_v7 = vstv %s8565_s7 }
 0xa46   : > { %v7800_v42 = vmul.f32 %v14378_v59, %v5887_v51  ;;  %v5885_v30 = vadd.f32 %v14348_v60, %v5881_v13  ;;  %v7534_v33 = vadd.f32 %v7530_v36, %v7517_v57  ;;  %v7575_v50 = vadd.f32 %v15670_v39, %v7554_v5 }
 0xa47   : > { %v7551_v27 = vpop.permute.xlu1 %7550  ;;  %v7591_v22 = vpop.permute.xlu0 %7590  ;;  %v4379_v36 = vstv %s8399_s23 }
 0xa48   : > { %v7806_v56 = vrot.slane %v7800_v42, 7  ;;  %v5888_v47 = vmax.f32 %v5885_v30, 0.0  ;;  %v7555_v62 = vadd.f32 %v7551_v27, %v7534_v33  ;;  %v7596_v40 = vadd.f32 %v7591_v22, %v7575_v50  ;;  %v15672_v50 = vld [vmem:[#allocation106_spill] sm:$0xff]  ;;  %v15673_v22 = vld [vmem:[#allocation131_spill] sm:$0xff] }
 0xa49   : > { %v4371_v42 = vstv %s4370_s21  ;;  %v4380_v30 = vmul.f32 %v14242_v2, %v4379_v36 }
 0xa4a   : > { %v7801_v16 = vmul.f32 %v14378_v59, %v5888_v47  ;;  %v7576_v21 = vadd.f32 %v15671_v12, %v7555_v62  ;;  %v7807_v25 = vsel %vm3585_vm9, %v7805_v32, %v7806_v56  ;;  %v7617_v38 = vadd.f32 %v14292_v1, %v7596_v40  ;;  %v14534_v62 = vld [vmem:[#allocation3 + $0x10] sm:$0x3f] }
 0xa4b   : > { %v7593_v60 = vpop.permute.xlu1 %7592  ;;  %7812 = vrot.lane.b32.xlu1 %v7807_v25, %s8977_s0  ;;  %v7633_v45 = vpop.permute.xlu0 %7632  ;;  %v4372_v33 = vmul.f32 %v14383_v15, %v4371_v42  ;;  %v4382_v47 = vmul.f32 %v14233_v35, %v4379_v36  ;;  %v4374_v40 = vmul.f32 %v14534_v62, %v4371_v42 }
 0xa4c   : > { %v7808_v6 = vrot.slane %v7801_v16, 7  ;;  %v7597_v41 = vadd.f32 %v7593_v60, %v7576_v21  ;;  %v7638_v54 = vadd.f32 %v7633_v45, %v7617_v38  ;;  %v4467_v16 = vstv %s8404_s13  ;;  %v15674_v21 = vld [vmem:[#allocation167_spill] sm:$0xff] }
 0xa4d   : > { %v4383_v39 = vadd.f32 %v4380_v30, %v4372_v33  ;;  %v4469_v12 = vmul.f32 %v14374_v44, %v4467_v16  ;;  %v4385_v38 = vadd.f32 %v4382_v47, %v4374_v40  ;;  %v4468_v60 = vmul.f32 %v14383_v15, %v4467_v16  ;;  %v15686_v33 = vld [vmem:[#allocation118_spill] sm:$0xff] }
 0xa4e   : > { %v7618_v55 = vadd.f32 %v14311_v9, %v7597_v41  ;;  %v7809_v14 = vsel %vm3585_vm9, %v7806_v56, %v7808_v6  ;;  %v7659_v59 = vadd.f32 %v14401_v29, %v7638_v54  ;;  %v4381_v45 = vmul.f32 %v14245_v23, %v4379_v36  ;;  %v15675_v6 = vld [vmem:[#allocation183_spill] sm:$0xff] }
 0xa4f   : > { %v7635_v61 = vpop.permute.xlu1 %7634  ;;  %7814 = vrot.lane.b32.xlu0 %v7809_v14, %s8977_s0  ;;  %v7675_v31 = vpop.permute.xlu0 %7674  ;;  %v4403_v27 = vadd.f32 %v15672_v50, %v4383_v39  ;;  %v4405_v41 = vadd.f32 %v15675_v6, %v4385_v38  ;;  %v4487_v54 = vstv %s8405_s16  ;;  %v4373_v14 = vmul.f32 %v14374_v44, %v4371_v42  ;;  %v15689_v6 = vld [vmem:[#allocation187_spill] sm:$0xff]  ;;  %s8979_s0 = smov [#allocation15]  }
 0xa50   : > { %v7639_v32 = vadd.f32 %v7635_v61, %v7618_v55  ;;  %v7680_v8 = vadd.f32 %v7675_v31, %v7659_v59  ;;  %v4476_v55 = vrot.slane %v4469_v12, 1  ;;  %v4489_v35 = vmul.f32 %v14245_v23, %v4487_v54  ;;  %v15676_v59 = vld [vmem:[#allocation134_spill] sm:$0xff]  ;;  %s8877_s1 = sshll.u32 %s8979_s0, 4  ;;  %s8878_s1 = int_to_ptr.vmem [resolvable:$false] %s8877_s1 }
 0xa51   : > { %v4423_v56 = vadd.f32 %v15673_v22, %v4403_v27  ;;  %v4475_v31 = vrot.slane %v4468_v60, 1  ;;  %v15687_v27 = vld [vmem:[#allocation250_spill] sm:$0xff]  ;;  %s8879_s5 = scalar_lea.vmem %s8878_s1, 8192  ;;  %p8880_p9 = scmp.lt.s32.totalorder %s14733_s20, %s8878_s1 }
 0xa52   : > { %v7660_v1 = vadd.f32 %v14412_v37, %v7639_v32  ;;  %v7701_v63 = vadd.f32 %v14433_v19, %v7680_v8  ;;  %v7787_v37 = vstv %s8466_s14  ;;  %v4488_v32 = vmul.f32 %v14242_v2, %v4487_v54  ;;  %p8881_p10 = scmp.lt.s32.totalorder %s8879_s5, %s8873_s15 }
 0xa53   : > { %v7677_v52 = vpop.permute.xlu1 %7676  ;;  %v7717_v18 = vpop.permute.xlu0 %7716  ;;  %v4443_v25 = vadd.f32 %v15674_v21, %v4423_v56  ;;  %v4384_v8 = vadd.f32 %v4381_v45, %v4373_v14  ;;  %v4626_v56 = vstv %s8411_s2  ;;  %v8767_v45 = vld [vmem:[#allocation3 + $0x18] sm:$0xff] }
 0xa54   : > { %v7681_v11 = vadd.f32 %v7677_v52, %v7660_v1  ;;  %v7722_v43 = vadd.f32 %v7717_v18, %v7701_v63  ;;  %v15677_v1 = vld [vmem:[#allocation132_spill] sm:$0xff]  ;;  %v4477_v52 = vsel %vm4474_vm7, %v4475_v31, %v4476_v55  ;;  %v4495_v18 = vrot.slane %v4489_v35, 1  ;;  %p8882_p11 = por %p8881_p10, %p8880_p9 }
 0xa55   : > { %v4463_v61 = vadd.f32 %v15676_v59, %v4443_v25  ;;  %v4425_v63 = vadd.f32 %v15677_v1, %v4405_v41  ;;  %v15688_v25 = vld [vmem:[#allocation224_spill] sm:$0xff] }
 0xa56   : > { %v7702_v9 = vadd.f32 %v14438_v58, %v7681_v11  ;;  %v7743_v24 = vadd.f32 %v14459_v4, %v7722_v43  ;;  %v15678_v11 = vld [vmem:[#allocation163_spill] sm:$0xff]  ;;  %p8883_p8 = pnand %p8882_p11, %p8876_p5 }
 0xa57   : > { %v7719_v29 = vpop.permute.xlu1 %7718  ;;  %v7759_v48 = vpop.permute.xlu0 %7758  ;;  %v4404_v43 = vadd.f32 %v15678_v11, %v4384_v8 }
 0xa58   : > { %v7723_v26 = vadd.f32 %v7719_v29, %v7702_v9  ;;  %v7764_v20 = vadd.f32 %v7759_v48, %v7743_v24  ;;  %v4483_v9 = vadd.f32 %v4477_v52, %v4463_v61  ;;  %v4494_v24 = vrot.slane %v4488_v32, 1  ;;  %v15679_v29 = vld [vmem:[#allocation172_spill] sm:$0xff]  ;;  %v15691_v61 = vld [vmem:[#allocation251_spill] sm:$0xff] }
 0xa59   : > { %v4445_v48 = vadd.f32 %v15679_v29, %v4425_v63  ;;  %v15692_v32 = vld [vmem:[#allocation192_spill] sm:$0xff] }
 0xa5a   : > { %v7744_v49 = vadd.f32 %v14469_v28, %v7723_v26  ;;  %v4496_v23 = vsel %vm4474_vm7, %v4494_v24, %v4495_v18  ;;  %v15680_v26 = vld [vmem:[#allocation133_spill] sm:$0xff] }
 0xa5b   : > { %v7761_v53 = vpop.permute.xlu1 %7760  ;;  %v7780_v46 = vpop.permute.xlu0 %7779  ;;  %v4502_v2 = vadd.f32 %v4496_v23, %v4483_v9 }
 0xa5c   : > { %v7785_v19 = vadd.f32 %v7780_v46, %v7764_v20  ;;  %v7765_v3 = vadd.f32 %v7761_v53, %v7744_v49  ;;  %v4424_v20 = vadd.f32 %v15680_v26, %v4404_v43  ;;  %v4470_v49 = vmul.f32 %v14534_v62, %v4467_v16  ;;  %v15681_v53 = vld [vmem:[#allocation110_spill] sm:$0xff]  ;;  %v15682_v46 = vld [vmem:[#allocation136_spill] sm:$0xff]  ;;  %v15694_v43 = vld [vmem:[#allocation137_spill] sm:$0xff] }
 0xa5d   : > { %v8766_v16 = vld [vmem:[#allocation3 + $0x20] sm:$0xff] }
 0xa5e   : > { %v7788_v10 = vadd.f32 %v7787_v37, %v7785_v19  ;;  %v4465_v19 = vadd.f32 %v15682_v46, %v4445_v48  ;;  %v4628_v12 = vmul.f32 %v8766_v16, %v4626_v56  ;;  %v15695_v48 = vld [vmem:[#allocation181_spill] sm:$0xff] }
 0xa5f   : > { %v7782_v17 = vpop.permute.xlu1 %7781  ;;  %v7811_v16 = vpop.permute.xlu0 %7810 }
 0xa60   : > { %v7790_v0 = vmax.f32 %v7788_v10, 0.0  ;;  %v7786_v34 = vadd.f32 %v7782_v17, %v7765_v3  ;;  %v15683_v3 = vld [vmem:[#allocation207_spill] sm:$0xff]  ;;  %v4634_v35 = vrot.slane %v4628_v12, 2 }
 0xa61   : > { %v4527_v10 = vadd.f32 %v15683_v3, %v4502_v2  ;;  %v8765_v17 = vld [vmem:[#allocation3 + $0x28] sm:$0x3f] }
 0xa62   : > { %v7824_v58 = vmul.f32 %v7823_v7, %v7790_v0  ;;  %v7789_v51 = vadd.f32 %v7787_v37, %v7786_v34  ;;  %v4444_v37 = vadd.f32 %v15681_v53, %v4424_v20  ;;  %v4490_v0 = vmul.f32 %v8765_v17, %v4487_v54  ;;  %v15684_v34 = vld [vmem:[#allocation135_spill] sm:$0xff]  ;;  %v15690_v54 = vld [vmem:[#allocation177_spill] sm:$0xff]  ;;  %v15697_v53 = vld [vmem:[#allocation226_spill] sm:$0xff] }
 0xa63   : > { %v4629_v29 = vmul.f32 %v8765_v17, %v4626_v56  ;;  %v15696_v20 = vld [vmem:[#allocation193_spill] sm:$0xff] }
 0xa64   : > { %v7828_v4 = vrot.slane %v7824_v58, 6  ;;  %v7791_v13 = vmax.f32 %v7789_v51, 0.0  ;;  %v4464_v58 = vadd.f32 %v15684_v34, %v4444_v37 }
 0xa65   : > { %v4636_v2 = vrot.slane %v4629_v29, 2 }
 0xa66   : > { %v7825_v5 = vmul.f32 %v7823_v7, %v7791_v13  ;;  %7831 = vrot.lane.b32.xlu1 %v7828_v4, %s8978_s12  ;;  %v4478_v7 = vrot.slane %v4470_v49, 1 }
 0xa68   : > { %v7829_v57 = vrot.slane %v7825_v5, 6  ;;  %v4485_v51 = vadd.f32 %v4478_v7, %v4465_v19  ;;  %v4497_v5 = vrot.slane %v4490_v0, 1  ;;  %v15699_v0 = vld [vmem:[#allocation252_spill] sm:$0xff] }
 0xa6a   : > { %7835 = vrot.lane.b32.xlu1 %v7829_v57, %s8978_s12  ;;  %v7830_v28 = vsel %vm3650_vm8, %v7828_v4, %v7829_v57  ;;  %v15685_v4 = vld [vmem:[#allocation102_spill] sm:$0xff]  ;;  %v4606_v57 = vstv %s8410_s8  ;;  %v4504_v42 = vadd.f32 %v4497_v5, %v4485_v51  ;;  %v4498_v47 = vsel %vm4474_vm7, %v4495_v18, %v4497_v5  ;;  %v15693_v18 = vld [vmem:[#allocation97_spill] sm:$0xff]  ;;  %v15702_v5 = vld [vmem:[#allocation119_spill] sm:$0xff] }
 0xa6b   : > { %7833 = vrot.lane.b32.xlu0 %v7830_v28, %s8978_s12  ;;  %v4552_v13 = vadd.f32 %v15685_v4, %v4527_v10  ;;  %v4479_v28 = vsel %vm4474_vm7, %v4476_v55, %v4478_v7  ;;  %v4608_v36 = vmul.f32 %v14374_v44, %v4606_v57  ;;  %v4607_v50 = vmul.f32 %v14383_v15, %v4606_v57  ;;  %v15701_v4 = vld [vmem:[#allocation98_spill] sm:$0xff] }
 0xa6c   : > { %v4484_v30 = vadd.f32 %v4479_v28, %v4464_v58  ;;  %v4529_v22 = vadd.f32 %v15687_v27, %v4504_v42  ;;  %v4627_v44 = vmul.f32 %v8767_v45, %v4626_v56  ;;  %v4609_v63 = vmul.f32 %v14534_v62, %v4606_v57  ;;  %v15698_v62 = vld [vmem:[#allocation182_spill] sm:$0xff]  ;;  %v15700_v58 = vld [vmem:[#allocation228_spill] sm:$0xff]  ;;  %v15703_v42 = vld [vmem:[#allocation253_spill] sm:$0xff] }
 0xa6d   : > { %v4577_v39 = vadd.f32 %v15686_v33, %v4552_v13  ;;  %v4615_v40 = vrot.slane %v4608_v36, 2  ;;  %v4614_v60 = vrot.slane %v4607_v50, 2  ;;  %v4637_v7 = vsel %vm4613_vm10, %v4634_v35, %v4636_v2  ;;  %v15704_v33 = vld [vmem:[#allocation194_spill] sm:$0xff]  ;;  %v15705_v27 = vld [vmem:[#allocation99_spill] sm:$0xff] }
 0xa6e   : > { %v4503_v21 = vadd.f32 %v4498_v47, %v4484_v30  ;;  %v4554_v41 = vadd.f32 %v15689_v6, %v4529_v22  ;;  %v4633_v59 = vrot.slane %v4627_v44, 2  ;;  %v4617_v24 = vrot.slane %v4609_v63, 2  ;;  %v15706_v56 = vld [vmem:[#allocation139_spill] sm:$0xff] }
 0xa6f   : > { %v4602_v38 = vadd.f32 %v15688_v25, %v4577_v39  ;;  %v4616_v15 = vsel %vm4613_vm10, %v4614_v60, %v4615_v40  ;;  %v4744_v28 = vstv %s4369_s3  ;;  %v15707_v25 = vld [vmem:[#allocation196_spill] sm:$0xff]  ;;  %v7844_v44 = vstv %s8566_s11 }
 0xa70   : > { %v4528_v55 = vadd.f32 %v15690_v54, %v4503_v21  ;;  %v4579_v31 = vadd.f32 %v15691_v61, %v4554_v41  ;;  %v4635_v1 = vsel %vm4613_vm10, %v4633_v59, %v4634_v35  ;;  %v4618_v46 = vsel %vm4613_vm10, %v4615_v40, %v4617_v24 }
 0xa71   : > { %v4622_v14 = vadd.f32 %v4616_v15, %v4602_v38  ;;  %v7793_v40 = vstv %s7792_s10 }
 0xa72   : > { %v4553_v8 = vadd.f32 %v15692_v32, %v4528_v55  ;;  %v4604_v11 = vadd.f32 %v15693_v18, %v4579_v31 }
 0xa73   : > { %v4641_v52 = vadd.f32 %v4635_v1, %v4622_v14 }
 0xa74   : > { %v4578_v9 = vadd.f32 %v15694_v43, %v4553_v8  ;;  %v4624_v26 = vadd.f32 %v4617_v24, %v4604_v11 }
 0xa75   : > { %v4666_v23 = vadd.f32 %v15695_v48, %v4641_v52 }
 0xa76   : > { %v4603_v49 = vadd.f32 %v15696_v20, %v4578_v9  ;;  %v4643_v19 = vadd.f32 %v4636_v2, %v4624_v26 }
 0xa77   : > { %v4691_v37 = vadd.f32 %v15697_v53, %v4666_v23 }
 0xa78   : > { %v4623_v3 = vadd.f32 %v4618_v46, %v4603_v49  ;;  %v4668_v34 = vadd.f32 %v15699_v0, %v4643_v19  ;;  %v15708_v49 = vld [vmem:[#allocation60_spill] sm:$0xff] }
 0xa79   : > { %v4716_v10 = vadd.f32 %v15698_v62, %v4691_v37  ;;  %v7868_v2 = vsub.s32 2, %v15708_v49  ;;  %v7880_v46 = vsub.s32 3, %v15708_v49  ;;  %v7892_v62 = vsub.s32 4, %v15708_v49 }
 0xa7a   : > { %v4642_v17 = vadd.f32 %v4637_v7, %v4623_v3  ;;  %v4693_v13 = vadd.f32 %v15701_v4, %v4668_v34  ;;  %v7904_v34 = vsub.s32 5, %v15708_v49 }
 0xa7b   : > { %v4741_v51 = vadd.f32 %v15700_v58, %v4716_v10 }
 0xa7c   : > { %v4667_v57 = vadd.f32 %v15702_v5, %v4642_v17  ;;  %v4718_v30 = vadd.f32 %v15703_v42, %v4693_v13  ;;  %v7928_v13 = vsub.s32 7, %v15708_v49 }
 0xa7d   : > { %v4745_v36 = vadd.f32 %v4744_v28, %v4741_v51  ;;  %v7916_v51 = vsub.s32 6, %v15708_v49 }
 0xa7e   : > { %v4692_v39 = vadd.f32 %v15704_v33, %v4667_v57  ;;  %v4743_v22 = vadd.f32 %v15705_v27, %v4718_v30  ;;  %v7952_v33 = vsub.s32 1, %v15708_v49  ;;  %v15722_v49 = vld [vmem:[#allocation32_spill] sm:$0xff] }
 0xa7f   : > { %v4748_v50 = vmax.f32 %v4745_v36, 0.0 }
 0xa80   : > { %v4717_v47 = vadd.f32 %v15706_v56, %v4692_v39  ;;  %v4747_v45 = vadd.f32 %v4744_v28, %v4743_v22 }
 0xa81   : > { %v7794_v21 = vmul.f32 %v7793_v40, %v4748_v50 }
 0xa82   : > { %v4742_v38 = vadd.f32 %v15707_v25, %v4717_v47  ;;  %v4750_v55 = vmax.f32 %v4747_v45, 0.0  ;;  %v15710_v25 = vld [vmem:[#allocation62_spill] sm:$0xff] }
 0xa83   : > { %v7819_v60 = vadd.f32 %v7811_v16, %v7794_v21 }
 0xa84   : > { %v4746_v54 = vadd.f32 %v4744_v28, %v4742_v38  ;;  %v7796_v61 = vmul.f32 %v7793_v40, %v4750_v55  ;;  %v15709_v28 = vld [vmem:[#allocation61_spill] sm:$0xff] }
 0xa86   : > { %v4749_v59 = vmax.f32 %v4746_v54, 0.0 }
 0xa88   : > { %v7795_v1 = vmul.f32 %v7793_v40, %v4749_v59  ;;  %v15714_v59 = vld [vmem:[#allocation67_spill] sm:$0xff] }
 0xabd   : > { %v7813_v12 = vpop.permute.xlu1 %7812 }
 0xabe   : > { %v7820_v18 = vadd.f32 %v7813_v12, %v7795_v1 }
 0xac1   : > { %v7815_v14 = vpop.permute.xlu0 %7814 }
 0xac2   : > { %v7821_v8 = vadd.f32 %v7815_v14, %v7796_v61 }
 0xad8   : > { %v7832_v6 = vpop.permute.xlu1 %7831 }
 0xad9   : > { %v7840_v41 = vadd.f32 %v7832_v6, %v7819_v60  ;;  %v15711_v60 = vld [vmem:[#allocation63_spill] sm:$0xff] }
 0xadb   : > { %v7845_v15 = vadd.f32 %v7844_v44, %v7840_v41  ;;  %v15713_v41 = vld [vmem:[#allocation28_spill] sm:$0xff] }
 0xadc   : > { %v7836_v32 = vpop.permute.xlu1 %7835 }
 0xadd   : > { %v7848_v35 = vsub.f32 0.0, %v7845_v15  ;;  %v7842_v63 = vadd.f32 %v7836_v32, %v7821_v8  ;;  %v7834_v52 = vpop.permute.xlu0 %7833  ;;  %v15717_v8 = vld [vmem:[#allocation31_spill] sm:$0xff] }
 0xade   : > { %v7841_v43 = vadd.f32 %v7834_v52, %v7820_v18 }
 0xadf   : > { %v7851_v31 = vmul.f32 1.442695, %v7848_v35  ;;  %v7847_v11 = vadd.f32 %v7844_v44, %v7842_v63  ;;  %v15718_v63 = vld [vmem:[#allocation30_spill] sm:$0xff] }
 0xae0   : > { %v7846_v29 = vadd.f32 %v7844_v44, %v7841_v43  ;;  %v15712_v44 = vld [vmem:[#allocation29_spill] sm:$0xff] }
 0xae1   : > { %8732 = vpow2.f32 %v7851_v31  ;;  %v7850_v24 = vsub.f32 0.0, %v7847_v11  ;;  %v15715_v31 = vld [vmem:[#allocation65_spill] sm:$0xff] }
 0xae2   : > { %v7849_v26 = vsub.f32 0.0, %v7846_v29 }
 0xae3   : > { %v7855_v23 = vmul.f32 1.442695, %v7850_v24  ;;  %v15719_v24 = vld [vmem:[#allocation69_spill] sm:$0xff] }
 0xae4   : > { %v7853_v20 = vmul.f32 1.442695, %v7849_v26  ;;  %v15721_v26 = vld [vmem:[#allocation33_spill] sm:$0xff] }
 0xaeb   : > { %v8733_v9 = vpop.eup %8732 }
 0xaec   : > { %v7857_v48 = vadd.f32 1.0, %v8733_v9 }
 0xaee   : > { %8734 = vrcp.f32 %v7857_v48  ;;  %v15720_v48 = vld [vmem:[#allocation64_spill] sm:$0xff] }
 0xaef   : > { %8736 = vpow2.f32 %v7855_v23 }
 0xaf0   : > { %8738 = vpow2.f32 %v7853_v20 }
 0xaf8   : > { %v8735_v53 = vpop.eup %8734 }
 0xaf9   : > { %v7869_v37 = vrot.slane %v8735_v53, %v7868_v2  ;;  %v8737_v19 = vpop.eup %8736  ;;  %v7881_v3 = vrot.slane %v8735_v53, %v7880_v46  ;;  %v7893_v0 = vrot.slane %v8735_v53, %v7892_v62  ;;  %v7905_v58 = vrot.slane %v8735_v53, %v7904_v34 }
 0xafa   : > { %v7859_v10 = vadd.f32 1.0, %v8737_v19  ;;  %v8739_v7 = vpop.eup %8738  ;;  %v7917_v4 = vrot.slane %v8735_v53, %v7916_v51  ;;  %v7929_v5 = vrot.slane %v8735_v53, %v7928_v13 }
 0xafb   : > { %7876 = vbcast.lane.b32.xlu1 %v7869_v37, 266  ;;  %7872 = vbcast.lane.b32.xlu0 %v7869_v37, 258  ;;  %v7858_v17 = vadd.f32 1.0, %v8739_v7 }
 0xafc   : > { %8740 = vrcp.f32 %v7859_v10  ;;  %v15724_v10 = vld [vmem:[#allocation66_spill] sm:$0xff] }
 0xafd   : > { %8742 = vrcp.f32 %v7858_v17  ;;  %v15726_v17 = vld [vmem:[#allocation34_spill] sm:$0xff] }
 0xaff   : > { %7888 = vbcast.lane.b32.xlu1 %v7881_v3, 266  ;;  %7884 = vbcast.lane.b32.xlu0 %v7881_v3, 258  ;;  %v15723_v3 = vld [vmem:[#allocation71_spill] sm:$0xff] }
 0xb03   : > { %7900 = vbcast.lane.b32.xlu1 %v7893_v0, 266  ;;  %7896 = vbcast.lane.b32.xlu0 %v7893_v0, 258  ;;  %v15725_v0 = vld [vmem:[#allocation35_spill] sm:$0xff] }
 0xb06   : > { %v8741_v57 = vpop.eup %8740 }
 0xb07   : > { %7912 = vbcast.lane.b32.xlu1 %v7905_v58, 266  ;;  %7908 = vbcast.lane.b32.xlu0 %v7905_v58, 258  ;;  %v8037_v36 = vrot.slane %v8741_v57, %v15709_v28  ;;  %v8743_v42 = vpop.eup %8742  ;;  %v8049_v16 = vrot.slane %v8741_v57, %v7952_v33  ;;  %v15727_v57 = vld [vmem:[#allocation73_spill] sm:$0xff] }
 0xb08   : > { %v7941_v30 = vrot.slane %v8743_v42, %v15709_v28  ;;  %v7953_v39 = vrot.slane %v8743_v42, %v7952_v33  ;;  %v7965_v50 = vrot.slane %v8743_v42, %v7868_v2  ;;  %v7977_v27 = vrot.slane %v8743_v42, %v7880_v46 }
 0xb09   : > { %v7989_v22 = vrot.slane %v8743_v42, %v7892_v62  ;;  %v8001_v56 = vrot.slane %v8743_v42, %v7904_v34  ;;  %v8013_v47 = vrot.slane %v8743_v42, %v7916_v51  ;;  %v8025_v40 = vrot.slane %v8743_v42, %v7928_v13 }
 0xb0b   : > { %7924 = vbcast.lane.b32.xlu1 %v7917_v4, 266  ;;  %7920 = vbcast.lane.b32.xlu0 %v7917_v4, 258 }
 0xb0f   : > { %7936 = vbcast.lane.b32.xlu1 %v7929_v5, 266  ;;  %7932 = vbcast.lane.b32.xlu0 %v7929_v5, 258 }
 0xb13   : > { %8044 = vbcast.lane.b32.xlu1 %v8037_v36, 266  ;;  %8040 = vbcast.lane.b32.xlu0 %v8037_v36, 258  ;;  %v15728_v36 = vld [vmem:[#allocation68_spill] sm:$0xff] }
 0xb17   : > { %7948 = vbcast.lane.b32.xlu1 %v7941_v30, 266  ;;  %7944 = vbcast.lane.b32.xlu0 %v7941_v30, 258  ;;  %v15729_v30 = vld [vmem:[#allocation37_spill] sm:$0xff] }
 0xb1b   : > { %7960 = vbcast.lane.b32.xlu1 %v7953_v39, 266  ;;  %7956 = vbcast.lane.b32.xlu0 %v7953_v39, 258  ;;  %v15730_v39 = vld [vmem:[#allocation36_spill] sm:$0xff] }
 0xb1f   : > { %7972 = vbcast.lane.b32.xlu1 %v7965_v50, 266  ;;  %7968 = vbcast.lane.b32.xlu0 %v7965_v50, 258 }
 0xb23   : > { %7984 = vbcast.lane.b32.xlu1 %v7977_v27, 266  ;;  %7980 = vbcast.lane.b32.xlu0 %v7977_v27, 258 }
 0xb27   : > { %7996 = vbcast.lane.b32.xlu1 %v7989_v22, 266  ;;  %7992 = vbcast.lane.b32.xlu0 %v7989_v22, 258 }
 0xb2b   : > { %8008 = vbcast.lane.b32.xlu1 %v8001_v56, 266  ;;  %8004 = vbcast.lane.b32.xlu0 %v8001_v56, 258 }
 0xb2f   : > { %8020 = vbcast.lane.b32.xlu1 %v8013_v47, 266  ;;  %8016 = vbcast.lane.b32.xlu0 %v8013_v47, 258 }
 0xb33   : > { %8032 = vbcast.lane.b32.xlu1 %v8025_v40, 266  ;;  %8028 = vbcast.lane.b32.xlu0 %v8025_v40, 258  ;;  %v15731_v40 = vld [vmem:[#allocation75_spill] sm:$0xff] }
 0xb37   : > { %8056 = vbcast.lane.b32.xlu1 %v8049_v16, 266  ;;  %8052 = vbcast.lane.b32.xlu0 %v8049_v16, 258 }
 0xb6d   : > { %v7877_v12 = vpop.permute.xlu1 %7876  ;;  %v7873_v21 = vpop.permute.xlu0 %7872 }
 0xb6e   : > { %v8059_v38 = vmul.f32 %v7877_v12, %v15710_v25  ;;  %v8058_v45 = vmul.f32 %v7873_v21, %v15711_v60  ;;  %v15732_v12 = vld [vmem:[#allocation70_spill] sm:$0xff]  ;;  %v15733_v25 = vld [vmem:[#allocation39_spill] sm:$0xff] }
 0xb6f   : > { %v15734_v60 = vld [vmem:[#allocation38_spill] sm:$0xff] }
 0xb70   : > { %v8091_v6 = vadd.f32 %v8059_v38, %v15712_v44  ;;  %v8090_v54 = vadd.f32 %v8058_v45, %v15713_v41 }
 0xb71   : > { %v7889_v55 = vpop.permute.xlu1 %7888  ;;  %v7885_v15 = vpop.permute.xlu0 %7884 }
 0xb72   : > { %v8123_v35 = vmax.f32 %v8091_v6, 0.0  ;;  %v8122_v14 = vmax.f32 %v8090_v54, 0.0  ;;  %v8061_v61 = vmul.f32 %v7889_v55, %v15714_v59  ;;  %v8060_v32 = vmul.f32 %v7885_v15, %v15715_v31  ;;  %v15735_v55 = vld [vmem:[#allocation92_spill] sm:$0xff]  ;;  %v15737_v59 = vld [vmem:[#allocation57_spill] sm:$0xff] }
 0xb73   : > { %v15738_v31 = vld [vmem:[#allocation56_spill] sm:$0xff] }
 0xb74   : > { %8155 = vst.msk [vmem:[%s14606_s18 + $0x8] sm:$0xff] %vm470_vm0, %v8123_v35  ;;  %8154 = vst.msk [vmem:[%s14606_s18] sm:$0xff] %vm470_vm0, %v8122_v14  ;;  %v8093_v1 = vadd.f32 %v8061_v61, %v15717_v8  ;;  %v8092_v52 = vadd.f32 %v8060_v32, %v15718_v63  ;;  %v15736_v35 = vld [vmem:[#allocation88_spill] sm:$0xff] }
 0xb75   : > { %v7901_v18 = vpop.permute.xlu1 %7900  ;;  %v7897_v11 = vpop.permute.xlu0 %7896 }
 0xb76   : > { %v8125_v43 = vmax.f32 %v8093_v1, 0.0  ;;  %v8124_v9 = vmax.f32 %v8092_v52, 0.0  ;;  %v8063_v29 = vmul.f32 %v7901_v18, %v15719_v24  ;;  %v8062_v23 = vmul.f32 %v7897_v11, %v15720_v48  ;;  %v15739_v18 = vld [vmem:[#allocation77_spill] sm:$0xff]  ;;  %v15742_v48 = vld [vmem:[#allocation40_spill] sm:$0xff] }
 0xb77   : > { %v15741_v24 = vld [vmem:[#allocation41_spill] sm:$0xff] }
 0xb78   : > { %8157 = vst.msk [vmem:[%s14606_s18 + $0x18] sm:$0xff] %vm470_vm0, %v8125_v43  ;;  %8156 = vst.msk [vmem:[%s14606_s18 + $0x10] sm:$0xff] %vm470_vm0, %v8124_v9  ;;  %v8095_v20 = vadd.f32 %v8063_v29, %v15721_v26  ;;  %v8094_v2 = vadd.f32 %v8062_v23, %v15722_v49  ;;  %v15740_v43 = vld [vmem:[#allocation72_spill] sm:$0xff] }
 0xb79   : > { %v7913_v53 = vpop.permute.xlu1 %7912  ;;  %v7909_v37 = vpop.permute.xlu0 %7908 }
 0xb7a   : > { %v8127_v46 = vmax.f32 %v8095_v20, 0.0  ;;  %v8126_v19 = vmax.f32 %v8094_v2, 0.0  ;;  %v8065_v62 = vmul.f32 %v7913_v53, %v15723_v3  ;;  %v8064_v7 = vmul.f32 %v7909_v37, %v15724_v10  ;;  %v15743_v53 = vld [vmem:[#allocation79_spill] sm:$0xff]  ;;  %v15746_v10 = vld [vmem:[#allocation42_spill] sm:$0xff] }
 0xb7b   : > { %v15745_v3 = vld [vmem:[#allocation43_spill] sm:$0xff] }
 0xb7c   : > { %8159 = vst.msk [vmem:[%s14606_s18 + $0x28] sm:$0xff] %vm470_vm0, %v8127_v46  ;;  %8158 = vst.msk [vmem:[%s14606_s18 + $0x20] sm:$0xff] %vm470_vm0, %v8126_v19  ;;  %v8097_v34 = vadd.f32 %v8065_v62, %v15725_v0  ;;  %v8096_v58 = vadd.f32 %v8064_v7, %v15726_v17  ;;  %v15744_v46 = vld [vmem:[#allocation74_spill] sm:$0xff] }
 0xb7d   : > { %v7925_v51 = vpop.permute.xlu1 %7924  ;;  %v7921_v4 = vpop.permute.xlu0 %7920 }
 0xb7e   : > { %v8129_v13 = vmax.f32 %v8097_v34, 0.0  ;;  %v8128_v5 = vmax.f32 %v8096_v58, 0.0  ;;  %v8067_v28 = vmul.f32 %v7925_v51, %v15727_v57  ;;  %v8066_v42 = vmul.f32 %v7921_v4, %v15728_v36  ;;  %v15747_v51 = vld [vmem:[#allocation81_spill] sm:$0xff]  ;;  %v15750_v36 = vld [vmem:[#allocation44_spill] sm:$0xff] }
 0xb7f   : > { %v15749_v57 = vld [vmem:[#allocation45_spill] sm:$0xff] }
 0xb80   : > { %8161 = vst.msk [vmem:[%s14606_s18 + $0x38] sm:$0xff] %vm470_vm0, %v8129_v13  ;;  %8160 = vst.msk [vmem:[%s14606_s18 + $0x30] sm:$0xff] %vm470_vm0, %v8128_v5  ;;  %v8099_v33 = vadd.f32 %v8067_v28, %v15729_v30  ;;  %v8098_v50 = vadd.f32 %v8066_v42, %v15730_v39  ;;  %v15748_v13 = vld [vmem:[#allocation76_spill] sm:$0xff] }
 0xb81   : > { %v7937_v27 = vpop.permute.xlu1 %7936  ;;  %v7933_v22 = vpop.permute.xlu0 %7932 }
 0xb82   : > { %v8131_v56 = vmax.f32 %v8099_v33, 0.0  ;;  %v8130_v47 = vmax.f32 %v8098_v50, 0.0  ;;  %v8069_v16 = vmul.f32 %v7937_v27, %v15731_v40  ;;  %v8068_v21 = vmul.f32 %v7933_v22, %v15732_v12  ;;  %v15751_v27 = vld [vmem:[#allocation83_spill] sm:$0xff]  ;;  %v15754_v12 = vld [vmem:[#allocation46_spill] sm:$0xff] }
 0xb83   : > { %v15753_v40 = vld [vmem:[#allocation47_spill] sm:$0xff] }
 0xb84   : > { %8163 = vst.msk [vmem:[%s14606_s18 + $0x48] sm:$0xff] %vm470_vm0, %v8131_v56  ;;  %8162 = vst.msk [vmem:[%s14606_s18 + $0x40] sm:$0xff] %vm470_vm0, %v8130_v47  ;;  %v8101_v38 = vadd.f32 %v8069_v16, %v15733_v25  ;;  %v8100_v45 = vadd.f32 %v8068_v21, %v15734_v60  ;;  %v15752_v56 = vld [vmem:[#allocation78_spill] sm:$0xff] }
 0xb85   : > { %v8045_v44 = vpop.permute.xlu1 %8044  ;;  %v8041_v6 = vpop.permute.xlu0 %8040 }
 0xb86   : > { %v8133_v41 = vmax.f32 %v8101_v38, 0.0  ;;  %v8132_v54 = vmax.f32 %v8100_v45, 0.0  ;;  %v8087_v15 = vmul.f32 %v8045_v44, %v15735_v55  ;;  %v8086_v14 = vmul.f32 %v8041_v6, %v15736_v35  ;;  %v15755_v44 = vld [vmem:[#allocation85_spill] sm:$0xff]  ;;  %v15758_v35 = vld [vmem:[#allocation48_spill] sm:$0xff] }
 0xb87   : > { %v15757_v55 = vld [vmem:[#allocation49_spill] sm:$0xff] }
 0xb88   : > { %8165 = vst.msk [vmem:[%s14606_s18 + $0x58] sm:$0xff] %vm470_vm0, %v8133_v41  ;;  %8164 = vst.msk [vmem:[%s14606_s18 + $0x50] sm:$0xff] %vm470_vm0, %v8132_v54  ;;  %v8119_v61 = vadd.f32 %v8087_v15, %v15737_v59  ;;  %v8118_v32 = vadd.f32 %v8086_v14, %v15738_v31  ;;  %v15756_v41 = vld [vmem:[#allocation80_spill] sm:$0xff] }
 0xb89   : > { %v7949_v8 = vpop.permute.xlu1 %7948  ;;  %v7945_v1 = vpop.permute.xlu0 %7944 }
 0xb8a   : > { %v8151_v63 = vmax.f32 %v8119_v61, 0.0  ;;  %v8150_v52 = vmax.f32 %v8118_v32, 0.0  ;;  %v8071_v11 = vmul.f32 %v7949_v8, %v15739_v18  ;;  %v8070_v9 = vmul.f32 %v7945_v1, %v15740_v43  ;;  %v15759_v8 = vld [vmem:[#allocation87_spill] sm:$0xff]  ;;  %v15762_v43 = vld [vmem:[#allocation50_spill] sm:$0xff] }
 0xb8b   : > { %v15761_v18 = vld [vmem:[#allocation51_spill] sm:$0xff] }
 0xb8c   : > { %8183 = vst.msk [vmem:[%s14606_s18 + $0xe8] sm:$0xff] %vm470_vm0, %v8151_v63  ;;  %8182 = vst.msk [vmem:[%s14606_s18 + $0xe0] sm:$0xff] %vm470_vm0, %v8150_v52  ;;  %v8103_v29 = vadd.f32 %v8071_v11, %v15741_v24  ;;  %v8102_v23 = vadd.f32 %v8070_v9, %v15742_v48  ;;  %v15760_v63 = vld [vmem:[#allocation82_spill] sm:$0xff] }
 0xb8d   : > { %v7961_v26 = vpop.permute.xlu1 %7960  ;;  %v7957_v20 = vpop.permute.xlu0 %7956 }
 0xb8e   : > { %v8135_v49 = vmax.f32 %v8103_v29, 0.0  ;;  %v8134_v2 = vmax.f32 %v8102_v23, 0.0  ;;  %v8073_v37 = vmul.f32 %v7961_v26, %v15743_v53  ;;  %v8072_v19 = vmul.f32 %v7957_v20, %v15744_v46  ;;  %v15763_v26 = vld [vmem:[#allocation89_spill] sm:$0xff]  ;;  %v15766_v46 = vld [vmem:[#allocation52_spill] sm:$0xff] }
 0xb8f   : > { %v15765_v53 = vld [vmem:[#allocation53_spill] sm:$0xff] }
 0xb90   : > { %8167 = vst.msk [vmem:[%s14606_s18 + $0x68] sm:$0xff] %vm470_vm0, %v8135_v49  ;;  %8166 = vst.msk [vmem:[%s14606_s18 + $0x60] sm:$0xff] %vm470_vm0, %v8134_v2  ;;  %v8105_v62 = vadd.f32 %v8073_v37, %v15745_v3  ;;  %v8104_v7 = vadd.f32 %v8072_v19, %v15746_v10  ;;  %v15764_v49 = vld [vmem:[#allocation84_spill] sm:$0xff] }
 0xb91   : > { %v7973_v0 = vpop.permute.xlu1 %7972  ;;  %v7969_v34 = vpop.permute.xlu0 %7968 }
 0xb92   : > { %v8137_v17 = vmax.f32 %v8105_v62, 0.0  ;;  %v8136_v58 = vmax.f32 %v8104_v7, 0.0  ;;  %v8075_v4 = vmul.f32 %v7973_v0, %v15747_v51  ;;  %v8074_v5 = vmul.f32 %v7969_v34, %v15748_v13  ;;  %v15767_v0 = vld [vmem:[#allocation91_spill] sm:$0xff]  ;;  %v15770_v13 = vld [vmem:[#allocation54_spill] sm:$0xff] }
 0xb93   : > { %v15769_v51 = vld [vmem:[#allocation55_spill] sm:$0xff] }
 0xb94   : > { %8169 = vst.msk [vmem:[%s14606_s18 + $0x78] sm:$0xff] %vm470_vm0, %v8137_v17  ;;  %8168 = vst.msk [vmem:[%s14606_s18 + $0x70] sm:$0xff] %vm470_vm0, %v8136_v58  ;;  %v8107_v28 = vadd.f32 %v8075_v4, %v15749_v57  ;;  %v8106_v42 = vadd.f32 %v8074_v5, %v15750_v36  ;;  %v15768_v17 = vld [vmem:[#allocation86_spill] sm:$0xff] }
 0xb95   : > { %v7985_v30 = vpop.permute.xlu1 %7984  ;;  %v7981_v33 = vpop.permute.xlu0 %7980 }
 0xb96   : > { %v8139_v39 = vmax.f32 %v8107_v28, 0.0  ;;  %v8138_v50 = vmax.f32 %v8106_v42, 0.0  ;;  %v8077_v22 = vmul.f32 %v7985_v30, %v15751_v27  ;;  %v8076_v47 = vmul.f32 %v7981_v33, %v15752_v56  ;;  %v15771_v30 = vld [vmem:[#allocation93_spill] sm:$0xff]  ;;  %v15773_v27 = vld [vmem:[#allocation59_spill] sm:$0xff]  ;;  %v15774_v56 = vld [vmem:[#allocation58_spill] sm:$0xff] }
 0xb98   : > { %8171 = vst.msk [vmem:[%s14606_s18 + $0x88] sm:$0xff] %vm470_vm0, %v8139_v39  ;;  %8170 = vst.msk [vmem:[%s14606_s18 + $0x80] sm:$0xff] %vm470_vm0, %v8138_v50  ;;  %v8109_v16 = vadd.f32 %v8077_v22, %v15753_v40  ;;  %v8108_v21 = vadd.f32 %v8076_v47, %v15754_v12  ;;  %v15772_v39 = vld [vmem:[#allocation90_spill] sm:$0xff] }
 0xb99   : > { %v7997_v25 = vpop.permute.xlu1 %7996  ;;  %v7993_v38 = vpop.permute.xlu0 %7992 }
 0xb9a   : > { %v8141_v60 = vmax.f32 %v8109_v16, 0.0  ;;  %v8140_v45 = vmax.f32 %v8108_v21, 0.0  ;;  %v8079_v6 = vmul.f32 %v7997_v25, %v15755_v44  ;;  %v8078_v54 = vmul.f32 %v7993_v38, %v15756_v41 }
 0xb9c   : > { %8173 = vst.msk [vmem:[%s14606_s18 + $0x98] sm:$0xff] %vm470_vm0, %v8141_v60  ;;  %8172 = vst.msk [vmem:[%s14606_s18 + $0x90] sm:$0xff] %vm470_vm0, %v8140_v45  ;;  %v8111_v15 = vadd.f32 %v8079_v6, %v15757_v55  ;;  %v8110_v14 = vadd.f32 %v8078_v54, %v15758_v35 }
 0xb9d   : > { %v8009_v59 = vpop.permute.xlu1 %8008  ;;  %v8005_v61 = vpop.permute.xlu0 %8004 }
 0xb9e   : > { %v8143_v31 = vmax.f32 %v8111_v15, 0.0  ;;  %v8142_v32 = vmax.f32 %v8110_v14, 0.0  ;;  %v8081_v1 = vmul.f32 %v8009_v59, %v15759_v8  ;;  %v8080_v52 = vmul.f32 %v8005_v61, %v15760_v63 }
 0xba0   : > { %8175 = vst.msk [vmem:[%s14606_s18 + $0xa8] sm:$0xff] %vm470_vm0, %v8143_v31  ;;  %8174 = vst.msk [vmem:[%s14606_s18 + $0xa0] sm:$0xff] %vm470_vm0, %v8142_v32  ;;  %v8113_v11 = vadd.f32 %v8081_v1, %v15761_v18  ;;  %v8112_v9 = vadd.f32 %v8080_v52, %v15762_v43 }
 0xba1   : > { %v8021_v24 = vpop.permute.xlu1 %8020  ;;  %v8017_v29 = vpop.permute.xlu0 %8016 }
 0xba2   : > { %v8145_v48 = vmax.f32 %v8113_v11, 0.0  ;;  %v8144_v23 = vmax.f32 %v8112_v9, 0.0  ;;  %v8083_v20 = vmul.f32 %v8021_v24, %v15763_v26  ;;  %v8082_v2 = vmul.f32 %v8017_v29, %v15764_v49 }
 0xba4   : > { %8177 = vst.msk [vmem:[%s14606_s18 + $0xb8] sm:$0xff] %vm470_vm0, %v8145_v48  ;;  %8176 = vst.msk [vmem:[%s14606_s18 + $0xb0] sm:$0xff] %vm470_vm0, %v8144_v23  ;;  %v8115_v37 = vadd.f32 %v8083_v20, %v15765_v53  ;;  %v8114_v19 = vadd.f32 %v8082_v2, %v15766_v46 }
 0xba5   : > { %v8033_v3 = vpop.permute.xlu1 %8032  ;;  %v8029_v62 = vpop.permute.xlu0 %8028 }
 0xba6   : > { %v8147_v10 = vmax.f32 %v8115_v37, 0.0  ;;  %v8146_v7 = vmax.f32 %v8114_v19, 0.0  ;;  %v8085_v34 = vmul.f32 %v8033_v3, %v15767_v0  ;;  %v8084_v58 = vmul.f32 %v8029_v62, %v15768_v17 }
 0xba8   : > { %8179 = vst.msk [vmem:[%s14606_s18 + $0xc8] sm:$0xff] %vm470_vm0, %v8147_v10  ;;  %8178 = vst.msk [vmem:[%s14606_s18 + $0xc0] sm:$0xff] %vm470_vm0, %v8146_v7  ;;  %v8117_v4 = vadd.f32 %v8085_v34, %v15769_v51  ;;  %v8116_v5 = vadd.f32 %v8084_v58, %v15770_v13 }
 0xba9   : > { %v8057_v57 = vpop.permute.xlu1 %8056  ;;  %v8053_v28 = vpop.permute.xlu0 %8052 }
 0xbaa   : > { %v8149_v36 = vmax.f32 %v8117_v4, 0.0  ;;  %v8148_v42 = vmax.f32 %v8116_v5, 0.0  ;;  %v8089_v33 = vmul.f32 %v8057_v57, %v15771_v30  ;;  %v8088_v50 = vmul.f32 %v8053_v28, %v15772_v39 }
 0xbac   : > { %8181 = vst.msk [vmem:[%s14606_s18 + $0xd8] sm:$0xff] %vm470_vm0, %v8149_v36  ;;  %8180 = vst.msk [vmem:[%s14606_s18 + $0xd0] sm:$0xff] %vm470_vm0, %v8148_v42  ;;  %v8121_v22 = vadd.f32 %v8089_v33, %v15773_v27  ;;  %v8120_v47 = vadd.f32 %v8088_v50, %v15774_v56 }
 0xbae   : > { %v8153_v40 = vmax.f32 %v8121_v22, 0.0  ;;  %v8152_v16 = vmax.f32 %v8120_v47, 0.0 }
 0xbb0   : > { %8185 = vst.msk [vmem:[%s14606_s18 + $0xf8] sm:$0xff] %vm470_vm0, %v8153_v40  ;;  %8184 = vst.msk [vmem:[%s14606_s18 + $0xf0] sm:$0xff] %vm470_vm0, %v8152_v16 }
 0xbb1   : > { %8886 = shalt.err (!%p8883_p8)
}
 0xbb2   : > { %s8887_s9 = scalar_lea.hbm %s14731_s27, 4096  ;;  %s8891_s6 = scalar_lea.hbm %s15775_s4, 8192 }
 0xbb3   : > { %p8888_p6 = scmp.ne.s32.totalorder %s14731_s27, %s8887_s9  ;;  %p8892_p7 = scmp.lt.u32.totalorder %s14731_s27, %s15775_s4 }
 0xbb4   : > { %p8893_p12 = scmp.lt.u32.totalorder %s8891_s6, %s8887_s9  ;;  %p8895_p13 = scmp.lt.u32.totalorder %s8887_s9, %s14731_s27 }
 0xbb5   : > { %p8889_p1 = pnand %p8888_p6, %p15776_p2 }
 0xbb6   : > { %p8894_p0 = por %p8893_p12, %p8892_p7 }
 0xbb7   : > { %p8890_p3 = pneg %p8889_p1 }
 0xbb8   : > { %p8896_p4 = por %p8895_p13, %p8894_p0 }
 0xbba   : > { %p8897_p5 = pnand %p8896_p4, %p8890_p3 }
 0xbbc   : > { %8900 = shalt.err (!%p8897_p5)
}
 0xbbd   : > { %s8980_s12 = smov 128   ;;  %s8981_s23 = smov 8  }
 0xbbe   : > { %8612 = dma.vmem_to_hbm [thread:$0]  (%p15776_p2), %s14733_s20, 4096, %s14731_s27, %s8187_s24, %s8980_s12, %s8980_s12, %s8981_s23  }
 0xbbf PF: > { %s15777_s21 = sld [smem:[#allocation21_spill]]  ;;  %s15778_s13 = sld [smem:[#allocation27_spill]] }
 0xbc0   : > { %s15779_s16 = sld [smem:[#allocation24_spill]] }
 0xbc5   : > { %s8215_s8 = sand.u32 1, %s15777_s21   ;;  %p15780_p9 = scmp.ne.s32.totalorder %s15778_s13, 0 }
 0xbc6   : > { %p15781_p10 = scmp.ge.s32.totalorder %s15779_s16, 2  ;;  %s8216_s2 = scalar_lea.sflag [#allocation6], %s8215_s8 }
 0xbc8   : > { %p8635_p11 = pnand %p15781_p10, %p15780_p9 }
 0xbca   : > { %8934 = dma.done.wait (!%p8635_p11), %s8216_s2, 4096  }
 0xbcb   : > { %8936 = vsyncadd (!%p8635_p11), %s8216_s2, 4294963200  ;;  %s15782_s20 = sld [smem:[#allocation25_spill]]  ;;  %s15783_s17 = sld [smem:[#allocation22_spill]] }
 0xbcc   : > { %s15784_s18 = sld [smem:[#allocation23_spill]]  ;;  %s15785_s19 = sld [smem:[#allocation26_spill]] }
 0xbd1   : > { %p27_p8 = scmp.ge.s32.totalorder %s15782_s20, 4  }
 0xbd3   :  { %29 = sbr.rel (!%p27_p8) target bundleno = 21 (0x15), region = 133 }
 0xbda   :  { %8221 = vsyncpa [#allocation5], 1 }
 0xbdb   :  { %8223 = vsyncpa [#allocation5 + $0x1], 1 }
 0xbdc   :  { %8224 = vsyncpa [#allocation6], 1 }
 0xbdd   :  { %8226 = vsyncpa [#allocation6 + $0x1], 1 }
 0xbde   :  { %8227 = vsyncpa [#allocation7], 1 }
 0xbdf   :  { %8229 = vsyncpa [#allocation7 + $0x1], 1 }
 0xbe0   :  { %8230 = vsyncpa [#allocation10], 1 }
 0xbe1   :  { %8231 = vsyncpa [#allocation13], 1 }

</bundles_post_ra>
